<compile_context>
chip_gen: v6e
topology: v6e:2x2x1
jax: 0.10.0
libtpu: 0.0.40
codegen_flags: <defaults>
</compile_context>

<pallas_src>
import functools

import jax
import jax.numpy as jnp
import numpy as np
from jax import lax
from jax.experimental import pallas as pl
from jax.experimental.pallas import tpu as pltpu

_BN_EPS = 1e-5


# ----------------------------- fused Pallas kernel -----------------------------

def mssam_fused_kernel(x_ref, skip_ref, w1_ref, w2_ref, w00_ref, b00_ref,
                       dwt_ref, dwb_ref, sspm_ref, fw_ref,
                       o_ref, skip1_scr, *, H, W, cr, dilations, bb):
    """One grid step == `bb` images, everything in lane-dense (C, H*W) layout.

    x_ref/skip_ref/o_ref : (bb, C, HW)   lane-dense image blocks
    w1_ref (r, C), w2_ref (C, r)         SCE fc weights (transposed)
    w00_ref (cr, C), b00_ref (cr, 1)     1x1 conv with BN folded
    dwt_ref (36, cr, HW)                 depthwise weight*mask tap table
    dwb_ref (cr, 4)                      per-branch BN shifts
    sspm_ref (2*HW, HW)                  SSP 7x7 conv as a matmul table
    fw_ref  (1, 2) in SMEM               normalized fusion weights
    skip1_scr (bb, C, HW) VMEM scratch   assembled MFIM output
    """
    HW = H * W
    f32 = jnp.float32
    C = x_ref.shape[1]

    # hoisted constants / small weights (avoid per-image broadcast_in_dim)
    inv_hw_col = jnp.full((HW, 1), 1.0 / HW, f32)   # spatial mean on MXU
    inv_c_row = jnp.full((1, cr), 1.0 / C, f32)     # channel mean on MXU
    w1 = w1_ref[...]
    w2 = w2_ref[...]
    w00 = w00_ref[...]
    b00 = b00_ref[...]
    dwb = dwb_ref[...]
    sspm = sspm_ref[...]
    fw0 = fw_ref[0, 0]
    fw1 = fw_ref[0, 1]

    for i in range(bb):
        x = x_ref[i]          # (C, HW)
        skip = skip_ref[i]    # (C, HW)

        # ---------------- SCE: channel attention c (C, 1) ----------------
        avg_c = jnp.dot(x, inv_hw_col, preferred_element_type=f32)   # (C, 1)
        max_c = jnp.max(x, axis=1, keepdims=True)                    # (C, 1)
        pooled = jnp.concatenate([avg_c, max_c], axis=1)             # (C, 2)
        h = jnp.clip(jnp.dot(w1, pooled, preferred_element_type=f32), 0.0, 6.0)
        z2 = jnp.dot(w2, h, preferred_element_type=f32)              # (C, 2)
        c_col = jax.nn.sigmoid(z2[:, 0:1] + z2[:, 1:2])              # (C, 1)

        # ---------------- MFIM: 1x1 conv + folded BN + ReLU6 ----------------
        a00 = jnp.dot(w00, skip, preferred_element_type=f32) + b00
        a00 = jnp.clip(a00, 0.0, 6.0)                                # (cr, HW)

        # -------- 4 merged depthwise dilated 3x3 branches (tap table) --------
        # tap at offset (oy, ox) == roll of the flattened spatial axis by
        # -(oy*W+ox); dwt_ref[t] already holds weight * zero-pad-validity.
        sum_r = jnp.zeros((1, HW), f32)                   # running channel sum/C
        max_r = jnp.full((1, HW), -jnp.inf, f32)          # running channel max
        for b, d in enumerate(dilations):
            acc = jnp.zeros((cr, HW), f32)
            for ky in range(3):
                for kx in range(3):
                    t = b * 9 + ky * 3 + kx
                    S = (ky - 1) * d * W + (kx - 1) * d
                    tap = a00 if S == 0 else pltpu.roll(a00, shift=(-S) % HW, axis=1)
                    acc = acc + tap * dwt_ref[t]
            br = jnp.clip(acc + dwb[:, b:b + 1], 0.0, 6.0)            # (cr, HW)
            skip1_scr[i, b * cr:(b + 1) * cr, :] = br                 # aligned slice
            # incremental SSP pooling while br is still in vregs
            sum_r = sum_r + jnp.dot(inv_c_row, br, preferred_element_type=f32)
            max_r = jnp.maximum(max_r, jnp.max(br, axis=0, keepdims=True))

        # ---------------- SSP: 7x7 conv + sigmoid as ONE MXU matmul ----------------
        am = jnp.concatenate([sum_r, max_r], axis=1)                  # (1, 2*HW)
        s_row = jax.nn.sigmoid(
            jnp.dot(am, sspm, preferred_element_type=f32))            # (1, HW)

        # ---------------- learned fusion ----------------
        o_ref[i] = x * (fw0 * s_row) + skip1_scr[i] * (fw1 * c_col)


# ----------------------------- static structure builders -----------------------------

def _dw_masks(H, W, dilations):
    """(36, HW) 0/1 validity of each depthwise tap at each output position."""
    HW = H * W
    h = np.arange(H)[:, None]
    w = np.arange(W)[None, :]
    rows = []
    for d in dilations:
        for ky in range(3):
            for kx in range(3):
                oy, ox = (ky - 1) * d, (kx - 1) * d
                valid = ((h + oy >= 0) & (h + oy < H) &
                         (w + ox >= 0) & (w + ox < W))
                rows.append(valid.reshape(HW))
    return np.stack(rows).astype(np.float32)              # (36, HW)


def _ssp_tap_index(H, W, K=7):
    """(HW, HW) int map: tap_idx[q, p] = flat 7x7 tap index feeding output p
    from input q (K*K means 'no tap' / zero-padded)."""
    HW = H * W
    pad = K // 2
    idx = np.full((HW, HW), K * K, np.int32)
    ph = np.arange(H)[:, None]
    pw = np.arange(W)[None, :]
    p = (ph * W + pw).reshape(-1)
    for ky in range(K):
        for kx in range(K):
            qh = ph + (ky - pad)
            qw = pw + (kx - pad)
            valid = ((qh >= 0) & (qh < H) & (qw >= 0) & (qw < W)).reshape(-1)
            q = (qh * W + qw).reshape(-1)
            idx[q[valid], p[valid]] = ky * K + kx
    return idx


def _tensorcores_per_chip():
    """Best-effort detection of multi-TensorCore chips (v7x / v4 megacore)."""
    try:
        kind = jax.devices()[0].device_kind.lower()
        if 'v7' in kind or 'v4' in kind:
            return 2
    except Exception:
        pass
    return 1


# ----------------------------- MSSAM forward -----------------------------

def mssam_forward(params, x_nchw, skip_nchw):
    x = x_nchw.astype(jnp.float32)
    skip = skip_nchw.astype(jnp.float32)
    B, C, H, W = x.shape
    HW = H * W
    cr = C // 4
    dilations = (1, 3, 5, 7)
    assert HW % 128 == 0 and C % 8 == 0 and cr % 8 == 0, (
        "lane-dense (C, HW) layout assumes HW % 128 == 0 and C, C//4 % 8 == 0")

    # free (contiguous) reshapes — no transposes
    x2 = x.reshape(B, C, HW)
    skip2 = skip.reshape(B, C, HW)

    # SCE fc weights, transposed to act on column-stacked pooled vectors
    w1k = params['sce_w1'].T                   # (r, C)
    w2k = params['sce_w2'].T                   # (C, r)
    r = w1k.shape[0]

    # 1x1 conv with BN folded into the weights
    g, beta, m, v = params['bn00']
    s00 = g / jnp.sqrt(v + _BN_EPS)
    w00f = params['w00'].T * s00[:, None]                       # (cr, C)
    b00f = ((params['b00'] - m) * s00 + beta).reshape(cr, 1)    # (cr, 1)

    # depthwise branches: fold BN scale into the taps, keep per-branch shift
    dww_cols, dwb_cols = [], []
    for name in ('dw0', 'dw1', 'dw2', 'dw3'):
        g, beta, m, v = params[name + '_bn']
        sc = g / jnp.sqrt(v + _BN_EPS)
        wf = params[name + '_w'] * sc[None, None, :]            # (3, 3, cr)
        dww_cols.append(wf.reshape(9, cr).T)                    # (cr, 9)
        dwb_cols.append(((params[name + '_b'] - m) * sc + beta).reshape(cr, 1))
    dw_w = jnp.concatenate(dww_cols, axis=1)                    # (cr, 36)
    dw_b = jnp.concatenate(dwb_cols, axis=1)                    # (cr, 4)

    # fold spatial validity mask * per-channel weight into ONE tap table
    dw_mask = jnp.asarray(_dw_masks(H, W, dilations))           # (36, HW)
    dw_table = dw_w.T[:, :, None] * dw_mask[:, None, :]         # (36, cr, HW)

    # SSP 7x7 conv (with zero padding) as a dense (2*HW, HW) matmul table:
    # rows [0,HW) act on the channel-mean row, rows [HW,2HW) on the max row.
    tap_idx = _ssp_tap_index(H, W)                              # np (HW, HW)
    spw_pad = jnp.concatenate(
        [params['ssp_w'].reshape(2, 49), jnp.zeros((2, 1), jnp.float32)], axis=1)
    ssp_mat = spw_pad[:, tap_idx].reshape(2 * HW, HW)           # (2*HW, HW)

    # normalized fusion weights
    wts = jax.nn.relu(params['fuse_w'])
    fw = (wts / (jnp.sum(wts) + 1e-8)).reshape(1, 2)

    # Batch mapping: multi-TC chips shard images across cores; single-TC chips
    # process the whole batch in one grid step (overhead amortized, more ILP).
    if _tensorcores_per_chip() > 1 and B > 1:
        grid, bb, dim_sem = (B,), 1, ("parallel",)
    else:
        grid, bb, dim_sem = (1,), B, ("arbitrary",)

    kern = functools.partial(mssam_fused_kernel, H=H, W=W, cr=cr,
                             dilations=dilations, bb=bb)
    out = pl.pallas_call(
        kern,
        out_shape=jax.ShapeDtypeStruct((B, C, HW), jnp.float32),
        grid=grid,
        in_specs=[
            pl.BlockSpec((bb, C, HW), lambda b: (b, 0, 0)),     # x
            pl.BlockSpec((bb, C, HW), lambda b: (b, 0, 0)),     # skip
            pl.BlockSpec((r, C), lambda b: (0, 0)),             # sce fc1
            pl.BlockSpec((C, r), lambda b: (0, 0)),             # sce fc2
            pl.BlockSpec((cr, C), lambda b: (0, 0)),            # 1x1 conv (folded)
            pl.BlockSpec((cr, 1), lambda b: (0, 0)),            # 1x1 shift
            pl.BlockSpec((36, cr, HW), lambda b: (0, 0, 0)),    # dw tap table
            pl.BlockSpec((cr, 4), lambda b: (0, 0)),            # dw shifts
            pl.BlockSpec((2 * HW, HW), lambda b: (0, 0)),       # ssp matmul table
            pl.BlockSpec(memory_space=pltpu.MemorySpace.SMEM),  # fusion weights
        ],
        out_specs=pl.BlockSpec((bb, C, HW), lambda b: (b, 0, 0)),
        scratch_shapes=[pltpu.VMEM((bb, C, HW), jnp.float32)],
        compiler_params=pltpu.CompilerParams(dimension_semantics=dim_sem),
    )(x2, skip2, w1k, w2k, w00f, b00f, dw_table, dw_b, ssp_mat, fw)

    return out.reshape(B, C, H, W)


# ----------------------------- parameters -----------------------------

def init_params(C, key):
    cr = C // 4
    ratio = 16 if C >= 16 else C
    sce_r = C // ratio
    ks = jax.random.split(key, 14)

    def nrm(k, shape, std):
        return (std * jax.random.normal(k, shape, jnp.float32)).astype(jnp.float32)

    def bn_default(n):
        return (jnp.ones((n,), jnp.float32), jnp.zeros((n,), jnp.float32),
                jnp.zeros((n,), jnp.float32), jnp.ones((n,), jnp.float32))

    p = {
        'w00': nrm(ks[0], (C, cr), float(np.sqrt(2.0 / cr))),
        'b00': nrm(ks[1], (cr,), 0.01),
        'bn00': bn_default(cr),
        'sce_w1': nrm(ks[2], (C, sce_r), 0.02),
        'sce_w2': nrm(ks[3], (sce_r, C), 0.02),
        'ssp_w': nrm(ks[4], (2, 7, 7), 0.02),
        'fuse_w': jnp.ones((2,), jnp.float32),
    }
    for i, name in enumerate(('dw0', 'dw1', 'dw2', 'dw3')):
        p[name + '_w'] = nrm(ks[5 + i], (3, 3, cr), float(np.sqrt(2.0 / 9.0)))
        p[name + '_b'] = nrm(ks[9 + i], (cr,), 0.01)
        p[name + '_bn'] = bn_default(cr)
    return p


# ----------------------------- pure-JAX reference -----------------------------

def reference_forward(params, x_nchw, skip_nchw):
    x = jnp.transpose(x_nchw, (0, 2, 3, 1)).astype(jnp.float32)
    skip = jnp.transpose(skip_nchw, (0, 2, 3, 1)).astype(jnp.float32)
    B, H, W, C = x.shape
    cr = C // 4
    relu6 = lambda v: jnp.clip(v, 0.0, 6.0)

    def bn(v, gbmv):
        g, b, m, var = gbmv
        return (v - m) / jnp.sqrt(var + _BN_EPS) * g + b

    avg = jnp.mean(x, axis=(1, 2))
    mx = jnp.max(x, axis=(1, 2))
    branch = lambda pool: relu6(pool @ params['sce_w1']) @ params['sce_w2']
    c = jax.nn.sigmoid(branch(avg) + branch(mx))  # (B, C)

    a00 = relu6(bn(jnp.einsum('bhwc,cd->bhwd', skip, params['w00']) + params['b00'],
                   params['bn00']))
    branches = []
    for name, d in (('dw0', 1), ('dw1', 3), ('dw2', 5), ('dw3', 7)):
        w = params[name + '_w'].reshape(3, 3, 1, cr)
        y = lax.conv_general_dilated(
            a00, w, window_strides=(1, 1), padding=[(d, d), (d, d)],
            rhs_dilation=(d, d), dimension_numbers=('NHWC', 'HWIO', 'NHWC'),
            feature_group_count=cr) + params[name + '_b']
        branches.append(relu6(bn(y, params[name + '_bn'])))
    skip1 = jnp.concatenate(branches, axis=-1)

    sm = jnp.concatenate([jnp.mean(skip1, axis=-1, keepdims=True),
                          jnp.max(skip1, axis=-1, keepdims=True)], axis=-1)
    w_hwio = jnp.transpose(params['ssp_w'], (1, 2, 0))[..., None]
    s = jax.nn.sigmoid(lax.conv_general_dilated(
        sm, w_hwio, window_strides=(1, 1), padding=[(3, 3), (3, 3)],
        dimension_numbers=('NHWC', 'HWIO', 'NHWC')))

    wts = jax.nn.relu(params['fuse_w'])
    fw = wts / (jnp.sum(wts) + 1e-8)
    out = fw[0] * (x * s) + fw[1] * (skip1 * c[:, None, None, :])
    return jnp.transpose(out, (0, 3, 1, 2))


# ----------------------------- main -----------------------------

if __name__ == "__main__":
    B, C, H, W = 2, 64, 16, 16   # in_dim=64 -> fc_ratio=4 and SCE ratio=16 divide cleanly
    key = jax.random.PRNGKey(0)
    k_x, k_skip, k_p = jax.random.split(key, 3)
    x = jax.random.normal(k_x, (B, C, H, W), jnp.float32)
    skip = jax.random.normal(k_skip, (B, C, H, W), jnp.float32)
    params = init_params(C, k_p)

    out = jax.jit(mssam_forward)(params, x, skip)
    out = jax.block_until_ready(out)

    ref = jax.block_until_ready(reference_forward(params, x, skip))
    np.testing.assert_allclose(np.asarray(out), np.asarray(ref), rtol=2e-4, atol=3e-4)
    print("KERNEL_OK")
</pallas_src>

<mosaic_0001>
module attributes {stable_mosaic.version = 11 : i64} {
  func.func @mssam_fused_kernel(%arg0: i32, %arg1: memref<2x64x256xf32, #tpu.memory_space<vmem>>, %arg2: memref<2x64x256xf32, #tpu.memory_space<vmem>>, %arg3: memref<4x64xf32, #tpu.memory_space<vmem>>, %arg4: memref<64x4xf32, #tpu.memory_space<vmem>>, %arg5: memref<16x64xf32, #tpu.memory_space<vmem>>, %arg6: memref<16x1xf32, #tpu.memory_space<vmem>>, %arg7: memref<36x16x256xf32, #tpu.memory_space<vmem>>, %arg8: memref<16x4xf32, #tpu.memory_space<vmem>>, %arg9: memref<512x256xf32, #tpu.memory_space<vmem>>, %arg10: memref<1x2xf32, #tpu.memory_space<smem>>, %arg11: memref<2x64x256xf32, #tpu.memory_space<vmem>>, %arg12: memref<2x64x256xf32, #tpu.memory_space<vmem>>) attributes {dimension_semantics = [#tpu.dimension_semantics<arbitrary>], iteration_bounds = array<i64: 1>, scalar_prefetch = 0 : i64, scratch_operands = 1 : i64, tpu.core_type = #tpu.core_type<tc>, window_params = [{transform_indices = @transform_0, window_bounds = array<i64: 2, 64, 256>}, {transform_indices = @transform_1, window_bounds = array<i64: 2, 64, 256>}, {pipeline_mode = #tpu.pipeline_mode<synchronous>, transform_indices = @transform_2, window_bounds = array<i64: 4, 64>}, {pipeline_mode = #tpu.pipeline_mode<synchronous>, transform_indices = @transform_3, window_bounds = array<i64: 64, 4>}, {pipeline_mode = #tpu.pipeline_mode<synchronous>, transform_indices = @transform_4, window_bounds = array<i64: 16, 64>}, {pipeline_mode = #tpu.pipeline_mode<synchronous>, transform_indices = @transform_5, window_bounds = array<i64: 16, 1>}, {pipeline_mode = #tpu.pipeline_mode<synchronous>, transform_indices = @transform_6, window_bounds = array<i64: 36, 16, 256>}, {pipeline_mode = #tpu.pipeline_mode<synchronous>, transform_indices = @transform_7, window_bounds = array<i64: 16, 4>}, {pipeline_mode = #tpu.pipeline_mode<synchronous>, transform_indices = @transform_8, window_bounds = array<i64: 512, 256>}, {transform_indices = @transform_9, window_bounds = array<i64: 1, 2>}, {transform_indices = @transform_10, window_bounds = array<i64: 2, 64, 256>}]} {
    %cst = arith.constant 3.906250e-03 : f32
    %0 = vector.broadcast %cst : f32 to vector<256x1xf32>
    %cst_0 = arith.constant 1.562500e-02 : f32
    %1 = vector.broadcast %cst_0 : f32 to vector<1x16xf32>
    %c0 = arith.constant 0 : index
    %c0_1 = arith.constant 0 : index
    %2 = vector.load %arg3[%c0, %c0_1] : memref<4x64xf32, #tpu.memory_space<vmem>>, vector<4x64xf32>
    %c0_2 = arith.constant 0 : index
    %c0_3 = arith.constant 0 : index
    %3 = vector.load %arg4[%c0_2, %c0_3] : memref<64x4xf32, #tpu.memory_space<vmem>>, vector<64x4xf32>
    %c0_4 = arith.constant 0 : index
    %c0_5 = arith.constant 0 : index
    %4 = vector.load %arg5[%c0_4, %c0_5] : memref<16x64xf32, #tpu.memory_space<vmem>>, vector<16x64xf32>
    %c0_6 = arith.constant 0 : index
    %c0_7 = arith.constant 0 : index
    %5 = vector.load %arg6[%c0_6, %c0_7] : memref<16x1xf32, #tpu.memory_space<vmem>>, vector<16x1xf32>
    %c0_8 = arith.constant 0 : index
    %c0_9 = arith.constant 0 : index
    %6 = vector.load %arg8[%c0_8, %c0_9] : memref<16x4xf32, #tpu.memory_space<vmem>>, vector<16x4xf32>
    %c0_10 = arith.constant 0 : index
    %c0_11 = arith.constant 0 : index
    %7 = vector.load %arg9[%c0_10, %c0_11] : memref<512x256xf32, #tpu.memory_space<vmem>>, vector<512x256xf32>
    %c0_12 = arith.constant 0 : index
    %c0_13 = arith.constant 0 : index
    %8 = memref.load %arg10[%c0_12, %c0_13] : memref<1x2xf32, #tpu.memory_space<smem>>
    %c0_14 = arith.constant 0 : index
    %c1 = arith.constant 1 : index
    %9 = memref.load %arg10[%c0_14, %c1] : memref<1x2xf32, #tpu.memory_space<smem>>
    %c0_15 = arith.constant 0 : index
    %c0_16 = arith.constant 0 : index
    %c0_17 = arith.constant 0 : index
    %10 = vector.load %arg1[%c0_15, %c0_16, %c0_17] : memref<2x64x256xf32, #tpu.memory_space<vmem>>, vector<1x64x256xf32>
    %11 = vector.shape_cast %10 : vector<1x64x256xf32> to vector<64x256xf32>
    %c0_18 = arith.constant 0 : index
    %c0_19 = arith.constant 0 : index
    %c0_20 = arith.constant 0 : index
    %12 = vector.load %arg2[%c0_18, %c0_19, %c0_20] : memref<2x64x256xf32, #tpu.memory_space<vmem>>, vector<1x64x256xf32>
    %13 = vector.shape_cast %12 : vector<1x64x256xf32> to vector<64x256xf32>
    %cst_21 = arith.constant dense<0.000000e+00> : vector<64x1xf32>
    %14 = tpu.matmul %11, %0, %cst_21 {dimension_numbers = #tpu.dot_dimension_numbers<[1], [0], [0], [1], [0, 0, 1, 1], [], []>} : vector<64x256xf32>, vector<256x1xf32>, vector<64x1xf32> -> vector<64x1xf32>
    %cst_22 = arith.constant dense<0xFF800000> : vector<64xf32>
    %15 = vector.multi_reduction <maximumf>, %11, %cst_22 [1] : vector<64x256xf32> to vector<64xf32>
    %16 = vector.shape_cast %15 : vector<64xf32> to vector<64x1xf32>
    %17 = tpu.concatenate %14, %16 in 1 : vector<64x1xf32>, vector<64x1xf32> -> vector<64x2xf32>
    %cst_23 = arith.constant dense<0.000000e+00> : vector<4x2xf32>
    %18 = tpu.matmul %2, %17, %cst_23 {dimension_numbers = #tpu.dot_dimension_numbers<[1], [0], [0], [1], [0, 0, 1, 1], [], []>} : vector<4x64xf32>, vector<64x2xf32>, vector<4x2xf32> -> vector<4x2xf32>
    %cst_24 = arith.constant 0.000000e+00 : f32
    %cst_25 = arith.constant 6.000000e+00 : f32
    %19 = vector.broadcast %cst_24 : f32 to vector<4x2xf32>
    %20 = arith.maximumf %19, %18 : vector<4x2xf32>
    %21 = vector.broadcast %cst_25 : f32 to vector<4x2xf32>
    %22 = arith.minimumf %21, %20 : vector<4x2xf32>
    %cst_26 = arith.constant dense<0.000000e+00> : vector<64x2xf32>
    %23 = tpu.matmul %3, %22, %cst_26 {dimension_numbers = #tpu.dot_dimension_numbers<[1], [0], [0], [1], [0, 0, 1, 1], [], []>} : vector<64x4xf32>, vector<4x2xf32>, vector<64x2xf32> -> vector<64x2xf32>
    %24 = vector.extract_strided_slice %23 {offsets = [0, 0], sizes = [64, 1], strides = [1, 1]} : vector<64x2xf32> to vector<64x1xf32>
    %25 = vector.extract_strided_slice %23 {offsets = [0, 1], sizes = [64, 1], strides = [1, 1]} : vector<64x2xf32> to vector<64x1xf32>
    %26 = arith.addf %24, %25 : vector<64x1xf32>
    %27 = arith.negf %26 : vector<64x1xf32>
    %28 = math.exp %27 : vector<64x1xf32>
    %cst_27 = arith.constant 1.000000e+00 : f32
    %29 = vector.broadcast %cst_27 : f32 to vector<64x1xf32>
    %30 = arith.addf %29, %28 : vector<64x1xf32>
    %31 = arith.divf %29, %30 : vector<64x1xf32>
    %cst_28 = arith.constant dense<0.000000e+00> : vector<16x256xf32>
    %32 = tpu.matmul %4, %13, %cst_28 {dimension_numbers = #tpu.dot_dimension_numbers<[1], [0], [0], [1], [0, 0, 1, 1], [], []>} : vector<16x64xf32>, vector<64x256xf32>, vector<16x256xf32> -> vector<16x256xf32>
    %33 = vector.broadcast %5 : vector<16x1xf32> to vector<16x256xf32>
    %34 = arith.addf %32, %33 : vector<16x256xf32>
    %cst_29 = arith.constant 0.000000e+00 : f32
    %cst_30 = arith.constant 6.000000e+00 : f32
    %35 = vector.broadcast %cst_29 : f32 to vector<16x256xf32>
    %36 = arith.maximumf %35, %34 : vector<16x256xf32>
    %37 = vector.broadcast %cst_30 : f32 to vector<16x256xf32>
    %38 = arith.minimumf %37, %36 : vector<16x256xf32>
    %cst_31 = arith.constant 0.000000e+00 : f32
    %39 = vector.broadcast %cst_31 : f32 to vector<1x256xf32>
    %cst_32 = arith.constant 0xFF800000 : f32
    %40 = vector.broadcast %cst_32 : f32 to vector<1x256xf32>
    %cst_33 = arith.constant 0.000000e+00 : f32
    %41 = vector.broadcast %cst_33 : f32 to vector<16x256xf32>
    %c17_i32 = arith.constant 17 : i32
    %42 = tpu.dynamic_rotate %38 by %c17_i32 dim 1 : vector<16x256xf32>, i32 -> vector<16x256xf32>
    %c0_34 = arith.constant 0 : index
    %c0_35 = arith.constant 0 : index
    %c0_36 = arith.constant 0 : index
    %43 = vector.load %arg7[%c0_34, %c0_35, %c0_36] : memref<36x16x256xf32, #tpu.memory_space<vmem>>, vector<1x16x256xf32>
    %44 = vector.shape_cast %43 : vector<1x16x256xf32> to vector<16x256xf32>
    %45 = arith.mulf %42, %44 : vector<16x256xf32>
    %46 = arith.addf %41, %45 : vector<16x256xf32>
    %c16_i32 = arith.constant 16 : i32
    %47 = tpu.dynamic_rotate %38 by %c16_i32 dim 1 : vector<16x256xf32>, i32 -> vector<16x256xf32>
    %c1_37 = arith.constant 1 : index
    %c0_38 = arith.constant 0 : index
    %c0_39 = arith.constant 0 : index
    %48 = vector.load %arg7[%c1_37, %c0_38, %c0_39] : memref<36x16x256xf32, #tpu.memory_space<vmem>>, vector<1x16x256xf32>
    %49 = vector.shape_cast %48 : vector<1x16x256xf32> to vector<16x256xf32>
    %50 = arith.mulf %47, %49 : vector<16x256xf32>
    %51 = arith.addf %46, %50 : vector<16x256xf32>
    %c15_i32 = arith.constant 15 : i32
    %52 = tpu.dynamic_rotate %38 by %c15_i32 dim 1 : vector<16x256xf32>, i32 -> vector<16x256xf32>
    %c2 = arith.constant 2 : index
    %c0_40 = arith.constant 0 : index
    %c0_41 = arith.constant 0 : index
    %53 = vector.load %arg7[%c2, %c0_40, %c0_41] : memref<36x16x256xf32, #tpu.memory_space<vmem>>, vector<1x16x256xf32>
    %54 = vector.shape_cast %53 : vector<1x16x256xf32> to vector<16x256xf32>
    %55 = arith.mulf %52, %54 : vector<16x256xf32>
    %56 = arith.addf %51, %55 : vector<16x256xf32>
    %c1_i32 = arith.constant 1 : i32
    %57 = tpu.dynamic_rotate %38 by %c1_i32 dim 1 : vector<16x256xf32>, i32 -> vector<16x256xf32>
    %c3 = arith.constant 3 : index
    %c0_42 = arith.constant 0 : index
    %c0_43 = arith.constant 0 : index
    %58 = vector.load %arg7[%c3, %c0_42, %c0_43] : memref<36x16x256xf32, #tpu.memory_space<vmem>>, vector<1x16x256xf32>
    %59 = vector.shape_cast %58 : vector<1x16x256xf32> to vector<16x256xf32>
    %60 = arith.mulf %57, %59 : vector<16x256xf32>
    %61 = arith.addf %56, %60 : vector<16x256xf32>
    %c4 = arith.constant 4 : index
    %c0_44 = arith.constant 0 : index
    %c0_45 = arith.constant 0 : index
    %62 = vector.load %arg7[%c4, %c0_44, %c0_45] : memref<36x16x256xf32, #tpu.memory_space<vmem>>, vector<1x16x256xf32>
    %63 = vector.shape_cast %62 : vector<1x16x256xf32> to vector<16x256xf32>
    %64 = arith.mulf %38, %63 : vector<16x256xf32>
    %65 = arith.addf %61, %64 : vector<16x256xf32>
    %c255_i32 = arith.constant 255 : i32
    %66 = tpu.dynamic_rotate %38 by %c255_i32 dim 1 : vector<16x256xf32>, i32 -> vector<16x256xf32>
    %c5 = arith.constant 5 : index
    %c0_46 = arith.constant 0 : index
    %c0_47 = arith.constant 0 : index
    %67 = vector.load %arg7[%c5, %c0_46, %c0_47] : memref<36x16x256xf32, #tpu.memory_space<vmem>>, vector<1x16x256xf32>
    %68 = vector.shape_cast %67 : vector<1x16x256xf32> to vector<16x256xf32>
    %69 = arith.mulf %66, %68 : vector<16x256xf32>
    %70 = arith.addf %65, %69 : vector<16x256xf32>
    %c241_i32 = arith.constant 241 : i32
    %71 = tpu.dynamic_rotate %38 by %c241_i32 dim 1 : vector<16x256xf32>, i32 -> vector<16x256xf32>
    %c6 = arith.constant 6 : index
    %c0_48 = arith.constant 0 : index
    %c0_49 = arith.constant 0 : index
    %72 = vector.load %arg7[%c6, %c0_48, %c0_49] : memref<36x16x256xf32, #tpu.memory_space<vmem>>, vector<1x16x256xf32>
    %73 = vector.shape_cast %72 : vector<1x16x256xf32> to vector<16x256xf32>
    %74 = arith.mulf %71, %73 : vector<16x256xf32>
    %75 = arith.addf %70, %74 : vector<16x256xf32>
    %c240_i32 = arith.constant 240 : i32
    %76 = tpu.dynamic_rotate %38 by %c240_i32 dim 1 : vector<16x256xf32>, i32 -> vector<16x256xf32>
    %c7 = arith.constant 7 : index
    %c0_50 = arith.constant 0 : index
    %c0_51 = arith.constant 0 : index
    %77 = vector.load %arg7[%c7, %c0_50, %c0_51] : memref<36x16x256xf32, #tpu.memory_space<vmem>>, vector<1x16x256xf32>
    %78 = vector.shape_cast %77 : vector<1x16x256xf32> to vector<16x256xf32>
    %79 = arith.mulf %76, %78 : vector<16x256xf32>
    %80 = arith.addf %75, %79 : vector<16x256xf32>
    %c239_i32 = arith.constant 239 : i32
    %81 = tpu.dynamic_rotate %38 by %c239_i32 dim 1 : vector<16x256xf32>, i32 -> vector<16x256xf32>
    %c8 = arith.constant 8 : index
    %c0_52 = arith.constant 0 : index
    %c0_53 = arith.constant 0 : index
    %82 = vector.load %arg7[%c8, %c0_52, %c0_53] : memref<36x16x256xf32, #tpu.memory_space<vmem>>, vector<1x16x256xf32>
    %83 = vector.shape_cast %82 : vector<1x16x256xf32> to vector<16x256xf32>
    %84 = arith.mulf %81, %83 : vector<16x256xf32>
    %85 = arith.addf %80, %84 : vector<16x256xf32>
    %86 = vector.extract_strided_slice %6 {offsets = [0, 0], sizes = [16, 1], strides = [1, 1]} : vector<16x4xf32> to vector<16x1xf32>
    %87 = vector.broadcast %86 : vector<16x1xf32> to vector<16x256xf32>
    %88 = arith.addf %85, %87 : vector<16x256xf32>
    %cst_54 = arith.constant 0.000000e+00 : f32
    %cst_55 = arith.constant 6.000000e+00 : f32
    %89 = vector.broadcast %cst_54 : f32 to vector<16x256xf32>
    %90 = arith.maximumf %89, %88 : vector<16x256xf32>
    %91 = vector.broadcast %cst_55 : f32 to vector<16x256xf32>
    %92 = arith.minimumf %91, %90 : vector<16x256xf32>
    %c0_56 = arith.constant 0 : index
    %c0_57 = arith.constant 0 : index
    %c0_58 = arith.constant 0 : index
    %93 = vector.load %arg12[%c0_56, %c0_57, %c0_58] : memref<2x64x256xf32, #tpu.memory_space<vmem>>, vector<1x16x256xf32>
    %94 = vector.shape_cast %93 : vector<1x16x256xf32> to vector<16x256xf32>
    %95 = vector.shape_cast %92 : vector<16x256xf32> to vector<1x16x256xf32>
    tpu.vector_store %arg12[%c0_56, %c0_57, %c0_58], %95 {strides = array<i32>} : memref<2x64x256xf32, #tpu.memory_space<vmem>>, vector<1x16x256xf32>,
    %cst_59 = arith.constant dense<0.000000e+00> : vector<1x256xf32>
    %96 = tpu.matmul %1, %92, %cst_59 {dimension_numbers = #tpu.dot_dimension_numbers<[1], [0], [0], [1], [0, 0, 1, 1], [], []>} : vector<1x16xf32>, vector<16x256xf32>, vector<1x256xf32> -> vector<1x256xf32>
    %97 = arith.addf %39, %96 : vector<1x256xf32>
    %cst_60 = arith.constant dense<0xFF800000> : vector<256xf32>
    %98 = vector.multi_reduction <maximumf>, %92, %cst_60 [0] : vector<16x256xf32> to vector<256xf32>
    %99 = vector.shape_cast %98 : vector<256xf32> to vector<1x256xf32>
    %100 = arith.maximumf %40, %99 : vector<1x256xf32>
    %cst_61 = arith.constant 0.000000e+00 : f32
    %101 = vector.broadcast %cst_61 : f32 to vector<16x256xf32>
    %c51_i32 = arith.constant 51 : i32
    %102 = tpu.dynamic_rotate %38 by %c51_i32 dim 1 : vector<16x256xf32>, i32 -> vector<16x256xf32>
    %c9 = arith.constant 9 : index
    %c0_62 = arith.constant 0 : index
    %c0_63 = arith.constant 0 : index
    %103 = vector.load %arg7[%c9, %c0_62, %c0_63] : memref<36x16x256xf32, #tpu.memory_space<vmem>>, vector<1x16x256xf32>
    %104 = vector.shape_cast %103 : vector<1x16x256xf32> to vector<16x256xf32>
    %105 = arith.mulf %102, %104 : vector<16x256xf32>
    %106 = arith.addf %101, %105 : vector<16x256xf32>
    %c48_i32 = arith.constant 48 : i32
    %107 = tpu.dynamic_rotate %38 by %c48_i32 dim 1 : vector<16x256xf32>, i32 -> vector<16x256xf32>
    %c10 = arith.constant 10 : index
    %c0_64 = arith.constant 0 : index
    %c0_65 = arith.constant 0 : index
    %108 = vector.load %arg7[%c10, %c0_64, %c0_65] : memref<36x16x256xf32, #tpu.memory_space<vmem>>, vector<1x16x256xf32>
    %109 = vector.shape_cast %108 : vector<1x16x256xf32> to vector<16x256xf32>
    %110 = arith.mulf %107, %109 : vector<16x256xf32>
    %111 = arith.addf %106, %110 : vector<16x256xf32>
    %c45_i32 = arith.constant 45 : i32
    %112 = tpu.dynamic_rotate %38 by %c45_i32 dim 1 : vector<16x256xf32>, i32 -> vector<16x256xf32>
    %c11 = arith.constant 11 : index
    %c0_66 = arith.constant 0 : index
    %c0_67 = arith.constant 0 : index
    %113 = vector.load %arg7[%c11, %c0_66, %c0_67] : memref<36x16x256xf32, #tpu.memory_space<vmem>>, vector<1x16x256xf32>
    %114 = vector.shape_cast %113 : vector<1x16x256xf32> to vector<16x256xf32>
    %115 = arith.mulf %112, %114 : vector<16x256xf32>
    %116 = arith.addf %111, %115 : vector<16x256xf32>
    %c3_i32 = arith.constant 3 : i32
    %117 = tpu.dynamic_rotate %38 by %c3_i32 dim 1 : vector<16x256xf32>, i32 -> vector<16x256xf32>
    %c12 = arith.constant 12 : index
    %c0_68 = arith.constant 0 : index
    %c0_69 = arith.constant 0 : index
    %118 = vector.load %arg7[%c12, %c0_68, %c0_69] : memref<36x16x256xf32, #tpu.memory_space<vmem>>, vector<1x16x256xf32>
    %119 = vector.shape_cast %118 : vector<1x16x256xf32> to vector<16x256xf32>
    %120 = arith.mulf %117, %119 : vector<16x256xf32>
    %121 = arith.addf %116, %120 : vector<16x256xf32>
    %c13 = arith.constant 13 : index
    %c0_70 = arith.constant 0 : index
    %c0_71 = arith.constant 0 : index
    %122 = vector.load %arg7[%c13, %c0_70, %c0_71] : memref<36x16x256xf32, #tpu.memory_space<vmem>>, vector<1x16x256xf32>
    %123 = vector.shape_cast %122 : vector<1x16x256xf32> to vector<16x256xf32>
    %124 = arith.mulf %38, %123 : vector<16x256xf32>
    %125 = arith.addf %121, %124 : vector<16x256xf32>
    %c253_i32 = arith.constant 253 : i32
    %126 = tpu.dynamic_rotate %38 by %c253_i32 dim 1 : vector<16x256xf32>, i32 -> vector<16x256xf32>
    %c14 = arith.constant 14 : index
    %c0_72 = arith.constant 0 : index
    %c0_73 = arith.constant 0 : index
    %127 = vector.load %arg7[%c14, %c0_72, %c0_73] : memref<36x16x256xf32, #tpu.memory_space<vmem>>, vector<1x16x256xf32>
    %128 = vector.shape_cast %127 : vector<1x16x256xf32> to vector<16x256xf32>
    %129 = arith.mulf %126, %128 : vector<16x256xf32>
    %130 = arith.addf %125, %129 : vector<16x256xf32>
    %c211_i32 = arith.constant 211 : i32
    %131 = tpu.dynamic_rotate %38 by %c211_i32 dim 1 : vector<16x256xf32>, i32 -> vector<16x256xf32>
    %c15 = arith.constant 15 : index
    %c0_74 = arith.constant 0 : index
    %c0_75 = arith.constant 0 : index
    %132 = vector.load %arg7[%c15, %c0_74, %c0_75] : memref<36x16x256xf32, #tpu.memory_space<vmem>>, vector<1x16x256xf32>
    %133 = vector.shape_cast %132 : vector<1x16x256xf32> to vector<16x256xf32>
    %134 = arith.mulf %131, %133 : vector<16x256xf32>
    %135 = arith.addf %130, %134 : vector<16x256xf32>
    %c208_i32 = arith.constant 208 : i32
    %136 = tpu.dynamic_rotate %38 by %c208_i32 dim 1 : vector<16x256xf32>, i32 -> vector<16x256xf32>
    %c16 = arith.constant 16 : index
    %c0_76 = arith.constant 0 : index
    %c0_77 = arith.constant 0 : index
    %137 = vector.load %arg7[%c16, %c0_76, %c0_77] : memref<36x16x256xf32, #tpu.memory_space<vmem>>, vector<1x16x256xf32>
    %138 = vector.shape_cast %137 : vector<1x16x256xf32> to vector<16x256xf32>
    %139 = arith.mulf %136, %138 : vector<16x256xf32>
    %140 = arith.addf %135, %139 : vector<16x256xf32>
    %c205_i32 = arith.constant 205 : i32
    %141 = tpu.dynamic_rotate %38 by %c205_i32 dim 1 : vector<16x256xf32>, i32 -> vector<16x256xf32>
    %c17 = arith.constant 17 : index
    %c0_78 = arith.constant 0 : index
    %c0_79 = arith.constant 0 : index
    %142 = vector.load %arg7[%c17, %c0_78, %c0_79] : memref<36x16x256xf32, #tpu.memory_space<vmem>>, vector<1x16x256xf32>
    %143 = vector.shape_cast %142 : vector<1x16x256xf32> to vector<16x256xf32>
    %144 = arith.mulf %141, %143 : vector<16x256xf32>
    %145 = arith.addf %140, %144 : vector<16x256xf32>
    %146 = vector.extract_strided_slice %6 {offsets = [0, 1], sizes = [16, 1], strides = [1, 1]} : vector<16x4xf32> to vector<16x1xf32>
    %147 = vector.broadcast %146 : vector<16x1xf32> to vector<16x256xf32>
    %148 = arith.addf %145, %147 : vector<16x256xf32>
    %cst_80 = arith.constant 0.000000e+00 : f32
    %cst_81 = arith.constant 6.000000e+00 : f32
    %149 = vector.broadcast %cst_80 : f32 to vector<16x256xf32>
    %150 = arith.maximumf %149, %148 : vector<16x256xf32>
    %151 = vector.broadcast %cst_81 : f32 to vector<16x256xf32>
    %152 = arith.minimumf %151, %150 : vector<16x256xf32>
    %c0_82 = arith.constant 0 : index
    %c16_83 = arith.constant 16 : index
    %c0_84 = arith.constant 0 : index
    %153 = vector.load %arg12[%c0_82, %c16_83, %c0_84] : memref<2x64x256xf32, #tpu.memory_space<vmem>>, vector<1x16x256xf32>
    %154 = vector.shape_cast %153 : vector<1x16x256xf32> to vector<16x256xf32>
    %155 = vector.shape_cast %152 : vector<16x256xf32> to vector<1x16x256xf32>
    tpu.vector_store %arg12[%c0_82, %c16_83, %c0_84], %155 {strides = array<i32>} : memref<2x64x256xf32, #tpu.memory_space<vmem>>, vector<1x16x256xf32>,
    %cst_85 = arith.constant dense<0.000000e+00> : vector<1x256xf32>
    %156 = tpu.matmul %1, %152, %cst_85 {dimension_numbers = #tpu.dot_dimension_numbers<[1], [0], [0], [1], [0, 0, 1, 1], [], []>} : vector<1x16xf32>, vector<16x256xf32>, vector<1x256xf32> -> vector<1x256xf32>
    %157 = arith.addf %97, %156 : vector<1x256xf32>
    %cst_86 = arith.constant dense<0xFF800000> : vector<256xf32>
    %158 = vector.multi_reduction <maximumf>, %152, %cst_86 [0] : vector<16x256xf32> to vector<256xf32>
    %159 = vector.shape_cast %158 : vector<256xf32> to vector<1x256xf32>
    %160 = arith.maximumf %100, %159 : vector<1x256xf32>
    %cst_87 = arith.constant 0.000000e+00 : f32
    %161 = vector.broadcast %cst_87 : f32 to vector<16x256xf32>
    %c85_i32 = arith.constant 85 : i32
    %162 = tpu.dynamic_rotate %38 by %c85_i32 dim 1 : vector<16x256xf32>, i32 -> vector<16x256xf32>
    %c18 = arith.constant 18 : index
    %c0_88 = arith.constant 0 : index
    %c0_89 = arith.constant 0 : index
    %163 = vector.load %arg7[%c18, %c0_88, %c0_89] : memref<36x16x256xf32, #tpu.memory_space<vmem>>, vector<1x16x256xf32>
    %164 = vector.shape_cast %163 : vector<1x16x256xf32> to vector<16x256xf32>
    %165 = arith.mulf %162, %164 : vector<16x256xf32>
    %166 = arith.addf %161, %165 : vector<16x256xf32>
    %c80_i32 = arith.constant 80 : i32
    %167 = tpu.dynamic_rotate %38 by %c80_i32 dim 1 : vector<16x256xf32>, i32 -> vector<16x256xf32>
    %c19 = arith.constant 19 : index
    %c0_90 = arith.constant 0 : index
    %c0_91 = arith.constant 0 : index
    %168 = vector.load %arg7[%c19, %c0_90, %c0_91] : memref<36x16x256xf32, #tpu.memory_space<vmem>>, vector<1x16x256xf32>
    %169 = vector.shape_cast %168 : vector<1x16x256xf32> to vector<16x256xf32>
    %170 = arith.mulf %167, %169 : vector<16x256xf32>
    %171 = arith.addf %166, %170 : vector<16x256xf32>
    %c75_i32 = arith.constant 75 : i32
    %172 = tpu.dynamic_rotate %38 by %c75_i32 dim 1 : vector<16x256xf32>, i32 -> vector<16x256xf32>
    %c20 = arith.constant 20 : index
    %c0_92 = arith.constant 0 : index
    %c0_93 = arith.constant 0 : index
    %173 = vector.load %arg7[%c20, %c0_92, %c0_93] : memref<36x16x256xf32, #tpu.memory_space<vmem>>, vector<1x16x256xf32>
    %174 = vector.shape_cast %173 : vector<1x16x256xf32> to vector<16x256xf32>
    %175 = arith.mulf %172, %174 : vector<16x256xf32>
    %176 = arith.addf %171, %175 : vector<16x256xf32>
    %c5_i32 = arith.constant 5 : i32
    %177 = tpu.dynamic_rotate %38 by %c5_i32 dim 1 : vector<16x256xf32>, i32 -> vector<16x256xf32>
    %c21 = arith.constant 21 : index
    %c0_94 = arith.constant 0 : index
    %c0_95 = arith.constant 0 : index
    %178 = vector.load %arg7[%c21, %c0_94, %c0_95] : memref<36x16x256xf32, #tpu.memory_space<vmem>>, vector<1x16x256xf32>
    %179 = vector.shape_cast %178 : vector<1x16x256xf32> to vector<16x256xf32>
    %180 = arith.mulf %177, %179 : vector<16x256xf32>
    %181 = arith.addf %176, %180 : vector<16x256xf32>
    %c22 = arith.constant 22 : index
    %c0_96 = arith.constant 0 : index
    %c0_97 = arith.constant 0 : index
    %182 = vector.load %arg7[%c22, %c0_96, %c0_97] : memref<36x16x256xf32, #tpu.memory_space<vmem>>, vector<1x16x256xf32>
    %183 = vector.shape_cast %182 : vector<1x16x256xf32> to vector<16x256xf32>
    %184 = arith.mulf %38, %183 : vector<16x256xf32>
    %185 = arith.addf %181, %184 : vector<16x256xf32>
    %c251_i32 = arith.constant 251 : i32
    %186 = tpu.dynamic_rotate %38 by %c251_i32 dim 1 : vector<16x256xf32>, i32 -> vector<16x256xf32>
    %c23 = arith.constant 23 : index
    %c0_98 = arith.constant 0 : index
    %c0_99 = arith.constant 0 : index
    %187 = vector.load %arg7[%c23, %c0_98, %c0_99] : memref<36x16x256xf32, #tpu.memory_space<vmem>>, vector<1x16x256xf32>
    %188 = vector.shape_cast %187 : vector<1x16x256xf32> to vector<16x256xf32>
    %189 = arith.mulf %186, %188 : vector<16x256xf32>
    %190 = arith.addf %185, %189 : vector<16x256xf32>
    %c181_i32 = arith.constant 181 : i32
    %191 = tpu.dynamic_rotate %38 by %c181_i32 dim 1 : vector<16x256xf32>, i32 -> vector<16x256xf32>
    %c24 = arith.constant 24 : index
    %c0_100 = arith.constant 0 : index
    %c0_101 = arith.constant 0 : index
    %192 = vector.load %arg7[%c24, %c0_100, %c0_101] : memref<36x16x256xf32, #tpu.memory_space<vmem>>, vector<1x16x256xf32>
    %193 = vector.shape_cast %192 : vector<1x16x256xf32> to vector<16x256xf32>
    %194 = arith.mulf %191, %193 : vector<16x256xf32>
    %195 = arith.addf %190, %194 : vector<16x256xf32>
    %c176_i32 = arith.constant 176 : i32
    %196 = tpu.dynamic_rotate %38 by %c176_i32 dim 1 : vector<16x256xf32>, i32 -> vector<16x256xf32>
    %c25 = arith.constant 25 : index
    %c0_102 = arith.constant 0 : index
    %c0_103 = arith.constant 0 : index
    %197 = vector.load %arg7[%c25, %c0_102, %c0_103] : memref<36x16x256xf32, #tpu.memory_space<vmem>>, vector<1x16x256xf32>
    %198 = vector.shape_cast %197 : vector<1x16x256xf32> to vector<16x256xf32>
    %199 = arith.mulf %196, %198 : vector<16x256xf32>
    %200 = arith.addf %195, %199 : vector<16x256xf32>
    %c171_i32 = arith.constant 171 : i32
    %201 = tpu.dynamic_rotate %38 by %c171_i32 dim 1 : vector<16x256xf32>, i32 -> vector<16x256xf32>
    %c26 = arith.constant 26 : index
    %c0_104 = arith.constant 0 : index
    %c0_105 = arith.constant 0 : index
    %202 = vector.load %arg7[%c26, %c0_104, %c0_105] : memref<36x16x256xf32, #tpu.memory_space<vmem>>, vector<1x16x256xf32>
    %203 = vector.shape_cast %202 : vector<1x16x256xf32> to vector<16x256xf32>
    %204 = arith.mulf %201, %203 : vector<16x256xf32>
    %205 = arith.addf %200, %204 : vector<16x256xf32>
    %206 = vector.extract_strided_slice %6 {offsets = [0, 2], sizes = [16, 1], strides = [1, 1]} : vector<16x4xf32> to vector<16x1xf32>
    %207 = vector.broadcast %206 : vector<16x1xf32> to vector<16x256xf32>
    %208 = arith.addf %205, %207 : vector<16x256xf32>
    %cst_106 = arith.constant 0.000000e+00 : f32
    %cst_107 = arith.constant 6.000000e+00 : f32
    %209 = vector.broadcast %cst_106 : f32 to vector<16x256xf32>
    %210 = arith.maximumf %209, %208 : vector<16x256xf32>
    %211 = vector.broadcast %cst_107 : f32 to vector<16x256xf32>
    %212 = arith.minimumf %211, %210 : vector<16x256xf32>
    %c0_108 = arith.constant 0 : index
    %c32 = arith.constant 32 : index
    %c0_109 = arith.constant 0 : index
    %213 = vector.load %arg12[%c0_108, %c32, %c0_109] : memref<2x64x256xf32, #tpu.memory_space<vmem>>, vector<1x16x256xf32>
    %214 = vector.shape_cast %213 : vector<1x16x256xf32> to vector<16x256xf32>
    %215 = vector.shape_cast %212 : vector<16x256xf32> to vector<1x16x256xf32>
    tpu.vector_store %arg12[%c0_108, %c32, %c0_109], %215 {strides = array<i32>} : memref<2x64x256xf32, #tpu.memory_space<vmem>>, vector<1x16x256xf32>,
    %cst_110 = arith.constant dense<0.000000e+00> : vector<1x256xf32>
    %216 = tpu.matmul %1, %212, %cst_110 {dimension_numbers = #tpu.dot_dimension_numbers<[1], [0], [0], [1], [0, 0, 1, 1], [], []>} : vector<1x16xf32>, vector<16x256xf32>, vector<1x256xf32> -> vector<1x256xf32>
    %217 = arith.addf %157, %216 : vector<1x256xf32>
    %cst_111 = arith.constant dense<0xFF800000> : vector<256xf32>
    %218 = vector.multi_reduction <maximumf>, %212, %cst_111 [0] : vector<16x256xf32> to vector<256xf32>
    %219 = vector.shape_cast %218 : vector<256xf32> to vector<1x256xf32>
    %220 = arith.maximumf %160, %219 : vector<1x256xf32>
    %cst_112 = arith.constant 0.000000e+00 : f32
    %221 = vector.broadcast %cst_112 : f32 to vector<16x256xf32>
    %c119_i32 = arith.constant 119 : i32
    %222 = tpu.dynamic_rotate %38 by %c119_i32 dim 1 : vector<16x256xf32>, i32 -> vector<16x256xf32>
    %c27 = arith.constant 27 : index
    %c0_113 = arith.constant 0 : index
    %c0_114 = arith.constant 0 : index
    %223 = vector.load %arg7[%c27, %c0_113, %c0_114] : memref<36x16x256xf32, #tpu.memory_space<vmem>>, vector<1x16x256xf32>
    %224 = vector.shape_cast %223 : vector<1x16x256xf32> to vector<16x256xf32>
    %225 = arith.mulf %222, %224 : vector<16x256xf32>
    %226 = arith.addf %221, %225 : vector<16x256xf32>
    %c112_i32 = arith.constant 112 : i32
    %227 = tpu.dynamic_rotate %38 by %c112_i32 dim 1 : vector<16x256xf32>, i32 -> vector<16x256xf32>
    %c28 = arith.constant 28 : index
    %c0_115 = arith.constant 0 : index
    %c0_116 = arith.constant 0 : index
    %228 = vector.load %arg7[%c28, %c0_115, %c0_116] : memref<36x16x256xf32, #tpu.memory_space<vmem>>, vector<1x16x256xf32>
    %229 = vector.shape_cast %228 : vector<1x16x256xf32> to vector<16x256xf32>
    %230 = arith.mulf %227, %229 : vector<16x256xf32>
    %231 = arith.addf %226, %230 : vector<16x256xf32>
    %c105_i32 = arith.constant 105 : i32
    %232 = tpu.dynamic_rotate %38 by %c105_i32 dim 1 : vector<16x256xf32>, i32 -> vector<16x256xf32>
    %c29 = arith.constant 29 : index
    %c0_117 = arith.constant 0 : index
    %c0_118 = arith.constant 0 : index
    %233 = vector.load %arg7[%c29, %c0_117, %c0_118] : memref<36x16x256xf32, #tpu.memory_space<vmem>>, vector<1x16x256xf32>
    %234 = vector.shape_cast %233 : vector<1x16x256xf32> to vector<16x256xf32>
    %235 = arith.mulf %232, %234 : vector<16x256xf32>
    %236 = arith.addf %231, %235 : vector<16x256xf32>
    %c7_i32 = arith.constant 7 : i32
    %237 = tpu.dynamic_rotate %38 by %c7_i32 dim 1 : vector<16x256xf32>, i32 -> vector<16x256xf32>
    %c30 = arith.constant 30 : index
    %c0_119 = arith.constant 0 : index
    %c0_120 = arith.constant 0 : index
    %238 = vector.load %arg7[%c30, %c0_119, %c0_120] : memref<36x16x256xf32, #tpu.memory_space<vmem>>, vector<1x16x256xf32>
    %239 = vector.shape_cast %238 : vector<1x16x256xf32> to vector<16x256xf32>
    %240 = arith.mulf %237, %239 : vector<16x256xf32>
    %241 = arith.addf %236, %240 : vector<16x256xf32>
    %c31 = arith.constant 31 : index
    %c0_121 = arith.constant 0 : index
    %c0_122 = arith.constant 0 : index
    %242 = vector.load %arg7[%c31, %c0_121, %c0_122] : memref<36x16x256xf32, #tpu.memory_space<vmem>>, vector<1x16x256xf32>
    %243 = vector.shape_cast %242 : vector<1x16x256xf32> to vector<16x256xf32>
    %244 = arith.mulf %38, %243 : vector<16x256xf32>
    %245 = arith.addf %241, %244 : vector<16x256xf32>
    %c249_i32 = arith.constant 249 : i32
    %246 = tpu.dynamic_rotate %38 by %c249_i32 dim 1 : vector<16x256xf32>, i32 -> vector<16x256xf32>
    %c32_123 = arith.constant 32 : index
    %c0_124 = arith.constant 0 : index
    %c0_125 = arith.constant 0 : index
    %247 = vector.load %arg7[%c32_123, %c0_124, %c0_125] : memref<36x16x256xf32, #tpu.memory_space<vmem>>, vector<1x16x256xf32>
    %248 = vector.shape_cast %247 : vector<1x16x256xf32> to vector<16x256xf32>
    %249 = arith.mulf %246, %248 : vector<16x256xf32>
    %250 = arith.addf %245, %249 : vector<16x256xf32>
    %c151_i32 = arith.constant 151 : i32
    %251 = tpu.dynamic_rotate %38 by %c151_i32 dim 1 : vector<16x256xf32>, i32 -> vector<16x256xf32>
    %c33 = arith.constant 33 : index
    %c0_126 = arith.constant 0 : index
    %c0_127 = arith.constant 0 : index
    %252 = vector.load %arg7[%c33, %c0_126, %c0_127] : memref<36x16x256xf32, #tpu.memory_space<vmem>>, vector<1x16x256xf32>
    %253 = vector.shape_cast %252 : vector<1x16x256xf32> to vector<16x256xf32>
    %254 = arith.mulf %251, %253 : vector<16x256xf32>
    %255 = arith.addf %250, %254 : vector<16x256xf32>
    %c144_i32 = arith.constant 144 : i32
    %256 = tpu.dynamic_rotate %38 by %c144_i32 dim 1 : vector<16x256xf32>, i32 -> vector<16x256xf32>
    %c34 = arith.constant 34 : index
    %c0_128 = arith.constant 0 : index
    %c0_129 = arith.constant 0 : index
    %257 = vector.load %arg7[%c34, %c0_128, %c0_129] : memref<36x16x256xf32, #tpu.memory_space<vmem>>, vector<1x16x256xf32>
    %258 = vector.shape_cast %257 : vector<1x16x256xf32> to vector<16x256xf32>
    %259 = arith.mulf %256, %258 : vector<16x256xf32>
    %260 = arith.addf %255, %259 : vector<16x256xf32>
    %c137_i32 = arith.constant 137 : i32
    %261 = tpu.dynamic_rotate %38 by %c137_i32 dim 1 : vector<16x256xf32>, i32 -> vector<16x256xf32>
    %c35 = arith.constant 35 : index
    %c0_130 = arith.constant 0 : index
    %c0_131 = arith.constant 0 : index
    %262 = vector.load %arg7[%c35, %c0_130, %c0_131] : memref<36x16x256xf32, #tpu.memory_space<vmem>>, vector<1x16x256xf32>
    %263 = vector.shape_cast %262 : vector<1x16x256xf32> to vector<16x256xf32>
    %264 = arith.mulf %261, %263 : vector<16x256xf32>
    %265 = arith.addf %260, %264 : vector<16x256xf32>
    %266 = vector.extract_strided_slice %6 {offsets = [0, 3], sizes = [16, 1], strides = [1, 1]} : vector<16x4xf32> to vector<16x1xf32>
    %267 = vector.broadcast %266 : vector<16x1xf32> to vector<16x256xf32>
    %268 = arith.addf %265, %267 : vector<16x256xf32>
    %cst_132 = arith.constant 0.000000e+00 : f32
    %cst_133 = arith.constant 6.000000e+00 : f32
    %269 = vector.broadcast %cst_132 : f32 to vector<16x256xf32>
    %270 = arith.maximumf %269, %268 : vector<16x256xf32>
    %271 = vector.broadcast %cst_133 : f32 to vector<16x256xf32>
    %272 = arith.minimumf %271, %270 : vector<16x256xf32>
    %c0_134 = arith.constant 0 : index
    %c48 = arith.constant 48 : index
    %c0_135 = arith.constant 0 : index
    %273 = vector.load %arg12[%c0_134, %c48, %c0_135] : memref<2x64x256xf32, #tpu.memory_space<vmem>>, vector<1x16x256xf32>
    %274 = vector.shape_cast %273 : vector<1x16x256xf32> to vector<16x256xf32>
    %275 = vector.shape_cast %272 : vector<16x256xf32> to vector<1x16x256xf32>
    tpu.vector_store %arg12[%c0_134, %c48, %c0_135], %275 {strides = array<i32>} : memref<2x64x256xf32, #tpu.memory_space<vmem>>, vector<1x16x256xf32>,
    %cst_136 = arith.constant dense<0.000000e+00> : vector<1x256xf32>
    %276 = tpu.matmul %1, %272, %cst_136 {dimension_numbers = #tpu.dot_dimension_numbers<[1], [0], [0], [1], [0, 0, 1, 1], [], []>} : vector<1x16xf32>, vector<16x256xf32>, vector<1x256xf32> -> vector<1x256xf32>
    %277 = arith.addf %217, %276 : vector<1x256xf32>
    %cst_137 = arith.constant dense<0xFF800000> : vector<256xf32>
    %278 = vector.multi_reduction <maximumf>, %272, %cst_137 [0] : vector<16x256xf32> to vector<256xf32>
    %279 = vector.shape_cast %278 : vector<256xf32> to vector<1x256xf32>
    %280 = arith.maximumf %220, %279 : vector<1x256xf32>
    %281 = tpu.concatenate %277, %280 in 1 : vector<1x256xf32>, vector<1x256xf32> -> vector<1x512xf32>
    %cst_138 = arith.constant dense<0.000000e+00> : vector<1x256xf32>
    %282 = tpu.matmul %281, %7, %cst_138 {dimension_numbers = #tpu.dot_dimension_numbers<[1], [0], [0], [1], [0, 0, 1, 1], [], []>} : vector<1x512xf32>, vector<512x256xf32>, vector<1x256xf32> -> vector<1x256xf32>
    %283 = arith.negf %282 : vector<1x256xf32>
    %284 = math.exp %283 : vector<1x256xf32>
    %cst_139 = arith.constant 1.000000e+00 : f32
    %285 = vector.broadcast %cst_139 : f32 to vector<1x256xf32>
    %286 = arith.addf %285, %284 : vector<1x256xf32>
    %287 = arith.divf %285, %286 : vector<1x256xf32>
    %288 = vector.broadcast %8 : f32 to vector<1x256xf32>
    %289 = arith.mulf %288, %287 : vector<1x256xf32>
    %290 = vector.broadcast %289 : vector<1x256xf32> to vector<64x256xf32>
    %291 = arith.mulf %11, %290 : vector<64x256xf32>
    %c0_140 = arith.constant 0 : index
    %c0_141 = arith.constant 0 : index
    %c0_142 = arith.constant 0 : index
    %292 = vector.load %arg12[%c0_140, %c0_141, %c0_142] : memref<2x64x256xf32, #tpu.memory_space<vmem>>, vector<1x64x256xf32>
    %293 = vector.shape_cast %292 : vector<1x64x256xf32> to vector<64x256xf32>
    %294 = vector.broadcast %9 : f32 to vector<64x1xf32>
    %295 = arith.mulf %294, %31 : vector<64x1xf32>
    %296 = vector.broadcast %295 : vector<64x1xf32> to vector<64x256xf32>
    %297 = arith.mulf %293, %296 : vector<64x256xf32>
    %298 = arith.addf %291, %297 : vector<64x256xf32>
    %c0_143 = arith.constant 0 : index
    %c0_144 = arith.constant 0 : index
    %c0_145 = arith.constant 0 : index
    %299 = vector.load %arg11[%c0_143, %c0_144, %c0_145] : memref<2x64x256xf32, #tpu.memory_space<vmem>>, vector<1x64x256xf32>
    %300 = vector.shape_cast %299 : vector<1x64x256xf32> to vector<64x256xf32>
    %301 = vector.shape_cast %298 : vector<64x256xf32> to vector<1x64x256xf32>
    tpu.vector_store %arg11[%c0_143, %c0_144, %c0_145], %301 {strides = array<i32>} : memref<2x64x256xf32, #tpu.memory_space<vmem>>, vector<1x64x256xf32>,
    %c1_146 = arith.constant 1 : index
    %c0_147 = arith.constant 0 : index
    %c0_148 = arith.constant 0 : index
    %302 = vector.load %arg1[%c1_146, %c0_147, %c0_148] : memref<2x64x256xf32, #tpu.memory_space<vmem>>, vector<1x64x256xf32>
    %303 = vector.shape_cast %302 : vector<1x64x256xf32> to vector<64x256xf32>
    %c1_149 = arith.constant 1 : index
    %c0_150 = arith.constant 0 : index
    %c0_151 = arith.constant 0 : index
    %304 = vector.load %arg2[%c1_149, %c0_150, %c0_151] : memref<2x64x256xf32, #tpu.memory_space<vmem>>, vector<1x64x256xf32>
    %305 = vector.shape_cast %304 : vector<1x64x256xf32> to vector<64x256xf32>
    %cst_152 = arith.constant dense<0.000000e+00> : vector<64x1xf32>
    %306 = tpu.matmul %303, %0, %cst_152 {dimension_numbers = #tpu.dot_dimension_numbers<[1], [0], [0], [1], [0, 0, 1, 1], [], []>} : vector<64x256xf32>, vector<256x1xf32>, vector<64x1xf32> -> vector<64x1xf32>
    %cst_153 = arith.constant dense<0xFF800000> : vector<64xf32>
    %307 = vector.multi_reduction <maximumf>, %303, %cst_153 [1] : vector<64x256xf32> to vector<64xf32>
    %308 = vector.shape_cast %307 : vector<64xf32> to vector<64x1xf32>
    %309 = tpu.concatenate %306, %308 in 1 : vector<64x1xf32>, vector<64x1xf32> -> vector<64x2xf32>
    %cst_154 = arith.constant dense<0.000000e+00> : vector<4x2xf32>
    %310 = tpu.matmul %2, %309, %cst_154 {dimension_numbers = #tpu.dot_dimension_numbers<[1], [0], [0], [1], [0, 0, 1, 1], [], []>} : vector<4x64xf32>, vector<64x2xf32>, vector<4x2xf32> -> vector<4x2xf32>
    %cst_155 = arith.constant 0.000000e+00 : f32
    %cst_156 = arith.constant 6.000000e+00 : f32
    %311 = vector.broadcast %cst_155 : f32 to vector<4x2xf32>
    %312 = arith.maximumf %311, %310 : vector<4x2xf32>
    %313 = vector.broadcast %cst_156 : f32 to vector<4x2xf32>
    %314 = arith.minimumf %313, %312 : vector<4x2xf32>
    %cst_157 = arith.constant dense<0.000000e+00> : vector<64x2xf32>
    %315 = tpu.matmul %3, %314, %cst_157 {dimension_numbers = #tpu.dot_dimension_numbers<[1], [0], [0], [1], [0, 0, 1, 1], [], []>} : vector<64x4xf32>, vector<4x2xf32>, vector<64x2xf32> -> vector<64x2xf32>
    %316 = vector.extract_strided_slice %315 {offsets = [0, 0], sizes = [64, 1], strides = [1, 1]} : vector<64x2xf32> to vector<64x1xf32>
    %317 = vector.extract_strided_slice %315 {offsets = [0, 1], sizes = [64, 1], strides = [1, 1]} : vector<64x2xf32> to vector<64x1xf32>
    %318 = arith.addf %316, %317 : vector<64x1xf32>
    %319 = arith.negf %318 : vector<64x1xf32>
    %320 = math.exp %319 : vector<64x1xf32>
    %cst_158 = arith.constant 1.000000e+00 : f32
    %321 = vector.broadcast %cst_158 : f32 to vector<64x1xf32>
    %322 = arith.addf %321, %320 : vector<64x1xf32>
    %323 = arith.divf %321, %322 : vector<64x1xf32>
    %cst_159 = arith.constant dense<0.000000e+00> : vector<16x256xf32>
    %324 = tpu.matmul %4, %305, %cst_159 {dimension_numbers = #tpu.dot_dimension_numbers<[1], [0], [0], [1], [0, 0, 1, 1], [], []>} : vector<16x64xf32>, vector<64x256xf32>, vector<16x256xf32> -> vector<16x256xf32>
    %325 = vector.broadcast %5 : vector<16x1xf32> to vector<16x256xf32>
    %326 = arith.addf %324, %325 : vector<16x256xf32>
    %cst_160 = arith.constant 0.000000e+00 : f32
    %cst_161 = arith.constant 6.000000e+00 : f32
    %327 = vector.broadcast %cst_160 : f32 to vector<16x256xf32>
    %328 = arith.maximumf %327, %326 : vector<16x256xf32>
    %329 = vector.broadcast %cst_161 : f32 to vector<16x256xf32>
    %330 = arith.minimumf %329, %328 : vector<16x256xf32>
    %cst_162 = arith.constant 0.000000e+00 : f32
    %331 = vector.broadcast %cst_162 : f32 to vector<1x256xf32>
    %cst_163 = arith.constant 0xFF800000 : f32
    %332 = vector.broadcast %cst_163 : f32 to vector<1x256xf32>
    %cst_164 = arith.constant 0.000000e+00 : f32
    %333 = vector.broadcast %cst_164 : f32 to vector<16x256xf32>
    %c17_i32_165 = arith.constant 17 : i32
    %334 = tpu.dynamic_rotate %330 by %c17_i32_165 dim 1 : vector<16x256xf32>, i32 -> vector<16x256xf32>
    %c0_166 = arith.constant 0 : index
    %c0_167 = arith.constant 0 : index
    %c0_168 = arith.constant 0 : index
    %335 = vector.load %arg7[%c0_166, %c0_167, %c0_168] : memref<36x16x256xf32, #tpu.memory_space<vmem>>, vector<1x16x256xf32>
    %336 = vector.shape_cast %335 : vector<1x16x256xf32> to vector<16x256xf32>
    %337 = arith.mulf %334, %336 : vector<16x256xf32>
    %338 = arith.addf %333, %337 : vector<16x256xf32>
    %c16_i32_169 = arith.constant 16 : i32
    %339 = tpu.dynamic_rotate %330 by %c16_i32_169 dim 1 : vector<16x256xf32>, i32 -> vector<16x256xf32>
    %c1_170 = arith.constant 1 : index
    %c0_171 = arith.constant 0 : index
    %c0_172 = arith.constant 0 : index
    %340 = vector.load %arg7[%c1_170, %c0_171, %c0_172] : memref<36x16x256xf32, #tpu.memory_space<vmem>>, vector<1x16x256xf32>
    %341 = vector.shape_cast %340 : vector<1x16x256xf32> to vector<16x256xf32>
    %342 = arith.mulf %339, %341 : vector<16x256xf32>
    %343 = arith.addf %338, %342 : vector<16x256xf32>
    %c15_i32_173 = arith.constant 15 : i32
    %344 = tpu.dynamic_rotate %330 by %c15_i32_173 dim 1 : vector<16x256xf32>, i32 -> vector<16x256xf32>
    %c2_174 = arith.constant 2 : index
    %c0_175 = arith.constant 0 : index
    %c0_176 = arith.constant 0 : index
    %345 = vector.load %arg7[%c2_174, %c0_175, %c0_176] : memref<36x16x256xf32, #tpu.memory_space<vmem>>, vector<1x16x256xf32>
    %346 = vector.shape_cast %345 : vector<1x16x256xf32> to vector<16x256xf32>
    %347 = arith.mulf %344, %346 : vector<16x256xf32>
    %348 = arith.addf %343, %347 : vector<16x256xf32>
    %c1_i32_177 = arith.constant 1 : i32
    %349 = tpu.dynamic_rotate %330 by %c1_i32_177 dim 1 : vector<16x256xf32>, i32 -> vector<16x256xf32>
    %c3_178 = arith.constant 3 : index
    %c0_179 = arith.constant 0 : index
    %c0_180 = arith.constant 0 : index
    %350 = vector.load %arg7[%c3_178, %c0_179, %c0_180] : memref<36x16x256xf32, #tpu.memory_space<vmem>>, vector<1x16x256xf32>
    %351 = vector.shape_cast %350 : vector<1x16x256xf32> to vector<16x256xf32>
    %352 = arith.mulf %349, %351 : vector<16x256xf32>
    %353 = arith.addf %348, %352 : vector<16x256xf32>
    %c4_181 = arith.constant 4 : index
    %c0_182 = arith.constant 0 : index
    %c0_183 = arith.constant 0 : index
    %354 = vector.load %arg7[%c4_181, %c0_182, %c0_183] : memref<36x16x256xf32, #tpu.memory_space<vmem>>, vector<1x16x256xf32>
    %355 = vector.shape_cast %354 : vector<1x16x256xf32> to vector<16x256xf32>
    %356 = arith.mulf %330, %355 : vector<16x256xf32>
    %357 = arith.addf %353, %356 : vector<16x256xf32>
    %c255_i32_184 = arith.constant 255 : i32
    %358 = tpu.dynamic_rotate %330 by %c255_i32_184 dim 1 : vector<16x256xf32>, i32 -> vector<16x256xf32>
    %c5_185 = arith.constant 5 : index
    %c0_186 = arith.constant 0 : index
    %c0_187 = arith.constant 0 : index
    %359 = vector.load %arg7[%c5_185, %c0_186, %c0_187] : memref<36x16x256xf32, #tpu.memory_space<vmem>>, vector<1x16x256xf32>
    %360 = vector.shape_cast %359 : vector<1x16x256xf32> to vector<16x256xf32>
    %361 = arith.mulf %358, %360 : vector<16x256xf32>
    %362 = arith.addf %357, %361 : vector<16x256xf32>
    %c241_i32_188 = arith.constant 241 : i32
    %363 = tpu.dynamic_rotate %330 by %c241_i32_188 dim 1 : vector<16x256xf32>, i32 -> vector<16x256xf32>
    %c6_189 = arith.constant 6 : index
    %c0_190 = arith.constant 0 : index
    %c0_191 = arith.constant 0 : index
    %364 = vector.load %arg7[%c6_189, %c0_190, %c0_191] : memref<36x16x256xf32, #tpu.memory_space<vmem>>, vector<1x16x256xf32>
    %365 = vector.shape_cast %364 : vector<1x16x256xf32> to vector<16x256xf32>
    %366 = arith.mulf %363, %365 : vector<16x256xf32>
    %367 = arith.addf %362, %366 : vector<16x256xf32>
    %c240_i32_192 = arith.constant 240 : i32
    %368 = tpu.dynamic_rotate %330 by %c240_i32_192 dim 1 : vector<16x256xf32>, i32 -> vector<16x256xf32>
    %c7_193 = arith.constant 7 : index
    %c0_194 = arith.constant 0 : index
    %c0_195 = arith.constant 0 : index
    %369 = vector.load %arg7[%c7_193, %c0_194, %c0_195] : memref<36x16x256xf32, #tpu.memory_space<vmem>>, vector<1x16x256xf32>
    %370 = vector.shape_cast %369 : vector<1x16x256xf32> to vector<16x256xf32>
    %371 = arith.mulf %368, %370 : vector<16x256xf32>
    %372 = arith.addf %367, %371 : vector<16x256xf32>
    %c239_i32_196 = arith.constant 239 : i32
    %373 = tpu.dynamic_rotate %330 by %c239_i32_196 dim 1 : vector<16x256xf32>, i32 -> vector<16x256xf32>
    %c8_197 = arith.constant 8 : index
    %c0_198 = arith.constant 0 : index
    %c0_199 = arith.constant 0 : index
    %374 = vector.load %arg7[%c8_197, %c0_198, %c0_199] : memref<36x16x256xf32, #tpu.memory_space<vmem>>, vector<1x16x256xf32>
    %375 = vector.shape_cast %374 : vector<1x16x256xf32> to vector<16x256xf32>
    %376 = arith.mulf %373, %375 : vector<16x256xf32>
    %377 = arith.addf %372, %376 : vector<16x256xf32>
    %378 = vector.extract_strided_slice %6 {offsets = [0, 0], sizes = [16, 1], strides = [1, 1]} : vector<16x4xf32> to vector<16x1xf32>
    %379 = vector.broadcast %378 : vector<16x1xf32> to vector<16x256xf32>
    %380 = arith.addf %377, %379 : vector<16x256xf32>
    %cst_200 = arith.constant 0.000000e+00 : f32
    %cst_201 = arith.constant 6.000000e+00 : f32
    %381 = vector.broadcast %cst_200 : f32 to vector<16x256xf32>
    %382 = arith.maximumf %381, %380 : vector<16x256xf32>
    %383 = vector.broadcast %cst_201 : f32 to vector<16x256xf32>
    %384 = arith.minimumf %383, %382 : vector<16x256xf32>
    %c1_202 = arith.constant 1 : index
    %c0_203 = arith.constant 0 : index
    %c0_204 = arith.constant 0 : index
    %385 = vector.load %arg12[%c1_202, %c0_203, %c0_204] : memref<2x64x256xf32, #tpu.memory_space<vmem>>, vector<1x16x256xf32>
    %386 = vector.shape_cast %385 : vector<1x16x256xf32> to vector<16x256xf32>
    %387 = vector.shape_cast %384 : vector<16x256xf32> to vector<1x16x256xf32>
    tpu.vector_store %arg12[%c1_202, %c0_203, %c0_204], %387 {strides = array<i32>} : memref<2x64x256xf32, #tpu.memory_space<vmem>>, vector<1x16x256xf32>,
    %cst_205 = arith.constant dense<0.000000e+00> : vector<1x256xf32>
    %388 = tpu.matmul %1, %384, %cst_205 {dimension_numbers = #tpu.dot_dimension_numbers<[1], [0], [0], [1], [0, 0, 1, 1], [], []>} : vector<1x16xf32>, vector<16x256xf32>, vector<1x256xf32> -> vector<1x256xf32>
    %389 = arith.addf %331, %388 : vector<1x256xf32>
    %cst_206 = arith.constant dense<0xFF800000> : vector<256xf32>
    %390 = vector.multi_reduction <maximumf>, %384, %cst_206 [0] : vector<16x256xf32> to vector<256xf32>
    %391 = vector.shape_cast %390 : vector<256xf32> to vector<1x256xf32>
    %392 = arith.maximumf %332, %391 : vector<1x256xf32>
    %cst_207 = arith.constant 0.000000e+00 : f32
    %393 = vector.broadcast %cst_207 : f32 to vector<16x256xf32>
    %c51_i32_208 = arith.constant 51 : i32
    %394 = tpu.dynamic_rotate %330 by %c51_i32_208 dim 1 : vector<16x256xf32>, i32 -> vector<16x256xf32>
    %c9_209 = arith.constant 9 : index
    %c0_210 = arith.constant 0 : index
    %c0_211 = arith.constant 0 : index
    %395 = vector.load %arg7[%c9_209, %c0_210, %c0_211] : memref<36x16x256xf32, #tpu.memory_space<vmem>>, vector<1x16x256xf32>
    %396 = vector.shape_cast %395 : vector<1x16x256xf32> to vector<16x256xf32>
    %397 = arith.mulf %394, %396 : vector<16x256xf32>
    %398 = arith.addf %393, %397 : vector<16x256xf32>
    %c48_i32_212 = arith.constant 48 : i32
    %399 = tpu.dynamic_rotate %330 by %c48_i32_212 dim 1 : vector<16x256xf32>, i32 -> vector<16x256xf32>
    %c10_213 = arith.constant 10 : index
    %c0_214 = arith.constant 0 : index
    %c0_215 = arith.constant 0 : index
    %400 = vector.load %arg7[%c10_213, %c0_214, %c0_215] : memref<36x16x256xf32, #tpu.memory_space<vmem>>, vector<1x16x256xf32>
    %401 = vector.shape_cast %400 : vector<1x16x256xf32> to vector<16x256xf32>
    %402 = arith.mulf %399, %401 : vector<16x256xf32>
    %403 = arith.addf %398, %402 : vector<16x256xf32>
    %c45_i32_216 = arith.constant 45 : i32
    %404 = tpu.dynamic_rotate %330 by %c45_i32_216 dim 1 : vector<16x256xf32>, i32 -> vector<16x256xf32>
    %c11_217 = arith.constant 11 : index
    %c0_218 = arith.constant 0 : index
    %c0_219 = arith.constant 0 : index
    %405 = vector.load %arg7[%c11_217, %c0_218, %c0_219] : memref<36x16x256xf32, #tpu.memory_space<vmem>>, vector<1x16x256xf32>
    %406 = vector.shape_cast %405 : vector<1x16x256xf32> to vector<16x256xf32>
    %407 = arith.mulf %404, %406 : vector<16x256xf32>
    %408 = arith.addf %403, %407 : vector<16x256xf32>
    %c3_i32_220 = arith.constant 3 : i32
    %409 = tpu.dynamic_rotate %330 by %c3_i32_220 dim 1 : vector<16x256xf32>, i32 -> vector<16x256xf32>
    %c12_221 = arith.constant 12 : index
    %c0_222 = arith.constant 0 : index
    %c0_223 = arith.constant 0 : index
    %410 = vector.load %arg7[%c12_221, %c0_222, %c0_223] : memref<36x16x256xf32, #tpu.memory_space<vmem>>, vector<1x16x256xf32>
    %411 = vector.shape_cast %410 : vector<1x16x256xf32> to vector<16x256xf32>
    %412 = arith.mulf %409, %411 : vector<16x256xf32>
    %413 = arith.addf %408, %412 : vector<16x256xf32>
    %c13_224 = arith.constant 13 : index
    %c0_225 = arith.constant 0 : index
    %c0_226 = arith.constant 0 : index
    %414 = vector.load %arg7[%c13_224, %c0_225, %c0_226] : memref<36x16x256xf32, #tpu.memory_space<vmem>>, vector<1x16x256xf32>
    %415 = vector.shape_cast %414 : vector<1x16x256xf32> to vector<16x256xf32>
    %416 = arith.mulf %330, %415 : vector<16x256xf32>
    %417 = arith.addf %413, %416 : vector<16x256xf32>
    %c253_i32_227 = arith.constant 253 : i32
    %418 = tpu.dynamic_rotate %330 by %c253_i32_227 dim 1 : vector<16x256xf32>, i32 -> vector<16x256xf32>
    %c14_228 = arith.constant 14 : index
    %c0_229 = arith.constant 0 : index
    %c0_230 = arith.constant 0 : index
    %419 = vector.load %arg7[%c14_228, %c0_229, %c0_230] : memref<36x16x256xf32, #tpu.memory_space<vmem>>, vector<1x16x256xf32>
    %420 = vector.shape_cast %419 : vector<1x16x256xf32> to vector<16x256xf32>
    %421 = arith.mulf %418, %420 : vector<16x256xf32>
    %422 = arith.addf %417, %421 : vector<16x256xf32>
    %c211_i32_231 = arith.constant 211 : i32
    %423 = tpu.dynamic_rotate %330 by %c211_i32_231 dim 1 : vector<16x256xf32>, i32 -> vector<16x256xf32>
    %c15_232 = arith.constant 15 : index
    %c0_233 = arith.constant 0 : index
    %c0_234 = arith.constant 0 : index
    %424 = vector.load %arg7[%c15_232, %c0_233, %c0_234] : memref<36x16x256xf32, #tpu.memory_space<vmem>>, vector<1x16x256xf32>
    %425 = vector.shape_cast %424 : vector<1x16x256xf32> to vector<16x256xf32>
    %426 = arith.mulf %423, %425 : vector<16x256xf32>
    %427 = arith.addf %422, %426 : vector<16x256xf32>
    %c208_i32_235 = arith.constant 208 : i32
    %428 = tpu.dynamic_rotate %330 by %c208_i32_235 dim 1 : vector<16x256xf32>, i32 -> vector<16x256xf32>
    %c16_236 = arith.constant 16 : index
    %c0_237 = arith.constant 0 : index
    %c0_238 = arith.constant 0 : index
    %429 = vector.load %arg7[%c16_236, %c0_237, %c0_238] : memref<36x16x256xf32, #tpu.memory_space<vmem>>, vector<1x16x256xf32>
    %430 = vector.shape_cast %429 : vector<1x16x256xf32> to vector<16x256xf32>
    %431 = arith.mulf %428, %430 : vector<16x256xf32>
    %432 = arith.addf %427, %431 : vector<16x256xf32>
    %c205_i32_239 = arith.constant 205 : i32
    %433 = tpu.dynamic_rotate %330 by %c205_i32_239 dim 1 : vector<16x256xf32>, i32 -> vector<16x256xf32>
    %c17_240 = arith.constant 17 : index
    %c0_241 = arith.constant 0 : index
    %c0_242 = arith.constant 0 : index
    %434 = vector.load %arg7[%c17_240, %c0_241, %c0_242] : memref<36x16x256xf32, #tpu.memory_space<vmem>>, vector<1x16x256xf32>
    %435 = vector.shape_cast %434 : vector<1x16x256xf32> to vector<16x256xf32>
    %436 = arith.mulf %433, %435 : vector<16x256xf32>
    %437 = arith.addf %432, %436 : vector<16x256xf32>
    %438 = vector.extract_strided_slice %6 {offsets = [0, 1], sizes = [16, 1], strides = [1, 1]} : vector<16x4xf32> to vector<16x1xf32>
    %439 = vector.broadcast %438 : vector<16x1xf32> to vector<16x256xf32>
    %440 = arith.addf %437, %439 : vector<16x256xf32>
    %cst_243 = arith.constant 0.000000e+00 : f32
    %cst_244 = arith.constant 6.000000e+00 : f32
    %441 = vector.broadcast %cst_243 : f32 to vector<16x256xf32>
    %442 = arith.maximumf %441, %440 : vector<16x256xf32>
    %443 = vector.broadcast %cst_244 : f32 to vector<16x256xf32>
    %444 = arith.minimumf %443, %442 : vector<16x256xf32>
    %c1_245 = arith.constant 1 : index
    %c16_246 = arith.constant 16 : index
    %c0_247 = arith.constant 0 : index
    %445 = vector.load %arg12[%c1_245, %c16_246, %c0_247] : memref<2x64x256xf32, #tpu.memory_space<vmem>>, vector<1x16x256xf32>
    %446 = vector.shape_cast %445 : vector<1x16x256xf32> to vector<16x256xf32>
    %447 = vector.shape_cast %444 : vector<16x256xf32> to vector<1x16x256xf32>
    tpu.vector_store %arg12[%c1_245, %c16_246, %c0_247], %447 {strides = array<i32>} : memref<2x64x256xf32, #tpu.memory_space<vmem>>, vector<1x16x256xf32>,
    %cst_248 = arith.constant dense<0.000000e+00> : vector<1x256xf32>
    %448 = tpu.matmul %1, %444, %cst_248 {dimension_numbers = #tpu.dot_dimension_numbers<[1], [0], [0], [1], [0, 0, 1, 1], [], []>} : vector<1x16xf32>, vector<16x256xf32>, vector<1x256xf32> -> vector<1x256xf32>
    %449 = arith.addf %389, %448 : vector<1x256xf32>
    %cst_249 = arith.constant dense<0xFF800000> : vector<256xf32>
    %450 = vector.multi_reduction <maximumf>, %444, %cst_249 [0] : vector<16x256xf32> to vector<256xf32>
    %451 = vector.shape_cast %450 : vector<256xf32> to vector<1x256xf32>
    %452 = arith.maximumf %392, %451 : vector<1x256xf32>
    %cst_250 = arith.constant 0.000000e+00 : f32
    %453 = vector.broadcast %cst_250 : f32 to vector<16x256xf32>
    %c85_i32_251 = arith.constant 85 : i32
    %454 = tpu.dynamic_rotate %330 by %c85_i32_251 dim 1 : vector<16x256xf32>, i32 -> vector<16x256xf32>
    %c18_252 = arith.constant 18 : index
    %c0_253 = arith.constant 0 : index
    %c0_254 = arith.constant 0 : index
    %455 = vector.load %arg7[%c18_252, %c0_253, %c0_254] : memref<36x16x256xf32, #tpu.memory_space<vmem>>, vector<1x16x256xf32>
    %456 = vector.shape_cast %455 : vector<1x16x256xf32> to vector<16x256xf32>
    %457 = arith.mulf %454, %456 : vector<16x256xf32>
    %458 = arith.addf %453, %457 : vector<16x256xf32>
    %c80_i32_255 = arith.constant 80 : i32
    %459 = tpu.dynamic_rotate %330 by %c80_i32_255 dim 1 : vector<16x256xf32>, i32 -> vector<16x256xf32>
    %c19_256 = arith.constant 19 : index
    %c0_257 = arith.constant 0 : index
    %c0_258 = arith.constant 0 : index
    %460 = vector.load %arg7[%c19_256, %c0_257, %c0_258] : memref<36x16x256xf32, #tpu.memory_space<vmem>>, vector<1x16x256xf32>
    %461 = vector.shape_cast %460 : vector<1x16x256xf32> to vector<16x256xf32>
    %462 = arith.mulf %459, %461 : vector<16x256xf32>
    %463 = arith.addf %458, %462 : vector<16x256xf32>
    %c75_i32_259 = arith.constant 75 : i32
    %464 = tpu.dynamic_rotate %330 by %c75_i32_259 dim 1 : vector<16x256xf32>, i32 -> vector<16x256xf32>
    %c20_260 = arith.constant 20 : index
    %c0_261 = arith.constant 0 : index
    %c0_262 = arith.constant 0 : index
    %465 = vector.load %arg7[%c20_260, %c0_261, %c0_262] : memref<36x16x256xf32, #tpu.memory_space<vmem>>, vector<1x16x256xf32>
    %466 = vector.shape_cast %465 : vector<1x16x256xf32> to vector<16x256xf32>
    %467 = arith.mulf %464, %466 : vector<16x256xf32>
    %468 = arith.addf %463, %467 : vector<16x256xf32>
    %c5_i32_263 = arith.constant 5 : i32
    %469 = tpu.dynamic_rotate %330 by %c5_i32_263 dim 1 : vector<16x256xf32>, i32 -> vector<16x256xf32>
    %c21_264 = arith.constant 21 : index
    %c0_265 = arith.constant 0 : index
    %c0_266 = arith.constant 0 : index
    %470 = vector.load %arg7[%c21_264, %c0_265, %c0_266] : memref<36x16x256xf32, #tpu.memory_space<vmem>>, vector<1x16x256xf32>
    %471 = vector.shape_cast %470 : vector<1x16x256xf32> to vector<16x256xf32>
    %472 = arith.mulf %469, %471 : vector<16x256xf32>
    %473 = arith.addf %468, %472 : vector<16x256xf32>
    %c22_267 = arith.constant 22 : index
    %c0_268 = arith.constant 0 : index
    %c0_269 = arith.constant 0 : index
    %474 = vector.load %arg7[%c22_267, %c0_268, %c0_269] : memref<36x16x256xf32, #tpu.memory_space<vmem>>, vector<1x16x256xf32>
    %475 = vector.shape_cast %474 : vector<1x16x256xf32> to vector<16x256xf32>
    %476 = arith.mulf %330, %475 : vector<16x256xf32>
    %477 = arith.addf %473, %476 : vector<16x256xf32>
    %c251_i32_270 = arith.constant 251 : i32
    %478 = tpu.dynamic_rotate %330 by %c251_i32_270 dim 1 : vector<16x256xf32>, i32 -> vector<16x256xf32>
    %c23_271 = arith.constant 23 : index
    %c0_272 = arith.constant 0 : index
    %c0_273 = arith.constant 0 : index
    %479 = vector.load %arg7[%c23_271, %c0_272, %c0_273] : memref<36x16x256xf32, #tpu.memory_space<vmem>>, vector<1x16x256xf32>
    %480 = vector.shape_cast %479 : vector<1x16x256xf32> to vector<16x256xf32>
    %481 = arith.mulf %478, %480 : vector<16x256xf32>
    %482 = arith.addf %477, %481 : vector<16x256xf32>
    %c181_i32_274 = arith.constant 181 : i32
    %483 = tpu.dynamic_rotate %330 by %c181_i32_274 dim 1 : vector<16x256xf32>, i32 -> vector<16x256xf32>
    %c24_275 = arith.constant 24 : index
    %c0_276 = arith.constant 0 : index
    %c0_277 = arith.constant 0 : index
    %484 = vector.load %arg7[%c24_275, %c0_276, %c0_277] : memref<36x16x256xf32, #tpu.memory_space<vmem>>, vector<1x16x256xf32>
    %485 = vector.shape_cast %484 : vector<1x16x256xf32> to vector<16x256xf32>
    %486 = arith.mulf %483, %485 : vector<16x256xf32>
    %487 = arith.addf %482, %486 : vector<16x256xf32>
    %c176_i32_278 = arith.constant 176 : i32
    %488 = tpu.dynamic_rotate %330 by %c176_i32_278 dim 1 : vector<16x256xf32>, i32 -> vector<16x256xf32>
    %c25_279 = arith.constant 25 : index
    %c0_280 = arith.constant 0 : index
    %c0_281 = arith.constant 0 : index
    %489 = vector.load %arg7[%c25_279, %c0_280, %c0_281] : memref<36x16x256xf32, #tpu.memory_space<vmem>>, vector<1x16x256xf32>
    %490 = vector.shape_cast %489 : vector<1x16x256xf32> to vector<16x256xf32>
    %491 = arith.mulf %488, %490 : vector<16x256xf32>
    %492 = arith.addf %487, %491 : vector<16x256xf32>
    %c171_i32_282 = arith.constant 171 : i32
    %493 = tpu.dynamic_rotate %330 by %c171_i32_282 dim 1 : vector<16x256xf32>, i32 -> vector<16x256xf32>
    %c26_283 = arith.constant 26 : index
    %c0_284 = arith.constant 0 : index
    %c0_285 = arith.constant 0 : index
    %494 = vector.load %arg7[%c26_283, %c0_284, %c0_285] : memref<36x16x256xf32, #tpu.memory_space<vmem>>, vector<1x16x256xf32>
    %495 = vector.shape_cast %494 : vector<1x16x256xf32> to vector<16x256xf32>
    %496 = arith.mulf %493, %495 : vector<16x256xf32>
    %497 = arith.addf %492, %496 : vector<16x256xf32>
    %498 = vector.extract_strided_slice %6 {offsets = [0, 2], sizes = [16, 1], strides = [1, 1]} : vector<16x4xf32> to vector<16x1xf32>
    %499 = vector.broadcast %498 : vector<16x1xf32> to vector<16x256xf32>
    %500 = arith.addf %497, %499 : vector<16x256xf32>
    %cst_286 = arith.constant 0.000000e+00 : f32
    %cst_287 = arith.constant 6.000000e+00 : f32
    %501 = vector.broadcast %cst_286 : f32 to vector<16x256xf32>
    %502 = arith.maximumf %501, %500 : vector<16x256xf32>
    %503 = vector.broadcast %cst_287 : f32 to vector<16x256xf32>
    %504 = arith.minimumf %503, %502 : vector<16x256xf32>
    %c1_288 = arith.constant 1 : index
    %c32_289 = arith.constant 32 : index
    %c0_290 = arith.constant 0 : index
    %505 = vector.load %arg12[%c1_288, %c32_289, %c0_290] : memref<2x64x256xf32, #tpu.memory_space<vmem>>, vector<1x16x256xf32>
    %506 = vector.shape_cast %505 : vector<1x16x256xf32> to vector<16x256xf32>
    %507 = vector.shape_cast %504 : vector<16x256xf32> to vector<1x16x256xf32>
    tpu.vector_store %arg12[%c1_288, %c32_289, %c0_290], %507 {strides = array<i32>} : memref<2x64x256xf32, #tpu.memory_space<vmem>>, vector<1x16x256xf32>,
    %cst_291 = arith.constant dense<0.000000e+00> : vector<1x256xf32>
    %508 = tpu.matmul %1, %504, %cst_291 {dimension_numbers = #tpu.dot_dimension_numbers<[1], [0], [0], [1], [0, 0, 1, 1], [], []>} : vector<1x16xf32>, vector<16x256xf32>, vector<1x256xf32> -> vector<1x256xf32>
    %509 = arith.addf %449, %508 : vector<1x256xf32>
    %cst_292 = arith.constant dense<0xFF800000> : vector<256xf32>
    %510 = vector.multi_reduction <maximumf>, %504, %cst_292 [0] : vector<16x256xf32> to vector<256xf32>
    %511 = vector.shape_cast %510 : vector<256xf32> to vector<1x256xf32>
    %512 = arith.maximumf %452, %511 : vector<1x256xf32>
    %cst_293 = arith.constant 0.000000e+00 : f32
    %513 = vector.broadcast %cst_293 : f32 to vector<16x256xf32>
    %c119_i32_294 = arith.constant 119 : i32
    %514 = tpu.dynamic_rotate %330 by %c119_i32_294 dim 1 : vector<16x256xf32>, i32 -> vector<16x256xf32>
    %c27_295 = arith.constant 27 : index
    %c0_296 = arith.constant 0 : index
    %c0_297 = arith.constant 0 : index
    %515 = vector.load %arg7[%c27_295, %c0_296, %c0_297] : memref<36x16x256xf32, #tpu.memory_space<vmem>>, vector<1x16x256xf32>
    %516 = vector.shape_cast %515 : vector<1x16x256xf32> to vector<16x256xf32>
    %517 = arith.mulf %514, %516 : vector<16x256xf32>
    %518 = arith.addf %513, %517 : vector<16x256xf32>
    %c112_i32_298 = arith.constant 112 : i32
    %519 = tpu.dynamic_rotate %330 by %c112_i32_298 dim 1 : vector<16x256xf32>, i32 -> vector<16x256xf32>
    %c28_299 = arith.constant 28 : index
    %c0_300 = arith.constant 0 : index
    %c0_301 = arith.constant 0 : index
    %520 = vector.load %arg7[%c28_299, %c0_300, %c0_301] : memref<36x16x256xf32, #tpu.memory_space<vmem>>, vector<1x16x256xf32>
    %521 = vector.shape_cast %520 : vector<1x16x256xf32> to vector<16x256xf32>
    %522 = arith.mulf %519, %521 : vector<16x256xf32>
    %523 = arith.addf %518, %522 : vector<16x256xf32>
    %c105_i32_302 = arith.constant 105 : i32
    %524 = tpu.dynamic_rotate %330 by %c105_i32_302 dim 1 : vector<16x256xf32>, i32 -> vector<16x256xf32>
    %c29_303 = arith.constant 29 : index
    %c0_304 = arith.constant 0 : index
    %c0_305 = arith.constant 0 : index
    %525 = vector.load %arg7[%c29_303, %c0_304, %c0_305] : memref<36x16x256xf32, #tpu.memory_space<vmem>>, vector<1x16x256xf32>
    %526 = vector.shape_cast %525 : vector<1x16x256xf32> to vector<16x256xf32>
    %527 = arith.mulf %524, %526 : vector<16x256xf32>
    %528 = arith.addf %523, %527 : vector<16x256xf32>
    %c7_i32_306 = arith.constant 7 : i32
    %529 = tpu.dynamic_rotate %330 by %c7_i32_306 dim 1 : vector<16x256xf32>, i32 -> vector<16x256xf32>
    %c30_307 = arith.constant 30 : index
    %c0_308 = arith.constant 0 : index
    %c0_309 = arith.constant 0 : index
    %530 = vector.load %arg7[%c30_307, %c0_308, %c0_309] : memref<36x16x256xf32, #tpu.memory_space<vmem>>, vector<1x16x256xf32>
    %531 = vector.shape_cast %530 : vector<1x16x256xf32> to vector<16x256xf32>
    %532 = arith.mulf %529, %531 : vector<16x256xf32>
    %533 = arith.addf %528, %532 : vector<16x256xf32>
    %c31_310 = arith.constant 31 : index
    %c0_311 = arith.constant 0 : index
    %c0_312 = arith.constant 0 : index
    %534 = vector.load %arg7[%c31_310, %c0_311, %c0_312] : memref<36x16x256xf32, #tpu.memory_space<vmem>>, vector<1x16x256xf32>
    %535 = vector.shape_cast %534 : vector<1x16x256xf32> to vector<16x256xf32>
    %536 = arith.mulf %330, %535 : vector<16x256xf32>
    %537 = arith.addf %533, %536 : vector<16x256xf32>
    %c249_i32_313 = arith.constant 249 : i32
    %538 = tpu.dynamic_rotate %330 by %c249_i32_313 dim 1 : vector<16x256xf32>, i32 -> vector<16x256xf32>
    %c32_314 = arith.constant 32 : index
    %c0_315 = arith.constant 0 : index
    %c0_316 = arith.constant 0 : index
    %539 = vector.load %arg7[%c32_314, %c0_315, %c0_316] : memref<36x16x256xf32, #tpu.memory_space<vmem>>, vector<1x16x256xf32>
    %540 = vector.shape_cast %539 : vector<1x16x256xf32> to vector<16x256xf32>
    %541 = arith.mulf %538, %540 : vector<16x256xf32>
    %542 = arith.addf %537, %541 : vector<16x256xf32>
    %c151_i32_317 = arith.constant 151 : i32
    %543 = tpu.dynamic_rotate %330 by %c151_i32_317 dim 1 : vector<16x256xf32>, i32 -> vector<16x256xf32>
    %c33_318 = arith.constant 33 : index
    %c0_319 = arith.constant 0 : index
    %c0_320 = arith.constant 0 : index
    %544 = vector.load %arg7[%c33_318, %c0_319, %c0_320] : memref<36x16x256xf32, #tpu.memory_space<vmem>>, vector<1x16x256xf32>
    %545 = vector.shape_cast %544 : vector<1x16x256xf32> to vector<16x256xf32>
    %546 = arith.mulf %543, %545 : vector<16x256xf32>
    %547 = arith.addf %542, %546 : vector<16x256xf32>
    %c144_i32_321 = arith.constant 144 : i32
    %548 = tpu.dynamic_rotate %330 by %c144_i32_321 dim 1 : vector<16x256xf32>, i32 -> vector<16x256xf32>
    %c34_322 = arith.constant 34 : index
    %c0_323 = arith.constant 0 : index
    %c0_324 = arith.constant 0 : index
    %549 = vector.load %arg7[%c34_322, %c0_323, %c0_324] : memref<36x16x256xf32, #tpu.memory_space<vmem>>, vector<1x16x256xf32>
    %550 = vector.shape_cast %549 : vector<1x16x256xf32> to vector<16x256xf32>
    %551 = arith.mulf %548, %550 : vector<16x256xf32>
    %552 = arith.addf %547, %551 : vector<16x256xf32>
    %c137_i32_325 = arith.constant 137 : i32
    %553 = tpu.dynamic_rotate %330 by %c137_i32_325 dim 1 : vector<16x256xf32>, i32 -> vector<16x256xf32>
    %c35_326 = arith.constant 35 : index
    %c0_327 = arith.constant 0 : index
    %c0_328 = arith.constant 0 : index
    %554 = vector.load %arg7[%c35_326, %c0_327, %c0_328] : memref<36x16x256xf32, #tpu.memory_space<vmem>>, vector<1x16x256xf32>
    %555 = vector.shape_cast %554 : vector<1x16x256xf32> to vector<16x256xf32>
    %556 = arith.mulf %553, %555 : vector<16x256xf32>
    %557 = arith.addf %552, %556 : vector<16x256xf32>
    %558 = vector.extract_strided_slice %6 {offsets = [0, 3], sizes = [16, 1], strides = [1, 1]} : vector<16x4xf32> to vector<16x1xf32>
    %559 = vector.broadcast %558 : vector<16x1xf32> to vector<16x256xf32>
    %560 = arith.addf %557, %559 : vector<16x256xf32>
    %cst_329 = arith.constant 0.000000e+00 : f32
    %cst_330 = arith.constant 6.000000e+00 : f32
    %561 = vector.broadcast %cst_329 : f32 to vector<16x256xf32>
    %562 = arith.maximumf %561, %560 : vector<16x256xf32>
    %563 = vector.broadcast %cst_330 : f32 to vector<16x256xf32>
    %564 = arith.minimumf %563, %562 : vector<16x256xf32>
    %c1_331 = arith.constant 1 : index
    %c48_332 = arith.constant 48 : index
    %c0_333 = arith.constant 0 : index
    %565 = vector.load %arg12[%c1_331, %c48_332, %c0_333] : memref<2x64x256xf32, #tpu.memory_space<vmem>>, vector<1x16x256xf32>
    %566 = vector.shape_cast %565 : vector<1x16x256xf32> to vector<16x256xf32>
    %567 = vector.shape_cast %564 : vector<16x256xf32> to vector<1x16x256xf32>
    tpu.vector_store %arg12[%c1_331, %c48_332, %c0_333], %567 {strides = array<i32>} : memref<2x64x256xf32, #tpu.memory_space<vmem>>, vector<1x16x256xf32>,
    %cst_334 = arith.constant dense<0.000000e+00> : vector<1x256xf32>
    %568 = tpu.matmul %1, %564, %cst_334 {dimension_numbers = #tpu.dot_dimension_numbers<[1], [0], [0], [1], [0, 0, 1, 1], [], []>} : vector<1x16xf32>, vector<16x256xf32>, vector<1x256xf32> -> vector<1x256xf32>
    %569 = arith.addf %509, %568 : vector<1x256xf32>
    %cst_335 = arith.constant dense<0xFF800000> : vector<256xf32>
    %570 = vector.multi_reduction <maximumf>, %564, %cst_335 [0] : vector<16x256xf32> to vector<256xf32>
    %571 = vector.shape_cast %570 : vector<256xf32> to vector<1x256xf32>
    %572 = arith.maximumf %512, %571 : vector<1x256xf32>
    %573 = tpu.concatenate %569, %572 in 1 : vector<1x256xf32>, vector<1x256xf32> -> vector<1x512xf32>
    %cst_336 = arith.constant dense<0.000000e+00> : vector<1x256xf32>
    %574 = tpu.matmul %573, %7, %cst_336 {dimension_numbers = #tpu.dot_dimension_numbers<[1], [0], [0], [1], [0, 0, 1, 1], [], []>} : vector<1x512xf32>, vector<512x256xf32>, vector<1x256xf32> -> vector<1x256xf32>
    %575 = arith.negf %574 : vector<1x256xf32>
    %576 = math.exp %575 : vector<1x256xf32>
    %cst_337 = arith.constant 1.000000e+00 : f32
    %577 = vector.broadcast %cst_337 : f32 to vector<1x256xf32>
    %578 = arith.addf %577, %576 : vector<1x256xf32>
    %579 = arith.divf %577, %578 : vector<1x256xf32>
    %580 = vector.broadcast %8 : f32 to vector<1x256xf32>
    %581 = arith.mulf %580, %579 : vector<1x256xf32>
    %582 = vector.broadcast %581 : vector<1x256xf32> to vector<64x256xf32>
    %583 = arith.mulf %303, %582 : vector<64x256xf32>
    %c1_338 = arith.constant 1 : index
    %c0_339 = arith.constant 0 : index
    %c0_340 = arith.constant 0 : index
    %584 = vector.load %arg12[%c1_338, %c0_339, %c0_340] : memref<2x64x256xf32, #tpu.memory_space<vmem>>, vector<1x64x256xf32>
    %585 = vector.shape_cast %584 : vector<1x64x256xf32> to vector<64x256xf32>
    %586 = vector.broadcast %9 : f32 to vector<64x1xf32>
    %587 = arith.mulf %586, %323 : vector<64x1xf32>
    %588 = vector.broadcast %587 : vector<64x1xf32> to vector<64x256xf32>
    %589 = arith.mulf %585, %588 : vector<64x256xf32>
    %590 = arith.addf %583, %589 : vector<64x256xf32>
    %c1_341 = arith.constant 1 : index
    %c0_342 = arith.constant 0 : index
    %c0_343 = arith.constant 0 : index
    %591 = vector.load %arg11[%c1_341, %c0_342, %c0_343] : memref<2x64x256xf32, #tpu.memory_space<vmem>>, vector<1x64x256xf32>
    %592 = vector.shape_cast %591 : vector<1x64x256xf32> to vector<64x256xf32>
    %593 = vector.shape_cast %590 : vector<64x256xf32> to vector<1x64x256xf32>
    tpu.vector_store %arg11[%c1_341, %c0_342, %c0_343], %593 {strides = array<i32>} : memref<2x64x256xf32, #tpu.memory_space<vmem>>, vector<1x64x256xf32>,
    return
  }
  func.func @transform_0(%arg0: i32) -> (i32, i32, i32) {
    %c0_i32 = arith.constant 0 : i32
    %c0_i32_0 = arith.constant 0 : i32
    %c0_i32_1 = arith.constant 0 : i32
    return %arg0, %c0_i32, %c0_i32_0 : i32, i32, i32
  }
  func.func @transform_1(%arg0: i32) -> (i32, i32, i32) {
    %c0_i32 = arith.constant 0 : i32
    %c0_i32_0 = arith.constant 0 : i32
    %c0_i32_1 = arith.constant 0 : i32
    return %arg0, %c0_i32, %c0_i32_0 : i32, i32, i32
  }
  func.func @transform_2(%arg0: i32) -> (i32, i32) {
    %c0_i32 = arith.constant 0 : i32
    %c0_i32_0 = arith.constant 0 : i32
    %c0_i32_1 = arith.constant 0 : i32
    return %c0_i32, %c0_i32_0 : i32, i32
  }
  func.func @transform_3(%arg0: i32) -> (i32, i32) {
    %c0_i32 = arith.constant 0 : i32
    %c0_i32_0 = arith.constant 0 : i32
    %c0_i32_1 = arith.constant 0 : i32
    return %c0_i32, %c0_i32_0 : i32, i32
  }
  func.func @transform_4(%arg0: i32) -> (i32, i32) {
    %c0_i32 = arith.constant 0 : i32
    %c0_i32_0 = arith.constant 0 : i32
    %c0_i32_1 = arith.constant 0 : i32
    return %c0_i32, %c0_i32_0 : i32, i32
  }
  func.func @transform_5(%arg0: i32) -> (i32, i32) {
    %c0_i32 = arith.constant 0 : i32
    %c0_i32_0 = arith.constant 0 : i32
    %c0_i32_1 = arith.constant 0 : i32
    return %c0_i32, %c0_i32_0 : i32, i32
  }
  func.func @transform_6(%arg0: i32) -> (i32, i32, i32) {
    %c0_i32 = arith.constant 0 : i32
    %c0_i32_0 = arith.constant 0 : i32
    %c0_i32_1 = arith.constant 0 : i32
    %c0_i32_2 = arith.constant 0 : i32
    return %c0_i32, %c0_i32_0, %c0_i32_1 : i32, i32, i32
  }
  func.func @transform_7(%arg0: i32) -> (i32, i32) {
    %c0_i32 = arith.constant 0 : i32
    %c0_i32_0 = arith.constant 0 : i32
    %c0_i32_1 = arith.constant 0 : i32
    return %c0_i32, %c0_i32_0 : i32, i32
  }
  func.func @transform_8(%arg0: i32) -> (i32, i32) {
    %c0_i32 = arith.constant 0 : i32
    %c0_i32_0 = arith.constant 0 : i32
    %c0_i32_1 = arith.constant 0 : i32
    return %c0_i32, %c0_i32_0 : i32, i32
  }
  func.func @transform_9(%arg0: i32) -> (i32, i32) {
    %c0_i32 = arith.constant 0 : i32
    %c0_i32_0 = arith.constant 0 : i32
    %c0_i32_1 = arith.constant 0 : i32
    return %c0_i32, %c0_i32_0 : i32, i32
  }
  func.func @transform_10(%arg0: i32) -> (i32, i32, i32) {
    %c0_i32 = arith.constant 0 : i32
    %c0_i32_0 = arith.constant 0 : i32
    %c0_i32_1 = arith.constant 0 : i32
    return %arg0, %c0_i32, %c0_i32_0 : i32, i32, i32
  }
}

</mosaic_0001>

<bundles_post_ra>
// kernel: mssam_forward.1
= control target key start
LH: loop header
LB: loop body
LE: loop exit
PB: predicated region body
PF: predicated region fallthrough
CT: control target
= control target key end

     0   :  { %15 = vsyncpa [#allocation4], 0  ;;  %s10182_s0 = inlined_call_operand.vmem [shape: f32[2,64,256], index: 0, kind: input, shape index: {}]   ;;  %s10183_s1 = inlined_call_operand.vmem [shape: f32[2,64,256], index: 1, kind: input, shape index: {}]   ;;  %s10184_s2 = inlined_call_operand.vmem [shape: f32[4,64], index: 2, kind: input, shape index: {}]   ;;  %s10185_s3 = inlined_call_operand.vmem [shape: f32[64,4], index: 3, kind: input, shape index: {}]   ;;  %s10186_s4 = inlined_call_operand.vmem [shape: f32[16,64], index: 4, kind: input, shape index: {}]   ;;  %s10187_s5 = inlined_call_operand.vmem [shape: f32[16,1], index: 5, kind: input, shape index: {}]   ;;  %s10188_s6 = inlined_call_operand.vmem [shape: f32[36,16,256], index: 6, kind: input, shape index: {}]   ;;  %s10189_s7 = inlined_call_operand.vmem [shape: f32[16,4], index: 7, kind: input, shape index: {}]   ;;  %s10190_s8 = inlined_call_operand.vmem [shape: f32[512,256], index: 8, kind: input, shape index: {}]   ;;  %s10191_s9 = inlined_call_operand.vmem [shape: f32[1,2], index: 9, kind: input, shape index: {}]   ;;  %s10192_s10 = inlined_call_operand.vmem [shape: f32[2,64,256], index: 10, kind: output, shape index: {}]  }
   0x1   :  { %s40_s15 = sshll.u32 %s10191_s9, 4  ;;  %s41_s15 = int_to_ptr.vmem [resolvable:$true] %s40_s15 }
   0x2   :  { %s5238_s16 = scalar_lea.vmem %s41_s15, 16  ;;  %p5243_p1 = scmp.lt.s32.totalorder %s41_s15, %s41_s15 }
   0x3   :  { %p5239_p0 = scmp.ne.s32.totalorder %s41_s15, %s5238_s16  ;;  %p5244_p2 = scmp.lt.s32.totalorder %s5238_s16, %s5238_s16 }
   0x5   :  { %p5245_p3 = por %p5244_p2, %p5243_p1 }
   0x7   :  { %p5246_p4 = pnand %p5245_p3, %p5239_p0 }
   0x9   :  { %5249 = shalt.err (!%p5246_p4)
}
   0xa   :  { %s5252_s17 = smov [#allocation3]  }
   0xb   :  { %43 = dma.vmem_to_smem %s41_s15, 16, %s5252_s17, [#allocation4]  }
   0xc   :  { %5250 = dma.done.wait [#allocation4], 16  }
   0xd   :  { %5251 = vsyncadd [#allocation4], 4294967280 }
   0xe   :  { %47 = sfence }
   0xf   :  { %v194_v0 = vld [vmem:[%s10182_s0 + $0x8] sm:$0xff]  ;;  %v10211_v1 = vmov 0.00390625   ;;  %v5356_v2 = vld [vmem:[%s10182_s0 + $0x58] sm:$0xff]  ;;  %v5361_v3 = vld [vmem:[%s10182_s0 + $0x50] sm:$0xff]  ;;  %v10213_v25 = vmov 0.0   ;;  %vm10311_vm0 = vmmov 0  }
  0x10   :  { %4727 = vmatprep.subr.mxu0 %v10211_v1  ;;  %289 = vmatprep.mubr.f32.mxu0 %v194_v0  ;;  %v5367_v4 = vld [vmem:[%s10182_s0 + $0x48] sm:$0xff]  ;;  %v345_v5 = vmax.f32 %v5361_v3, %v5356_v2  ;;  %v201_v6 = vld [vmem:[%s10182_s0 + $0x40] sm:$0xff]  ;;  %v5378_v7 = vld [vmem:[%s10182_s0 + $0x78] sm:$0xff]  ;;  %vm10310_vm1 = vcmask 7168   ;;  %vm10304_vm2 = vcmask 523264   ;;  %vm10303_vm3 = vcmask 31744  }
  0x11   :  { %4728 = vmatpush3.msra.mxu0 %v10211_v1  ;;  %v5383_v8 = vld [vmem:[%s10182_s0 + $0x70] sm:$0xff]  ;;  %v342_v10 = vmax.f32 %v201_v6, %v5367_v4  ;;  %v206_v11 = vld [vmem:[%s10182_s0 + $0x68] sm:$0xff]  ;;  %v205_v12 = vld [vmem:[%s10182_s0 + $0x60] sm:$0xff]  ;;  %4875 = vmatprep.subr.mxu1 %v10213_v25  ;;  %vm10297_vm4 = vcmask 1043456   ;;  %s10333_s24 = smov 51   ;;  %s10264_s25 = smov 119  }
  0x12   :  { %4729 = vmatprep.subr.mxu0 %v10211_v1  ;;  %346 = vmax.xlane.f32.xlu1 %v345_v5  ;;  %v351_v9 = vmax.f32 %v5383_v8, %v5378_v7  ;;  %v348_v13 = vmax.f32 %v205_v12, %v206_v11  ;;  %v198_v14 = vld [vmem:[%s10182_s0 + $0x28] sm:$0xff]  ;;  %v197_v15 = vld [vmem:[%s10182_s0 + $0x20] sm:$0xff]  ;;  %v200_v17 = vld [vmem:[%s10182_s0 + $0x38] sm:$0xff]  ;;  %s10193_s26 = smov 48   ;;  %s10246_s27 = smov 113  }
  0x13   :  { %4730 = vmatpush3.msra.mxu0 %v10211_v1  ;;  %v336_v16 = vmax.f32 %v197_v15, %v198_v14  ;;  %v199_v18 = vld [vmem:[%s10182_s0 + $0x30] sm:$0xff]  ;;  %v193_v20 = vld [vmem:[%s10182_s0] sm:$0xff]  ;;  %v196_v22 = vld [vmem:[%s10182_s0 + $0x18] sm:$0xff]  ;;  %4891 = vmatprep.mubr.msk.f32.mxu1 %vm10311_vm0, %v10213_v25  ;;  %s5264_s28 = smov 45   ;;  %s10238_s29 = smov 77  }
  0x14   :  { %4731 = vmatprep.subr.mxu0 %v10211_v1  ;;  %352 = vmax.xlane.f32.xlu0 %v351_v9  ;;  %v339_v19 = vmax.f32 %v199_v18, %v200_v17  ;;  %v330_v21 = vmax.f32 %v193_v20, %v194_v0  ;;  %v195_v23 = vld [vmem:[%s10182_s0 + $0x10] sm:$0xff]  ;;  %v59_v5 = vld [vmem:[%s10187_s5] sm:$0xff]  ;;  %v60_v9 = vld [vmem:[%s10187_s5 + $0x8] sm:$0xff]  ;;  %s5266_s30 = smov 17   ;;  %s10256_s11 = smov 105  }
  0x15   :  { %4732 = vmatpush3.msra.mxu0 %v10211_v1  ;;  %v333_v24 = vmax.f32 %v195_v23, %v196_v22  ;;  %s10195_s12 = smov 16   ;;  %s10209_s13 = smov 7  }
  0x16   :  { %4733 = vmatprep.subr.mxu0 %v10211_v1  ;;  %343 = vmax.xlane.f32.xlu1 %v342_v10  ;;  %s10197_s14 = smov 3   ;;  %s10207_s15 = smov 111  }
  0x17   :  { %4734 = vmatpush3.msra.mxu0 %v10211_v1  ;;  %s10199_s16 = smov 15   ;;  %s10234_s17 = smov 121  }
  0x18   :  { %4735 = vmatprep.subr.mxu0 %v10211_v1  ;;  %349 = vmax.xlane.f32.xlu0 %v348_v13  ;;  %s10274_s18 = smov 1   ;;  %s10230_s19 = smov 43  }
  0x19   :  { %4736 = vmatpush3.msra.mxu0 %v10211_v1  ;;  %s10269_s9 = smov 125   ;;  %s5277_s20 = smov 80  }
  0x1a   :  { %4737 = vmatprep.subr.mxu0 %v10211_v1  ;;  %337 = vmax.xlane.f32.xlu1 %v336_v16  ;;  %v223_v16 = vld [vmem:[%s10183_s1 + $0x70] sm:$0xff]  ;;  %s10276_s21 = smov 85   ;;  %s10261_s5 = smov 83  }
  0x1b   :  { %4738 = vmatpush3.msra.mxu0 %v10211_v1  ;;  %s10266_s22 = smov 75   ;;  %s10254_s23 = smov 127  }
  0x1c   :  { %4739 = vmatprep.subr.mxu0 %v10211_v1  ;;  %340 = vmax.xlane.f32.xlu0 %v339_v19  ;;  %v221_v19 = vld [vmem:[%s10183_s1 + $0x60] sm:$0xff] }
  0x1d   :  { %4740 = vmatpush3.msra.mxu0 %v10211_v1 }
  0x1e   :  { %4741 = vmatprep.subr.mxu0 %v10211_v1  ;;  %331 = vmax.xlane.f32.xlu1 %v330_v21  ;;  %v220_v21 = vld [vmem:[%s10183_s1 + $0x58] sm:$0xff] }
  0x1f   :  { %4742 = vmatpush3.msra.mxu0 %v10211_v1 }
  0x20   :  { %4743 = vmatprep.subr.mxu0 %v10211_v1  ;;  %334 = vmax.xlane.f32.xlu0 %v333_v24  ;;  %v218_v24 = vld [vmem:[%s10183_s1 + $0x48] sm:$0xff] }
  0x21   :  { %4744 = vmatpush3.msra.mxu0 %v10211_v1 }
  0x22   :  { %4745 = vmatprep.subr.mxu0 %v10211_v1 }
  0x23   :  { %4746 = vmatpush3.msra.mxu0 %v10211_v1 }
  0x24   :  { %4747 = vmatprep.subr.mxu0 %v10211_v1 }
  0x25   :  { %4748 = vmatpush3.msra.mxu0 %v10211_v1 }
  0x26   :  { %4749 = vmatprep.subr.mxu0 %v10211_v1 }
  0x27   :  { %4750 = vmatpush3.msra.mxu0 %v10211_v1 }
  0x28   :  { %4751 = vmatprep.subr.mxu0 %v10211_v1 }
  0x29   :  { %4752 = vmatpush3.msra.mxu0 %v10211_v1 }
  0x2a   :  { %4753 = vmatprep.subr.mxu0 %v10211_v1 }
  0x2b   :  { %4754 = vmatpush3.msra.mxu0 %v10211_v1 }
  0x2c   :  { %4755 = vmatprep.subr.mxu0 %v10211_v1 }
  0x2d   :  { %4756 = vmatpush3.msra.mxu0 %v10211_v1 }
  0x2e   :  { %4757 = vmatprep.subr.mxu0 %v10211_v1 }
  0x2f   :  { %4758 = vmatpush3.msra.mxu0 %v10211_v1 }
  0x30   :  { %290 = vmatmul.mubr.f32.vlgmr.msra.gmra.mxu0 %v193_v20  ;;  %v52_v20 = vld [vmem:[%s10185_s3 + $0x18] sm:$0xff] }
  0x31   :  { %294 = vmatprep.mubr.f32.mxu0 %v196_v22  ;;  %v219_v22 = vld [vmem:[%s10183_s1 + $0x50] sm:$0xff] }
  0x34   :  { %295 = vmatmul.mubr.f32.gmra.mxu0 %v195_v23  ;;  %v53_v23 = vld [vmem:[%s10185_s3 + $0x20] sm:$0xff] }
  0x35   :  { %299 = vmatprep.mubr.f32.mxu0 %v198_v14  ;;  %v50_v14 = vld [vmem:[%s10185_s3 + $0x8] sm:$0xff] }
  0x38   :  { %300 = vmatmul.mubr.f32.gmra.mxu0 %v197_v15  ;;  %v224_v15 = vld [vmem:[%s10183_s1 + $0x78] sm:$0xff] }
  0x39   :  { %304 = vmatprep.mubr.f32.mxu0 %v200_v17  ;;  %v51_v17 = vld [vmem:[%s10185_s3 + $0x10] sm:$0xff] }
  0x3c   :  { %305 = vmatmul.mubr.f32.gmra.mxu0 %v199_v18  ;;  %v222_v18 = vld [vmem:[%s10183_s1 + $0x68] sm:$0xff] }
  0x3d   :  { %309 = vmatprep.mubr.f32.mxu0 %v5367_v4  ;;  %v49_v4 = vld [vmem:[%s10185_s3] sm:$0xff] }
  0x40   :  { %310 = vmatmul.mubr.f32.gmra.mxu0 %v201_v6  ;;  %v10215_v6 = vmov 0  }
  0x41   :  { %314 = vmatprep.mubr.f32.mxu0 %v5356_v2  ;;  %v48_v2 = vld [vmem:[%s10184_s2] sm:$0xf]  ;;  %4978 = vset.pattern.permute.xlu1 %v10215_v6 }
  0x42   :  { %663 = vperm.xlu1 %4978, %v59_v5  }
  0x44   :  { %315 = vmatmul.mubr.f32.gmra.mxu0 %v5361_v3 }
  0x45   :  { %319 = vmatprep.mubr.f32.mxu0 %v206_v11 }
  0x48   :  { %320 = vmatmul.mubr.f32.gmra.mxu0 %v205_v12 }
  0x49   :  { %324 = vmatprep.mubr.f32.mxu0 %v5378_v7  ;;  %v5480_v7 = vld [vmem:[%s10189_s7] sm:$0xff] }
  0x4c   :  { %325 = vmatmul.mubr.f32.gmra.mxu0 %v5383_v8  ;;  %v5257_v8 = vmov 1  }
  0x4d   :  { %4980 = vset.pattern.permute.xlu0 %v5257_v8  ;;  %4979 = vset.pattern.permute.xlu1 %v5257_v8  ;;  %v5286_v8 = vmov 3  }
  0x4e   :  { %1246 = vperm.xlu0 %4980, %v5480_v7  }
  0x52   :  { %4981 = vset.pattern.permute.xlu0 %v10215_v6 }
  0x53   :  { %668 = vperm.xlu0 %4981, %v60_v9  }
  0x9b   :  { %v347_v40 = vpop.xlane.xlu1 %346 }
  0x9d   :  { %v353_v38 = vpop.xlane.xlu0 %352 }
  0x9f   :  { %v344_v47 = vpop.xlane.xlu1 %343 }
  0xa1   :  { %v350_v43 = vpop.xlane.xlu0 %349 }
  0xa3   :  { %v338_v55 = vpop.xlane.xlu1 %337 }
  0xa5   :  { %v341_v52 = vpop.xlane.xlu0 %340 }
  0xa7   :  { %v332_v63 = vpop.xlane.xlu1 %331 }
  0xa9   :  { %v335_v60 = vpop.xlane.xlu0 %334 }
  0xf0   :  { %v4759_v26 = vpop.f32.mrf.mxu0 }
  0xf2   :  { %v4760_v27 = vpop.f32.mrf.mxu0 }
  0xf3   :  { %v4761_v61 = vadd.f32 %v4760_v27, %v4759_v26  ;;  %v217_v26 = vld [vmem:[%s10183_s1 + $0x40] sm:$0xff]  ;;  %v54_v27 = vld [vmem:[%s10185_s3 + $0x28] sm:$0xff] }
  0xf4   :  { %v4762_v28 = vpop.f32.mrf.mxu0 }
  0xf5   :  { %v355_v3 = vsel %vm10310_vm1, %v4761_v61, %v332_v63 }
  0xf6   :  { %v4763_v29 = vpop.f32.mrf.mxu0 }
  0xf7   :  { %v4764_v58 = vadd.f32 %v4763_v29, %v4762_v28  ;;  %v216_v28 = vld [vmem:[%s10183_s1 + $0x38] sm:$0xff]  ;;  %v215_v29 = vld [vmem:[%s10183_s1 + $0x30] sm:$0xff] }
  0xf8   :  { %v4765_v30 = vpop.f32.mrf.mxu0 }
  0xf9   :  { %v356_v0 = vsel %vm10310_vm1, %v4764_v58, %v335_v60 }
  0xfa   :  { %v4766_v31 = vpop.f32.mrf.mxu0 }
  0xfb   :  { %v4767_v56 = vadd.f32 %v4766_v31, %v4765_v30  ;;  %v55_v30 = vld [vmem:[%s10185_s3 + $0x30] sm:$0xff]  ;;  %v214_v31 = vld [vmem:[%s10183_s1 + $0x28] sm:$0xff] }
  0xfc   :  { %v4768_v32 = vpop.f32.mrf.mxu0 }
  0xfd   :  { %v357_v62 = vsel %vm10310_vm1, %v4767_v56, %v338_v55 }
  0xfe   :  { %v4769_v33 = vpop.f32.mrf.mxu0 }
  0xff   :  { %v4770_v53 = vadd.f32 %v4769_v33, %v4768_v32  ;;  %v213_v32 = vld [vmem:[%s10183_s1 + $0x20] sm:$0xff]  ;;  %v56_v33 = vld [vmem:[%s10185_s3 + $0x38] sm:$0xff] }
 0x100   :  { %v4771_v34 = vpop.f32.mrf.mxu0 }
 0x101   :  { %v358_v59 = vsel %vm10310_vm1, %v4770_v53, %v341_v52 }
 0x102   :  { %v4772_v35 = vpop.f32.mrf.mxu0 }
 0x103   :  { %v4773_v50 = vadd.f32 %v4772_v35, %v4771_v34  ;;  %v212_v34 = vld [vmem:[%s10183_s1 + $0x18] sm:$0xff]  ;;  %v211_v35 = vld [vmem:[%s10183_s1 + $0x10] sm:$0xff] }
 0x104   :  { %v4774_v36 = vpop.f32.mrf.mxu0 }
 0x105   :  { %v359_v57 = vsel %vm10310_vm1, %v4773_v50, %v344_v47  ;;  %v5603_v50 = vpop.permute.xlu1 %663 }
 0x106   :  { %v4775_v37 = vpop.f32.mrf.mxu0  ;;  %10417 = vst [vmem:[#allocation14_spill] sm:$0xff] %v5603_v50 }
 0x107   :  { %v4776_v48 = vadd.f32 %v4775_v37, %v4774_v36  ;;  %v210_v36 = vld [vmem:[%s10183_s1 + $0x8] sm:$0xff]  ;;  %v209_v37 = vld [vmem:[%s10183_s1] sm:$0xff] }
 0x108   :  { %v4777_v39 = vpop.f32.mrf.mxu0 }
 0x109   :  { %v360_v54 = vsel %vm10310_vm1, %v4776_v48, %v347_v40  ;;  %v5579_v40 = vld [vmem:[%s10189_s7 + $0x8] sm:$0xff]  ;;  %s10259_s7 = smov 5  }
 0x10a   :  { %v4778_v41 = vpop.f32.mrf.mxu0  ;;  %991 = vperm.xlu0 %4981, %v5579_v40   ;;  %1250 = vperm.xlu1 %4979, %v5579_v40  }
 0x10b   :  { %v4779_v45 = vadd.f32 %v4778_v41, %v4777_v39  ;;  %v58_v39 = vld [vmem:[%s10186_s4 + $0x8] sm:$0xff]  ;;  %v5258_v41 = vmov 2  }
 0x10c   :  { %v4780_v42 = vpop.f32.mrf.mxu0 }
 0x10d   :  { %v361_v51 = vsel %vm10310_vm1, %v4779_v45, %v350_v43 }
 0x10e   :  { %v4781_v44 = vpop.f32.mrf.mxu0  ;;  %986 = vperm.xlu0 %4981, %v5480_v7   ;;  %4982 = vset.pattern.permute.xlu1 %v5258_v41 }
 0x10f   :  { %v4782_v46 = vadd.f32 %v4781_v44, %v4780_v42  ;;  %1631 = vperm.xlu1 %4982, %v5579_v40  }
 0x111   :  { %v362_v49 = vsel %vm10310_vm1, %v4782_v46, %v353_v38  ;;  %v57_v38 = vld [vmem:[%s10186_s4] sm:$0xff] }
 0x112   :  { %4876 = vmatpush3.msra.mxu1 %v362_v49  ;;  %4983 = vset.pattern.permute.xlu0 %v5258_v41 }
 0x113   :  { %4877 = vmatprep.subr.mxu1 %v10213_v25  ;;  %1627 = vperm.xlu0 %4983, %v5480_v7  }
 0x114   :  { %4878 = vmatpush3.msra.mxu1 %v361_v51  ;;  %4985 = vset.pattern.permute.xlu1 %v10215_v6 }
 0x115   :  { %4879 = vmatprep.subr.mxu1 %v10213_v25 }
 0x116   :  { %4880 = vmatpush3.msra.mxu1 %v360_v54 }
 0x117   :  { %4881 = vmatprep.subr.mxu1 %v10213_v25  ;;  %4984 = vset.pattern.permute.xlu0 %v5286_v8 }
 0x118   :  { %4882 = vmatpush3.msra.mxu1 %v359_v57 }
 0x119   :  { %4883 = vmatprep.subr.mxu1 %v10213_v25 }
 0x11a   :  { %4884 = vmatpush3.msra.mxu1 %v358_v59  ;;  %v5687_v59 = vpop.permute.xlu0 %1246 }
 0x11b   :  { %4885 = vmatprep.subr.mxu1 %v10213_v25  ;;  %10418 = vst [vmem:[#allocation15_spill] sm:$0xff] %v5687_v59 }
 0x11c   :  { %4886 = vmatpush3.msra.mxu1 %v357_v62 }
 0x11d   :  { %4887 = vmatprep.subr.mxu1 %v10213_v25 }
 0x11e   :  { %4888 = vmatpush3.msra.mxu1 %v356_v0  ;;  %v5697_v60 = vpop.permute.xlu0 %668 }
 0x11f   :  { %4889 = vmatprep.subr.mxu1 %v10213_v25  ;;  %10419 = vst [vmem:[#allocation16_spill] sm:$0xff] %v5697_v60 }
 0x120   :  { %4890 = vmatpush3.msra.mxu1 %v355_v3 }
 0x121   :  { %4892 = vmatmul.mubr.msk.f32.vlgmr.msra.gmra.mxu1 %vm10304_vm2, %v48_v2 }
 0x122   :  { %4896 = vmatprep.mubr.msk.f32.mxu1 %vm10303_vm3, %v49_v4 }
 0x185   :  { %v5718_v2 = vpop.permute.xlu0 %991  ;;  %v5724_v3 = vpop.permute.xlu1 %1250 }
 0x186   :  { %10420 = vst [vmem:[#allocation17_spill] sm:$0xff] %v5718_v2  ;;  %10421 = vst [vmem:[#allocation18_spill] sm:$0xff] %v5724_v3 }
 0x189   :  { %v5726_v4 = vpop.permute.xlu0 %986 }
 0x18a   :  { %10422 = vst [vmem:[#allocation19_spill] sm:$0xff] %v5726_v4 }
 0x18e   :  { %v5736_v9 = vpop.permute.xlu0 %1627 }
 0x18f   :  { %10423 = vst [vmem:[#allocation20_spill] sm:$0xff] %v5736_v9 }
 0x1e1   :  { %v433_v10 = vpop.f32.mrf.mxu1 }
 0x1e2   :  { %v437_v11 = vmax.f32 %v433_v10, 0.0  ;;  %v5738_v10 = vpop.permute.xlu1 %1631 }
 0x1e3   :  { %v4893_v12 = vpop.f32.mrf.mxu1  ;;  %10424 = vst [vmem:[#allocation21_spill] sm:$0xff] %v5738_v10 }
 0x1e4   :  { %v438_v13 = vmin.f32 %v437_v11, 6.0 }
 0x1e6   :  { %4894 = vmatprep.subr.msk.mxu1 %vm10297_vm4, %v438_v13 }
 0x1e7   :  { %4895 = vmatpush3.msk.msra.mxu1 %vm10297_vm4, %v438_v13 }
 0x1e8   :  { %4897 = vmatmul.mubr.msk.f32.vlgmr.msra.gmra.mxu1 %vm10303_vm3, %v50_v14  ;;  %693 = vmatprep.subr.mxu1 %v224_v15 }
 0x1e9   :  { %694 = vmatpush1.msra.mxu1 %v223_v16  ;;  %4899 = vmatprep.mubr.msk.f32.mxu1 %vm10303_vm3, %v51_v17 }
 0x1ea   :  { %695 = vmatprep.subr.mxu1 %v222_v18 }
 0x1eb   :  { %696 = vmatpush1.msra.mxu1 %v221_v19 }
 0x1ec   :  { %4900 = vmatmul.mubr.msk.f32.gmra.mxu1 %vm10303_vm3, %v52_v20  ;;  %697 = vmatprep.subr.mxu1 %v220_v21 }
 0x1ed   :  { %698 = vmatpush1.msra.mxu1 %v219_v22  ;;  %4902 = vmatprep.mubr.msk.f32.mxu1 %vm10303_vm3, %v53_v23 }
 0x1ee   :  { %699 = vmatprep.subr.mxu1 %v218_v24 }
 0x1ef   :  { %700 = vmatpush1.msra.mxu1 %v217_v26 }
 0x1f0   :  { %4903 = vmatmul.mubr.msk.f32.gmra.mxu1 %vm10303_vm3, %v54_v27  ;;  %701 = vmatprep.subr.mxu1 %v216_v28 }
 0x1f1   :  { %702 = vmatpush1.msra.mxu1 %v215_v29  ;;  %4905 = vmatprep.mubr.msk.f32.mxu1 %vm10303_vm3, %v55_v30 }
 0x1f2   :  { %703 = vmatprep.subr.mxu1 %v214_v31 }
 0x1f3   :  { %704 = vmatpush1.msra.mxu1 %v213_v32 }
 0x1f4   :  { %4906 = vmatmul.mubr.msk.f32.gmra.mxu1 %vm10303_vm3, %v56_v33  ;;  %705 = vmatprep.subr.mxu1 %v212_v34 }
 0x1f5   :  { %706 = vmatpush1.msra.mxu1 %v211_v35  ;;  %741 = vmatprep.mubr.f32.mxu1 %v10213_v25 }
 0x1f6   :  { %707 = vmatprep.subr.mxu1 %v210_v36 }
 0x1f7   :  { %708 = vmatpush1.msra.mxu1 %v209_v37 }
 0x1f8   :  { %4365 = vmatmul.mubr.msk.f32.vlgmr.msra.gmra.mxu1 %vm10304_vm2, %v57_v38 }
 0x1f9   :  { %747 = vmatprep.mubr.f32.mxu1 %v10213_v25 }
 0x1fc   :  { %4366 = vmatmul.mubr.msk.f32.gmra.mxu1 %vm10304_vm2, %v58_v39 }
 0x1fd   :  { %1337 = vmatprep.mubr.f32.mxu1 %v10213_v25 }
 0x2a8   :  { %v5587_v42 = vpop.f32.mrf.mxu1 }
 0x2a9   :  { %10409 = vst [vmem:[#allocation6_spill] sm:$0xff] %v5587_v42 }
 0x2aa   :  { %v5589_v43 = vpop.f32.mrf.mxu1 }
 0x2ab   :  { %10410 = vst [vmem:[#allocation7_spill] sm:$0xff] %v5589_v43 }
 0x2ac   :  { %v5591_v44 = vpop.f32.mrf.mxu1 }
 0x2ad   :  { %10411 = vst [vmem:[#allocation8_spill] sm:$0xff] %v5591_v44  ;;  %v10438_v44 = vmov 0  }
 0x2ae   :  { %v5593_v45 = vpop.f32.mrf.mxu1 }
 0x2af   :  { %10412 = vst [vmem:[#allocation9_spill] sm:$0xff] %v5593_v45 }
 0x2b0   :  { %v5595_v46 = vpop.f32.mrf.mxu1 }
 0x2b1   :  { %10413 = vst [vmem:[#allocation10_spill] sm:$0xff] %v5595_v46 }
 0x2b2   :  { %v5597_v47 = vpop.f32.mrf.mxu1 }
 0x2b3   :  { %10414 = vst [vmem:[#allocation11_spill] sm:$0xff] %v5597_v47 }
 0x2b4   :  { %v5599_v48 = vpop.f32.mrf.mxu1 }
 0x2b5   :  { %10415 = vst [vmem:[#allocation12_spill] sm:$0xff] %v5599_v48 }
 0x2b6   :  { %v5601_v49 = vpop.f32.mrf.mxu1 }
 0x2b7   :  { %10416 = vst [vmem:[#allocation13_spill] sm:$0xff] %v5601_v49 }
 0x2b8   :  { %v743_v51 = vpop.f32.mrf.mxu1 }
 0x2b9   :  { %v744_v52 = vadd.f32 %v743_v51, %v5603_v50 }
 0x2ba   :  { %v745_v55 = vpop.f32.mrf.mxu1 }
 0x2bb   :  { %v754_v53 = vmax.f32 %v744_v52, 0.0  ;;  %v746_v56 = vadd.f32 %v745_v55, %v5603_v50 }
 0x2bc   :  { %v749_v61 = vpop.f32.mrf.mxu1 }
 0x2bd   :  { %v5606_v54 = vmin.f32 %v754_v53, 6.0  ;;  %v755_v57 = vmax.f32 %v746_v56, 0.0  ;;  %v750_v62 = vadd.f32 %v749_v61, %v5697_v60 }
 0x2be   :  { %v751_v5 = vpop.f32.mrf.mxu1 }
 0x2bf   :  { %1496 = vrot.lane.b32.xlu0 %v5606_v54, %s10259_s7  ;;  %1024 = vrot.lane.b32.xlu1 %v5606_v54, %s10333_s24  ;;  %v5645_v58 = vmin.f32 %v755_v57, 6.0  ;;  %v756_v63 = vmax.f32 %v750_v62, 0.0  ;;  %v752_v11 = vadd.f32 %v751_v5, %v5697_v60 }
 0x2c1   :  { %v5708_v0 = vmin.f32 %v756_v63, 6.0  ;;  %v757_v12 = vmax.f32 %v752_v11, 0.0 }
 0x2c3   :  { %1739 = vrot.lane.b32.xlu0 %v5606_v54, %s10264_s25  ;;  %1050 = vrot.lane.b32.xlu1 %v5606_v54, %s10193_s26  ;;  %v5749_v15 = vmin.f32 %v757_v12, 6.0 }
 0x2c7   :  { %906 = vrot.lane.b32.xlu0 %v5606_v54, %s10246_s27  ;;  %1076 = vrot.lane.b32.xlu1 %v5606_v54, %s5264_s28 }
 0x2cb   :  { %1219 = vrot.lane.b32.xlu0 %v5606_v54, %s10238_s29  ;;  %762 = vrot.lane.b32.xlu1 %v5606_v54, %s5266_s30 }
 0x2cf   :  { %1778 = vrot.lane.b32.xlu0 %v5606_v54, %s10256_s11  ;;  %789 = vrot.lane.b32.xlu1 %v5606_v54, %s10195_s12 }
 0x2d3   :  { %1804 = vrot.lane.b32.xlu0 %v5606_v54, %s10209_s13  ;;  %1102 = vrot.lane.b32.xlu1 %v5606_v54, %s10197_s14 }
 0x2d7   :  { %958 = vrot.lane.b32.xlu0 %v5606_v54, %s10207_s15  ;;  %815 = vrot.lane.b32.xlu1 %v5606_v54, %s10199_s16 }
 0x2db   :  { %1843 = vrot.lane.b32.xlu0 %v5606_v54, %s10234_s17  ;;  %841 = vrot.lane.b32.xlu1 %v5606_v54, %s10274_s18 }
 0x2df   :  { %1600 = vrot.lane.b32.xlu0 %v5606_v54, %s10230_s19  ;;  %1141 = vrot.lane.b32.xlu1 %v5606_v54, %s10269_s9 }
 0x2e3   :  { %1054 = vrot.lane.b32.xlu0 %v5645_v58, %s10193_s26  ;;  %1193 = vrot.lane.b32.xlu1 %v5606_v54, %s5277_s20  ;;  %s10271_s26 = smov 112  }
 0x2e7   :  { %1080 = vrot.lane.b32.xlu0 %v5645_v58, %s5264_s28  ;;  %1431 = vrot.lane.b32.xlu1 %v5606_v54, %s10276_s21 }
 0x2eb   :  { %766 = vrot.lane.b32.xlu0 %v5645_v58, %s5266_s30  ;;  %1167 = vrot.lane.b32.xlu1 %v5606_v54, %s10261_s5 }
 0x2ef   :  { %793 = vrot.lane.b32.xlu0 %v5645_v58, %s10195_s12  ;;  %1470 = vrot.lane.b32.xlu1 %v5606_v54, %s10266_s22  ;;  %s10242_s12 = smov 123  }
 0x2f3   :  { %1106 = vrot.lane.b32.xlu0 %v5645_v58, %s10197_s14  ;;  %880 = vrot.lane.b32.xlu1 %v5606_v54, %s10254_s23  ;;  %s10201_s14 = smov 53  }
 0x2f7   :  { %819 = vrot.lane.b32.xlu0 %v5645_v58, %s10199_s16  ;;  %932 = vrot.lane.b32.xlu1 %v5606_v54, %s10271_s26  ;;  %s10205_s16 = smov 23  }
 0x2fb   :  { %845 = vrot.lane.b32.xlu0 %v5645_v58, %s10274_s18  ;;  %1535 = vrot.lane.b32.xlu1 %v5606_v54, %s10242_s12 }
 0x2ff   :  { %1145 = vrot.lane.b32.xlu0 %v5645_v58, %s10269_s9  ;;  %1561 = vrot.lane.b32.xlu1 %v5606_v54, %s10201_s14 }
 0x303   :  { %1197 = vrot.lane.b32.xlu0 %v5645_v58, %s5277_s20  ;;  %1869 = vrot.lane.b32.xlu1 %v5606_v54, %s10205_s16 }
 0x307   :  { %1435 = vrot.lane.b32.xlu0 %v5645_v58, %s10276_s21  ;;  %1028 = vrot.lane.b32.xlu1 %v5645_v58, %s10333_s24 }
 0x30b   :  { %1171 = vrot.lane.b32.xlu0 %v5645_v58, %s10261_s5  ;;  %1500 = vrot.lane.b32.xlu1 %v5645_v58, %s10259_s7 }
 0x30f   :  { %1474 = vrot.lane.b32.xlu0 %v5645_v58, %s10266_s22  ;;  %1743 = vrot.lane.b32.xlu1 %v5645_v58, %s10264_s25 }
 0x313   :  { %884 = vrot.lane.b32.xlu0 %v5645_v58, %s10254_s23  ;;  %910 = vrot.lane.b32.xlu1 %v5645_v58, %s10246_s27 }
 0x317   :  { %936 = vrot.lane.b32.xlu0 %v5645_v58, %s10271_s26  ;;  %1223 = vrot.lane.b32.xlu1 %v5645_v58, %s10238_s29 }
 0x31b   :  { %1565 = vrot.lane.b32.xlu0 %v5645_v58, %s10201_s14  ;;  %1782 = vrot.lane.b32.xlu1 %v5645_v58, %s10256_s11 }
 0x31f   :  { %1780 = vrot.lane.b32.xlu0 %v5708_v0, %s10256_s11  ;;  %1539 = vrot.lane.b32.xlu1 %v5645_v58, %s10242_s12 }
 0x323   :  { %1806 = vrot.lane.b32.xlu0 %v5708_v0, %s10209_s13  ;;  %1808 = vrot.lane.b32.xlu1 %v5645_v58, %s10209_s13  ;;  %s10430_s13 = smov 15  }
 0x327   :  { %960 = vrot.lane.b32.xlu0 %v5708_v0, %s10207_s15  ;;  %962 = vrot.lane.b32.xlu1 %v5645_v58, %s10207_s15  ;;  %s10428_s15 = smov 3  }
 0x32b   :  { %1563 = vrot.lane.b32.xlu0 %v5708_v0, %s10201_s14  ;;  %1847 = vrot.lane.b32.xlu1 %v5645_v58, %s10234_s17  ;;  %s10203_s14 = smov 9  }
 0x32f   :  { %1871 = vrot.lane.b32.xlu0 %v5708_v0, %s10205_s16  ;;  %1604 = vrot.lane.b32.xlu1 %v5645_v58, %s10230_s19 }
 0x331   :  { %v5745_v13 = vpop.permute.xlu0 %1496  ;;  %v5747_v14 = vpop.permute.xlu1 %1024 }
 0x333   :  { %1910 = vrot.lane.b32.xlu0 %v5708_v0, %s10203_s14  ;;  %1873 = vrot.lane.b32.xlu1 %v5645_v58, %s10205_s16  ;;  %s10425_s14 = smov 48   ;;  %s10426_s16 = smov 16  }
 0x335   :  { %v5755_v16 = vpop.permute.xlu0 %1739  ;;  %v5757_v17 = vpop.permute.xlu1 %1050 }
 0x337   :  { %1082 = vrot.lane.b32.xlu0 %v5749_v15, %s5264_s28  ;;  %1026 = vrot.lane.b32.xlu1 %v5708_v0, %s10333_s24 }
 0x339   :  { %v5763_v18 = vpop.permute.xlu0 %906  ;;  %v5765_v19 = vpop.permute.xlu1 %1076 }
 0x33b   :  { %768 = vrot.lane.b32.xlu0 %v5749_v15, %s5266_s30  ;;  %1052 = vrot.lane.b32.xlu1 %v5708_v0, %s10425_s14 }
 0x33d   :  { %v5771_v20 = vpop.permute.xlu0 %1219  ;;  %v5773_v21 = vpop.permute.xlu1 %762 }
 0x33f   :  { %795 = vrot.lane.b32.xlu0 %v5749_v15, %s10426_s16  ;;  %1078 = vrot.lane.b32.xlu1 %v5708_v0, %s5264_s28 }
 0x341   :  { %v5779_v22 = vpop.permute.xlu0 %1778  ;;  %v5781_v23 = vpop.permute.xlu1 %789 }
 0x342   :  { %10427 = vst [vmem:[#allocation22_spill] sm:$0xff] %v5779_v22  ;;  %v4418_v22 = vld [vmem:[%s10188_s6 + $0x1b8] sm:$0xff] }
 0x343   :  { %1108 = vrot.lane.b32.xlu0 %v5749_v15, %s10428_s15  ;;  %764 = vrot.lane.b32.xlu1 %v5708_v0, %s5266_s30 }
 0x345   :  { %v5787_v24 = vpop.permute.xlu0 %1804  ;;  %v5789_v26 = vpop.permute.xlu1 %1102 }
 0x346   :  { %10429 = vst [vmem:[#allocation23_spill] sm:$0xff] %v5787_v24  ;;  %v4381_v24 = vld [vmem:[%s10188_s6 + $0x90] sm:$0xff] }
 0x347   :  { %821 = vrot.lane.b32.xlu0 %v5749_v15, %s10430_s13  ;;  %791 = vrot.lane.b32.xlu1 %v5708_v0, %s10426_s16 }
 0x349   :  { %v5795_v27 = vpop.permute.xlu0 %958  ;;  %v5797_v28 = vpop.permute.xlu1 %815 }
 0x34a   :  { %10431 = vst [vmem:[#allocation24_spill] sm:$0xff] %v5795_v27  ;;  %v4399_v27 = vld [vmem:[%s10188_s6 + $0x120] sm:$0xff] }
 0x34b   :  { %847 = vrot.lane.b32.xlu0 %v5749_v15, %s10274_s18  ;;  %1104 = vrot.lane.b32.xlu1 %v5708_v0, %s10428_s15 }
 0x34d   :  { %v5803_v29 = vpop.permute.xlu0 %1843  ;;  %v5805_v30 = vpop.permute.xlu1 %841 }
 0x34e   :  { %10432 = vst [vmem:[#allocation25_spill] sm:$0xff] %v5803_v29  ;;  %v4491_v29 = vld [vmem:[%s10188_s6 + $0x3e8] sm:$0xff] }
 0x34f   :  { %1147 = vrot.lane.b32.xlu0 %v5749_v15, %s10269_s9  ;;  %817 = vrot.lane.b32.xlu1 %v5708_v0, %s10430_s13 }
 0x351   :  { %v5811_v31 = vpop.permute.xlu0 %1600  ;;  %v5813_v32 = vpop.permute.xlu1 %1141 }
 0x352   :  { %10433 = vst [vmem:[#allocation26_spill] sm:$0xff] %v5811_v31  ;;  %v4454_v31 = vld [vmem:[%s10188_s6 + $0x2c8] sm:$0xff] }
 0x353   :  { %1199 = vrot.lane.b32.xlu0 %v5749_v15, %s5277_s20  ;;  %843 = vrot.lane.b32.xlu1 %v5708_v0, %s10274_s18  ;;  %s10639_s18 = smov 119  }
 0x355   :  { %v5819_v33 = vpop.permute.xlu0 %1054  ;;  %v5821_v34 = vpop.permute.xlu1 %1193 }
 0x357   :  { %1437 = vrot.lane.b32.xlu0 %v5749_v15, %s10276_s21  ;;  %1143 = vrot.lane.b32.xlu1 %v5708_v0, %s10269_s9  ;;  %s10640_s9 = smov 83  }
 0x359   :  { %v5827_v35 = vpop.permute.xlu0 %1080  ;;  %v5829_v36 = vpop.permute.xlu1 %1431 }
 0x35b   :  { %1173 = vrot.lane.b32.xlu0 %v5749_v15, %s10261_s5  ;;  %1195 = vrot.lane.b32.xlu1 %v5708_v0, %s5277_s20 }
 0x35d   :  { %v5835_v37 = vpop.permute.xlu0 %766  ;;  %v5837_v38 = vpop.permute.xlu1 %1167 }
 0x35f   :  { %1476 = vrot.lane.b32.xlu0 %v5749_v15, %s10266_s22  ;;  %1433 = vrot.lane.b32.xlu1 %v5708_v0, %s10276_s21  ;;  %s10641_s21 = smov 5  }
 0x361   :  { %v5843_v39 = vpop.permute.xlu0 %793  ;;  %v5845_v41 = vpop.permute.xlu1 %1470 }
 0x363   :  { %886 = vrot.lane.b32.xlu0 %v5749_v15, %s10254_s23  ;;  %1169 = vrot.lane.b32.xlu1 %v5708_v0, %s10261_s5  ;;  %s10648_s5 = smov 121  }
 0x365   :  { %v5851_v51 = vpop.permute.xlu0 %1106  ;;  %v5853_v52 = vpop.permute.xlu1 %880 }
 0x367   :  { %938 = vrot.lane.b32.xlu0 %v5749_v15, %s10271_s26  ;;  %1472 = vrot.lane.b32.xlu1 %v5708_v0, %s10266_s22  ;;  %s10637_s22 = smov 125  }
 0x369   :  { %v5859_v53 = vpop.permute.xlu0 %819  ;;  %v5861_v55 = vpop.permute.xlu1 %932 }
 0x36a   :  { %10434 = vst [vmem:[#allocation27_spill] sm:$0xff] %v5861_v55 }
 0x36b   :  { %1502 = vrot.lane.b32.xlu0 %v5749_v15, %s10259_s7  ;;  %882 = vrot.lane.b32.xlu1 %v5708_v0, %s10254_s23  ;;  %s10643_s23 = smov 127  }
 0x36d   :  { %v5867_v56 = vpop.permute.xlu0 %845  ;;  %v5869_v57 = vpop.permute.xlu1 %1535 }
 0x36e   :  { %10435 = vst [vmem:[#allocation28_spill] sm:$0xff] %v5869_v57  ;;  %v6086_v57 = vmul.f32 %v4381_v24, %v5708_v0  ;;  %v4404_v24 = vld [vmem:[%s10188_s6 + $0x148] sm:$0xff] }
 0x36f   :  { %1745 = vrot.lane.b32.xlu0 %v5749_v15, %s10264_s25  ;;  %934 = vrot.lane.b32.xlu1 %v5708_v0, %s10271_s26  ;;  %s10638_s26 = smov 75  }
 0x370   :  { %10473 = vst [vmem:[#allocation60_spill] sm:$0xff] %v6086_v57 }
 0x371   :  { %v5875_v61 = vpop.permute.xlu0 %1145  ;;  %v5877_v62 = vpop.permute.xlu1 %1561 }
 0x372   :  { %10436 = vst [vmem:[#allocation29_spill] sm:$0xff] %v5877_v62  ;;  %v4455_v62 = vld [vmem:[%s10188_s6 + $0x2d0] sm:$0xff] }
 0x373   :  { %912 = vrot.lane.b32.xlu0 %v5749_v15, %s10246_s27  ;;  %1498 = vrot.lane.b32.xlu1 %v5708_v0, %s10259_s7  ;;  %s10645_s7 = smov 77  }
 0x375   :  { %v5883_v63 = vpop.permute.xlu0 %1197  ;;  %v5885_v5 = vpop.permute.xlu1 %1869 }
 0x376   :  { %10437 = vst [vmem:[#allocation30_spill] sm:$0xff] %v5885_v5 }
 0x377   :  { %1225 = vrot.lane.b32.xlu0 %v5749_v15, %s10238_s29  ;;  %1741 = vrot.lane.b32.xlu1 %v5708_v0, %s10264_s25  ;;  %s10636_s25 = smov 112  }
 0x379   :  { %v5891_v8 = vpop.permute.xlu0 %1435  ;;  %v5893_v11 = vpop.permute.xlu1 %1028 }
 0x37b   :  { %1849 = vrot.lane.b32.xlu0 %v5749_v15, %s10234_s17  ;;  %908 = vrot.lane.b32.xlu1 %v5708_v0, %s10246_s27  ;;  %s10461_s27 = smov 23  }
 0x37d   :  { %v5899_v12 = vpop.permute.xlu0 %1171  ;;  %v5901_v1 = vpop.permute.xlu1 %1500 }
 0x37f   :  { %1606 = vrot.lane.b32.xlu0 %v5749_v15, %s10230_s19  ;;  %1221 = vrot.lane.b32.xlu1 %v5708_v0, %s10238_s29  ;;  %s10455_s29 = smov 53  }
 0x381   :  { %v5907_v25 = vpop.permute.xlu0 %1474  ;;  %v5909_v6 = vpop.permute.xlu1 %1743 }
 0x383   :  { %1939 = vperm.xlu0 %4984, %v5579_v40   ;;  %1537 = vrot.lane.b32.xlu1 %v5708_v0, %s10242_s12 }
 0x385   :  { %v5914_v48 = vpop.permute.xlu0 %884  ;;  %v5916_v49 = vpop.permute.xlu1 %910 }
 0x387   :  { %1935 = vperm.xlu0 %4984, %v5480_v7   ;;  %1845 = vrot.lane.b32.xlu1 %v5708_v0, %s10234_s17  ;;  %s10452_s17 = smov 111  }
 0x389   :  { %v5921_v46 = vpop.permute.xlu0 %936  ;;  %v5923_v47 = vpop.permute.xlu1 %1223 }
 0x38b   :  { %4986 = vset.pattern.permute.xlu0 %v10438_v44  ;;  %1602 = vrot.lane.b32.xlu1 %v5708_v0, %s10230_s19  ;;  %s10449_s19 = smov 7  }
 0x38d   :  { %v5928_v40 = vpop.permute.xlu0 %1565  ;;  %v5930_v45 = vpop.permute.xlu1 %1782 }
 0x38e   :  { %10439 = vst [vmem:[#allocation31_spill] sm:$0xff] %v5928_v40  ;;  %10440 = vst [vmem:[#allocation32_spill] sm:$0xff] %v5930_v45  ;;  %v4382_v40 = vld [vmem:[%s10188_s6 + $0x98] sm:$0xff]  ;;  %v6081_v45 = vmul.f32 %v4491_v29, %v5645_v58  ;;  %v4403_v29 = vld [vmem:[%s10188_s6 + $0x140] sm:$0xff] }
 0x38f   :  { %1030 = vrot.lane.b32.xlu1 %v5749_v15, %s10333_s24 }
 0x390   :  { %10471 = vst [vmem:[#allocation58_spill] sm:$0xff] %v6081_v45  ;;  %v6128_v45 = vmul.f32 %v4418_v22, %v5749_v15  ;;  %v4408_v22 = vld [vmem:[%s10188_s6 + $0x168] sm:$0xff] }
 0x391   :  { %v5934_v7 = vpop.permute.xlu0 %1780  ;;  %v5936_v42 = vpop.permute.xlu1 %1539 }
 0x392   :  { %10441 = vst [vmem:[#allocation33_spill] sm:$0xff] %v5934_v7  ;;  %10442 = vst [vmem:[#allocation34_spill] sm:$0xff] %v5936_v42 }
 0x393   :  { %1056 = vrot.lane.b32.xlu1 %v5749_v15, %s10425_s14  ;;  %10481 = vst [vmem:[#allocation68_spill] sm:$0xff] %v6128_v45  ;;  %v778_v45 = vld [vmem:[%s10188_s6 + $0x8] sm:$0xff] }
 0x395   :  { %v5940_v43 = vpop.permute.xlu0 %1806  ;;  %v5942_v44 = vpop.permute.xlu1 %1808 }
 0x396   :  { %10443 = vst [vmem:[#allocation35_spill] sm:$0xff] %v5940_v43  ;;  %10444 = vst [vmem:[#allocation36_spill] sm:$0xff] %v5942_v44  ;;  %v4417_v44 = vld [vmem:[%s10188_s6 + $0x1b0] sm:$0xff] }
 0x397   :  { %1784 = vrot.lane.b32.xlu1 %v5749_v15, %s10256_s11  ;;  %s10642_s11 = smov 105  }
 0x399   :  { %v5946_v60 = vpop.permute.xlu0 %960  ;;  %v5948_v50 = vpop.permute.xlu1 %962 }
 0x39a   :  { %10445 = vst [vmem:[#allocation37_spill] sm:$0xff] %v5946_v60  ;;  %10446 = vst [vmem:[#allocation38_spill] sm:$0xff] %v5948_v50  ;;  %v4492_v50 = vld [vmem:[%s10188_s6 + $0x3f0] sm:$0xff] }
 0x39b   :  { %1541 = vrot.lane.b32.xlu1 %v5749_v15, %s10242_s12  ;;  %s10458_s12 = smov 9  }
 0x39d   :  { %v5952_v10 = vpop.permute.xlu0 %1563  ;;  %v5954_v2 = vpop.permute.xlu1 %1847 }
 0x39e   :  { %10447 = vst [vmem:[#allocation39_spill] sm:$0xff] %v5952_v10  ;;  %10448 = vst [vmem:[#allocation40_spill] sm:$0xff] %v5954_v2 }
 0x39f   :  { %1810 = vrot.lane.b32.xlu1 %v5749_v15, %s10449_s19 }
 0x3a1   :  { %v5958_v3 = vpop.permute.xlu0 %1871  ;;  %v5960_v43 = vpop.permute.xlu1 %1604 }
 0x3a2   :  { %10450 = vst [vmem:[#allocation41_spill] sm:$0xff] %v5958_v3  ;;  %10451 = vst [vmem:[#allocation42_spill] sm:$0xff] %v5960_v43  ;;  %v4380_v43 = vld [vmem:[%s10188_s6 + $0x88] sm:$0xff] }
 0x3a3   :  { %964 = vrot.lane.b32.xlu1 %v5749_v15, %s10452_s17 }
 0x3a5   :  { %v5964_v60 = vpop.permute.xlu0 %1910  ;;  %v5966_v7 = vpop.permute.xlu1 %1873 }
 0x3a6   :  { %10453 = vst [vmem:[#allocation43_spill] sm:$0xff] %v5964_v60  ;;  %10454 = vst [vmem:[#allocation44_spill] sm:$0xff] %v5966_v7 }
 0x3a7   :  { %1567 = vrot.lane.b32.xlu1 %v5749_v15, %s10455_s29 }
 0x3a9   :  { %v5970_v10 = vpop.permute.xlu1 %1026  ;;  %v5972_v9 = vpop.permute.xlu0 %1082 }
 0x3aa   :  { %10456 = vst [vmem:[#allocation45_spill] sm:$0xff] %v5970_v10  ;;  %10457 = vst [vmem:[#allocation46_spill] sm:$0xff] %v5972_v9  ;;  %v10278_v9 = vlaneseq }
 0x3ab   :  { %1908 = vrot.lane.b32.xlu1 %v5606_v54, %s10458_s12 }
 0x3ad   :  { %v5976_v3 = vpop.permute.xlu1 %1052  ;;  %v5978_v5 = vpop.permute.xlu0 %768 }
 0x3ae   :  { %10459 = vst [vmem:[#allocation47_spill] sm:$0xff] %v5976_v3  ;;  %10460 = vst [vmem:[#allocation48_spill] sm:$0xff] %v5978_v5  ;;  %v5995_v3 = vand.u32 127, %v10278_v9  ;;  %v4379_v5 = vld [vmem:[%s10188_s6 + $0x80] sm:$0xff] }
 0x3af   :  { %1875 = vrot.lane.b32.xlu1 %v5749_v15, %s10461_s27  ;;  %v4490_v9 = vld [vmem:[%s10188_s6 + $0x3e0] sm:$0xff] }
 0x3b0   :  { %vm10313_vm5 = vcmp.lt.s32.totalorder %v5995_v3, 51  ;;  %vm10312_vm6 = vcmp.lt.s32.totalorder %v5995_v3, 48  ;;  %vm1084_vm7 = vcmp.lt.s32.totalorder %v5995_v3, 45  ;;  %vm772_vm8 = vcmp.lt.s32.totalorder %v5995_v3, 17 }
 0x3b1   :  { %v5982_v60 = vpop.permute.xlu1 %1078  ;;  %v5988_v10 = vpop.permute.xlu0 %795  ;;  %vm797_vm9 = vcmp.lt.s32.totalorder %v5995_v3, 16  ;;  %vm1110_vm10 = vcmp.lt.s32.totalorder %v5995_v3, 3  ;;  %vm10326_vm11 = vcmp.lt.s32.totalorder %v5995_v3, 15  ;;  %vm10325_vm12 = vcmp.lt.s32.totalorder %v5995_v3, 1 }
 0x3b2   :  { %10462 = vst [vmem:[#allocation49_spill] sm:$0xff] %v5982_v60  ;;  %10464 = vst [vmem:[#allocation51_spill] sm:$0xff] %v5988_v10  ;;  %v4415_v60 = vld [vmem:[%s10188_s6 + $0x1a0] sm:$0xff]  ;;  %vm10328_vm13 = vcmp.lt.s32.totalorder %v5995_v3, 125  ;;  %vm10315_vm14 = vcmp.lt.s32.totalorder %v5995_v3, 80  ;;  %vm10319_vm15 = vcmp.lt.s32.totalorder %v5995_v3, 85 }
 0x3b3   :  { %1914 = vrot.lane.b32.xlu1 %v5749_v15, %s10458_s12  ;;  %v4453_v10 = vld [vmem:[%s10188_s6 + $0x2c0] sm:$0xff]  ;;  %v6027_v59 = vmul.f32 %v4415_v60, %v5606_v54  ;;  %vm10316_vm4 = vcmp.lt.s32.totalorder %v5995_v3, 83  ;;  %vm10317_vm3 = vcmp.lt.s32.totalorder %v5995_v3, 5  ;;  %vm10314_vm2 = vcmp.lt.s32.totalorder %v5995_v3, 75 }
 0x3b4   :  { %vm1747_vm1 = vcmp.lt.s32.totalorder %v5995_v3, 119  ;;  %vm10318_vm0 = vcmp.lt.s32.totalorder %v5995_v3, 127 }
 0x3b5   :  { %v5986_v7 = vpop.permute.xlu1 %764 }
 0x3b6   :  { %10463 = vst [vmem:[#allocation50_spill] sm:$0xff] %v5986_v7  ;;  %v4416_v7 = vld [vmem:[%s10188_s6 + $0x1a8] sm:$0xff] }
 0x3b7   :  { %1912 = vrot.lane.b32.xlu1 %v5645_v58, %s10458_s12  ;;  %v6043_v60 = vmul.f32 %v4416_v7, %v5645_v58  ;;  %v6072_v7 = vmul.f32 %v4380_v43, %v5645_v58  ;;  %v4456_v43 = vld [vmem:[%s10188_s6 + $0x2d8] sm:$0xff] }
 0x3b9   :  { %v5992_v4 = vpop.permute.xlu1 %791 }
 0x3ba   :  { %10465 = vst [vmem:[#allocation52_spill] sm:$0xff] %v5992_v4  ;;  %v6012_v4 = vpop.permute.xlu0 %1108 }
 0x3bb   :  { %10466 = vst [vmem:[#allocation53_spill] sm:$0xff] %v6012_v4  ;;  %v6030_v4 = vmul.f32 %v4379_v5, %v5606_v54  ;;  %v6046_v5 = vmul.f32 %v4453_v10, %v5606_v54  ;;  %v4400_v10 = vld [vmem:[%s10188_s6 + $0x128] sm:$0xff] }
 0x3bd   :  { %v6024_v2 = vpop.permute.xlu1 %1104  ;;  %10468 = vst [vmem:[#allocation55_spill] sm:$0xff] %v6046_v5 }
 0x3be   :  { %10467 = vst [vmem:[#allocation54_spill] sm:$0xff] %v6024_v2  ;;  %v6049_v2 = vmul.f32 %v4490_v9, %v5606_v54  ;;  %v1033_v54 = vsel %vm10313_vm5, %v5747_v14, %v5893_v11  ;;  %v1035_v9 = vsel %vm10313_vm5, %v5893_v11, %v5747_v14  ;;  %v6089_v14 = vmul.f32 %v4417_v44, %v5708_v0  ;;  %v6119_v44 = vpop.permute.xlu0 %821 }
 0x3bf   :  { %v6110_v11 = vsel %vm10312_vm6, %v5757_v17, %v5819_v33  ;;  %10478 = vst [vmem:[#allocation65_spill] sm:$0xff] %v6119_v44  ;;  %v1043_v57 = vmul.f32 %v4400_v10, %v1033_v54  ;;  %v4367_v54 = vld [vmem:[%s10188_s6 + $0x20] sm:$0xff]  ;;  %vm940_vm5 = vcmp.lt.s32.totalorder %v5995_v3, 112 }
 0x3c0   :  { %10469 = vst [vmem:[#allocation56_spill] sm:$0xff] %v6049_v2  ;;  %v6075_v2 = vmul.f32 %v4454_v31, %v5645_v58  ;;  %10474 = vst [vmem:[#allocation61_spill] sm:$0xff] %v6089_v14  ;;  %v6095_v31 = vmul.f32 %v4455_v62, %v5708_v0  ;;  %v4493_v58 = vld [vmem:[%s10188_s6 + $0x3f8] sm:$0xff]  ;;  %v6116_v62 = vsel %vm10312_vm6, %v5819_v33, %v5757_v17  ;;  %vm914_vm6 = vcmp.lt.s32.totalorder %v5995_v3, 113 }
 0x3c1   :  { %v6083_v5 = vpop.permute.xlu1 %817  ;;  %10476 = vst [vmem:[#allocation63_spill] sm:$0xff] %v6110_v11  ;;  %10477 = vst [vmem:[#allocation64_spill] sm:$0xff] %v6116_v62  ;;  %v6122_v14 = vmul.f32 %v4492_v50, %v5708_v0  ;;  %v6133_v17 = vmul.f32 %v4456_v43, %v5749_v15  ;;  %v6136_v33 = vmul.f32 %v4493_v58, %v5749_v15 }
 0x3c2   :  { %10470 = vst [vmem:[#allocation57_spill] sm:$0xff] %v6075_v2  ;;  %10472 = vst [vmem:[#allocation59_spill] sm:$0xff] %v6083_v5  ;;  %v6125_v5 = vmul.f32 %v4382_v40, %v5749_v15  ;;  %v1068_v50 = vmul.f32 %v4403_v29, %v6116_v62  ;;  %v1069_v0 = vmul.f32 %v4404_v24, %v6110_v11 }
 0x3c3   :  { %10475 = vst [vmem:[#allocation62_spill] sm:$0xff] %v6095_v31  ;;  %10479 = vst [vmem:[#allocation66_spill] sm:$0xff] %v6122_v14  ;;  %v1042_v31 = vmul.f32 %v4399_v27, %v1035_v9  ;;  %v4407_v27 = vld [vmem:[%s10188_s6 + $0x160] sm:$0xff]  ;;  %v1085_v40 = vsel %vm1084_vm7, %v5765_v19, %v5827_v35  ;;  %v1087_v15 = vsel %vm1084_vm7, %v5827_v35, %v5765_v19  ;;  %v4368_v9 = vld [vmem:[%s10188_s6 + $0x28] sm:$0xff]  ;;  %v6183_v14 = vpop.permute.xlu0 %847 }
 0x3c4   :  { %10480 = vst [vmem:[#allocation67_spill] sm:$0xff] %v6125_v5  ;;  %10482 = vst [vmem:[#allocation69_spill] sm:$0xff] %v6133_v17  ;;  %v6170_v19 = vsel %vm797_vm9, %v5781_v23, %v5843_v39  ;;  %v6176_v35 = vsel %vm797_vm9, %v5843_v39, %v5781_v23  ;;  %v1073_v58 = vadd.f32 %v1069_v0, %v1043_v57  ;;  %v4371_v57 = vld [vmem:[%s10188_s6 + $0x40] sm:$0xff] }
 0x3c5   :  { %10483 = vst [vmem:[#allocation70_spill] sm:$0xff] %v6136_v33  ;;  %v6154_v10 = vpop.permute.xlu1 %843  ;;  %10485 = vst [vmem:[#allocation72_spill] sm:$0xff] %v6170_v19  ;;  %v1072_v43 = vadd.f32 %v1068_v50, %v1042_v31  ;;  %v1094_v29 = vmul.f32 %v4407_v27, %v1087_v15  ;;  %v1095_v24 = vmul.f32 %v4408_v22, %v1085_v40  ;;  %v777_v33 = vld [vmem:[%s10188_s6] sm:$0xff]  ;;  %v4372_v31 = vld [vmem:[%s10188_s6 + $0x48] sm:$0xff] }
 0x3c6   :  { %10484 = vst [vmem:[#allocation71_spill] sm:$0xff] %v6154_v10  ;;  %10486 = vst [vmem:[#allocation73_spill] sm:$0xff] %v6176_v35  ;;  %v773_v23 = vsel %vm772_vm8, %v5773_v21, %v5835_v37  ;;  %v775_v39 = vsel %vm772_vm8, %v5835_v37, %v5773_v21  ;;  %v824_v50 = vsel %vm10326_vm11, %v5797_v28, %v5859_v53  ;;  %v4411_v27 = vld [vmem:[%s10188_s6 + $0x180] sm:$0xff]  ;;  %v4412_v22 = vld [vmem:[%s10188_s6 + $0x188] sm:$0xff] }
 0x3c7   :  { %10487 = vst [vmem:[#allocation74_spill] sm:$0xff] %v6183_v14  ;;  %v826_v0 = vsel %vm10326_vm11, %v5859_v53, %v5797_v28  ;;  %v807_v21 = vmul.f32 %v4367_v54, %v6176_v35  ;;  %v808_v37 = vmul.f32 %v4368_v9, %v6170_v19  ;;  %v1111_v40 = vsel %vm1110_vm10, %v5789_v26, %v5851_v51  ;;  %v4375_v15 = vld [vmem:[%s10188_s6 + $0x60] sm:$0xff]  ;;  %v4376_v54 = vld [vmem:[%s10188_s6 + $0x68] sm:$0xff]  ;;  %v6245_v42 = vpop.permute.xlu0 %1147 }
 0x3c8   :  { %v1113_v28 = vsel %vm1110_vm10, %v5851_v51, %v5789_v26  ;;  %v850_v9 = vsel %vm10325_vm12, %v5805_v30, %v5867_v56  ;;  %v852_v26 = vsel %vm10325_vm12, %v5867_v56, %v5805_v30  ;;  %v1098_v51 = vadd.f32 %v1094_v29, %v1072_v43  ;;  %v4438_v30 = vld [vmem:[%s10188_s6 + $0x248] sm:$0xff] }
 0x3c9   :  { %v6227_v53 = vpop.permute.xlu1 %1143  ;;  %v1099_v17 = vadd.f32 %v1095_v24, %v1073_v58  ;;  %v781_v5 = vmul.f32 %v777_v33, %v775_v39  ;;  %v833_v10 = vmul.f32 %v4371_v57, %v826_v0  ;;  %v834_v14 = vmul.f32 %v4372_v31, %v824_v50  ;;  %v4419_v24 = vld [vmem:[%s10188_s6 + $0x1c0] sm:$0xff] }
 0x3ca   :  { %10488 = vst [vmem:[#allocation75_spill] sm:$0xff] %v6227_v53  ;;  %v782_v53 = vmul.f32 %v778_v45, %v773_v23  ;;  %v1120_v44 = vmul.f32 %v4411_v27, %v1113_v28  ;;  %v1121_v35 = vmul.f32 %v4412_v22, %v1111_v40  ;;  %v859_v11 = vmul.f32 %v4375_v15, %v852_v26  ;;  %v4437_v45 = vld [vmem:[%s10188_s6 + $0x240] sm:$0xff]  ;;  %v4420_v23 = vld [vmem:[%s10188_s6 + $0x1c8] sm:$0xff] }
 0x3cb   :  { %v811_v19 = vadd.f32 %v807_v21, %v781_v5  ;;  %v860_v2 = vmul.f32 %v4376_v54, %v850_v9  ;;  %v1440_v56 = vsel %vm10319_vm15, %v5829_v36, %v5891_v8  ;;  %v1442_v5 = vsel %vm10319_vm15, %v5891_v8, %v5829_v36  ;;  %v6319_v22 = vpop.permute.xlu0 %1199  ;;  %v4449_v9 = vld [vmem:[%s10188_s6 + $0x2a0] sm:$0xff] }
 0x3cc   :  { %v812_v62 = vadd.f32 %v808_v37, %v782_v53  ;;  %v1124_v33 = vadd.f32 %v1120_v44, %v1098_v51  ;;  %v1125_v43 = vadd.f32 %v1121_v35, %v1099_v17  ;;  %v1150_v36 = vsel %vm10328_vm13, %v5813_v32, %v5875_v61  ;;  %v4427_v51 = vld [vmem:[%s10188_s6 + $0x200] sm:$0xff] }
 0x3cd   :  { %v6247_v55 = vpop.permute.xlu1 %1195  ;;  %v837_v58 = vadd.f32 %v833_v10, %v811_v19  ;;  %v1152_v8 = vsel %vm10328_vm13, %v5875_v61, %v5813_v32  ;;  %v6289_v44 = vsel %vm10315_vm14, %v5821_v34, %v5883_v63  ;;  %v6295_v17 = vsel %vm10315_vm14, %v5883_v63, %v5821_v34  ;;  %v4445_v10 = vld [vmem:[%s10188_s6 + $0x280] sm:$0xff]  ;;  %v4446_v19 = vld [vmem:[%s10188_s6 + $0x288] sm:$0xff] }
 0x3ce   :  { %v838_v29 = vadd.f32 %v834_v14, %v812_v62  ;;  %v4441_v14 = vld [vmem:[%s10188_s6 + $0x260] sm:$0xff]  ;;  %v4442_v62 = vld [vmem:[%s10188_s6 + $0x268] sm:$0xff]  ;;  %v1449_v32 = vmul.f32 %v4437_v45, %v1442_v5  ;;  %v1450_v61 = vmul.f32 %v4438_v30, %v1440_v56  ;;  %v1479_v35 = vsel %vm10314_vm2, %v5845_v41, %v5907_v25 }
 0x3cf   :  { %v1481_v34 = vsel %vm10314_vm2, %v5907_v25, %v5845_v41  ;;  %v863_v39 = vadd.f32 %v859_v11, %v837_v58  ;;  %v1137_v31 = vadd.f32 %v6027_v59, %v1124_v33  ;;  %v1138_v50 = vadd.f32 %v6043_v60, %v1125_v43  ;;  %v4423_v25 = vld [vmem:[%s10188_s6 + $0x1e0] sm:$0xff]  ;;  %v4424_v59 = vld [vmem:[%s10188_s6 + $0x1e8] sm:$0xff] }
 0x3d0   :  { %v864_v57 = vadd.f32 %v860_v2, %v838_v29  ;;  %v1159_v0 = vmul.f32 %v4419_v24, %v1150_v36  ;;  %v1160_v21 = vmul.f32 %v4420_v23, %v1152_v8  ;;  %v1462_v37 = vmul.f32 %v4441_v14, %v6295_v17  ;;  %v4428_v33 = vld [vmem:[%s10188_s6 + $0x208] sm:$0xff]  ;;  %v4474_v23 = vld [vmem:[%s10188_s6 + $0x360] sm:$0xff] }
 0x3d1   :  { %v6311_v63 = vpop.permute.xlu1 %1433  ;;  %v1463_v27 = vmul.f32 %v4442_v62, %v6289_v44  ;;  %v1176_v2 = vsel %vm10316_vm4, %v5837_v38, %v5899_v12  ;;  %v1178_v41 = vsel %vm10316_vm4, %v5899_v12, %v5837_v38  ;;  %v1488_v60 = vmul.f32 %v4445_v10, %v1481_v34  ;;  %v4450_v38 = vld [vmem:[%s10188_s6 + $0x2a8] sm:$0xff] }
 0x3d2   :  { %v1489_v11 = vmul.f32 %v4446_v19, %v1479_v35  ;;  %v1466_v40 = vadd.f32 %v1462_v37, %v1449_v32  ;;  %vm10321_vm2 = vcmp.lt.s32.totalorder %v5995_v3, 77  ;;  %vm10320_vm14 = vcmp.lt.s32.totalorder %v5995_v3, 123  ;;  %v4475_v36 = vld [vmem:[%s10188_s6 + $0x368] sm:$0xff] }
 0x3d3   :  { %v1467_v28 = vadd.f32 %v1463_v27, %v1450_v61  ;;  %v1163_v15 = vadd.f32 %v1159_v0, %v1137_v31  ;;  %v1164_v54 = vadd.f32 %v1160_v21, %v1138_v50  ;;  %v1505_v12 = vsel %vm10317_vm3, %v5745_v13, %v5901_v1  ;;  %v4431_v61 = vld [vmem:[%s10188_s6 + $0x220] sm:$0xff]  ;;  %v4432_v10 = vld [vmem:[%s10188_s6 + $0x228] sm:$0xff] }
 0x3d4   :  { %v1507_v26 = vsel %vm10317_vm3, %v5901_v1, %v5745_v13  ;;  %v1185_v45 = vmul.f32 %v4423_v25, %v1176_v2  ;;  %v1186_v30 = vmul.f32 %v4424_v59, %v1178_v41  ;;  %v876_v56 = vadd.f32 %v6030_v4, %v863_v39  ;;  %v4383_v1 = vld [vmem:[%s10188_s6 + $0xa0] sm:$0xff]  ;;  %v4384_v13 = vld [vmem:[%s10188_s6 + $0xa8] sm:$0xff] }
 0x3d5   :  { %v6337_v53 = vpop.permute.xlu1 %1169  ;;  %v877_v5 = vadd.f32 %v6072_v7, %v864_v57  ;;  %vm1786_vm4 = vcmp.lt.s32.totalorder %v5995_v3, 105  ;;  %v1492_v43 = vadd.f32 %v1488_v60, %v1466_v40  ;;  %v1493_v58 = vadd.f32 %v1489_v11, %v1467_v28  ;;  %v4387_v21 = vld [vmem:[%s10188_s6 + $0xc0] sm:$0xff]  ;;  %v4388_v37 = vld [vmem:[%s10188_s6 + $0xc8] sm:$0xff] }
 0x3d6   :  { %v889_v4 = vsel %vm10318_vm0, %v5853_v52, %v5914_v48  ;;  %v891_v7 = vsel %vm10318_vm0, %v5914_v48, %v5853_v52  ;;  %vm966_vm3 = vcmp.lt.s32.totalorder %v5995_v3, 111  ;;  %v1514_v29 = vmul.f32 %v4449_v9, %v1507_v26  ;;  %v6393_v52 = vpop.permute.xlu0 %1437  ;;  %v4391_v25 = vld [vmem:[%s10188_s6 + $0xe0] sm:$0xff]  ;;  %v4392_v59 = vld [vmem:[%s10188_s6 + $0xe8] sm:$0xff] }
 0x3d7   :  { %v1515_v24 = vmul.f32 %v4450_v38, %v1505_v12  ;;  %v1748_v8 = vsel %vm1747_vm1, %v5755_v16, %v5909_v6  ;;  %v1750_v48 = vsel %vm1747_vm1, %v5909_v6, %v5755_v16  ;;  %vm10322_vm0 = vcmp.lt.s32.totalorder %v5995_v3, 53  ;;  %v10489_v2 = vld [vmem:[#allocation27_spill] sm:$0xff]  ;;  %v4478_v28 = vld [vmem:[%s10188_s6 + $0x380] sm:$0xff]  ;;  %v10491_v38 = vld [vmem:[#allocation28_spill] sm:$0xff] }
 0x3d8   :  { %vm1812_vm15 = vcmp.lt.s32.totalorder %v5995_v3, 7  ;;  %v1189_v62 = vadd.f32 %v1185_v45, %v1163_v15  ;;  %v1190_v32 = vadd.f32 %v1186_v30, %v1164_v54  ;;  %v1228_v6 = vsel %vm10321_vm2, %v5771_v20, %v5923_v47  ;;  %v4457_v15 = vld [vmem:[%s10188_s6 + $0x2e0] sm:$0xff]  ;;  %v4458_v54 = vld [vmem:[%s10188_s6 + $0x2e8] sm:$0xff] }
 0x3d9   :  { %v6395_v14 = vpop.permute.xlu1 %1472  ;;  %v1230_v16 = vsel %vm10321_vm2, %v5923_v47, %v5771_v20  ;;  %v1211_v19 = vmul.f32 %v4427_v51, %v6289_v44  ;;  %v1212_v35 = vmul.f32 %v4428_v33, %v6295_v17  ;;  %v898_v34 = vmul.f32 %v4383_v1, %v889_v4  ;;  %v10490_v9 = vld [vmem:[#allocation34_spill] sm:$0xff]  ;;  %v4479_v30 = vld [vmem:[%s10188_s6 + $0x388] sm:$0xff] }
 0x3da   :  { %v899_v39 = vmul.f32 %v4384_v13, %v891_v7  ;;  %v1518_v57 = vadd.f32 %v1514_v29, %v1492_v43  ;;  %v1519_v31 = vadd.f32 %v1515_v24, %v1493_v58  ;;  %v1757_v50 = vmul.f32 %v4474_v23, %v1750_v48  ;;  %v6462_v26 = vpop.permute.xlu0 %1173  ;;  %v10493_v33 = vld [vmem:[#allocation55_spill] sm:$0xff]  ;;  %v10494_v23 = vld [vmem:[#allocation32_spill] sm:$0xff] }
 0x3db   :  { %v6413_v0 = vmul.f32 %v4475_v36, %v1748_v8  ;;  %v915_v47 = vsel %vm914_vm6, %v5763_v18, %v5916_v49  ;;  %v917_v20 = vsel %vm914_vm6, %v5916_v49, %v5763_v18  ;;  %v1237_v44 = vmul.f32 %v4431_v61, %v1228_v6  ;;  %v4483_v24 = vld [vmem:[%s10188_s6 + $0x3a8] sm:$0xff]  ;;  %v10495_v36 = vld [vmem:[#allocation22_spill] sm:$0xff] }
 0x3dc   :  { %v1238_v17 = vmul.f32 %v4432_v10, %v1230_v16  ;;  %v941_v41 = vsel %vm940_vm5, %v10489_v2, %v5921_v46  ;;  %v943_v49 = vsel %vm940_vm5, %v5921_v46, %v10489_v2  ;;  %v1216_v18 = vadd.f32 %v1212_v35, %v1190_v32  ;;  %v4396_v6 = vld [vmem:[%s10188_s6 + $0x108] sm:$0xff]  ;;  %v10496_v16 = vld [vmem:[#allocation24_spill] sm:$0xff] }
 0x3dd   :  { %v6429_v27 = vpop.permute.xlu1 %882  ;;  %v1215_v60 = vadd.f32 %v1211_v19, %v1189_v62  ;;  %v902_v11 = vadd.f32 %v898_v34, %v876_v56  ;;  %v903_v40 = vadd.f32 %v899_v39, %v877_v5  ;;  %v1544_v46 = vsel %vm10320_vm14, %v10491_v38, %v10490_v9  ;;  %v10492_v56 = vld [vmem:[#allocation57_spill] sm:$0xff]  ;;  %v10497_v19 = vld [vmem:[#allocation38_spill] sm:$0xff]  ;;  %v10498_v39 = vld [vmem:[#allocation31_spill] sm:$0xff] }
 0x3de   :  { %v1546_v12 = vsel %vm10320_vm14, %v10490_v9, %v10491_v38  ;;  %v924_v51 = vmul.f32 %v4387_v21, %v915_v47  ;;  %v925_v45 = vmul.f32 %v4388_v37, %v917_v20  ;;  %v1532_v5 = vadd.f32 %v10492_v56, %v1519_v31  ;;  %v4461_v34 = vld [vmem:[%s10188_s6 + $0x300] sm:$0xff]  ;;  %v4487_v47 = vld [vmem:[%s10188_s6 + $0x3c8] sm:$0xff]  ;;  %v10500_v20 = vld [vmem:[#allocation36_spill] sm:$0xff] }
 0x3df   :  { %v1531_v43 = vadd.f32 %v10493_v33, %v1518_v57  ;;  %v950_v58 = vmul.f32 %v4391_v25, %v941_v41  ;;  %v951_v1 = vmul.f32 %v4392_v59, %v943_v49  ;;  %v1241_v13 = vadd.f32 %v1237_v44, %v1215_v60  ;;  %v10499_v57 = vld [vmem:[#allocation29_spill] sm:$0xff]  ;;  %v10501_v44 = vld [vmem:[#allocation23_spill] sm:$0xff]  ;;  %v4482_v59 = vld [vmem:[%s10188_s6 + $0x3a0] sm:$0xff] }
 0x3e0   :  { %v1242_v4 = vadd.f32 %v1238_v17, %v1216_v18  ;;  %v1770_v29 = vmul.f32 %v4478_v28, %v943_v49  ;;  %v1787_v8 = vsel %vm1786_vm4, %v10495_v36, %v10494_v23  ;;  %v1553_v48 = vmul.f32 %v4457_v15, %v1544_v46  ;;  %v4462_v25 = vld [vmem:[%s10188_s6 + $0x308] sm:$0xff]  ;;  %v6522_v18 = vpop.permute.xlu0 %1476 }
 0x3e1   :  { %v6469_v7 = vpop.permute.xlu1 %934  ;;  %v1554_v62 = vmul.f32 %v4458_v54, %v1546_v12  ;;  %vm1851_vm14 = vcmp.lt.s32.totalorder %v5995_v3, 121  ;;  %vm10332_vm2 = vcmp.lt.s32.totalorder %v5995_v3, 43  ;;  %v928_v32 = vadd.f32 %v924_v51, %v902_v11  ;;  %v10502_v11 = vld [vmem:[#allocation15_spill] sm:$0xff]  ;;  %v4486_v51 = vld [vmem:[%s10188_s6 + $0x3c0] sm:$0xff] }
 0x3e2   :  { %v929_v61 = vadd.f32 %v925_v45, %v903_v40  ;;  %v1771_v10 = vmul.f32 %v4479_v30, %v941_v41  ;;  %v969_v35 = vsel %vm966_vm3, %v10497_v19, %v10496_v16  ;;  %v1570_v31 = vsel %vm10322_vm0, %v10499_v57, %v10498_v39  ;;  %v4395_v41 = vld [vmem:[%s10188_s6 + $0x100] sm:$0xff]  ;;  %v4466_v56 = vld [vmem:[%s10188_s6 + $0x328] sm:$0xff] }
 0x3e3   :  { %v1572_v21 = vsel %vm10322_vm0, %v10498_v39, %v10499_v57  ;;  %v1789_v37 = vsel %vm1786_vm4, %v10494_v23, %v10495_v36  ;;  %v1813_v17 = vsel %vm1812_vm15, %v10501_v44, %v10500_v20  ;;  %v1797_v2 = vmul.f32 %v4483_v24, %v1787_v8  ;;  %v10505_v39 = vld [vmem:[#allocation72_spill] sm:$0xff] }
 0x3e4   :  { %v967_v49 = vsel %vm966_vm3, %v10496_v16, %v10497_v19  ;;  %v1254_v40 = vadd.f32 %v10502_v11, %v1242_v4  ;;  %v1253_v28 = vadd.f32 %v10502_v11, %v1241_v13  ;;  %v1774_v15 = vadd.f32 %v1770_v29, %v1757_v50  ;;  %v4465_v50 = vld [vmem:[%s10188_s6 + $0x320] sm:$0xff]  ;;  %v4503_v13 = vld [vmem:[%s10188_s6 + $0x448] sm:$0xff]  ;;  %v10504_v16 = vld [vmem:[#allocation64_spill] sm:$0xff] }
 0x3e5   :  { %v6524_v60 = vpop.permute.xlu1 %1498  ;;  %v1557_v54 = vadd.f32 %v1553_v48, %v1531_v43  ;;  %v1558_v9 = vadd.f32 %v1554_v62, %v1532_v5  ;;  %v977_v38 = vmul.f32 %v4396_v6, %v969_v35  ;;  %v955_v46 = vadd.f32 %v951_v1, %v929_v61  ;;  %v4502_v1 = vld [vmem:[%s10188_s6 + $0x440] sm:$0xff] }
 0x3e6   :  { %v1775_v12 = vadd.f32 %v1771_v10, %v6413_v0  ;;  %v1815_v45 = vsel %vm1812_vm15, %v10500_v20, %v10501_v44  ;;  %v1823_v30 = vmul.f32 %v4487_v47, %v1813_v17  ;;  %v1579_v5 = vmul.f32 %v4461_v34, %v1570_v31  ;;  %v10503_v10 = vld [vmem:[#allocation63_spill] sm:$0xff]  ;;  %v6553_v34 = vpop.permute.xlu0 %886  ;;  %v10509_v47 = vld [vmem:[#allocation40_spill] sm:$0xff]  ;;  %v10510_v20 = vld [vmem:[#allocation25_spill] sm:$0xff] }
 0x3e7   :  { %v1580_v0 = vmul.f32 %v4462_v25, %v1572_v21  ;;  %v1796_v33 = vmul.f32 %v4482_v59, %v1789_v37  ;;  %v976_v43 = vmul.f32 %v4395_v41, %v967_v49  ;;  %v954_v4 = vadd.f32 %v950_v58, %v928_v32  ;;  %v10507_v32 = vld [vmem:[#allocation73_spill] sm:$0xff]  ;;  %v4494_v37 = vld [vmem:[%s10188_s6 + $0x400] sm:$0xff]  ;;  %v4470_v17 = vld [vmem:[%s10188_s6 + $0x348] sm:$0xff] }
 0x3e8   :  { %v1801_v29 = vadd.f32 %v1797_v2, %v1775_v12  ;;  %v1258_v23 = vmax.f32 %v1254_v40, 0.0  ;;  %v1257_v36 = vmax.f32 %v1253_v28, 0.0  ;;  %v1583_v8 = vadd.f32 %v1579_v5, %v1557_v54  ;;  %v10511_v25 = vld [vmem:[#allocation26_spill] sm:$0xff]  ;;  %v10518_v5 = vld [vmem:[#allocation52_spill] sm:$0xff] }
 0x3e9   :  { %v6548_v24 = vpop.permute.xlu1 %1741  ;;  %v1584_v48 = vadd.f32 %v1580_v0, %v1558_v9  ;;  %v1822_v62 = vmul.f32 %v4486_v51, %v1815_v45  ;;  %v981_v61 = vadd.f32 %v977_v38, %v955_v46  ;;  %v1592_v6 = vmul.f32 %v4465_v50, %v10503_v10  ;;  %v10512_v59 = vld [vmem:[#allocation42_spill] sm:$0xff]  ;;  %v10515_v9 = vld [vmem:[#allocation19_spill] sm:$0xff]  ;;  %v4370_v50 = vld [vmem:[%s10188_s6 + $0x38] sm:$0xff] }
 0x3ea   :  { %v1593_v19 = vmul.f32 %v4466_v56, %v10504_v16  ;;  %v1827_v35 = vadd.f32 %v1823_v30, %v1801_v29  ;;  %vm1877_vm0 = vcmp.lt.s32.totalorder %v5995_v3, 23  ;;  %v6556_v58 = vmul.f32 %v4502_v1, %v10505_v39  ;;  %v10516_v46 = vld [vmem:[#allocation58_spill] sm:$0xff]  ;;  %v4495_v51 = vld [vmem:[%s10188_s6 + $0x408] sm:$0xff]  ;;  %v4369_v30 = vld [vmem:[%s10188_s6 + $0x30] sm:$0xff] }
 0x3eb   :  { %v6559_v57 = vmul.f32 %v4503_v13, %v10507_v32  ;;  %v1800_v31 = vadd.f32 %v1796_v33, %v1774_v15  ;;  %v980_v21 = vadd.f32 %v976_v43, %v954_v4  ;;  %v1852_v44 = vsel %vm1851_vm14, %v10510_v20, %v10509_v47  ;;  %v10517_v56 = vld [vmem:[#allocation51_spill] sm:$0xff]  ;;  %v4469_v1 = vld [vmem:[%s10188_s6 + $0x340] sm:$0xff]  ;;  %v779_v29 = vld [vmem:[%s10188_s6 + $0x10] sm:$0xff]  ;;  %v6644_v32 = vpop.permute.xlu0 %938 }
 0x3ec   :  { %10506 = vst [vmem:[#allocation27_spill] sm:$0xff] %v6556_v58  ;;  %v1611_v2 = vsel %vm10332_vm2, %v10512_v59, %v10511_v25  ;;  %v6577_v49 = vmin.f32 %v1258_v23, 6.0  ;;  %v6579_v40 = vmin.f32 %v1257_v36, 6.0  ;;  %v1597_v15 = vadd.f32 %v1593_v19, %v1584_v48  ;;  %v780_v36 = vld [vmem:[%s10188_s6 + $0x18] sm:$0xff]  ;;  %v10520_v48 = vld [vmem:[#allocation50_spill] sm:$0xff]  ;;  %v4373_v10 = vld [vmem:[%s10188_s6 + $0x50] sm:$0xff] }
 0x3ed   :  { %10508 = vst [vmem:[#allocation34_spill] sm:$0xff] %v6559_v57  ;;  %v6575_v41 = vpop.permute.xlu1 %908  ;;  %v1826_v28 = vadd.f32 %v1822_v62, %v1800_v31  ;;  %v1596_v54 = vadd.f32 %v1592_v6, %v1583_v8  ;;  %v995_v38 = vadd.f32 %v10515_v9, %v981_v61  ;;  %v1840_v12 = vadd.f32 %v10516_v46, %v1827_v35  ;;  %v10519_v8 = vld [vmem:[#allocation48_spill] sm:$0xff]  ;;  %v4374_v6 = vld [vmem:[%s10188_s6 + $0x58] sm:$0xff]  ;;  %v10522_v19 = vld [vmem:[#allocation59_spill] sm:$0xff] }
 0x3ee   :  { %10513 = vst [vmem:[#allocation28_spill] sm:$0xff] %v6577_v49  ;;  %10514 = vst [vmem:[#allocation57_spill] sm:$0xff] %v6579_v40  ;;  %v1854_v45 = vsel %vm1851_vm14, %v10509_v47, %v10510_v20  ;;  %v6600_v0 = vsel %vm797_vm9, %v10518_v5, %v10517_v56  ;;  %v6606_v33 = vsel %vm797_vm9, %v10517_v56, %v10518_v5  ;;  %v10521_v16 = vld [vmem:[#allocation65_spill] sm:$0xff] }
 0x3ef   :  { %v1861_v43 = vmul.f32 %v4494_v37, %v1852_v44  ;;  %v1609_v13 = vsel %vm10332_vm2, %v10511_v25, %v10512_v59  ;;  %v1619_v4 = vmul.f32 %v4470_v17, %v1611_v2  ;;  %v994_v23 = vadd.f32 %v10515_v9, %v980_v21  ;;  %v10523_v17 = vld [vmem:[#allocation44_spill] sm:$0xff]  ;;  %v10524_v25 = vld [vmem:[#allocation30_spill] sm:$0xff]  ;;  %v4378_v46 = vld [vmem:[%s10188_s6 + $0x78] sm:$0xff] }
 0x3f0   :  { %v774_v62 = vsel %vm772_vm8, %v10520_v48, %v10519_v8  ;;  %v776_v61 = vsel %vm772_vm8, %v10519_v8, %v10520_v48  ;;  %v825_v35 = vsel %vm10326_vm11, %v10522_v19, %v10521_v16  ;;  %v827_v39 = vsel %vm10326_vm11, %v10521_v16, %v10522_v19  ;;  %v4377_v2 = vld [vmem:[%s10188_s6 + $0x70] sm:$0xff] }
 0x3f1   :  { %v6646_v31 = vpop.permute.xlu1 %1221  ;;  %v1862_v21 = vmul.f32 %v4495_v51, %v1854_v45  ;;  %v809_v37 = vmul.f32 %v4369_v30, %v6606_v33  ;;  %v810_v47 = vmul.f32 %v4370_v50, %v6600_v0  ;;  %v999_v20 = vmax.f32 %v995_v38, 0.0  ;;  %v10525_v51 = vld [vmem:[#allocation74_spill] sm:$0xff]  ;;  %v10526_v45 = vld [vmem:[#allocation71_spill] sm:$0xff]  ;;  %v10527_v8 = vld [vmem:[#allocation56_spill] sm:$0xff] }
 0x3f2   :  { %v1618_v44 = vmul.f32 %v4469_v1, %v1609_v13  ;;  %v1878_v59 = vsel %vm1877_vm0, %v10524_v25, %v10523_v17  ;;  %v851_v30 = vsel %vm10325_vm12, %v10526_v45, %v10525_v51  ;;  %v853_v38 = vsel %vm10325_vm12, %v10525_v51, %v10526_v45  ;;  %v4498_v50 = vld [vmem:[%s10188_s6 + $0x420] sm:$0xff]  ;;  %v4499_v51 = vld [vmem:[%s10188_s6 + $0x428] sm:$0xff] }
 0x3f3   :  { %v783_v56 = vmul.f32 %v779_v29, %v776_v61  ;;  %v784_v5 = vmul.f32 %v780_v36, %v774_v62  ;;  %v835_v1 = vmul.f32 %v4373_v10, %v827_v39  ;;  %v836_v13 = vmul.f32 %v4374_v6, %v825_v35  ;;  %v94_v6 = vld [vmem:[%s10190_s8 + $0xf8] sm:$0xff]  ;;  %v92_v35 = vld [vmem:[%s10190_s8 + $0xe8] sm:$0xff] }
 0x3f4   :  { %v1839_v48 = vadd.f32 %v10527_v8, %v1826_v28  ;;  %v1623_v16 = vadd.f32 %v1619_v4, %v1597_v15  ;;  %v1880_v19 = vsel %vm1877_vm0, %v10523_v17, %v10524_v25  ;;  %v998_v11 = vmax.f32 %v994_v23, 0.0  ;;  %v6683_v4 = vpop.permute.xlu0 %1502  ;;  %v93_v23 = vld [vmem:[%s10190_s8 + $0xf0] sm:$0xff]  ;;  %2047 = vmatprep.subr.mxu0 %v94_v6  ;;  %v4410_v25 = vld [vmem:[%s10188_s6 + $0x178] sm:$0xff] }
 0x3f5   :  { %v6676_v9 = vpop.permute.xlu1 %1537  ;;  %v813_v45 = vadd.f32 %v809_v37, %v783_v56  ;;  %v814_v29 = vadd.f32 %v810_v47, %v784_v5  ;;  %v861_v36 = vmul.f32 %v4377_v2, %v853_v38  ;;  %v862_v62 = vmul.f32 %v4378_v46, %v851_v30  ;;  %v10532_v46 = vld [vmem:[#allocation20_spill] sm:$0xff]  ;;  %2048 = vmatpush1.msra.mxu0 %v93_v23  ;;  %v10533_v56 = vld [vmem:[#allocation54_spill] sm:$0xff]  ;;  %v10534_v5 = vld [vmem:[#allocation53_spill] sm:$0xff] }
 0x3f6   :  { %v1865_v61 = vadd.f32 %v1861_v43, %v1839_v48  ;;  %v6681_v10 = vadd.f32 %v1862_v21, %v1840_v12  ;;  %v1622_v28 = vadd.f32 %v1618_v44, %v1596_v54  ;;  %v1887_v15 = vmul.f32 %v4498_v50, %v1878_v59  ;;  %v4409_v12 = vld [vmem:[%s10188_s6 + $0x170] sm:$0xff]  ;;  %v10528_v54 = vld [vmem:[#allocation49_spill] sm:$0xff]  ;;  %v10529_v43 = vld [vmem:[#allocation46_spill] sm:$0xff]  ;;  %2049 = vmatprep.subr.mxu0 %v92_v35 }
 0x3f7   :  { %v1088_v39 = vsel %vm1084_vm7, %v10529_v43, %v10528_v54  ;;  %v839_v21 = vadd.f32 %v835_v1, %v813_v45  ;;  %v840_v37 = vadd.f32 %v836_v13, %v814_v29  ;;  %v6701_v47 = vmin.f32 %v999_v20, 6.0  ;;  %v91_v44 = vld [vmem:[%s10190_s8 + $0xe0] sm:$0xff]  ;;  %v90_v20 = vld [vmem:[%s10190_s8 + $0xd8] sm:$0xff]  ;;  %v4413_v50 = vld [vmem:[%s10188_s6 + $0x190] sm:$0xff] }
 0x3f8   :  { %v6706_v17 = vmul.f32 %v4499_v51, %v1880_v19  ;;  %v6713_v2 = vmin.f32 %v998_v11, 6.0  ;;  %v6716_v30 = vadd.f32 %v10532_v46, %v1623_v16  ;;  %v1086_v38 = vsel %vm1084_vm7, %v10528_v54, %v10529_v43  ;;  %v4414_v11 = vld [vmem:[%s10188_s6 + $0x198] sm:$0xff]  ;;  %v89_v48 = vld [vmem:[%s10190_s8 + $0xd0] sm:$0xff]  ;;  %2050 = vmatpush1.msra.mxu0 %v91_v44 }
 0x3f9   :  { %10530 = vst [vmem:[#allocation55_spill] sm:$0xff] %v6701_v47  ;;  %v6711_v59 = vpop.permute.xlu1 %1845  ;;  %v1114_v1 = vsel %vm1110_vm10, %v10534_v5, %v10533_v56  ;;  %v865_v13 = vadd.f32 %v861_v36, %v839_v21  ;;  %v866_v8 = vadd.f32 %v862_v62, %v840_v37  ;;  %v6738_v16 = vadd.f32 %v1887_v15, %v1865_v61  ;;  %v4421_v45 = vld [vmem:[%s10188_s6 + $0x1d0] sm:$0xff]  ;;  %v4422_v29 = vld [vmem:[%s10188_s6 + $0x1d8] sm:$0xff]  ;;  %v88_v62 = vld [vmem:[%s10190_s8 + $0xc8] sm:$0xff]  ;;  %v6801_v37 = vpop.permute.xlu0 %1745 }
 0x3fa   :  { %10531 = vst [vmem:[#allocation32_spill] sm:$0xff] %v6713_v2  ;;  %v6740_v19 = vmul.f32 %v4409_v12, %v1088_v39  ;;  %v1112_v51 = vsel %vm1110_vm10, %v10533_v56, %v10534_v5  ;;  %v6753_v36 = vadd.f32 %v10532_v46, %v1622_v28  ;;  %v10537_v61 = vld [vmem:[#allocation75_spill] sm:$0xff]  ;;  %v4439_v28 = vld [vmem:[%s10188_s6 + $0x250] sm:$0xff]  ;;  %v4440_v23 = vld [vmem:[%s10188_s6 + $0x258] sm:$0xff]  ;;  %vm10538_vm12 = vcmp.lt.s32.totalorder %v5995_v3, 85  ;;  %2051 = vmatprep.subr.mxu0 %v90_v20 }
 0x3fb   :  { %10535 = vst [vmem:[#allocation22_spill] sm:$0xff] %v6738_v16  ;;  %v1151_v15 = vsel %vm10328_vm13, %v10537_v61, %v6245_v42  ;;  %v1153_v6 = vsel %vm10328_vm13, %v6245_v42, %v10537_v61  ;;  %v1441_v35 = vsel %vm10538_vm12, %v6311_v63, %v6393_v52  ;;  %vm10539_vm11 = vmmov %vm10538_vm12  ;;  %v87_v42 = vld [vmem:[%s10190_s8 + $0xc0] sm:$0xff]  ;;  %v6783_v54 = vmul.f32 %v4410_v25, %v1086_v38  ;;  %v4429_v39 = vld [vmem:[%s10188_s6 + $0x210] sm:$0xff] }
 0x3fc   :  { %10536 = vst [vmem:[#allocation24_spill] sm:$0xff] %v6753_v36  ;;  %v1443_v12 = vsel %vm10539_vm11, %v6393_v52, %v6311_v63  ;;  %v6785_v43 = vmul.f32 %v4413_v50, %v1114_v1  ;;  %v4443_v21 = vld [vmem:[%s10188_s6 + $0x270] sm:$0xff]  ;;  %vm10540_vm11 = vcmp.lt.s32.totalorder %v5995_v3, 80  ;;  %2052 = vmatpush1.msra.mxu0 %v89_v48  ;;  %v86_v25 = vld [vmem:[%s10190_s8 + $0xb8] sm:$0xff]  ;;  %v6808_v20 = vmul.f32 %v4414_v11, %v1112_v51  ;;  %v10544_v5 = vld [vmem:[#allocation67_spill] sm:$0xff] }
 0x3fd   :  { %v1203_v63 = vsel %vm10540_vm11, %v6247_v55, %v6319_v22  ;;  %vm10541_vm12 = vmmov %vm10540_vm11  ;;  %v6803_v44 = vpop.permute.xlu1 %1602  ;;  %v4444_v38 = vld [vmem:[%s10188_s6 + $0x278] sm:$0xff]  ;;  %v4447_v50 = vld [vmem:[%s10188_s6 + $0x290] sm:$0xff]  ;;  %vm10542_vm11 = vcmp.lt.s32.totalorder %v5995_v3, 75  ;;  %v6824_v1 = vadd.f32 %v10544_v5, %v866_v8  ;;  %2053 = vmatprep.subr.mxu0 %v88_v62  ;;  %v6829_v48 = vmul.f32 %v4421_v45, %v1151_v15 }
 0x3fe   :  { %v1205_v52 = vsel %vm10541_vm12, %v6319_v22, %v6247_v55  ;;  %v1482_v55 = vsel %vm10542_vm11, %v6522_v18, %v6395_v14  ;;  %v10543_v22 = vld [vmem:[#allocation60_spill] sm:$0xff]  ;;  %v6831_v51 = vmul.f32 %v4422_v29, %v1153_v6  ;;  %v4430_v61 = vld [vmem:[%s10188_s6 + $0x218] sm:$0xff]  ;;  %v1451_v46 = vmul.f32 %v4439_v28, %v1443_v12  ;;  %2054 = vmatpush1.msra.mxu0 %v87_v42  ;;  %v84_v8 = vld [vmem:[%s10190_s8 + $0xa8] sm:$0xff] }
 0x3ff   :  { %v6821_v56 = vadd.f32 %v10543_v22, %v865_v13  ;;  %v85_v11 = vld [vmem:[%s10190_s8 + $0xb0] sm:$0xff]  ;;  %v1452_v58 = vmul.f32 %v4440_v23, %v1441_v35  ;;  %v6842_v62 = vmul.f32 %v4429_v39, %v1203_v63  ;;  %v1464_v45 = vmul.f32 %v4443_v21, %v1205_v52  ;;  %v4426_v29 = vld [vmem:[%s10188_s6 + $0x1f8] sm:$0xff]  ;;  %2055 = vmatprep.subr.mxu0 %v86_v25  ;;  %v83_v23 = vld [vmem:[%s10190_s8 + $0xa0] sm:$0xff] }
 0x400   :  { %v4425_v13 = vld [vmem:[%s10188_s6 + $0x1f0] sm:$0xff]  ;;  %vm10545_vm12 = vcmp.lt.s32.totalorder %v5995_v3, 83  ;;  %v4448_v28 = vld [vmem:[%s10188_s6 + $0x298] sm:$0xff]  ;;  %v1465_v35 = vmul.f32 %v4444_v38, %v1203_v63  ;;  %vm10547_vm13 = vcmp.lt.s32.totalorder %v5995_v3, 75  ;;  %v1490_v42 = vmul.f32 %v4447_v50, %v1482_v55  ;;  %2056 = vmatpush1.msra.mxu0 %v85_v11  ;;  %v913_v11 = vpop.permute.xlu0 %912 }
 0x401   :  { %v1177_v15 = vsel %vm10545_vm12, %v6337_v53, %v6462_v26  ;;  %vm10546_vm11 = vmmov %vm10545_vm12  ;;  %v1480_v12 = vsel %vm10547_vm13, %v6395_v14, %v6522_v18  ;;  %vm10548_vm12 = vcmp.lt.s32.totalorder %v5995_v3, 127  ;;  %v1031_v21 = vpop.permute.xlu1 %1030  ;;  %v82_v14 = vld [vmem:[%s10190_s8 + $0x98] sm:$0xff]  ;;  %v6878_v18 = vmul.f32 %v4430_v61, %v1205_v52  ;;  %v4451_v25 = vld [vmem:[%s10188_s6 + $0x2b0] sm:$0xff]  ;;  %2057 = vmatprep.subr.mxu0 %v84_v8 }
 0x402   :  { %v1179_v6 = vsel %vm10546_vm11, %v6462_v26, %v6337_v53  ;;  %v4385_v53 = vld [vmem:[%s10188_s6 + $0xb0] sm:$0xff]  ;;  %v4386_v26 = vld [vmem:[%s10188_s6 + $0xb8] sm:$0xff]  ;;  %v890_v39 = vsel %vm10548_vm12, %v6429_v27, %v6553_v34  ;;  %vm10549_vm13 = vmmov %vm10548_vm12  ;;  %vm10550_vm11 = vcmp.lt.s32.totalorder %v5995_v3, 5  ;;  %v1469_v55 = vadd.f32 %v1465_v35, %v1452_v58  ;;  %2058 = vmatpush1.msra.mxu0 %v83_v23 }
 0x403   :  { %v892_v63 = vsel %vm10549_vm13, %v6553_v34, %v6429_v27  ;;  %v4452_v38 = vld [vmem:[%s10188_s6 + $0x2b8] sm:$0xff]  ;;  %v1506_v50 = vsel %vm10550_vm11, %v6524_v60, %v6683_v4  ;;  %vm10551_vm12 = vmmov %vm10550_vm11  ;;  %v81_v27 = vld [vmem:[%s10190_s8 + $0x90] sm:$0xff]  ;;  %v1468_v34 = vadd.f32 %v1464_v45, %v1451_v46  ;;  %v6901_v22 = vmul.f32 %v4425_v13, %v1177_v15  ;;  %2059 = vmatprep.subr.mxu0 %v82_v14 }
 0x404   :  { %v1508_v52 = vsel %vm10551_vm12, %v6683_v4, %v6524_v60  ;;  %v6903_v5 = vmul.f32 %v4426_v29, %v1179_v6  ;;  %v4401_v61 = vld [vmem:[%s10188_s6 + $0x130] sm:$0xff]  ;;  %v4402_v60 = vld [vmem:[%s10188_s6 + $0x138] sm:$0xff]  ;;  %v80_v4 = vld [vmem:[%s10190_s8 + $0x88] sm:$0xff]  ;;  %v1491_v46 = vmul.f32 %v4448_v28, %v1480_v12  ;;  %v900_v58 = vmul.f32 %v4385_v53, %v890_v39  ;;  %2060 = vmatpush1.msra.mxu0 %v81_v27 }
 0x405   :  { %v10552_v13 = vld [vmem:[#allocation45_spill] sm:$0xff]  ;;  %vm10553_vm13 = vcmp.lt.s32.totalorder %v5995_v3, 51  ;;  %v4405_v29 = vld [vmem:[%s10188_s6 + $0x150] sm:$0xff]  ;;  %v79_v6 = vld [vmem:[%s10190_s8 + $0x80] sm:$0xff]  ;;  %v1494_v28 = vadd.f32 %v1490_v42, %v1468_v34  ;;  %v901_v23 = vmul.f32 %v4386_v26, %v892_v63  ;;  %v1516_v35 = vmul.f32 %v4451_v25, %v1508_v52  ;;  %v1057_v53 = vpop.permute.xlu1 %1056  ;;  %2061 = vmatprep.subr.mxu0 %v80_v4 }
 0x406   :  { %v1034_v8 = vsel %vm10553_vm13, %v10552_v13, %v1031_v21  ;;  %vm10554_vm11 = vmmov %vm10553_vm13  ;;  %v4406_v15 = vld [vmem:[%s10188_s6 + $0x158] sm:$0xff]  ;;  %v1517_v12 = vmul.f32 %v4452_v38, %v1506_v50  ;;  %v916_v14 = vsel %vm914_vm6, %v6575_v41, %v913_v11  ;;  %vm10556_vm12 = vcmp.lt.s32.totalorder %v5995_v3, 48  ;;  %v77_v63 = vld [vmem:[%s10190_s8 + $0x70] sm:$0xff]  ;;  %2062 = vmatpush1.msra.mxu0 %v79_v6 }
 0x407   :  { %v1036_v45 = vsel %vm10554_vm11, %v1031_v21, %v10552_v13  ;;  %v78_v39 = vld [vmem:[%s10190_s8 + $0x78] sm:$0xff]  ;;  %v1751_v21 = vsel %vm1747_vm1, %v6801_v37, %v6548_v24  ;;  %v10555_v13 = vld [vmem:[#allocation47_spill] sm:$0xff]  ;;  %vm10557_vm13 = vmmov %vm10556_vm12  ;;  %v1045_v27 = vmul.f32 %v4402_v60, %v1034_v8  ;;  %v904_v16 = vadd.f32 %v900_v58, %v6821_v56  ;;  %v1226_v8 = vpop.permute.xlu0 %1225 }
 0x408   :  { %v6942_v42 = vsel %vm10556_vm12, %v10555_v13, %v1057_v53  ;;  %v6947_v26 = vsel %vm10557_vm13, %v1057_v53, %v10555_v13  ;;  %v4393_v25 = vld [vmem:[%s10188_s6 + $0xf0] sm:$0xff]  ;;  %v1044_v52 = vmul.f32 %v4401_v61, %v1036_v45  ;;  %v76_v53 = vld [vmem:[%s10190_s8 + $0x68] sm:$0xff]  ;;  %v1495_v13 = vadd.f32 %v1491_v46, %v1469_v55  ;;  %v4394_v2 = vld [vmem:[%s10188_s6 + $0xf8] sm:$0xff]  ;;  %2063 = vmatprep.subr.mxu0 %v78_v39 }
 0x409   :  { %v4476_v38 = vld [vmem:[%s10188_s6 + $0x370] sm:$0xff]  ;;  %v1070_v34 = vmul.f32 %v4405_v29, %v6947_v26  ;;  %v1071_v4 = vmul.f32 %v4406_v15, %v6942_v42  ;;  %v942_v61 = vsel %vm940_vm5, %v6469_v7, %v6644_v32  ;;  %v4477_v60 = vld [vmem:[%s10188_s6 + $0x378] sm:$0xff]  ;;  %v1749_v55 = vsel %vm1747_vm1, %v6548_v24, %v6801_v37  ;;  %v75_v56 = vld [vmem:[%s10190_s8 + $0x60] sm:$0xff]  ;;  %v1785_v15 = vpop.permute.xlu1 %1784  ;;  %2064 = vmatpush1.msra.mxu0 %v77_v63 }
 0x40a   :  { %v4389_v50 = vld [vmem:[%s10188_s6 + $0xd0] sm:$0xff]  ;;  %v944_v58 = vsel %vm940_vm5, %v6644_v32, %v6469_v7  ;;  %v4390_v45 = vld [vmem:[%s10188_s6 + $0xd8] sm:$0xff]  ;;  %v918_v24 = vsel %vm914_vm6, %v913_v11, %v6575_v41  ;;  %v1520_v32 = vadd.f32 %v1516_v35, %v1494_v28  ;;  %v1521_v39 = vadd.f32 %v1517_v12, %v1495_v13  ;;  %2065 = vmatprep.subr.mxu0 %v76_v53  ;;  %v72_v28 = vld [vmem:[%s10190_s8 + $0x48] sm:$0xff] }
 0x40b   :  { %v4480_v46 = vld [vmem:[%s10188_s6 + $0x390] sm:$0xff]  ;;  %v1074_v37 = vadd.f32 %v1070_v34, %v1044_v52  ;;  %v1075_v29 = vadd.f32 %v1071_v4, %v1045_v27  ;;  %v74_v6 = vld [vmem:[%s10190_s8 + $0x58] sm:$0xff]  ;;  %v1759_v36 = vmul.f32 %v4476_v38, %v1751_v21  ;;  %v926_v57 = vmul.f32 %v4389_v50, %v916_v14  ;;  %2066 = vmatpush1.msra.mxu0 %v75_v56  ;;  %v71_v38 = vld [vmem:[%s10190_s8 + $0x40] sm:$0xff] }
 0x40c   :  { %v4481_v7 = vld [vmem:[%s10188_s6 + $0x398] sm:$0xff]  ;;  %v73_v41 = vld [vmem:[%s10190_s8 + $0x50] sm:$0xff]  ;;  %v905_v11 = vadd.f32 %v901_v23, %v6824_v1  ;;  %v1760_v63 = vmul.f32 %v4477_v60, %v1749_v55  ;;  %v952_v35 = vmul.f32 %v4393_v25, %v942_v61  ;;  %v953_v12 = vmul.f32 %v4394_v2, %v944_v58  ;;  %2067 = vmatprep.subr.mxu0 %v74_v6  ;;  %v10559_v53 = vld [vmem:[#allocation62_spill] sm:$0xff]  ;;  %v1850_v55 = vpop.permute.xlu0 %1849 }
 0x40d   :  { %v1100_v52 = vadd.f32 %v6740_v19, %v1074_v37  ;;  %v1101_v27 = vadd.f32 %v6783_v54, %v1075_v29  ;;  %v1772_v21 = vmul.f32 %v4480_v46, %v944_v58  ;;  %v927_v14 = vmul.f32 %v4390_v45, %v918_v24  ;;  %v4433_v19 = vld [vmem:[%s10188_s6 + $0x230] sm:$0xff]  ;;  %v1542_v25 = vpop.permute.xlu1 %1541  ;;  %2068 = vmatpush1.msra.mxu0 %v73_v41  ;;  %v70_v50 = vld [vmem:[%s10190_s8 + $0x38] sm:$0xff]  ;;  %v68_v45 = vld [vmem:[%s10190_s8 + $0x28] sm:$0xff] }
 0x40e   :  { %v1773_v1 = vmul.f32 %v4481_v7, %v942_v61  ;;  %vm10558_vm11 = vcmp.lt.s32.totalorder %v5995_v3, 77  ;;  %v930_v4 = vadd.f32 %v926_v57, %v904_v16  ;;  %v7029_v13 = vadd.f32 %v10559_v53, %v1520_v32  ;;  %v10560_v61 = vld [vmem:[#allocation69_spill] sm:$0xff]  ;;  %2069 = vmatprep.subr.mxu0 %v72_v28  ;;  %v10563_v46 = vld [vmem:[#allocation68_spill] sm:$0xff]  ;;  %v67_v32 = vld [vmem:[%s10190_s8 + $0x20] sm:$0xff] }
 0x40f   :  { %v1229_v54 = vsel %vm10558_vm11, %v6646_v31, %v1226_v8  ;;  %v1126_v23 = vadd.f32 %v6785_v43, %v1100_v52  ;;  %v1127_v2 = vadd.f32 %v6808_v20, %v1101_v27  ;;  %v7026_v34 = vadd.f32 %v1772_v21, %v1759_v36  ;;  %v69_v43 = vld [vmem:[%s10190_s8 + $0x30] sm:$0xff]  ;;  %v4434_v56 = vld [vmem:[%s10188_s6 + $0x238] sm:$0xff]  ;;  %vm10561_vm12 = vmmov %vm10558_vm11  ;;  %2070 = vmatpush1.msra.mxu0 %v71_v38 }
 0x410   :  { %v7032_v60 = vadd.f32 %v10560_v61, %v1521_v39  ;;  %v1777_v20 = vadd.f32 %v1773_v1, %v1760_v63  ;;  %v1231_v57 = vsel %vm10561_vm12, %v1226_v8, %v6646_v31  ;;  %v10562_v16 = vld [vmem:[#allocation61_spill] sm:$0xff]  ;;  %v931_v24 = vadd.f32 %v927_v14, %v905_v11  ;;  %v4484_v29 = vld [vmem:[%s10188_s6 + $0x3b0] sm:$0xff]  ;;  %2071 = vmatprep.subr.mxu0 %v70_v50  ;;  %v10567_v38 = vld [vmem:[#allocation35_spill] sm:$0xff] }
 0x411   :  { %v1139_v36 = vadd.f32 %v10562_v16, %v1126_v23  ;;  %v1140_v58 = vadd.f32 %v10563_v46, %v1127_v2  ;;  %v7048_v37 = vmul.f32 %v4433_v19, %v1229_v54  ;;  %v4485_v31 = vld [vmem:[%s10188_s6 + $0x3b8] sm:$0xff]  ;;  %v4459_v41 = vld [vmem:[%s10188_s6 + $0x2f0] sm:$0xff]  ;;  %vm10565_vm13 = vcmp.lt.s32.totalorder %v5995_v3, 123  ;;  %v1811_v52 = vpop.permute.xlu1 %1810  ;;  %2072 = vmatpush1.msra.mxu0 %v69_v43  ;;  %v64_v50 = vld [vmem:[%s10190_s8 + $0x8] sm:$0xff] }
 0x412   :  { %v10564_v8 = vld [vmem:[#allocation33_spill] sm:$0xff]  ;;  %v1545_v63 = vsel %vm10565_vm13, %v6676_v9, %v1542_v25  ;;  %vm10566_vm11 = vmmov %vm10565_vm13  ;;  %v1240_v28 = vmul.f32 %v4434_v56, %v1231_v57  ;;  %v4488_v21 = vld [vmem:[%s10188_s6 + $0x3d0] sm:$0xff]  ;;  %v956_v1 = vadd.f32 %v952_v35, %v930_v4  ;;  %2073 = vmatprep.subr.mxu0 %v68_v45  ;;  %v7105_v35 = vsel %vm1851_vm14, %v6711_v59, %v1850_v55  ;;  %v1607_v56 = vpop.permute.xlu0 %1606 }
 0x413   :  { %v1788_v6 = vsel %vm1786_vm4, %v10564_v8, %v1785_v15  ;;  %v1790_v7 = vsel %vm1786_vm4, %v1785_v15, %v10564_v8  ;;  %v1165_v39 = vadd.f32 %v6829_v48, %v1139_v36  ;;  %v4460_v11 = vld [vmem:[%s10188_s6 + $0x2f8] sm:$0xff]  ;;  %v1547_v15 = vsel %vm10566_vm11, %v1542_v25, %v6676_v9  ;;  %v65_v19 = vld [vmem:[%s10190_s8 + $0x10] sm:$0xff]  ;;  %2074 = vmatpush1.msra.mxu0 %v67_v32 }
 0x414   :  { %v1166_v27 = vadd.f32 %v6831_v51, %v1140_v58  ;;  %v66_v48 = vld [vmem:[%s10190_s8 + $0x18] sm:$0xff]  ;;  %v1814_v9 = vsel %vm1812_vm15, %v10567_v38, %v1811_v52  ;;  %v1816_v51 = vsel %vm1812_vm15, %v1811_v52, %v10567_v38  ;;  %v1798_v54 = vmul.f32 %v4484_v29, %v1790_v7  ;;  %v4397_v43 = vld [vmem:[%s10188_s6 + $0x110] sm:$0xff]  ;;  %v124_v7 = vld [vmem:[%s10190_s8 + $0x1e8] sm:$0xff] }
 0x415   :  { %v4489_v14 = vld [vmem:[%s10188_s6 + $0x3d8] sm:$0xff]  ;;  %v1799_v23 = vmul.f32 %v4485_v31, %v1788_v6  ;;  %v1191_v25 = vadd.f32 %v6901_v22, %v1165_v39  ;;  %v1555_v4 = vmul.f32 %v4459_v41, %v1545_v63  ;;  %v1556_v53 = vmul.f32 %v4460_v11, %v1547_v15  ;;  %2075 = vmatprep.subr.mxu0 %v66_v48  ;;  %v965_v36 = vpop.permute.xlu1 %964  ;;  %v125_v31 = vld [vmem:[%s10190_s8 + $0x1f0] sm:$0xff]  ;;  %v123_v63 = vld [vmem:[%s10190_s8 + $0x1e0] sm:$0xff] }
 0x416   :  { %v1192_v2 = vadd.f32 %v6903_v5, %v1166_v27  ;;  %v957_v61 = vadd.f32 %v953_v12, %v931_v24  ;;  %v4398_v22 = vld [vmem:[%s10188_s6 + $0x118] sm:$0xff]  ;;  %v63_v5 = vld [vmem:[%s10190_s8] sm:$0xff]  ;;  %v1824_v57 = vmul.f32 %v4488_v21, %v1816_v51  ;;  %v1825_v16 = vmul.f32 %v4489_v14, %v1814_v9  ;;  %2076 = vmatpush1.msra.mxu0 %v65_v19  ;;  %v4463_v41 = vld [vmem:[%s10188_s6 + $0x310] sm:$0xff] }
 0x417   :  { %v1217_v12 = vadd.f32 %v6842_v62, %v1191_v25  ;;  %v126_v58 = vld [vmem:[%s10190_s8 + $0x1f8] sm:$0xff]  ;;  %v7124_v45 = vsel %vm1851_vm14, %v1850_v55, %v6711_v59  ;;  %v1612_v24 = vsel %vm10332_vm2, %v1607_v56, %v6803_v44  ;;  %2077 = vmatprep.subr.mxu0 %v64_v50  ;;  %v1802_v59 = vadd.f32 %v1798_v54, %v7026_v34  ;;  %v10569_v21 = vld [vmem:[#allocation39_spill] sm:$0xff]  ;;  %v10572_v9 = vld [vmem:[#allocation18_spill] sm:$0xff] }
 0x418   :  { %v1218_v46 = vadd.f32 %v6878_v18, %v1192_v2  ;;  %v10568_v29 = vld [vmem:[#allocation37_spill] sm:$0xff]  ;;  %v1803_v55 = vadd.f32 %v1799_v23, %v1777_v20  ;;  %2078 = vmatpush1.msra.mxu0 %v63_v5  ;;  %v1559_v32 = vadd.f32 %v1555_v4, %v7029_v13  ;;  %v1560_v39 = vadd.f32 %v1556_v53, %v7032_v60  ;;  %v121_v19 = vld [vmem:[%s10190_s8 + $0x1d0] sm:$0xff]  ;;  %v120_v53 = vld [vmem:[%s10190_s8 + $0x1c8] sm:$0xff] }
 0x419   :  { %v968_v18 = vsel %vm966_vm3, %v10568_v29, %v965_v36  ;;  %v970_v62 = vsel %vm966_vm3, %v965_v36, %v10568_v29  ;;  %v4464_v34 = vld [vmem:[%s10188_s6 + $0x318] sm:$0xff]  ;;  %v1243_v11 = vadd.f32 %v7048_v37, %v1217_v12  ;;  %2079 = vmatprep.subr.mxu0 %v126_v58  ;;  %v1828_v60 = vadd.f32 %v1824_v57, %v1802_v59  ;;  %v1568_v48 = vpop.permute.xlu1 %1567  ;;  %v4467_v54 = vld [vmem:[%s10188_s6 + $0x330] sm:$0xff]  ;;  %v119_v57 = vld [vmem:[%s10190_s8 + $0x1c0] sm:$0xff] }
 0x41a   :  { %v978_v8 = vmul.f32 %v4397_v43, %v968_v18  ;;  %v979_v6 = vmul.f32 %v4398_v22, %v970_v62  ;;  %v1244_v20 = vadd.f32 %v1240_v28, %v1218_v46  ;;  %v4472_v13 = vld [vmem:[%s10188_s6 + $0x358] sm:$0xff]  ;;  %v1829_v15 = vadd.f32 %v1825_v16, %v1803_v55  ;;  %2080 = vmatpush2.msra.mxu0 %v125_v31  ;;  %v4496_v16 = vld [vmem:[%s10188_s6 + $0x410] sm:$0xff]  ;;  %v10574_v18 = vld [vmem:[#allocation66_spill] sm:$0xff] }
 0x41b   :  { %vm10330_vm12 = vcmask 130048   ;;  %v122_v37 = vld [vmem:[%s10190_s8 + $0x1d8] sm:$0xff]  ;;  %vm10570_vm13 = vcmp.lt.s32.totalorder %v5995_v3, 53  ;;  %2081 = vmatprep.subr.mxu0 %v124_v7  ;;  %v1621_v43 = vmul.f32 %v4472_v13, %v1612_v24  ;;  %v1841_v62 = vadd.f32 %v10574_v18, %v1828_v60  ;;  %v4471_v55 = vld [vmem:[%s10188_s6 + $0x350] sm:$0xff]  ;;  %v7270_v18 = vpop.permute.xlu0 %1939 }
 0x41c   :  { %v982_v52 = vadd.f32 %v978_v8, %v956_v1  ;;  %v983_v27 = vadd.f32 %v979_v6, %v957_v61  ;;  %v4468_v28 = vld [vmem:[%s10188_s6 + $0x338] sm:$0xff]  ;;  %v1571_v14 = vsel %vm10570_vm13, %v10569_v21, %v1568_v48  ;;  %vm10571_vm11 = vmmov %vm10570_vm13  ;;  %v1256_v51 = vadd.f32 %v10572_v9, %v1244_v20  ;;  %2082 = vmatpush2.msra.mxu0 %v123_v63  ;;  %v10577_v8 = vld [vmem:[#allocation70_spill] sm:$0xff] }
 0x41d   :  { %v1573_v38 = vsel %vm10571_vm11, %v1568_v48, %v10569_v21  ;;  %v1255_v1 = vadd.f32 %v10572_v9, %v1243_v11  ;;  %v1581_v23 = vmul.f32 %v4463_v41, %v1571_v14  ;;  %v10573_v25 = vld [vmem:[#allocation17_spill] sm:$0xff]  ;;  %v1610_v61 = vsel %vm10332_vm2, %v6803_v44, %v1607_v56  ;;  %2083 = vmatprep.subr.mxu0 %v122_v37  ;;  %v7192_v58 = vpop.permute.xlu1 %1908  ;;  %v4504_v56 = vld [vmem:[%s10188_s6 + $0x450] sm:$0xff] }
 0x41e   :  { %v1582_v2 = vmul.f32 %v4464_v34, %v1573_v38  ;;  %v997_v50 = vadd.f32 %v10573_v25, %v983_v27  ;;  %v996_v4 = vadd.f32 %v10573_v25, %v982_v52  ;;  %v1260_v22 = vmax.f32 %v1256_v51, 0.0  ;;  %2084 = vmatpush2.msra.mxu0 %v121_v19  ;;  %v118_v44 = vld [vmem:[%s10190_s8 + $0x1b8] sm:$0xff]  ;;  %v4500_v20 = vld [vmem:[%s10188_s6 + $0x430] sm:$0xff]  ;;  %10587 = vst [vmem:[#allocation23_spill] sm:$0xff] %v7270_v18 }
 0x41f   :  { %v1259_v5 = vmax.f32 %v1255_v1, 0.0  ;;  %v1595_v36 = vmul.f32 %v4468_v28, %v6947_v26  ;;  %v1585_v46 = vadd.f32 %v1581_v23, %v1559_v32  ;;  %v4497_v24 = vld [vmem:[%s10188_s6 + $0x418] sm:$0xff]  ;;  %v1594_v26 = vmul.f32 %v4467_v54, %v6942_v42  ;;  %2085 = vmatprep.subr.mxu0 %v120_v53  ;;  %v4508_v51 = vld [vmem:[%s10188_s6 + $0x470] sm:$0xff] }
 0x420   :  { %v1586_v12 = vadd.f32 %v1582_v2, %v1560_v39  ;;  %v1001_v29 = vmax.f32 %v997_v50, 0.0  ;;  %v7205_v31 = vmin.f32 %v1260_v22, 6.0  ;;  %v1842_v6 = vadd.f32 %v10577_v8, %v1829_v15  ;;  %2086 = vmatpush2.msra.mxu0 %v119_v57  ;;  %v4501_v11 = vld [vmem:[%s10188_s6 + $0x438] sm:$0xff]  ;;  %v10582_v22 = vld [vmem:[#allocation43_spill] sm:$0xff]  ;;  %v10588_v8 = vld [vmem:[#allocation22_spill] sm:$0xff] }
 0x421   :  { %v7207_v59 = vmin.f32 %v1259_v5, 6.0  ;;  %v1000_v39 = vmax.f32 %v996_v4, 0.0  ;;  %v1892_v42 = vadd.f32 %v6706_v17, %v6681_v10  ;;  %v1863_v41 = vmul.f32 %v4496_v16, %v7105_v35  ;;  %2087 = vmatprep.subr.mxu0 %v118_v44  ;;  %v1876_v17 = vpop.permute.xlu1 %1875  ;;  %v4505_v60 = vld [vmem:[%s10188_s6 + $0x458] sm:$0xff] }
 0x422   :  { %10575 = vst [vmem:[#allocation38_spill] sm:$0xff] %v7205_v31  ;;  %v1599_v7 = vadd.f32 %v1595_v36, %v1586_v12  ;;  %v7213_v32 = vmin.f32 %v1001_v29, 6.0  ;;  %v1598_v34 = vadd.f32 %v1594_v26, %v1585_v46  ;;  %1301 = vmatprep.subr.mxu1 %v7205_v31  ;;  %vm10331_vm13 = vcmp.lt.s32.totalorder %v5995_v3, 9  ;;  %v10579_v27 = vld [vmem:[#allocation41_spill] sm:$0xff]  ;;  %v10585_v36 = vld [vmem:[#allocation24_spill] sm:$0xff] }
 0x423   :  { %10576 = vst [vmem:[#allocation31_spill] sm:$0xff] %v7207_v59  ;;  %v1902_v63 = vmul.f32 %v4504_v56, %v6600_v0  ;;  %v1864_v10 = vmul.f32 %v4497_v24, %v7124_v45  ;;  %1302 = vmatpush1.msra.mxu1 %v7207_v59  ;;  %v1620_v15 = vmul.f32 %v4471_v55, %v1610_v61  ;;  %v7242_v21 = vmin.f32 %v1000_v39, 6.0  ;;  %v4509_v1 = vld [vmem:[%s10188_s6 + $0x478] sm:$0xff]  ;;  %v10586_v24 = vld [vmem:[#allocation32_spill] sm:$0xff]  ;;  %v4507_v55 = vld [vmem:[%s10188_s6 + $0x468] sm:$0xff] }
 0x424   :  { %10578 = vst [vmem:[#allocation29_spill] sm:$0xff] %v7213_v32  ;;  %v1017_v35 = vmax.f32 %v6701_v47, %v7213_v32  ;;  %v1625_v13 = vadd.f32 %v1621_v43, %v1599_v7  ;;  %1303 = vmatprep.subr.mxu1 %v6577_v49  ;;  %v1867_v52 = vadd.f32 %v1863_v41, %v1841_v62  ;;  %v10334_v38 = vmov 0.015625   ;;  %v10581_v19 = vld [vmem:[#allocation21_spill] sm:$0xff]  ;;  %v4506_v62 = vld [vmem:[%s10188_s6 + $0x460] sm:$0xff] }
 0x425   :  { %v1879_v0 = vsel %vm1877_vm0, %v10579_v27, %v1876_v17  ;;  %v1881_v45 = vsel %vm1877_vm0, %v1876_v17, %v10579_v27  ;;  %v1868_v48 = vadd.f32 %v1864_v10, %v1842_v6  ;;  %1304 = vmatpush1.msra.mxu1 %v6579_v40  ;;  %10580 = vst [vmem:[#allocation36_spill] sm:$0xff] %v7242_v21  ;;  %v1639_v2 = vmax.f32 %v6716_v30, 0.0  ;;  %v1915_v61 = vpop.permute.xlu1 %1914  ;;  %v10584_v30 = vld [vmem:[#allocation34_spill] sm:$0xff]  ;;  %v10589_v6 = vld [vmem:[#allocation27_spill] sm:$0xff] }
 0x426   :  { %v1889_v37 = vmul.f32 %v4500_v20, %v1879_v0  ;;  %v1890_v28 = vmul.f32 %v4501_v11, %v1881_v45  ;;  %v1422_v14 = vmax.f32 %v6577_v49, %v7205_v31  ;;  %1372 = vmatprep.subr.mxu1 %v7213_v32  ;;  %4435 = vmatmul.mubr.msk.f32.vlgmr.msra.gmra.mxu1 %vm10330_vm12, %v10334_v38  ;;  %v1018_v43 = vrot.slane %v1017_v35, 4 }
 0x427   :  { %v1637_v54 = vadd.f32 %v10581_v19, %v1625_v13  ;;  %v1624_v23 = vadd.f32 %v1620_v15, %v1598_v34  ;;  %v1903_v50 = vmul.f32 %v4505_v60, %v6606_v33  ;;  %1373 = vmatpush1.msra.mxu1 %v7242_v21  ;;  %v1918_v5 = vsel %vm10331_vm13, %v10582_v22, %v1915_v61 }
 0x428   :  { %v1893_v4 = vadd.f32 %v1889_v37, %v1867_v52  ;;  %v1894_v53 = vadd.f32 %v1890_v28, %v1868_v48  ;;  %v1920_v57 = vsel %vm10331_vm13, %v1915_v61, %v10582_v22  ;;  %1374 = vmatprep.subr.mxu1 %v6701_v47  ;;  %v10583_v16 = vmov 0.0  }
 0x429   :  { %1408 = vmatprep.mubr.f32.mxu1 %v10583_v16  ;;  %v1905_v33 = vadd.f32 %v10584_v30, %v1892_v42  ;;  %v1638_v46 = vmax.f32 %v10585_v36, 0.0  ;;  %v1928_v44 = vmul.f32 %v4508_v51, %v1918_v5  ;;  %v1929_v56 = vmul.f32 %v4509_v1, %v1920_v57  ;;  %1375 = vmatpush1.msra.mxu1 %v10586_v24  ;;  %v1913_v11 = vpop.permute.xlu1 %1912 }
 0x42a   :  { %v1906_v12 = vadd.f32 %v1902_v63, %v1893_v4  ;;  %v1907_v29 = vadd.f32 %v1903_v50, %v1894_v53  ;;  %v1423_v26 = vrot.slane %v1422_v14, 4  ;;  %v1904_v7 = vadd.f32 %v10589_v6, %v10588_v8  ;;  %4436 = vmatmul.mubr.msk.f32.vlgmr.msra.gmra.mxu1 %vm10330_vm12, %v10334_v38  ;;  %v154_v6 = vld [vmem:[%s10190_s8 + $0x2d8] sm:$0xff] }
 0x42b   :  { %v1641_v39 = vmax.f32 %v1637_v54, 0.0  ;;  %v1636_v42 = vadd.f32 %v10581_v19, %v1624_v23  ;;  %v1019_v20 = vmax.f32 %v1017_v35, %v1018_v43  ;;  %v7283_v63 = vmin.f32 %v1639_v2, 6.0  ;;  %1714 = vmatprep.mubr.f32.mxu1 %v10583_v16  ;;  %v7301_v54 = vpop.permute.xlu0 %1935 }
 0x42c   :  { %v1932_v41 = vadd.f32 %v1928_v44, %v1906_v12  ;;  %v1933_v34 = vadd.f32 %v1929_v56, %v1907_v29  ;;  %v1917_v10 = vsel %vm10331_vm13, %v7192_v58, %v1913_v11  ;;  %v1919_v17 = vsel %vm10331_vm13, %v1913_v11, %v7192_v58  ;;  %10593 = vst [vmem:[#allocation73_spill] sm:$0xff] %v7301_v54  ;;  %v157_v29 = vld [vmem:[%s10190_s8 + $0x2f0] sm:$0xff] }
 0x42d   :  { %10590 = vst [vmem:[#allocation63_spill] sm:$0xff] %v7283_v63  ;;  %v7292_v13 = vmin.f32 %v1641_v39, 6.0  ;;  %v1640_v60 = vmax.f32 %v1636_v42, 0.0  ;;  %v1926_v15 = vmul.f32 %v4506_v62, %v1917_v10  ;;  %v1927_v52 = vmul.f32 %v4507_v55, %v1919_v17  ;;  %v155_v55 = vld [vmem:[%s10190_s8 + $0x2e0] sm:$0xff]  ;;  %v150_v17 = vld [vmem:[%s10190_s8 + $0x2b8] sm:$0xff] }
 0x42e   :  { %v1945_v35 = vadd.f32 %v7270_v18, %v1933_v34  ;;  %v1944_v27 = vadd.f32 %v7270_v18, %v1932_v41  ;;  %v1424_v0 = vmax.f32 %v1422_v14, %v1423_v26  ;;  %v1020_v1 = vrot.slane %v1019_v20, 2  ;;  %v156_v26 = vld [vmem:[%s10190_s8 + $0x2e8] sm:$0xff] }
 0x42f   :  { %10591 = vst [vmem:[#allocation64_spill] sm:$0xff] %v7292_v13  ;;  %1678 = vmatprep.subr.mxu1 %v7292_v13  ;;  %v7297_v45 = vmin.f32 %v1640_v60, 6.0  ;;  %v1730_v48 = vmax.f32 %v7283_v63, %v7292_v13  ;;  %v1930_v37 = vadd.f32 %v1926_v15, %v1904_v7  ;;  %v1931_v28 = vadd.f32 %v1927_v52, %v1905_v33  ;;  %v153_v7 = vld [vmem:[%s10190_s8 + $0x2d0] sm:$0xff]  ;;  %v152_v34 = vld [vmem:[%s10190_s8 + $0x2c8] sm:$0xff] }
 0x430   :  { %v1949_v58 = vmax.f32 %v1945_v35, 0.0  ;;  %v1948_v51 = vmax.f32 %v1944_v27, 0.0  ;;  %v7304_v2 = vmin.f32 %v1638_v46, 6.0  ;;  %v1425_v43 = vrot.slane %v1424_v0, 2  ;;  %v158_v46 = vld [vmem:[%s10190_s8 + $0x2f8] sm:$0xff]  ;;  %v149_v60 = vld [vmem:[%s10190_s8 + $0x2b0] sm:$0xff] }
 0x431   :  { %10592 = vst [vmem:[#allocation72_spill] sm:$0xff] %v7297_v45  ;;  %1679 = vmatpush1.msra.mxu1 %v7297_v45  ;;  %v1731_v23 = vrot.slane %v1730_v48, 4  ;;  %v1943_v4 = vadd.f32 %v7301_v54, %v1931_v28  ;;  %v1942_v53 = vadd.f32 %v7301_v54, %v1930_v37  ;;  %v1021_v36 = vmax.f32 %v1019_v20, %v1020_v1  ;;  %v151_v20 = vld [vmem:[%s10190_s8 + $0x2c0] sm:$0xff]  ;;  %v148_v27 = vld [vmem:[%s10190_s8 + $0x2a8] sm:$0xff]  ;;  %v146_v28 = vld [vmem:[%s10190_s8 + $0x298] sm:$0xff] }
 0x432   :  { %10594 = vst [vmem:[#allocation40_spill] sm:$0xff] %v7304_v2  ;;  %1680 = vmatprep.subr.mxu1 %v7283_v63  ;;  %v7307_v14 = vmin.f32 %v1949_v58, 6.0  ;;  %v7309_v50 = vmin.f32 %v1948_v51, 6.0  ;;  %v1426_v44 = vmax.f32 %v1424_v0, %v1425_v43  ;;  %v147_v0 = vld [vmem:[%s10190_s8 + $0x2a0] sm:$0xff]  ;;  %v145_v58 = vld [vmem:[%s10190_s8 + $0x290] sm:$0xff]  ;;  %vm10599_vm11 = vmmov 0  }
 0x433   :  { %v1732_v61 = vmax.f32 %v1730_v48, %v1731_v23  ;;  %1681 = vmatpush1.msra.mxu1 %v7304_v2  ;;  %v1947_v22 = vmax.f32 %v1943_v4, 0.0  ;;  %v1946_v5 = vmax.f32 %v1942_v53, 0.0  ;;  %v1022_v8 = vrot.slane %v1021_v36, 1  ;;  %v144_v23 = vld [vmem:[%s10190_s8 + $0x288] sm:$0xff]  ;;  %v143_v53 = vld [vmem:[%s10190_s8 + $0x280] sm:$0xff]  ;;  %v141_v43 = vld [vmem:[%s10190_s8 + $0x270] sm:$0xff] }
 0x434   :  { %10595 = vst [vmem:[#allocation25_spill] sm:$0xff] %v7307_v14  ;;  %10596 = vst [vmem:[#allocation26_spill] sm:$0xff] %v7309_v50  ;;  %4473 = vmatmul.mubr.msk.f32.vlgmr.msra.gmra.mxu1 %vm10330_vm12, %v10334_v38  ;;  %1986 = vmatprep.subr.mxu1 %v7307_v14  ;;  %v1427_v39 = vrot.slane %v1426_v44, 1 }
 0x435   :  { %1987 = vmatpush1.msra.mxu1 %v7309_v50  ;;  %2022 = vmatprep.mubr.f32.mxu1 %v10583_v16  ;;  %v1733_v57 = vrot.slane %v1732_v61, 2  ;;  %v7319_v30 = vmin.f32 %v1947_v22, 6.0  ;;  %v7321_v33 = vmin.f32 %v1946_v5, 6.0  ;;  %v1023_v11 = vmax.f32 %v1021_v36, %v1022_v8  ;;  %v140_v22 = vld [vmem:[%s10190_s8 + $0x268] sm:$0xff]  ;;  %v139_v5 = vld [vmem:[%s10190_s8 + $0x260] sm:$0xff]  ;;  %v137_v36 = vld [vmem:[%s10190_s8 + $0x250] sm:$0xff] }
 0x436   :  { %v1428_v15 = vmax.f32 %v1426_v44, %v1427_v39  ;;  %v133_v44 = vld [vmem:[%s10190_s8 + $0x230] sm:$0xff]  ;;  %v128_v8 = vld [vmem:[%s10190_s8 + $0x208] sm:$0xff]  ;;  %v1010_v39 = vmax.f32 %v10586_v24, %v7242_v21 }
 0x437   :  { %10597 = vst [vmem:[#allocation42_spill] sm:$0xff] %v7319_v30  ;;  %10598 = vst [vmem:[#allocation58_spill] sm:$0xff] %v7321_v33  ;;  %1988 = vmatprep.subr.mxu1 %v7319_v30  ;;  %v2038_v12 = vmax.f32 %v7319_v30, %v7307_v14  ;;  %v1734_v56 = vmax.f32 %v1732_v61, %v1733_v57  ;;  %v142_v61 = vld [vmem:[%s10190_s8 + $0x278] sm:$0xff] }
 0x438   :  { %1989 = vmatpush1.msra.mxu1 %v7321_v33  ;;  %v1430_v48 = vmax.f32 %v1023_v11, %v1428_v15  ;;  %v138_v57 = vld [vmem:[%s10190_s8 + $0x258] sm:$0xff]  ;;  %v187_v11 = vld [vmem:[%s10190_s8 + $0x3e0] sm:$0xff]  ;;  %v185_v15 = vld [vmem:[%s10190_s8 + $0x3d0] sm:$0xff] }
 0x439   :  { %v2039_v62 = vrot.slane %v2038_v12, 4  ;;  %4510 = vmatmul.mubr.msk.f32.vlgmr.msra.gmra.mxu1 %vm10330_vm12, %v10334_v38  ;;  %2118 = vmatprep.subr.mxu1 %v158_v46  ;;  %v1735_v42 = vrot.slane %v1734_v56, 1  ;;  %v136_v46 = vld [vmem:[%s10190_s8 + $0x248] sm:$0xff] }
 0x43a   :  { %2119 = vmatpush1.msra.mxu1 %v157_v29  ;;  %v134_v29 = vld [vmem:[%s10190_s8 + $0x238] sm:$0xff] }
 0x43b   :  { %2120 = vmatprep.subr.mxu1 %v156_v26  ;;  %v2040_v41 = vmax.f32 %v2038_v12, %v2039_v62  ;;  %v1736_v52 = vmax.f32 %v1734_v56, %v1735_v42  ;;  %v135_v12 = vld [vmem:[%s10190_s8 + $0x240] sm:$0xff]  ;;  %v132_v56 = vld [vmem:[%s10190_s8 + $0x228] sm:$0xff]  ;;  %v130_v62 = vld [vmem:[%s10190_s8 + $0x218] sm:$0xff] }
 0x43c   :  { %2121 = vmatpush1.msra.mxu1 %v155_v55  ;;  %v131_v26 = vld [vmem:[%s10190_s8 + $0x220] sm:$0xff]  ;;  %v129_v55 = vld [vmem:[%s10190_s8 + $0x210] sm:$0xff] }
 0x43d   :  { %2122 = vmatprep.subr.mxu1 %v154_v6  ;;  %v2041_v10 = vrot.slane %v2040_v41, 2  ;;  %v1738_v51 = vmax.f32 %v1430_v48, %v1736_v52  ;;  %v127_v6 = vld [vmem:[%s10190_s8 + $0x200] sm:$0xff]  ;;  %v189_v42 = vld [vmem:[%s10190_s8 + $0x3f0] sm:$0xff]  ;;  %v184_v52 = vld [vmem:[%s10190_s8 + $0x3c8] sm:$0xff] }
 0x43e   :  { %2123 = vmatpush1.msra.mxu1 %v153_v7  ;;  %v190_v7 = vld [vmem:[%s10190_s8 + $0x3f8] sm:$0xff] }
 0x43f   :  { %2124 = vmatprep.subr.mxu1 %v152_v34  ;;  %v2042_v35 = vmax.f32 %v2040_v41, %v2041_v10  ;;  %v188_v41 = vld [vmem:[%s10190_s8 + $0x3e8] sm:$0xff]  ;;  %v1415_v34 = vmax.f32 %v6579_v40, %v7207_v59  ;;  %v186_v10 = vld [vmem:[%s10190_s8 + $0x3d8] sm:$0xff] }
 0x440   :  { %2125 = vmatpush1.msra.mxu1 %v151_v20  ;;  %v1723_v20 = vmax.f32 %v7304_v2, %v7297_v45  ;;  %v182_v48 = vld [vmem:[%s10190_s8 + $0x3b8] sm:$0xff] }
 0x441   :  { %2126 = vmatprep.subr.mxu1 %v150_v17  ;;  %v2043_v37 = vrot.slane %v2042_v35, 1  ;;  %v1011_v17 = vrot.slane %v1010_v39, 4 }
 0x442   :  { %2127 = vmatpush1.msra.mxu1 %v149_v60  ;;  %v2031_v60 = vmax.f32 %v7321_v33, %v7309_v50 }
 0x443   :  { %2128 = vmatprep.subr.mxu1 %v148_v27  ;;  %v2044_v1 = vmax.f32 %v2042_v35, %v2043_v37  ;;  %v1416_v35 = vrot.slane %v1415_v34, 4  ;;  %v1724_v27 = vrot.slane %v1723_v20, 4  ;;  %v1012_v37 = vmax.f32 %v1010_v39, %v1011_v17  ;;  %v112_v17 = vld [vmem:[%s10190_s8 + $0x188] sm:$0xff] }
 0x444   :  { %2129 = vmatpush1.msra.mxu1 %v147_v0  ;;  %v183_v0 = vld [vmem:[%s10190_s8 + $0x3c0] sm:$0xff] }
 0x445   :  { %2130 = vmatprep.subr.mxu1 %v146_v28  ;;  %v2046_v4 = vmax.f32 %v1738_v51, %v2044_v1  ;;  %v2032_v28 = vrot.slane %v2031_v60, 4  ;;  %v180_v51 = vld [vmem:[%s10190_s8 + $0x3a8] sm:$0xff]  ;;  %v1417_v1 = vmax.f32 %v1415_v34, %v1416_v35  ;;  %v169_v34 = vld [vmem:[%s10190_s8 + $0x350] sm:$0xff] }
 0x446   :  { %2131 = vmatpush1.msra.mxu1 %v145_v58  ;;  %v181_v58 = vld [vmem:[%s10190_s8 + $0x3b0] sm:$0xff] }
 0x447   :  { %2132 = vmatprep.subr.mxu1 %v144_v23  ;;  %2182 = vmatprep.mubr.f32.mxu1 %v2046_v4  ;;  %v1725_v23 = vmax.f32 %v1723_v20, %v1724_v27  ;;  %v179_v4 = vld [vmem:[%s10190_s8 + $0x3a0] sm:$0xff] }
 0x448   :  { %2133 = vmatpush1.msra.mxu1 %v143_v53  ;;  %v178_v53 = vld [vmem:[%s10190_s8 + $0x398] sm:$0xff]  ;;  %v111_v27 = vld [vmem:[%s10190_s8 + $0x180] sm:$0xff] }
 0x449   :  { %2134 = vmatprep.subr.mxu1 %v142_v61  ;;  %v1013_v61 = vrot.slane %v1012_v37, 2 }
 0x44a   :  { %2135 = vmatpush1.msra.mxu1 %v141_v43  ;;  %v177_v43 = vld [vmem:[%s10190_s8 + $0x390] sm:$0xff] }
 0x44b   :  { %2136 = vmatprep.subr.mxu1 %v140_v22  ;;  %v2033_v22 = vmax.f32 %v2031_v60, %v2032_v28  ;;  %v168_v60 = vld [vmem:[%s10190_s8 + $0x348] sm:$0xff] }
 0x44c   :  { %2137 = vmatpush1.msra.mxu1 %v139_v5  ;;  %v176_v5 = vld [vmem:[%s10190_s8 + $0x388] sm:$0xff] }
 0x44d   :  { %2138 = vmatprep.subr.mxu1 %v138_v57  ;;  %v1418_v57 = vrot.slane %v1417_v1, 2 }
 0x44e   :  { %2139 = vmatpush1.msra.mxu1 %v137_v36  ;;  %v175_v36 = vld [vmem:[%s10190_s8 + $0x380] sm:$0xff] }
 0x44f   :  { %2140 = vmatprep.subr.mxu1 %v136_v46  ;;  %v1726_v46 = vrot.slane %v1725_v23, 2  ;;  %v1419_v39 = vmax.f32 %v1417_v1, %v1418_v57  ;;  %v163_v1 = vld [vmem:[%s10190_s8 + $0x320] sm:$0xff]  ;;  %v109_v57 = vld [vmem:[%s10190_s8 + $0x170] sm:$0xff] }
 0x450   :  { %2141 = vmatpush1.msra.mxu1 %v135_v12  ;;  %v174_v12 = vld [vmem:[%s10190_s8 + $0x378] sm:$0xff] }
 0x451   :  { %2142 = vmatprep.subr.mxu1 %v134_v29  ;;  %v117_v29 = vld [vmem:[%s10190_s8 + $0x1b0] sm:$0xff] }
 0x452   :  { %2143 = vmatpush1.msra.mxu1 %v133_v44  ;;  %v116_v44 = vld [vmem:[%s10190_s8 + $0x1a8] sm:$0xff]  ;;  %2088 = vmatpush2.msra.mxu0 %v117_v29  ;;  %v107_v29 = vld [vmem:[%s10190_s8 + $0x160] sm:$0xff] }
 0x453   :  { %2144 = vmatprep.subr.mxu1 %v132_v56  ;;  %v173_v56 = vld [vmem:[%s10190_s8 + $0x370] sm:$0xff]  ;;  %2089 = vmatprep.subr.mxu0 %v116_v44  ;;  %v106_v44 = vld [vmem:[%s10190_s8 + $0x158] sm:$0xff] }
 0x454   :  { %2145 = vmatpush1.msra.mxu1 %v131_v26  ;;  %v1014_v26 = vmax.f32 %v1012_v37, %v1013_v61  ;;  %v165_v37 = vld [vmem:[%s10190_s8 + $0x330] sm:$0xff] }
 0x455   :  { %2146 = vmatprep.subr.mxu1 %v130_v62  ;;  %v2034_v62 = vrot.slane %v2033_v22, 2  ;;  %v161_v61 = vld [vmem:[%s10190_s8 + $0x310] sm:$0xff] }
 0x456   :  { %2147 = vmatpush1.msra.mxu1 %v129_v55  ;;  %v172_v55 = vld [vmem:[%s10190_s8 + $0x368] sm:$0xff]  ;;  %v1015_v20 = vrot.slane %v1014_v26, 1 }
 0x457   :  { %2148 = vmatprep.subr.mxu1 %v128_v8  ;;  %v115_v8 = vld [vmem:[%s10190_s8 + $0x1a0] sm:$0xff] }
 0x458   :  { %2149 = vmatpush1.msra.mxu1 %v127_v6  ;;  %v114_v6 = vld [vmem:[%s10190_s8 + $0x198] sm:$0xff]  ;;  %2090 = vmatpush2.msra.mxu0 %v115_v8  ;;  %v1016_v28 = vmax.f32 %v1014_v26, %v1015_v20  ;;  %v95_v20 = vld [vmem:[%s10190_s8 + $0x100] sm:$0xff] }
 0x459   :  { %2150 = vmatprep.subr.mxu1 %v190_v7  ;;  %v171_v7 = vld [vmem:[%s10190_s8 + $0x360] sm:$0xff]  ;;  %2091 = vmatprep.subr.mxu0 %v114_v6  ;;  %v102_v8 = vld [vmem:[%s10190_s8 + $0x138] sm:$0xff]  ;;  %v101_v6 = vld [vmem:[%s10190_s8 + $0x130] sm:$0xff] }
 0x45a   :  { %2151 = vmatpush2.msra.mxu1 %v189_v42  ;;  %v1727_v42 = vmax.f32 %v1725_v23, %v1726_v46  ;;  %v159_v46 = vld [vmem:[%s10190_s8 + $0x300] sm:$0xff] }
 0x45b   :  { %2152 = vmatprep.subr.mxu1 %v188_v41  ;;  %v170_v41 = vld [vmem:[%s10190_s8 + $0x358] sm:$0xff] }
 0x45c   :  { %2153 = vmatpush2.msra.mxu1 %v187_v11  ;;  %v2035_v11 = vmax.f32 %v2033_v22, %v2034_v62  ;;  %v1728_v35 = vrot.slane %v1727_v42, 1  ;;  %v104_v62 = vld [vmem:[%s10190_s8 + $0x148] sm:$0xff] }
 0x45d   :  { %2154 = vmatprep.subr.mxu1 %v186_v10  ;;  %v113_v10 = vld [vmem:[%s10190_s8 + $0x190] sm:$0xff] }
 0x45e   :  { %2155 = vmatpush2.msra.mxu1 %v185_v15  ;;  %2092 = vmatpush2.msra.mxu0 %v113_v10  ;;  %v167_v15 = vld [vmem:[%s10190_s8 + $0x340] sm:$0xff]  ;;  %v7605_v10 = vld [vmem:[%s10182_s0 + $0xe8] sm:$0xff] }
 0x45f   :  { %2156 = vmatprep.subr.mxu1 %v184_v52  ;;  %v1420_v52 = vrot.slane %v1419_v39, 1  ;;  %2093 = vmatprep.subr.mxu0 %v112_v17  ;;  %v7610_v17 = vld [vmem:[%s10182_s0 + $0xe0] sm:$0xff] }
 0x460   :  { %2157 = vmatpush2.msra.mxu1 %v183_v0  ;;  %v110_v0 = vld [vmem:[%s10190_s8 + $0x178] sm:$0xff]  ;;  %2094 = vmatpush2.msra.mxu0 %v111_v27  ;;  %v2498_v27 = vmax.f32 %v7610_v17, %v7605_v10 }
 0x461   :  { %2158 = vmatprep.subr.mxu1 %v182_v48  ;;  %v166_v48 = vld [vmem:[%s10190_s8 + $0x338] sm:$0xff]  ;;  %2095 = vmatprep.subr.mxu0 %v110_v0  ;;  %v1421_v23 = vmax.f32 %v1419_v39, %v1420_v52  ;;  %v99_v39 = vld [vmem:[%s10190_s8 + $0x120] sm:$0xff]  ;;  %v7625_v52 = vld [vmem:[%s10182_s0 + $0xc8] sm:$0xff] }
 0x462   :  { %2159 = vmatpush2.msra.mxu1 %v181_v58  ;;  %v2036_v58 = vrot.slane %v2035_v11, 1  ;;  %2096 = vmatpush2.msra.mxu0 %v109_v57  ;;  %v7634_v0 = vld [vmem:[%s10182_s0 + $0xc0] sm:$0xff]  ;;  %v4515_v57 = vld [vmem:[%s10182_s0 + $0x90] sm:$0xff] }
 0x463   :  { %2160 = vmatprep.subr.mxu1 %v180_v51  ;;  %v164_v51 = vld [vmem:[%s10190_s8 + $0x328] sm:$0xff]  ;;  %2499 = vmax.xlane.f32.xlu0 %v2498_v27 }
 0x464   :  { %2161 = vmatpush2.msra.mxu1 %v179_v4  ;;  %v1729_v4 = vmax.f32 %v1727_v42, %v1728_v35  ;;  %v2037_v22 = vmax.f32 %v2035_v11, %v2036_v58  ;;  %v98_v42 = vld [vmem:[%s10190_s8 + $0x118] sm:$0xff]  ;;  %v10600_v11 = vmov 0.00390625  }
 0x465   :  { %2162 = vmatprep.subr.mxu1 %v178_v53  ;;  %v162_v53 = vld [vmem:[%s10190_s8 + $0x318] sm:$0xff] }
 0x466   :  { %2163 = vmatpush2.msra.mxu1 %v177_v43  ;;  %v1429_v43 = vmax.f32 %v1016_v28, %v1421_v23  ;;  %v2492_v28 = vmax.f32 %v7634_v0, %v7625_v52  ;;  %v7663_v23 = vld [vmem:[%s10182_s0 + $0xb8] sm:$0xff] }
 0x467   :  { %2164 = vmatprep.subr.mxu1 %v176_v5  ;;  %v160_v5 = vld [vmem:[%s10190_s8 + $0x308] sm:$0xff] }
 0x468   :  { %2165 = vmatpush2.msra.mxu1 %v175_v36  ;;  %v108_v36 = vld [vmem:[%s10190_s8 + $0x168] sm:$0xff] }
 0x469   :  { %2166 = vmatprep.subr.mxu1 %v174_v12  ;;  %v1737_v12 = vmax.f32 %v1429_v43, %v1729_v4  ;;  %2097 = vmatprep.subr.mxu0 %v108_v36  ;;  %v7668_v4 = vld [vmem:[%s10182_s0 + $0xb0] sm:$0xff]  ;;  %v4514_v43 = vld [vmem:[%s10182_s0 + $0x88] sm:$0xff] }
 0x46a   :  { %2167 = vmatpush2.msra.mxu1 %v173_v56  ;;  %v105_v56 = vld [vmem:[%s10190_s8 + $0x150] sm:$0xff]  ;;  %2098 = vmatpush2.msra.mxu0 %v107_v29 }
 0x46b   :  { %2168 = vmatprep.subr.mxu1 %v172_v55  ;;  %v2045_v26 = vmax.f32 %v1737_v12, %v2037_v22  ;;  %2099 = vmatprep.subr.mxu0 %v106_v44  ;;  %v103_v55 = vld [vmem:[%s10190_s8 + $0x140] sm:$0xff] }
 0x46c   :  { %2169 = vmatpush2.msra.mxu1 %v171_v7  ;;  %2100 = vmatpush2.msra.mxu0 %v105_v56  ;;  %v100_v7 = vld [vmem:[%s10190_s8 + $0x128] sm:$0xff]  ;;  %v4513_v22 = vld [vmem:[%s10182_s0 + $0x80] sm:$0xff] }
 0x46d   :  { %2170 = vmatprep.subr.mxu1 %v170_v41  ;;  %2101 = vmatprep.subr.mxu0 %v104_v62  ;;  %v97_v41 = vld [vmem:[%s10190_s8 + $0x110] sm:$0xff]  ;;  %v2480_v36 = vmax.f32 %v4513_v22, %v4514_v43 }
 0x46e   :  { %2171 = vmatpush2.msra.mxu1 %v169_v34  ;;  %2102 = vmatpush2.msra.mxu0 %v103_v55  ;;  %v96_v34 = vld [vmem:[%s10190_s8 + $0x108] sm:$0xff] }
 0x46f   :  { %2172 = vmatprep.subr.mxu1 %v168_v60  ;;  %2103 = vmatprep.subr.mxu0 %v102_v8  ;;  %v7615_v60 = vld [vmem:[%s10182_s0 + $0xf8] sm:$0xff] }
 0x470   :  { %2173 = vmatpush2.msra.mxu1 %v167_v15  ;;  %2104 = vmatpush2.msra.mxu0 %v101_v6  ;;  %v7620_v15 = vld [vmem:[%s10182_s0 + $0xf0] sm:$0xff] }
 0x471   :  { %2174 = vmatprep.subr.mxu1 %v166_v48  ;;  %2105 = vmatprep.subr.mxu0 %v100_v7  ;;  %v2501_v35 = vmax.f32 %v7620_v15, %v7615_v60  ;;  %v7639_v48 = vld [vmem:[%s10182_s0 + $0xd8] sm:$0xff] }
 0x472   :  { %2175 = vmatpush2.msra.mxu1 %v165_v37  ;;  %2106 = vmatpush2.msra.mxu0 %v99_v39  ;;  %v7644_v37 = vld [vmem:[%s10182_s0 + $0xd0] sm:$0xff] }
 0x473   :  { %2176 = vmatprep.subr.mxu1 %v164_v51  ;;  %2107 = vmatprep.subr.mxu0 %v98_v42  ;;  %v2495_v58 = vmax.f32 %v7644_v37, %v7639_v48  ;;  %v7653_v51 = vld [vmem:[%s10182_s0 + $0xa8] sm:$0xff] }
 0x474   :  { %2177 = vmatpush2.msra.mxu1 %v163_v1  ;;  %2108 = vmatpush2.msra.mxu0 %v97_v41  ;;  %v7658_v1 = vld [vmem:[%s10182_s0 + $0xa0] sm:$0xff] }
 0x475   :  { %2178 = vmatprep.subr.mxu1 %v162_v53  ;;  %2109 = vmatprep.subr.mxu0 %v96_v34  ;;  %v2486_v53 = vmax.f32 %v7658_v1, %v7653_v51 }
 0x476   :  { %2179 = vmatpush2.msra.mxu1 %v161_v61  ;;  %2110 = vmatpush2.msra.mxu0 %v95_v20  ;;  %v2489_v61 = vmax.f32 %v7668_v4, %v7663_v23 }
 0x477   :  { %2180 = vmatprep.subr.mxu1 %v160_v5  ;;  %4801 = vmatprep.subr.mxu0 %v10600_v11  ;;  %v4516_v5 = vld [vmem:[%s10182_s0 + $0x98] sm:$0xff] }
 0x478   :  { %2181 = vmatpush2.msra.mxu1 %v159_v46  ;;  %2502 = vmax.xlane.f32.xlu1 %v2501_v35  ;;  %v2483_v46 = vmax.f32 %v4515_v57, %v4516_v5 }
 0x479   :  { %2183 = vmatmul.mubr.f32.vlgmr.msra.gmra.mxu1 %v2045_v26  ;;  %4908 = vmatprep.subr.mxu1 %v10583_v16 }
 0x47a   :  { %4924 = vmatprep.mubr.msk.f32.mxu1 %vm10599_vm11, %v10583_v16  ;;  %2496 = vmax.xlane.f32.xlu0 %v2495_v58  ;;  %vm10603_vm11 = vcmask 7168  }
 0x47b   :  { %vm10604_vm12 = vmmov %vm10603_vm11 }
 0x47c   :  { %2493 = vmax.xlane.f32.xlu1 %v2492_v28  ;;  %vm10605_vm13 = vmmov %vm10603_vm11 }
 0x47d   :  { %vm10606_vm2 = vmmov %vm10603_vm11 }
 0x47e   :  { %2490 = vmax.xlane.f32.xlu0 %v2489_v61 }
 0x480   :  { %2487 = vmax.xlane.f32.xlu1 %v2486_v53 }
 0x482   :  { %2484 = vmax.xlane.f32.xlu0 %v2483_v46 }
 0x484   :  { %2481 = vmax.xlane.f32.xlu1 %v2480_v36 }
 0x4e6   :  { %v1339_v12 = vpop.f32.mrf.mxu1 }
 0x4e8   :  { %v1341_v29 = vpop.f32.mrf.mxu1 }
 0x4ea   :  { %v1410_v44 = vpop.f32.mrf.mxu1 }
 0x4eb   :  { %v1411_v62 = vadd.f32 %v1410_v44, %v1339_v12 }
 0x4ec   :  { %v1412_v56 = vpop.f32.mrf.mxu1 }
 0x4ed   :  { %v1413_v8 = vadd.f32 %v1412_v56, %v1341_v29 }
 0x4f4   :  { %v1716_v26 = vpop.f32.mrf.mxu1 }
 0x4f5   :  { %v1721_v39 = vadd.f32 %v1716_v26, %v1411_v62 }
 0x4f6   :  { %v1718_v55 = vpop.f32.mrf.mxu1 }
 0x4f7   :  { %v1722_v7 = vadd.f32 %v1718_v55, %v1413_v8 }
 0x4f9   :  { %v2024_v6 = vpop.f32.mrf.mxu1 }
 0x4fa   :  { %v2029_v34 = vadd.f32 %v2024_v6, %v1721_v39 }
 0x4fb   :  { %v2026_v42 = vpop.f32.mrf.mxu1 }
 0x4fc   :  { %v2030_v41 = vadd.f32 %v2026_v42, %v1722_v7 }
 0x4fe   :  { %2111 = vmatprep.mubr.f32.mxu0 %v2030_v41 }
 0x4ff   :  { %2112 = vmatmul.mubr.f32.vlgmr.msra.gmra.mxu0 %v2029_v34 }
 0x500   :  { %4802 = vmatpush3.msra.mxu0 %v10600_v11  ;;  %2439 = vmatprep.mubr.f32.mxu0 %v4514_v43 }
 0x501   :  { %4803 = vmatprep.subr.mxu0 %v10600_v11 }
 0x502   :  { %4804 = vmatpush3.msra.mxu0 %v10600_v11 }
 0x503   :  { %4805 = vmatprep.subr.mxu0 %v10600_v11 }
 0x504   :  { %4806 = vmatpush3.msra.mxu0 %v10600_v11 }
 0x505   :  { %4807 = vmatprep.subr.mxu0 %v10600_v11 }
 0x506   :  { %4808 = vmatpush3.msra.mxu0 %v10600_v11 }
 0x507   :  { %4809 = vmatprep.subr.mxu0 %v10600_v11 }
 0x508   :  { %4810 = vmatpush3.msra.mxu0 %v10600_v11 }
 0x509   :  { %4811 = vmatprep.subr.mxu0 %v10600_v11 }
 0x50a   :  { %4812 = vmatpush3.msra.mxu0 %v10600_v11 }
 0x50b   :  { %4813 = vmatprep.subr.mxu0 %v10600_v11 }
 0x50c   :  { %4814 = vmatpush3.msra.mxu0 %v10600_v11 }
 0x50d   :  { %4815 = vmatprep.subr.mxu0 %v10600_v11 }
 0x50e   :  { %4816 = vmatpush3.msra.mxu0 %v10600_v11 }
 0x50f   :  { %4817 = vmatprep.subr.mxu0 %v10600_v11 }
 0x510   :  { %4818 = vmatpush3.msra.mxu0 %v10600_v11 }
 0x511   :  { %4819 = vmatprep.subr.mxu0 %v10600_v11 }
 0x512   :  { %4820 = vmatpush3.msra.mxu0 %v10600_v11 }
 0x513   :  { %4821 = vmatprep.subr.mxu0 %v10600_v11 }
 0x514   :  { %4822 = vmatpush3.msra.mxu0 %v10600_v11 }
 0x515   :  { %4823 = vmatprep.subr.mxu0 %v10600_v11 }
 0x516   :  { %4824 = vmatpush3.msra.mxu0 %v10600_v11 }
 0x517   :  { %4825 = vmatprep.subr.mxu0 %v10600_v11 }
 0x518   :  { %4826 = vmatpush3.msra.mxu0 %v10600_v11 }
 0x519   :  { %4827 = vmatprep.subr.mxu0 %v10600_v11 }
 0x51a   :  { %4828 = vmatpush3.msra.mxu0 %v10600_v11 }
 0x51b   :  { %4829 = vmatprep.subr.mxu0 %v10600_v11 }
 0x51c   :  { %4830 = vmatpush3.msra.mxu0 %v10600_v11 }
 0x51d   :  { %4831 = vmatprep.subr.mxu0 %v10600_v11 }
 0x51e   :  { %4832 = vmatpush3.msra.mxu0 %v10600_v11 }
 0x51f   :  { %2440 = vmatmul.mubr.f32.vlgmr.msra.gmra.mxu0 %v4513_v22 }
 0x520   :  { %2444 = vmatprep.mubr.f32.mxu0 %v4516_v5 }
 0x523   :  { %2445 = vmatmul.mubr.f32.gmra.mxu0 %v4515_v57 }
 0x524   :  { %2449 = vmatprep.mubr.f32.mxu0 %v7653_v51 }
 0x527   :  { %2450 = vmatmul.mubr.f32.gmra.mxu0 %v7658_v1  ;;  %v2500_v1 = vpop.xlane.xlu0 %2499 }
 0x528   :  { %2454 = vmatprep.mubr.f32.mxu0 %v7663_v23  ;;  %v2503_v23 = vpop.xlane.xlu1 %2502 }
 0x52b   :  { %2455 = vmatmul.mubr.f32.gmra.mxu0 %v7668_v4  ;;  %v2497_v61 = vpop.xlane.xlu0 %2496 }
 0x52c   :  { %2459 = vmatprep.mubr.f32.mxu0 %v7625_v52  ;;  %v2494_v57 = vpop.xlane.xlu1 %2493 }
 0x52f   :  { %2460 = vmatmul.mubr.f32.gmra.mxu0 %v7634_v0  ;;  %v2491_v44 = vpop.xlane.xlu0 %2490 }
 0x530   :  { %2464 = vmatprep.mubr.f32.mxu0 %v7639_v48  ;;  %v2488_v62 = vpop.xlane.xlu1 %2487 }
 0x533   :  { %2465 = vmatmul.mubr.f32.gmra.mxu0 %v7644_v37  ;;  %v2485_v39 = vpop.xlane.xlu0 %2484 }
 0x534   :  { %2469 = vmatprep.mubr.f32.mxu0 %v7605_v10  ;;  %v2482_v34 = vpop.xlane.xlu1 %2481 }
 0x537   :  { %2470 = vmatmul.mubr.f32.gmra.mxu0 %v7610_v17 }
 0x538   :  { %2474 = vmatprep.mubr.f32.mxu0 %v7615_v60 }
 0x53b   :  { %2475 = vmatmul.mubr.f32.gmra.mxu0 %v7620_v15 }
 0x53c   :  { %3384 = vmatprep.mubr.f32.mxu0 %v10583_v16 }
 0x5bf   :  { %v7730_v20 = vpop.f32.mrf.mxu0 }
 0x5c0   :  { %10601 = vst [vmem:[#allocation51_spill] sm:$0xff] %v7730_v20 }
 0x5c1   :  { %v7732_v11 = vpop.f32.mrf.mxu0 }
 0x5c2   :  { %10602 = vst [vmem:[#allocation52_spill] sm:$0xff] %v7732_v11 }
 0x5df   :  { %v4833_v52 = vpop.f32.mrf.mxu0 }
 0x5e1   :  { %v4834_v35 = vpop.f32.mrf.mxu0 }
 0x5e2   :  { %v4835_v42 = vadd.f32 %v4834_v35, %v4833_v52  ;;  %v5067_v52 = vld [vmem:[%s10184_s2] sm:$0xf]  ;;  %s10644_s2 = smov 113  }
 0x5e3   :  { %v4836_v27 = vpop.f32.mrf.mxu0  ;;  %v5068_v35 = vld [vmem:[%s10185_s3] sm:$0xff] }
 0x5e5   :  { %v4837_v0 = vpop.f32.mrf.mxu0 }
 0x5e6   :  { %v4838_v6 = vadd.f32 %v4837_v0, %v4836_v27  ;;  %v2504_v27 = vsel %vm10606_vm2, %v4835_v42, %v2482_v34  ;;  %v7757_v0 = vpop.f32.mrf.mxu1 }
 0x5e7   :  { %v4839_v48 = vpop.f32.mrf.mxu0  ;;  %10612 = vst [vmem:[#allocation48_spill] sm:$0xff] %v7757_v0 }
 0x5e9   :  { %v4840_v37 = vpop.f32.mrf.mxu0 }
 0x5ea   :  { %v4841_v55 = vadd.f32 %v4840_v37, %v4839_v48  ;;  %v7759_v37 = vpop.f32.mrf.mxu1 }
 0x5eb   :  { %v4842_v28 = vpop.f32.mrf.mxu0  ;;  %10613 = vst [vmem:[#allocation50_spill] sm:$0xff] %v7759_v37 }
 0x5ed   :  { %v4843_v10 = vpop.f32.mrf.mxu0 }
 0x5ee   :  { %v4844_v56 = vadd.f32 %v4843_v10, %v4842_v28 }
 0x5ef   :  { %v4845_v58 = vpop.f32.mrf.mxu0 }
 0x5f1   :  { %v4846_v17 = vpop.f32.mrf.mxu0 }
 0x5f2   :  { %v4847_v12 = vadd.f32 %v4846_v17, %v4845_v58 }
 0x5f3   :  { %v4848_v51 = vpop.f32.mrf.mxu0 }
 0x5f4   :  { %v2508_v8 = vsel %vm10606_vm2, %v4847_v12, %v2494_v57  ;;  %v5072_v57 = vld [vmem:[%s10185_s3 + $0x20] sm:$0xff]  ;;  %v4534_v12 = vld [vmem:[%s10183_s1 + $0xa8] sm:$0xff] }
 0x5f5   :  { %v4849_v60 = vpop.f32.mrf.mxu0 }
 0x5f6   :  { %v4850_v36 = vadd.f32 %v4849_v60, %v4848_v51  ;;  %v4544_v51 = vld [vmem:[%s10183_s1 + $0xf8] sm:$0xff]  ;;  %v4543_v60 = vld [vmem:[%s10183_s1 + $0xf0] sm:$0xff] }
 0x5f7   :  { %v4851_v15 = vpop.f32.mrf.mxu0 }
 0x5f8   :  { %v2509_v26 = vsel %vm10605_vm13, %v4850_v36, %v2497_v61  ;;  %vm10609_vm13 = vmmov %vm10606_vm2  ;;  %v4539_v61 = vld [vmem:[%s10183_s1 + $0xd0] sm:$0xff]  ;;  %v4536_v36 = vld [vmem:[%s10183_s1 + $0xb8] sm:$0xff] }
 0x5f9   :  { %v4852_v4 = vpop.f32.mrf.mxu0  ;;  %v2505_v48 = vsel %vm10609_vm13, %v4838_v6, %v2485_v39  ;;  %vm10614_vm13 = vcmask 1043456   ;;  %v4529_v6 = vld [vmem:[%s10183_s1 + $0x80] sm:$0xff]  ;;  %v5077_v39 = vld [vmem:[%s10186_s4 + $0x8] sm:$0xff] }
 0x5fa   :  { %v4853_v22 = vadd.f32 %v4852_v4, %v4851_v15  ;;  %v5069_v15 = vld [vmem:[%s10185_s3 + $0x8] sm:$0xff]  ;;  %v5070_v4 = vld [vmem:[%s10185_s3 + $0x10] sm:$0xff] }
 0x5fb   :  { %v4854_v53 = vpop.f32.mrf.mxu0 }
 0x5fc   :  { %v2510_v29 = vsel %vm10604_vm12, %v4853_v22, %v2500_v1  ;;  %vm10608_vm12 = vmmov %vm10606_vm2  ;;  %v4542_v1 = vld [vmem:[%s10183_s1 + $0xe8] sm:$0xff]  ;;  %v5071_v22 = vld [vmem:[%s10185_s3 + $0x18] sm:$0xff] }
 0x5fd   :  { %v4855_v43 = vpop.f32.mrf.mxu0  ;;  %v2506_v41 = vsel %vm10608_vm12, %v4841_v55, %v2488_v62  ;;  %vm10611_vm12 = vcmask 31744   ;;  %v4531_v62 = vld [vmem:[%s10183_s1 + $0x90] sm:$0xff]  ;;  %v4530_v55 = vld [vmem:[%s10183_s1 + $0x88] sm:$0xff] }
 0x5fe   :  { %v4856_v5 = vadd.f32 %v4855_v43, %v4854_v53  ;;  %v4540_v53 = vld [vmem:[%s10183_s1 + $0xd8] sm:$0xff]  ;;  %v4538_v43 = vld [vmem:[%s10183_s1 + $0xc8] sm:$0xff] }
 0x600   :  { %v2511_v46 = vsel %vm10603_vm11, %v4856_v5, %v2503_v23  ;;  %vm10607_vm11 = vmmov %vm10606_vm2  ;;  %v4541_v23 = vld [vmem:[%s10183_s1 + $0xe0] sm:$0xff] }
 0x601   :  { %4909 = vmatpush3.msra.mxu1 %v2511_v46  ;;  %v2507_v7 = vsel %vm10607_vm11, %v4844_v56, %v2491_v44  ;;  %vm10610_vm11 = vcmask 523264   ;;  %vm10615_vm2 = vmmov %vm10614_vm13  ;;  %v4537_v5 = vld [vmem:[%s10183_s1 + $0xc0] sm:$0xff]  ;;  %v4535_v46 = vld [vmem:[%s10183_s1 + $0xb0] sm:$0xff] }
 0x602   :  { %4910 = vmatprep.subr.mxu1 %v10583_v16  ;;  %v4533_v44 = vld [vmem:[%s10183_s1 + $0xa0] sm:$0xff]  ;;  %v5074_v56 = vld [vmem:[%s10185_s3 + $0x30] sm:$0xff] }
 0x603   :  { %4911 = vmatpush3.msra.mxu1 %v2510_v29  ;;  %v5073_v29 = vld [vmem:[%s10185_s3 + $0x28] sm:$0xff] }
 0x604   :  { %4912 = vmatprep.subr.mxu1 %v10583_v16 }
 0x605   :  { %4913 = vmatpush3.msra.mxu1 %v2509_v26  ;;  %v4532_v26 = vld [vmem:[%s10183_s1 + $0x98] sm:$0xff]  ;;  %s10634_s1 = smov 85  }
 0x606   :  { %4914 = vmatprep.subr.mxu1 %v10583_v16 }
 0x607   :  { %4915 = vmatpush3.msra.mxu1 %v2508_v8  ;;  %v5075_v8 = vld [vmem:[%s10185_s3 + $0x38] sm:$0xff]  ;;  %s10646_s3 = smov 123  }
 0x608   :  { %4916 = vmatprep.subr.mxu1 %v10583_v16 }
 0x609   :  { %4917 = vmatpush3.msra.mxu1 %v2507_v7  ;;  %v5076_v7 = vld [vmem:[%s10186_s4] sm:$0xff]  ;;  %s10635_s4 = smov 1  }
 0x60a   :  { %4918 = vmatprep.subr.mxu1 %v10583_v16 }
 0x60b   :  { %4919 = vmatpush3.msra.mxu1 %v2506_v41 }
 0x60c   :  { %4920 = vmatprep.subr.mxu1 %v10583_v16 }
 0x60d   :  { %4921 = vmatpush3.msra.mxu1 %v2505_v48 }
 0x60e   :  { %4922 = vmatprep.subr.mxu1 %v10583_v16 }
 0x60f   :  { %4923 = vmatpush3.msra.mxu1 %v2504_v27 }
 0x610   :  { %4925 = vmatmul.mubr.msk.f32.vlgmr.msra.gmra.mxu1 %vm10610_vm11, %v5067_v52  ;;  %vm10616_vm11 = vmmov %vm10611_vm12 }
 0x611   :  { %4929 = vmatprep.mubr.msk.f32.mxu1 %vm10611_vm12, %v5068_v35  ;;  %vm10617_vm12 = vmmov %vm10616_vm11 }
 0x6d0   :  { %v2578_v28 = vpop.f32.mrf.mxu1 }
 0x6d1   :  { %v2582_v10 = vmax.f32 %v2578_v28, 0.0 }
 0x6d2   :  { %v4926_v58 = vpop.f32.mrf.mxu1 }
 0x6d3   :  { %v2583_v17 = vmin.f32 %v2582_v10, 6.0  ;;  %v10633_v58 = vld [vmem:[#allocation14_spill] sm:$0xff] }
 0x6d5   :  { %4927 = vmatprep.subr.msk.mxu1 %vm10614_vm13, %v2583_v17  ;;  %vm10618_vm13 = vmmov %vm10616_vm11 }
 0x6d6   :  { %4928 = vmatpush3.msk.msra.mxu1 %vm10615_vm2, %v2583_v17  ;;  %vm10619_vm2 = vmmov %vm10616_vm11 }
 0x6d7   :  { %4930 = vmatmul.mubr.msk.f32.vlgmr.msra.gmra.mxu1 %vm10616_vm11, %v5069_v15  ;;  %2796 = vmatprep.subr.mxu1 %v4544_v51  ;;  %vm10620_vm11 = vmmov %vm10619_vm2 }
 0x6d8   :  { %2797 = vmatpush1.msra.mxu1 %v4543_v60  ;;  %4932 = vmatprep.mubr.msk.f32.mxu1 %vm10617_vm12, %v5070_v4  ;;  %vm10621_vm12 = vmmov %vm10619_vm2 }
 0x6d9   :  { %2798 = vmatprep.subr.mxu1 %v4542_v1 }
 0x6da   :  { %2799 = vmatpush1.msra.mxu1 %v4541_v23 }
 0x6db   :  { %4933 = vmatmul.mubr.msk.f32.gmra.mxu1 %vm10618_vm13, %v5071_v22  ;;  %2800 = vmatprep.subr.mxu1 %v4540_v53  ;;  %vm10622_vm13 = vmmov %vm10619_vm2 }
 0x6dc   :  { %2801 = vmatpush1.msra.mxu1 %v4539_v61  ;;  %4935 = vmatprep.mubr.msk.f32.mxu1 %vm10619_vm2, %v5072_v57  ;;  %vm10623_vm2 = vcmask 523264   ;;  %v10647_v61 = vld [vmem:[#allocation16_spill] sm:$0xff] }
 0x6dd   :  { %2802 = vmatprep.subr.mxu1 %v4538_v43 }
 0x6de   :  { %2803 = vmatpush1.msra.mxu1 %v4537_v5 }
 0x6df   :  { %4936 = vmatmul.mubr.msk.f32.gmra.mxu1 %vm10620_vm11, %v5073_v29  ;;  %2804 = vmatprep.subr.mxu1 %v4536_v36  ;;  %vm10624_vm11 = vmmov %vm10623_vm2 }
 0x6e0   :  { %2805 = vmatpush1.msra.mxu1 %v4535_v46  ;;  %4938 = vmatprep.mubr.msk.f32.mxu1 %vm10621_vm12, %v5074_v56  ;;  %vm10682_vm12 = vcmp.lt.s32.totalorder %v5995_v3, 48 }
 0x6e1   :  { %2806 = vmatprep.subr.mxu1 %v4534_v12 }
 0x6e2   :  { %2807 = vmatpush1.msra.mxu1 %v4533_v44 }
 0x6e3   :  { %4939 = vmatmul.mubr.msk.f32.gmra.mxu1 %vm10622_vm13, %v5075_v8  ;;  %2808 = vmatprep.subr.mxu1 %v4532_v26  ;;  %vm10684_vm13 = vmmov %vm10682_vm12 }
 0x6e4   :  { %2809 = vmatpush1.msra.mxu1 %v4531_v62  ;;  %2844 = vmatprep.mubr.f32.mxu1 %v10583_v16 }
 0x6e5   :  { %2810 = vmatprep.subr.mxu1 %v4530_v55 }
 0x6e6   :  { %2811 = vmatpush1.msra.mxu1 %v4529_v6 }
 0x6e7   :  { %4563 = vmatmul.mubr.msk.f32.vlgmr.msra.gmra.mxu1 %vm10623_vm2, %v5076_v7  ;;  %vm10693_vm2 = vmmov %vm10682_vm12 }
 0x6e8   :  { %2850 = vmatprep.mubr.f32.mxu1 %v10583_v16 }
 0x6eb   :  { %4564 = vmatmul.mubr.msk.f32.gmra.mxu1 %vm10624_vm11, %v5077_v39  ;;  %vm10696_vm11 = vcmp.lt.s32.totalorder %v5995_v3, 51 }
 0x6ec   :  { %3738 = vmatprep.mubr.f32.mxu1 %v10583_v16 }
 0x797   :  { %v7850_v42 = vpop.f32.mrf.mxu1 }
 0x798   :  { %10625 = vst [vmem:[#allocation65_spill] sm:$0xff] %v7850_v42 }
 0x799   :  { %v7852_v41 = vpop.f32.mrf.mxu1 }
 0x79a   :  { %10626 = vst [vmem:[#allocation59_spill] sm:$0xff] %v7852_v41 }
 0x79b   :  { %v7854_v34 = vpop.f32.mrf.mxu1 }
 0x79c   :  { %10627 = vst [vmem:[#allocation44_spill] sm:$0xff] %v7854_v34 }
 0x79d   :  { %v7856_v48 = vpop.f32.mrf.mxu1 }
 0x79e   :  { %10628 = vst [vmem:[#allocation30_spill] sm:$0xff] %v7856_v48 }
 0x79f   :  { %v7858_v27 = vpop.f32.mrf.mxu1 }
 0x7a0   :  { %10629 = vst [vmem:[#allocation74_spill] sm:$0xff] %v7858_v27 }
 0x7a1   :  { %v7860_v52 = vpop.f32.mrf.mxu1 }
 0x7a2   :  { %10630 = vst [vmem:[#allocation71_spill] sm:$0xff] %v7860_v52 }
 0x7a3   :  { %v7862_v35 = vpop.f32.mrf.mxu1 }
 0x7a4   :  { %10631 = vst [vmem:[#allocation56_spill] sm:$0xff] %v7862_v35 }
 0x7a5   :  { %v7864_v28 = vpop.f32.mrf.mxu1 }
 0x7a6   :  { %10632 = vst [vmem:[#allocation49_spill] sm:$0xff] %v7864_v28 }
 0x7a7   :  { %v2846_v10 = vpop.f32.mrf.mxu1 }
 0x7a8   :  { %v2847_v17 = vadd.f32 %v2846_v10, %v10633_v58 }
 0x7a9   :  { %v2848_v51 = vpop.f32.mrf.mxu1 }
 0x7aa   :  { %v2857_v60 = vmax.f32 %v2847_v17, 0.0  ;;  %v2849_v1 = vadd.f32 %v2848_v51, %v10633_v58 }
 0x7ab   :  { %v2852_v53 = vpop.f32.mrf.mxu1 }
 0x7ac   :  { %v7868_v15 = vmin.f32 %v2857_v60, 6.0  ;;  %v2858_v23 = vmax.f32 %v2849_v1, 0.0  ;;  %v2853_v43 = vadd.f32 %v2852_v53, %v10647_v61 }
 0x7ad   :  { %v2854_v57 = vpop.f32.mrf.mxu1 }
 0x7ae   :  { %v7870_v4 = vmin.f32 %v2858_v23, 6.0  ;;  %3100 = vrot.lane.b32.xlu1 %v7868_v15, %s10333_s24  ;;  %v2859_v22 = vmax.f32 %v2853_v43, 0.0  ;;  %v2855_v36 = vadd.f32 %v2854_v57, %v10647_v61 }
 0x7b0   :  { %3104 = vrot.lane.b32.xlu0 %v7870_v4, %s10333_s24  ;;  %v7967_v5 = vmin.f32 %v2859_v22, 6.0  ;;  %v2860_v46 = vmax.f32 %v2855_v36, 0.0 }
 0x7b2   :  { %3124 = vrot.lane.b32.xlu1 %v7868_v15, %s10425_s14  ;;  %v7988_v12 = vmin.f32 %v2860_v46, 6.0 }
 0x7b4   :  { %3128 = vrot.lane.b32.xlu0 %v7870_v4, %s10425_s14 }
 0x7b6   :  { %3148 = vrot.lane.b32.xlu1 %v7868_v15, %s5264_s28 }
 0x7b8   :  { %3152 = vrot.lane.b32.xlu0 %v7870_v4, %s5264_s28 }
 0x7ba   :  { %2865 = vrot.lane.b32.xlu1 %v7868_v15, %s5266_s30 }
 0x7bc   :  { %2869 = vrot.lane.b32.xlu0 %v7870_v4, %s5266_s30 }
 0x7be   :  { %2889 = vrot.lane.b32.xlu1 %v7868_v15, %s10426_s16 }
 0x7c0   :  { %2893 = vrot.lane.b32.xlu0 %v7870_v4, %s10426_s16 }
 0x7c2   :  { %3172 = vrot.lane.b32.xlu1 %v7868_v15, %s10428_s15 }
 0x7c4   :  { %3176 = vrot.lane.b32.xlu0 %v7870_v4, %s10428_s15 }
 0x7c6   :  { %2913 = vrot.lane.b32.xlu1 %v7868_v15, %s10430_s13 }
 0x7c8   :  { %2917 = vrot.lane.b32.xlu0 %v7870_v4, %s10430_s13 }
 0x7ca   :  { %3256 = vrot.lane.b32.xlu1 %v7868_v15, %s5277_s20 }
 0x7cc   :  { %3260 = vrot.lane.b32.xlu0 %v7870_v4, %s5277_s20 }
 0x7ce   :  { %3478 = vrot.lane.b32.xlu1 %v7868_v15, %s10634_s1 }
 0x7d0   :  { %3482 = vrot.lane.b32.xlu0 %v7870_v4, %s10634_s1 }
 0x7d2   :  { %2937 = vrot.lane.b32.xlu1 %v7868_v15, %s10635_s4 }
 0x7d4   :  { %2941 = vrot.lane.b32.xlu0 %v7870_v4, %s10635_s4 }
 0x7d6   :  { %3021 = vrot.lane.b32.xlu1 %v7868_v15, %s10636_s25 }
 0x7d8   :  { %3025 = vrot.lane.b32.xlu0 %v7870_v4, %s10636_s25 }
 0x7da   :  { %3208 = vrot.lane.b32.xlu1 %v7868_v15, %s10637_s22 }
 0x7dc   :  { %3212 = vrot.lane.b32.xlu0 %v7870_v4, %s10637_s22 }
 0x7de   :  { %3514 = vrot.lane.b32.xlu1 %v7868_v15, %s10638_s26 }
 0x7e0   :  { %3518 = vrot.lane.b32.xlu0 %v7870_v4, %s10638_s26 }
 0x7e2   :  { %3763 = vrot.lane.b32.xlu1 %v7868_v15, %s10639_s18 }
 0x7e4   :  { %3767 = vrot.lane.b32.xlu0 %v7870_v4, %s10639_s18 }
 0x7e6   :  { %3232 = vrot.lane.b32.xlu1 %v7868_v15, %s10640_s9 }
 0x7e8   :  { %3236 = vrot.lane.b32.xlu0 %v7870_v4, %s10640_s9 }
 0x7ea   :  { %3538 = vrot.lane.b32.xlu1 %v7868_v15, %s10641_s21 }
 0x7ec   :  { %3542 = vrot.lane.b32.xlu0 %v7870_v4, %s10641_s21 }
 0x7ee   :  { %3799 = vrot.lane.b32.xlu1 %v7868_v15, %s10642_s11 }
 0x7f0   :  { %3803 = vrot.lane.b32.xlu0 %v7870_v4, %s10642_s11 }
 0x7f2   :  { %2973 = vrot.lane.b32.xlu1 %v7868_v15, %s10643_s23 }
 0x7f4   :  { %2977 = vrot.lane.b32.xlu0 %v7870_v4, %s10643_s23 }
 0x7f6   :  { %3823 = vrot.lane.b32.xlu1 %v7868_v15, %s10449_s19 }
 0x7f8   :  { %3827 = vrot.lane.b32.xlu0 %v7870_v4, %s10449_s19 }
 0x7fa   :  { %2997 = vrot.lane.b32.xlu1 %v7868_v15, %s10644_s2 }
 0x7fc   :  { %3001 = vrot.lane.b32.xlu0 %v7870_v4, %s10644_s2 }
 0x7fe   :  { %3280 = vrot.lane.b32.xlu1 %v7868_v15, %s10645_s7 }
 0x800   :  { %3284 = vrot.lane.b32.xlu0 %v7870_v4, %s10645_s7 }
 0x802   :  { %3574 = vrot.lane.b32.xlu1 %v7868_v15, %s10646_s3 }
 0x804   :  { %3578 = vrot.lane.b32.xlu0 %v7870_v4, %s10646_s3 }
 0x806   :  { %3598 = vrot.lane.b32.xlu1 %v7868_v15, %s10455_s29 }
 0x808   :  { %3602 = vrot.lane.b32.xlu0 %v7870_v4, %s10455_s29 }
 0x80a   :  { %3859 = vrot.lane.b32.xlu1 %v7868_v15, %s10648_s5 }
 0x80c   :  { %3863 = vrot.lane.b32.xlu0 %v7870_v4, %s10648_s5 }
 0x80e   :  { %3126 = vrot.lane.b32.xlu1 %v7967_v5, %s10425_s14 }
 0x810   :  { %3102 = vrot.lane.b32.xlu0 %v7967_v5, %s10333_s24  ;;  %s10649_s24 = smov 43  }
 0x812   :  { %3150 = vrot.lane.b32.xlu1 %v7967_v5, %s5264_s28 }
 0x814   :  { %3049 = vrot.lane.b32.xlu0 %v7870_v4, %s10452_s17 }
 0x816   :  { %2867 = vrot.lane.b32.xlu1 %v7967_v5, %s5266_s30 }
 0x818   :  { %3887 = vrot.lane.b32.xlu0 %v7870_v4, %s10461_s27 }
 0x81a   :  { %2891 = vrot.lane.b32.xlu1 %v7967_v5, %s10426_s16 }
 0x81c   :  { %3638 = vrot.lane.b32.xlu0 %v7870_v4, %s10649_s24 }
 0x81e   :  { %3174 = vrot.lane.b32.xlu1 %v7967_v5, %s10428_s15 }
 0x820   :  { %3130 = vrot.lane.b32.xlu0 %v7988_v12, %s10425_s14  ;;  %v7994_v29 = vpop.permute.xlu1 %3100 }
 0x822   :  { %v7996_v44 = vpop.permute.xlu0 %3104  ;;  %2915 = vrot.lane.b32.xlu1 %v7967_v5, %s10430_s13 }
 0x824   :  { %3154 = vrot.lane.b32.xlu0 %v7988_v12, %s5264_s28  ;;  %v8002_v56 = vpop.permute.xlu1 %3124  ;;  %s10668_s28 = smov 51  }
 0x826   :  { %v8004_v26 = vpop.permute.xlu0 %3128  ;;  %3258 = vrot.lane.b32.xlu1 %v7967_v5, %s5277_s20 }
 0x828   :  { %2871 = vrot.lane.b32.xlu0 %v7988_v12, %s5266_s30  ;;  %v8010_v62 = vpop.permute.xlu1 %3148 }
 0x82a   :  { %v8012_v55 = vpop.permute.xlu0 %3152  ;;  %3480 = vrot.lane.b32.xlu1 %v7967_v5, %s10634_s1 }
 0x82c   :  { %2895 = vrot.lane.b32.xlu0 %v7988_v12, %s10426_s16  ;;  %v8018_v8 = vpop.permute.xlu1 %2865 }
 0x82e   :  { %v8020_v6 = vpop.permute.xlu0 %2869  ;;  %2939 = vrot.lane.b32.xlu1 %v7967_v5, %s10635_s4 }
 0x830   :  { %3178 = vrot.lane.b32.xlu0 %v7988_v12, %s10428_s15  ;;  %v8026_v7 = vpop.permute.xlu1 %2889 }
 0x832   :  { %v8028_v39 = vpop.permute.xlu0 %2893  ;;  %3023 = vrot.lane.b32.xlu1 %v7967_v5, %s10636_s25 }
 0x834   :  { %2919 = vrot.lane.b32.xlu0 %v7988_v12, %s10430_s13  ;;  %v8034_v10 = vpop.permute.xlu1 %3172 }
 0x836   :  { %v8036_v58 = vpop.permute.xlu0 %3176  ;;  %3210 = vrot.lane.b32.xlu1 %v7967_v5, %s10637_s22 }
 0x838   :  { %3262 = vrot.lane.b32.xlu0 %v7988_v12, %s5277_s20  ;;  %v8042_v17 = vpop.permute.xlu1 %2913 }
 0x83a   :  { %v8044_v51 = vpop.permute.xlu0 %2917  ;;  %3516 = vrot.lane.b32.xlu1 %v7967_v5, %s10638_s26 }
 0x83c   :  { %3484 = vrot.lane.b32.xlu0 %v7988_v12, %s10634_s1  ;;  %v8050_v60 = vpop.permute.xlu1 %3256 }
 0x83e   :  { %v8052_v1 = vpop.permute.xlu0 %3260  ;;  %3765 = vrot.lane.b32.xlu1 %v7967_v5, %s10639_s18 }
 0x840   :  { %2943 = vrot.lane.b32.xlu0 %v7988_v12, %s10635_s4  ;;  %v8058_v23 = vpop.permute.xlu1 %3478 }
 0x842   :  { %v8060_v53 = vpop.permute.xlu0 %3482  ;;  %3234 = vrot.lane.b32.xlu1 %v7967_v5, %s10640_s9 }
 0x844   :  { %3027 = vrot.lane.b32.xlu0 %v7988_v12, %s10636_s25  ;;  %v8066_v61 = vpop.permute.xlu1 %2937 }
 0x846   :  { %v8068_v43 = vpop.permute.xlu0 %2941  ;;  %3540 = vrot.lane.b32.xlu1 %v7967_v5, %s10641_s21 }
 0x848   :  { %3214 = vrot.lane.b32.xlu0 %v7988_v12, %s10637_s22  ;;  %v8074_v22 = vpop.permute.xlu1 %3021 }
 0x84a   :  { %v8076_v57 = vpop.permute.xlu0 %3025  ;;  %3801 = vrot.lane.b32.xlu1 %v7967_v5, %s10642_s11 }
 0x84c   :  { %3520 = vrot.lane.b32.xlu0 %v7988_v12, %s10638_s26  ;;  %v8082_v36 = vpop.permute.xlu1 %3208 }
 0x84e   :  { %v8084_v46 = vpop.permute.xlu0 %3212  ;;  %2975 = vrot.lane.b32.xlu1 %v7967_v5, %s10643_s23 }
 0x850   :  { %3769 = vrot.lane.b32.xlu0 %v7988_v12, %s10639_s18  ;;  %v8090_v38 = vpop.permute.xlu1 %3514 }
 0x851   :  { %10650 = vst [vmem:[#allocation46_spill] sm:$0xff] %v8090_v38 }
 0x852   :  { %v8092_v14 = vpop.permute.xlu0 %3518  ;;  %3825 = vrot.lane.b32.xlu1 %v7967_v5, %s10449_s19 }
 0x853   :  { %10651 = vst [vmem:[#allocation54_spill] sm:$0xff] %v8092_v14 }
 0x854   :  { %3238 = vrot.lane.b32.xlu0 %v7988_v12, %s10640_s9  ;;  %v8098_v50 = vpop.permute.xlu1 %3763  ;;  %s9538_s9 = sld [smem:[#allocation3 + $0x1]] }
 0x855   :  { %10652 = vst [vmem:[#allocation53_spill] sm:$0xff] %v8098_v50 }
 0x856   :  { %v8100_v30 = vpop.permute.xlu0 %3767  ;;  %2999 = vrot.lane.b32.xlu1 %v7967_v5, %s10644_s2 }
 0x857   :  { %10653 = vst [vmem:[#allocation75_spill] sm:$0xff] %v8100_v30  ;;  %v4652_v30 = vld [vmem:[%s10188_s6 + $0x2c8] sm:$0xff] }
 0x858   :  { %3544 = vrot.lane.b32.xlu0 %v7988_v12, %s10641_s21  ;;  %v8106_v33 = vpop.permute.xlu1 %3232 }
 0x859   :  { %10654 = vst [vmem:[#allocation60_spill] sm:$0xff] %v8106_v33 }
 0x85a   :  { %v8108_v13 = vpop.permute.xlu0 %3236  ;;  %3282 = vrot.lane.b32.xlu1 %v7967_v5, %s10645_s7 }
 0x85b   :  { %10655 = vst [vmem:[#allocation67_spill] sm:$0xff] %v8108_v13 }
 0x85c   :  { %3805 = vrot.lane.b32.xlu0 %v7988_v12, %s10642_s11  ;;  %v8114_v45 = vpop.permute.xlu1 %3538 }
 0x85d   :  { %10656 = vst [vmem:[#allocation45_spill] sm:$0xff] %v8114_v45 }
 0x85e   :  { %v8116_v63 = vpop.permute.xlu0 %3542  ;;  %3576 = vrot.lane.b32.xlu1 %v7967_v5, %s10646_s3 }
 0x85f   :  { %10657 = vst [vmem:[#allocation47_spill] sm:$0xff] %v8116_v63  ;;  %v8289_v63 = vsel %vm10693_vm2, %v8004_v26, %v8002_v56 }
 0x860   :  { %2979 = vrot.lane.b32.xlu0 %v7988_v12, %s10643_s23  ;;  %v8122_v2 = vpop.permute.xlu1 %3799 }
 0x861   :  { %10658 = vst [vmem:[#allocation62_spill] sm:$0xff] %v8122_v2  ;;  %v4578_v2 = vld [vmem:[%s10188_s6 + $0x88] sm:$0xff] }
 0x862   :  { %v8124_v31 = vpop.permute.xlu0 %3803  ;;  %3600 = vrot.lane.b32.xlu1 %v7967_v5, %s10455_s29 }
 0x863   :  { %10659 = vst [vmem:[#allocation69_spill] sm:$0xff] %v8124_v31  ;;  %v4614_v31 = vld [vmem:[%s10188_s6 + $0x1a8] sm:$0xff] }
 0x864   :  { %3829 = vrot.lane.b32.xlu0 %v7988_v12, %s10449_s19  ;;  %v8130_v59 = vpop.permute.xlu1 %2973 }
 0x865   :  { %10660 = vst [vmem:[#allocation61_spill] sm:$0xff] %v8130_v59 }
 0x866   :  { %v8132_v49 = vpop.permute.xlu0 %2977  ;;  %3861 = vrot.lane.b32.xlu1 %v7967_v5, %s10648_s5 }
 0x867   :  { %10661 = vst [vmem:[#allocation68_spill] sm:$0xff] %v8132_v49  ;;  %v4568_v49 = vld [vmem:[%s10188_s6 + $0x38] sm:$0xff] }
 0x868   :  { %3003 = vrot.lane.b32.xlu0 %v7988_v12, %s10644_s2  ;;  %v8138_v40 = vpop.permute.xlu1 %3823 }
 0x869   :  { %10662 = vst [vmem:[#allocation33_spill] sm:$0xff] %v8138_v40  ;;  %v10687_v40 = vld [vmem:[#allocation11_spill] sm:$0xff] }
 0x86a   :  { %v8140_v32 = vpop.permute.xlu0 %3827  ;;  %3047 = vrot.lane.b32.xlu1 %v7967_v5, %s10452_s17 }
 0x86b   :  { %10663 = vst [vmem:[#allocation35_spill] sm:$0xff] %v8140_v32 }
 0x86c   :  { %3286 = vrot.lane.b32.xlu0 %v7988_v12, %s10645_s7  ;;  %v8146_v21 = vpop.permute.xlu1 %2997 }
 0x86d   :  { %10664 = vst [vmem:[#allocation37_spill] sm:$0xff] %v8146_v21  ;;  %v10680_v21 = vld [vmem:[#allocation6_spill] sm:$0xff] }
 0x86e   :  { %v8148_v47 = vpop.permute.xlu0 %3001  ;;  %3885 = vrot.lane.b32.xlu1 %v7967_v5, %s10461_s27 }
 0x86f   :  { %10665 = vst [vmem:[#allocation39_spill] sm:$0xff] %v8148_v47 }
 0x870   :  { %3580 = vrot.lane.b32.xlu0 %v7988_v12, %s10646_s3  ;;  %v8154_v24 = vpop.permute.xlu1 %3280 }
 0x871   :  { %10666 = vst [vmem:[#allocation66_spill] sm:$0xff] %v8154_v24  ;;  %v4688_v24 = vld [vmem:[%s10188_s6 + $0x3e0] sm:$0xff] }
 0x872   :  { %v8156_v37 = vpop.permute.xlu0 %3284  ;;  %3106 = vrot.lane.b32.xlu1 %v7988_v12, %s10668_s28 }
 0x873   :  { %10667 = vst [vmem:[#allocation70_spill] sm:$0xff] %v8156_v37 }
 0x874   :  { %3604 = vrot.lane.b32.xlu0 %v7988_v12, %s10455_s29  ;;  %v8162_v11 = vpop.permute.xlu1 %3574 }
 0x875   :  { %10669 = vst [vmem:[#allocation41_spill] sm:$0xff] %v8162_v11 }
 0x876   :  { %v8164_v0 = vpop.permute.xlu0 %3578  ;;  %3045 = vrot.lane.b32.xlu1 %v7868_v15, %s10452_s17 }
 0x877   :  { %10670 = vst [vmem:[#allocation43_spill] sm:$0xff] %v8164_v0 }
 0x878   :  { %3865 = vrot.lane.b32.xlu0 %v7988_v12, %s10648_s5  ;;  %v8170_v20 = vpop.permute.xlu1 %3598  ;;  %s191_s5 = sld [smem:[#allocation3]] }
 0x879   :  { %10671 = vst [vmem:[#allocation34_spill] sm:$0xff] %v8170_v20 }
 0x87a   :  { %v8172_v16 = vpop.permute.xlu0 %3602  ;;  %3636 = vrot.lane.b32.xlu1 %v7967_v5, %s10649_s24 }
 0x87b   :  { %10672 = vst [vmem:[#allocation24_spill] sm:$0xff] %v8172_v16 }
 0x87c   :  { %3051 = vrot.lane.b32.xlu0 %v7988_v12, %s10452_s17  ;;  %v8178_v54 = vpop.permute.xlu1 %3859 }
 0x87d   :  { %10673 = vst [vmem:[#allocation22_spill] sm:$0xff] %v8178_v54 }
 0x87e   :  { %v8180_v18 = vpop.permute.xlu0 %3863  ;;  %3883 = vrot.lane.b32.xlu1 %v7868_v15, %s10461_s27 }
 0x87f   :  { %10674 = vst [vmem:[#allocation27_spill] sm:$0xff] %v8180_v18 }
 0x880   :  { %3889 = vrot.lane.b32.xlu0 %v7988_v12, %s10461_s27  ;;  %v3127_v19 = vpop.permute.xlu1 %3126 }
 0x882   :  { %v8186_v9 = vpop.permute.xlu0 %3102  ;;  %3634 = vrot.lane.b32.xlu1 %v7868_v15, %s10649_s24 }
 0x883   :  { %10675 = vst [vmem:[#allocation14_spill] sm:$0xff] %v8186_v9 }
 0x884   :  { %3640 = vrot.lane.b32.xlu0 %v7988_v12, %s10649_s24  ;;  %v3151_v25 = vpop.permute.xlu1 %3150 }
 0x886   :  { %v8192_v20 = vpop.permute.xlu0 %3049  ;;  %3921 = vrot.lane.b32.xlu1 %v7967_v5, %s10458_s12 }
 0x887   :  { %10676 = vst [vmem:[#allocation16_spill] sm:$0xff] %v8192_v20  ;;  %v10679_v20 = vld [vmem:[#allocation7_spill] sm:$0xff] }
 0x888   :  { %3925 = vrot.lane.b32.xlu0 %v7988_v12, %s10458_s12  ;;  %v2868_v54 = vpop.permute.xlu1 %2867 }
 0x88a   :  { %v8198_v18 = vpop.permute.xlu0 %3887  ;;  %3919 = vrot.lane.b32.xlu1 %v7868_v15, %s10458_s12 }
 0x88b   :  { %10677 = vst [vmem:[#allocation76_spill] sm:$0xff] %v8198_v18  ;;  %v10681_v18 = vld [vmem:[#allocation9_spill] sm:$0xff] }
 0x88c   :  { %3923 = vrot.lane.b32.xlu0 %v7870_v4, %s10458_s12  ;;  %v2892_v9 = vpop.permute.xlu1 %2891 }
 0x88e   :  { %v8204_v16 = vpop.permute.xlu0 %3638  ;;  %581 = vrot.lane.b32.xlu1 %v10679_v20, %s10643_s23 }
 0x88f   :  { %10678 = vst [vmem:[#allocation77_spill] sm:$0xff] %v8204_v16  ;;  %v10686_v16 = vld [vmem:[#allocation8_spill] sm:$0xff] }
 0x890   :  { %583 = vrot.lane.b32.xlu0 %v10680_v21, %s10643_s23  ;;  %v8210_v47 = vpop.permute.xlu1 %3174 }
 0x892   :  { %v3131_v11 = vpop.permute.xlu0 %3130  ;;  %585 = vrot.lane.b32.xlu1 %v10681_v18, %s10643_s23 }
 0x893   :  { %v8216_v0 = vsel %vm10682_vm12, %v3127_v19, %v3131_v11  ;;  %v8220_v32 = vsel %vm10684_vm13, %v3131_v11, %v3127_v19  ;;  %v10690_v19 = vld [vmem:[#allocation10_spill] sm:$0xff]  ;;  %vm10697_vm12 = vmmov %vm10693_vm2 }
 0x894   :  { %10683 = vst [vmem:[#allocation78_spill] sm:$0xff] %v8216_v0  ;;  %10685 = vst [vmem:[#allocation79_spill] sm:$0xff] %v8220_v32  ;;  %587 = vrot.lane.b32.xlu0 %v10686_v16, %s10643_s23  ;;  %v8224_v20 = vpop.permute.xlu1 %2915  ;;  %v10691_v32 = vld [vmem:[#allocation13_spill] sm:$0xff] }
 0x895   :  { %vm10698_vm13 = vmmov %vm10696_vm11 }
 0x896   :  { %v3155_v21 = vpop.permute.xlu0 %3154  ;;  %589 = vrot.lane.b32.xlu1 %v10687_v40, %s10643_s23  ;;  %v4613_v40 = vld [vmem:[%s10188_s6 + $0x1a0] sm:$0xff] }
 0x897   :  { %v8230_v18 = vsel %vm1084_vm7, %v3151_v25, %v3155_v21  ;;  %v8234_v0 = vsel %vm1084_vm7, %v3155_v21, %v3151_v25  ;;  %v4577_v21 = vld [vmem:[%s10188_s6 + $0x80] sm:$0xff] }
 0x898   :  { %10688 = vst [vmem:[#allocation80_spill] sm:$0xff] %v8230_v18  ;;  %10689 = vst [vmem:[#allocation81_spill] sm:$0xff] %v8234_v0  ;;  %591 = vrot.lane.b32.xlu0 %v10690_v19, %s10643_s23  ;;  %v8238_v11 = vpop.permute.xlu1 %3258  ;;  %v4651_v19 = vld [vmem:[%s10188_s6 + $0x2c0] sm:$0xff]  ;;  %v10692_v0 = vld [vmem:[#allocation12_spill] sm:$0xff] }
 0x899   :  { %v8321_v38 = vmul.f32 %v4651_v19, %v7868_v15  ;;  %v3110_v19 = vsel %vm10696_vm11, %v7996_v44, %v7994_v29 }
 0x89a   :  { %v2872_v16 = vpop.permute.xlu0 %2871  ;;  %593 = vrot.lane.b32.xlu1 %v10691_v32, %s10643_s23  ;;  %v2879_v32 = vld [vmem:[%s10188_s6 + $0x10] sm:$0xff] }
 0x89b   :  { %v2874_v18 = vsel %vm772_vm8, %v2868_v54, %v2872_v16  ;;  %v2876_v25 = vsel %vm772_vm8, %v2872_v16, %v2868_v54  ;;  %v2880_v16 = vld [vmem:[%s10188_s6 + $0x18] sm:$0xff]  ;;  %v4567_v54 = vld [vmem:[%s10188_s6 + $0x30] sm:$0xff] }
 0x89c   :  { %595 = vrot.lane.b32.xlu0 %v10692_v0, %s10643_s23  ;;  %v8260_v59 = vpop.permute.xlu1 %3480  ;;  %v8275_v0 = vmul.f32 %v4613_v40, %v7868_v15  ;;  %v8292_v40 = vmul.f32 %v4577_v21, %v7868_v15  ;;  %v2883_v33 = vmul.f32 %v2879_v32, %v2876_v25  ;;  %v2884_v13 = vmul.f32 %v2880_v16, %v2874_v18  ;;  %v4689_v32 = vld [vmem:[%s10188_s6 + $0x3e8] sm:$0xff]  ;;  %v4579_v18 = vld [vmem:[%s10188_s6 + $0x90] sm:$0xff] }
 0x89e   :  { %v2896_v37 = vpop.permute.xlu0 %2895  ;;  %2700 = vrot.lane.b32.xlu1 %v7852_v41, %s10643_s23  ;;  %10694 = vst [vmem:[#allocation82_spill] sm:$0xff] %v8292_v40  ;;  %v4601_v41 = vld [vmem:[%s10188_s6 + $0x140] sm:$0xff] }
 0x89f   :  { %v8296_v45 = vsel %vm797_vm9, %v2892_v9, %v2896_v37  ;;  %v8300_v50 = vsel %vm797_vm9, %v2896_v37, %v2892_v9  ;;  %v8315_v9 = vmul.f32 %v4614_v31, %v7870_v4  ;;  %v8318_v37 = vmul.f32 %v4578_v2, %v7870_v4  ;;  %v4653_v31 = vld [vmem:[%s10188_s6 + $0x2d0] sm:$0xff]  ;;  %v4597_v2 = vld [vmem:[%s10188_s6 + $0x120] sm:$0xff] }
 0x8a0   :  { %10695 = vst [vmem:[#allocation83_spill] sm:$0xff] %v8300_v50  ;;  %v2907_v21 = vmul.f32 %v4567_v54, %v8300_v50  ;;  %v2908_v40 = vmul.f32 %v4568_v49, %v8296_v45  ;;  %2702 = vrot.lane.b32.xlu0 %v7850_v42, %s10643_s23  ;;  %v8312_v14 = vpop.permute.xlu1 %2939  ;;  %v8327_v49 = vmul.f32 %v4688_v24, %v7868_v15  ;;  %v4602_v24 = vld [vmem:[%s10188_s6 + $0x148] sm:$0xff]  ;;  %v4615_v42 = vld [vmem:[%s10188_s6 + $0x1b0] sm:$0xff] }
 0x8a1   :  { %v8349_v15 = vsel %vm10697_vm12, %v8002_v56, %v8004_v26  ;;  %v4598_v50 = vld [vmem:[%s10188_s6 + $0x128] sm:$0xff]  ;;  %v3108_v56 = vsel %vm10698_vm13, %v7994_v29, %v7996_v44  ;;  %v4690_v29 = vld [vmem:[%s10188_s6 + $0x3f0] sm:$0xff]  ;;  %v8384_v44 = vmul.f32 %v4689_v32, %v7870_v4  ;;  %vm10716_vm12 = vcmp.lt.s32.totalorder %v5995_v3, 85 }
 0x8a2   :  { %v2911_v25 = vadd.f32 %v2907_v21, %v2883_v33  ;;  %v2912_v16 = vadd.f32 %v2908_v40, %v2884_v13  ;;  %v3179_v54 = vpop.permute.xlu0 %3178  ;;  %2704 = vrot.lane.b32.xlu1 %v7856_v48, %s10643_s23  ;;  %v3140_v33 = vmul.f32 %v4601_v41, %v8289_v63  ;;  %v4580_v40 = vld [vmem:[%s10188_s6 + $0x98] sm:$0xff]  ;;  %v8381_v41 = vmul.f32 %v4652_v30, %v7870_v4  ;;  %v4605_v30 = vld [vmem:[%s10188_s6 + $0x160] sm:$0xff]  ;;  %v4571_v32 = vld [vmem:[%s10188_s6 + $0x50] sm:$0xff] }
 0x8a3   :  { %v8367_v13 = vsel %vm1110_vm10, %v8210_v47, %v3179_v54  ;;  %v8372_v26 = vsel %vm1110_vm10, %v3179_v54, %v8210_v47  ;;  %v8391_v47 = vmul.f32 %v4579_v18, %v7967_v5  ;;  %v8394_v54 = vmul.f32 %v4653_v31, %v7967_v5  ;;  %v4572_v18 = vld [vmem:[%s10188_s6 + $0x58] sm:$0xff]  ;;  %vm10717_vm13 = vmmov %vm10716_vm12 }
 0x8a4   :  { %10699 = vst [vmem:[#allocation84_spill] sm:$0xff] %v8367_v13  ;;  %10700 = vst [vmem:[#allocation85_spill] sm:$0xff] %v8372_v26  ;;  %2706 = vrot.lane.b32.xlu0 %v7854_v34, %s10643_s23  ;;  %v8388_v21 = vpop.permute.xlu1 %3023  ;;  %v3116_v48 = vmul.f32 %v4597_v2, %v3110_v19  ;;  %v3141_v13 = vmul.f32 %v4602_v24, %v8349_v15  ;;  %v3158_v4 = vsel %vm1084_vm7, %v8012_v55, %v8010_v62  ;;  %v4606_v19 = vld [vmem:[%s10188_s6 + $0x168] sm:$0xff] }
 0x8a5   :  { %10701 = vst [vmem:[#allocation86_spill] sm:$0xff] %v8394_v54  ;;  %v8411_v31 = vmul.f32 %v4615_v42, %v7967_v5  ;;  %v3117_v2 = vmul.f32 %v4598_v50, %v3108_v56  ;;  %v3156_v24 = vsel %vm1084_vm7, %v8010_v62, %v8012_v55  ;;  %v8423_v54 = vmul.f32 %v4580_v40, %v7988_v12  ;;  %v4609_v56 = vld [vmem:[%s10188_s6 + $0x180] sm:$0xff] }
 0x8a6   :  { %v2920_v34 = vpop.permute.xlu0 %2919  ;;  %2708 = vrot.lane.b32.xlu1 %v7860_v52, %s10643_s23  ;;  %v8426_v42 = vmul.f32 %v4690_v29, %v7967_v5  ;;  %v3144_v50 = vadd.f32 %v3140_v33, %v3116_v48  ;;  %v3182_v62 = vsel %vm1110_vm10, %v8036_v58, %v8034_v10  ;;  %vm10704_vm7 = vcmp.lt.s32.totalorder %v5995_v3, 15  ;;  %v4610_v48 = vld [vmem:[%s10188_s6 + $0x188] sm:$0xff] }
 0x8a7   :  { %10702 = vst [vmem:[#allocation87_spill] sm:$0xff] %v8411_v31  ;;  %v2922_v55 = vsel %vm10704_vm7, %v8224_v20, %v2920_v34  ;;  %vm10705_vm2 = vmmov %vm10704_vm7  ;;  %v3164_v5 = vmul.f32 %v4605_v30, %v3158_v4  ;;  %v3180_v33 = vsel %vm1110_vm10, %v8034_v10, %v8036_v58  ;;  %v3145_v31 = vadd.f32 %v3141_v13, %v3117_v2  ;;  %v4654_v10 = vld [vmem:[%s10188_s6 + $0x2d8] sm:$0xff]  ;;  %v2877_v13 = vld [vmem:[%s10188_s6] sm:$0xff] }
 0x8a8   :  { %10703 = vst [vmem:[#allocation88_spill] sm:$0xff] %v8426_v42  ;;  %v2924_v40 = vsel %vm10705_vm2, %v2920_v34, %v8224_v20  ;;  %v2932_v52 = vmul.f32 %v4572_v18, %v2922_v55  ;;  %2710 = vrot.lane.b32.xlu0 %v7858_v27, %s10643_s23  ;;  %v8450_v42 = vpop.permute.xlu1 %3210  ;;  %v3165_v26 = vmul.f32 %v4606_v19, %v3156_v24  ;;  %v4616_v58 = vld [vmem:[%s10188_s6 + $0x1b8] sm:$0xff]  ;;  %v4565_v30 = vld [vmem:[%s10188_s6 + $0x20] sm:$0xff]  ;;  %v2878_v19 = vld [vmem:[%s10188_s6 + $0x8] sm:$0xff]  ;;  %vm10718_vm7 = vcmp.lt.s32.totalorder %v5995_v3, 1 }
 0x8a9   :  { %v2931_v29 = vmul.f32 %v4571_v32, %v2924_v40  ;;  %10706 = vst [vmem:[#allocation89_spill] sm:$0xff] %v8450_v42  ;;  %v2873_v20 = vsel %vm772_vm8, %v8018_v8, %v8020_v6  ;;  %v2875_v34 = vsel %vm772_vm8, %v8020_v6, %v8018_v8  ;;  %v8476_v8 = vsel %vm797_vm9, %v8028_v39, %v8026_v7  ;;  %v4691_v2 = vld [vmem:[%s10188_s6 + $0x3f8] sm:$0xff]  ;;  %v4566_v24 = vld [vmem:[%s10188_s6 + $0x28] sm:$0xff]  ;;  %v4569_v55 = vld [vmem:[%s10188_s6 + $0x40] sm:$0xff] }
 0x8aa   :  { %v3188_v6 = vmul.f32 %v4609_v56, %v3182_v62  ;;  %v8480_v32 = vadd.f32 %v2932_v52, %v2912_v16  ;;  %v3263_v18 = vpop.permute.xlu0 %3262  ;;  %2712 = vrot.lane.b32.xlu1 %v7864_v28, %s10643_s23  ;;  %v8497_v52 = vsel %vm797_vm9, %v8026_v7, %v8028_v39  ;;  %vm10707_vm8 = vcmp.lt.s32.totalorder %v5995_v3, 80  ;;  %vm10711_vm9 = vmmov %vm10705_vm2  ;;  %v4641_v39 = vld [vmem:[%s10188_s6 + $0x270] sm:$0xff]  ;;  %v4679_v42 = vld [vmem:[%s10188_s6 + $0x398] sm:$0xff] }
 0x8ab   :  { %v8478_v4 = vadd.f32 %v2931_v29, %v2911_v25  ;;  %v3189_v25 = vmul.f32 %v4610_v48, %v3180_v33  ;;  %v8502_v16 = vsel %vm10707_vm8, %v8238_v11, %v3263_v18  ;;  %vm10709_vm10 = vmmov %vm10707_vm8  ;;  %v3168_v62 = vadd.f32 %v3164_v5, %v3144_v50  ;;  %v4642_v29 = vld [vmem:[%s10188_s6 + $0x278] sm:$0xff] }
 0x8ac   :  { %10708 = vst [vmem:[#allocation90_spill] sm:$0xff] %v8502_v16  ;;  %v8507_v56 = vsel %vm10709_vm10, %v3263_v18, %v8238_v11  ;;  %v2923_v7 = vsel %vm10711_vm9, %v8044_v51, %v8042_v17  ;;  %2714 = vrot.lane.b32.xlu0 %v7862_v35, %s10643_s23  ;;  %v8521_v40 = vpop.permute.xlu1 %3516  ;;  %v8524_v11 = vmul.f32 %v4654_v10, %v7988_v12  ;;  %v4637_v18 = vld [vmem:[%s10188_s6 + $0x250] sm:$0xff]  ;;  %v4638_v10 = vld [vmem:[%s10188_s6 + $0x258] sm:$0xff]  ;;  %vm10715_vm11 = vmmov %vm10705_vm2  ;;  %vm10723_vm9 = vcmp.lt.s32.totalorder %v5995_v3, 80 }
 0x8ad   :  { %10710 = vst [vmem:[#allocation91_spill] sm:$0xff] %v8507_v56  ;;  %v8527_v50 = vmul.f32 %v4616_v58, %v7988_v12  ;;  %v3169_v5 = vadd.f32 %v3165_v26, %v3145_v31  ;;  %v2881_v48 = vmul.f32 %v2877_v13, %v2875_v34  ;;  %v2905_v33 = vmul.f32 %v4565_v30, %v8476_v8  ;;  %v4663_v26 = vld [vmem:[%s10188_s6 + $0x320] sm:$0xff]  ;;  %v4664_v31 = vld [vmem:[%s10188_s6 + $0x328] sm:$0xff]  ;;  %vm10719_vm2 = vmmov %vm10718_vm7 }
 0x8ae   :  { %10712 = vst [vmem:[#allocation92_spill] sm:$0xff] %v8524_v11  ;;  %v8540_v35 = vmul.f32 %v4691_v2, %v7988_v12  ;;  %v2882_v34 = vmul.f32 %v2878_v19, %v2873_v20  ;;  %v2906_v58 = vmul.f32 %v4566_v24, %v8497_v52  ;;  %v3192_v13 = vadd.f32 %v3188_v6, %v3168_v62  ;;  %v4570_v30 = vld [vmem:[%s10188_s6 + $0x48] sm:$0xff]  ;;  %v3485_v2 = vpop.permute.xlu0 %3484  ;;  %vm10720_vm8 = vmmov %vm10716_vm12 }
 0x8af   :  { %10713 = vst [vmem:[#allocation93_spill] sm:$0xff] %v8527_v50  ;;  %v2921_v12 = vsel %vm10715_vm11, %v8042_v17, %v8044_v51  ;;  %v3193_v28 = vadd.f32 %v3189_v25, %v3169_v5  ;;  %v2929_v27 = vmul.f32 %v4569_v55, %v2923_v7  ;;  %v3489_v20 = vsel %vm10717_vm13, %v3485_v2, %v8260_v59  ;;  %v4576_v7 = vld [vmem:[%s10188_s6 + $0x78] sm:$0xff]  ;;  %vm10721_vm10 = vmmov %vm10720_vm8 }
 0x8b0   :  { %10714 = vst [vmem:[#allocation94_spill] sm:$0xff] %v8540_v35  ;;  %v3487_v35 = vsel %vm10716_vm12, %v8260_v59, %v3485_v2  ;;  %v3508_v6 = vmul.f32 %v4641_v39, %v8507_v56  ;;  %v3509_v19 = vmul.f32 %v4642_v29, %v8502_v16  ;;  %v3496_v24 = vmul.f32 %v4637_v18, %v3489_v20  ;;  %v8564_v50 = vpop.permute.xlu1 %3765  ;;  %v4575_v59 = vld [vmem:[%s10188_s6 + $0x70] sm:$0xff]  ;;  %vm10724_vm11 = vmmov %vm10719_vm2  ;;  %v4617_v20 = vld [vmem:[%s10188_s6 + $0x1c0] sm:$0xff] }
 0x8b1   :  { %v3497_v62 = vmul.f32 %v4638_v10, %v3487_v35  ;;  %v8567_v17 = vmul.f32 %v4663_v26, %v8349_v15  ;;  %v8570_v51 = vmul.f32 %v4664_v31, %v8289_v63  ;;  %v2909_v25 = vadd.f32 %v2905_v33, %v2881_v48  ;;  %v4636_v10 = vld [vmem:[%s10188_s6 + $0x248] sm:$0xff]  ;;  %vm10725_vm12 = vmmov %vm10719_vm2 }
 0x8b2   :  { %v2930_v55 = vmul.f32 %v4570_v30, %v2921_v12  ;;  %v2910_v39 = vadd.f32 %v2906_v58, %v2882_v34  ;;  %v8579_v35 = vadd.f32 %v8275_v0, %v3192_v13  ;;  %v8581_v5 = vadd.f32 %v3508_v6, %v3496_v24  ;;  %v2944_v63 = vpop.permute.xlu0 %2943  ;;  %v4635_v0 = vld [vmem:[%s10188_s6 + $0x240] sm:$0xff]  ;;  %v4640_v12 = vld [vmem:[%s10188_s6 + $0x268] sm:$0xff]  ;;  %vm10726_vm13 = vmmov %vm10723_vm9 }
 0x8b3   :  { %v8583_v15 = vadd.f32 %v3509_v19, %v3497_v62  ;;  %v2933_v29 = vadd.f32 %v2929_v27, %v2909_v25  ;;  %v8586_v48 = vadd.f32 %v8315_v9, %v3193_v28  ;;  %v2946_v33 = vsel %vm10718_vm7, %v8312_v14, %v2944_v63  ;;  %v4639_v34 = vld [vmem:[%s10188_s6 + $0x260] sm:$0xff] }
 0x8b4   :  { %v2948_v18 = vsel %vm10719_vm2, %v2944_v63, %v8312_v14  ;;  %v3486_v27 = vsel %vm10720_vm8, %v8058_v23, %v8060_v53  ;;  %v3488_v28 = vsel %vm10721_vm10, %v8060_v53, %v8058_v23  ;;  %v2956_v14 = vmul.f32 %v4576_v7, %v2946_v33  ;;  %v8608_v26 = vpop.permute.xlu1 %3234  ;;  %v4573_v13 = vld [vmem:[%s10188_s6 + $0x60] sm:$0xff]  ;;  %v4574_v23 = vld [vmem:[%s10188_s6 + $0x68] sm:$0xff] }
 0x8b5   :  { %v2955_v9 = vmul.f32 %v4575_v59, %v2948_v18  ;;  %10722 = vst [vmem:[#allocation95_spill] sm:$0xff] %v8608_v26  ;;  %v2934_v31 = vadd.f32 %v2930_v55, %v2910_v39  ;;  %v3266_v58 = vsel %vm10723_vm9, %v8052_v1, %v8050_v60  ;;  %v2945_v53 = vsel %vm10724_vm11, %v8066_v61, %v8068_v43  ;;  %v4618_v7 = vld [vmem:[%s10188_s6 + $0x1c8] sm:$0xff] }
 0x8b6   :  { %v2947_v30 = vsel %vm10725_vm12, %v8068_v43, %v8066_v61  ;;  %v3264_v2 = vsel %vm10726_vm13, %v8050_v60, %v8052_v1  ;;  %vm10727_vm7 = vcmp.lt.s32.totalorder %v5995_v3, 125  ;;  %v8649_v43 = vadd.f32 %v2956_v14, %v8480_v32  ;;  %v3028_v19 = vpop.permute.xlu0 %3027  ;;  %v4625_v60 = vld [vmem:[%s10188_s6 + $0x200] sm:$0xff]  ;;  %v4626_v1 = vld [vmem:[%s10188_s6 + $0x208] sm:$0xff] }
 0x8b7   :  { %v3216_v6 = vsel %vm10727_vm7, %v8082_v36, %v8084_v46  ;;  %v8646_v61 = vadd.f32 %v2955_v9, %v8478_v4  ;;  %v3494_v24 = vmul.f32 %v4635_v0, %v3488_v28  ;;  %v3495_v62 = vmul.f32 %v4636_v10, %v3486_v27  ;;  %vm10730_vm2 = vmmov %vm10727_vm7  ;;  %v4643_v10 = vld [vmem:[%s10188_s6 + $0x280] sm:$0xff]  ;;  %v4677_v14 = vld [vmem:[%s10188_s6 + $0x388] sm:$0xff] }
 0x8b8   :  { %v8660_v25 = vsel %vm940_vm5, %v8388_v21, %v3028_v19  ;;  %v8665_v4 = vsel %vm940_vm5, %v3028_v19, %v8388_v21  ;;  %v3506_v32 = vmul.f32 %v4639_v34, %v3266_v58  ;;  %v2953_v55 = vmul.f32 %v4573_v13, %v2947_v30  ;;  %v8674_v63 = vpop.permute.xlu1 %3540  ;;  %v4676_v21 = vld [vmem:[%s10188_s6 + $0x380] sm:$0xff] }
 0x8b9   :  { %10728 = vst [vmem:[#allocation96_spill] sm:$0xff] %v8660_v25  ;;  %10729 = vst [vmem:[#allocation97_spill] sm:$0xff] %v8665_v4  ;;  %v2954_v59 = vmul.f32 %v4574_v23, %v2945_v53  ;;  %v3218_v39 = vsel %vm10730_vm2, %v8084_v46, %v8082_v36  ;;  %v3507_v33 = vmul.f32 %v4640_v12, %v3264_v2  ;;  %v10731_v27 = vld [vmem:[#allocation46_spill] sm:$0xff]  ;;  %vm10733_vm8 = vcmp.lt.s32.totalorder %v5995_v3, 75  ;;  %v10734_v23 = vld [vmem:[#allocation67_spill] sm:$0xff] }
 0x8ba   :  { %v8683_v18 = vsel %vm940_vm5, %v8076_v57, %v8074_v22  ;;  %v3224_v0 = vmul.f32 %v4617_v20, %v3216_v6  ;;  %v10732_v36 = vld [vmem:[#allocation54_spill] sm:$0xff]  ;;  %v8692_v28 = vmul.f32 %v4625_v60, %v3264_v2  ;;  %v8694_v9 = vmul.f32 %v4626_v1, %v3266_v58  ;;  %v10735_v53 = vld [vmem:[#allocation60_spill] sm:$0xff]  ;;  %v8712_v30 = vpop.permute.xlu0 %3214  ;;  %v4622_v6 = vld [vmem:[%s10188_s6 + $0x1e8] sm:$0xff] }
 0x8bb   :  { %v3524_v46 = vsel %vm10733_vm8, %v10732_v36, %v10731_v27  ;;  %v8703_v34 = vsel %vm940_vm5, %v8074_v22, %v8076_v57  ;;  %v4621_v13 = vld [vmem:[%s10188_s6 + $0x1e0] sm:$0xff]  ;;  %vm10736_vm10 = vcmp.lt.s32.totalorder %v5995_v3, 83  ;;  %10737 = vst [vmem:[#allocation46_spill] sm:$0xff] %v8712_v30  ;;  %v3510_v12 = vadd.f32 %v3506_v32, %v3494_v24  ;;  %v4644_v32 = vld [vmem:[%s10188_s6 + $0x288] sm:$0xff]  ;;  %vm10740_vm9 = vmmov %vm10733_vm8 }
 0x8bc   :  { %v3240_v58 = vsel %vm10736_vm10, %v10735_v53, %v10734_v23  ;;  %v3511_v2 = vadd.f32 %v3507_v33, %v3495_v62  ;;  %v3225_v20 = vmul.f32 %v4618_v7, %v3218_v39  ;;  %vm10738_vm5 = vmmov %vm10736_vm10  ;;  %v2957_v57 = vadd.f32 %v2953_v55, %v2933_v29  ;;  %v8726_v11 = vpop.permute.xlu1 %3801  ;;  %v4645_v55 = vld [vmem:[%s10188_s6 + $0x290] sm:$0xff]  ;;  %v4673_v7 = vld [vmem:[%s10188_s6 + $0x368] sm:$0xff] }
 0x8bd   :  { %v3242_v22 = vsel %vm10738_vm5, %v10734_v23, %v10735_v53  ;;  %v8721_v19 = vadd.f32 %v2954_v59, %v2934_v31  ;;  %v8724_v60 = vmul.f32 %v4676_v21, %v8683_v18  ;;  %v3530_v1 = vmul.f32 %v4643_v10, %v3524_v46  ;;  %10739 = vst [vmem:[#allocation54_spill] sm:$0xff] %v8726_v11  ;;  %v4646_v59 = vld [vmem:[%s10188_s6 + $0x298] sm:$0xff]  ;;  %v10741_v39 = vld [vmem:[#allocation75_spill] sm:$0xff]  ;;  %vm10747_vm13 = vmmov %vm10733_vm8 }
 0x8be   :  { %v3792_v24 = vmul.f32 %v4677_v14, %v8703_v34  ;;  %v3228_v62 = vadd.f32 %v3224_v0, %v8579_v35  ;;  %v3522_v29 = vsel %vm10740_vm9, %v10731_v27, %v10732_v36  ;;  %v3248_v31 = vmul.f32 %v4621_v13, %v3240_v58  ;;  %v4672_v35 = vld [vmem:[%s10188_s6 + $0x360] sm:$0xff]  ;;  %v10742_v33 = vld [vmem:[#allocation53_spill] sm:$0xff]  ;;  %v10744_v46 = vld [vmem:[#allocation47_spill] sm:$0xff]  ;;  %v3521_v13 = vpop.permute.xlu0 %3520 }
 0x8bf   :  { %v3771_v21 = vsel %vm1747_vm1, %v10742_v33, %v10741_v39  ;;  %v3773_v0 = vsel %vm1747_vm1, %v10741_v39, %v10742_v33  ;;  %v3249_v10 = vmul.f32 %v4622_v6, %v3242_v22  ;;  %v4647_v27 = vld [vmem:[%s10188_s6 + $0x2a0] sm:$0xff]  ;;  %v10743_v36 = vld [vmem:[#allocation45_spill] sm:$0xff]  ;;  %vm10745_vm11 = vcmp.lt.s32.totalorder %v5995_v3, 5  ;;  %v4648_v53 = vld [vmem:[%s10188_s6 + $0x2a8] sm:$0xff] }
 0x8c0   :  { %v3548_v14 = vsel %vm10745_vm11, %v10744_v46, %v10743_v36  ;;  %v3229_v23 = vadd.f32 %v3225_v20, %v8586_v48  ;;  %vm10746_vm12 = vmmov %vm10745_vm11  ;;  %v3523_v6 = vsel %vm10747_vm13, %v8521_v40, %v3521_v13  ;;  %v3531_v39 = vmul.f32 %v4644_v32, %v3522_v29  ;;  %v4678_v48 = vld [vmem:[%s10188_s6 + $0x390] sm:$0xff]  ;;  %v8781_v56 = vpop.permute.xlu1 %2975 }
 0x8c1   :  { %v3546_v58 = vsel %vm10746_vm12, %v10743_v36, %v10744_v46  ;;  %vm10748_vm7 = vmmov %vm10733_vm8  ;;  %v3534_v33 = vadd.f32 %v3530_v1, %v3510_v12  ;;  %v3533_v26 = vmul.f32 %v4646_v59, %v3523_v6  ;;  %v3779_v16 = vmul.f32 %v4672_v35, %v3773_v0  ;;  %v4675_v12 = vld [vmem:[%s10188_s6 + $0x378] sm:$0xff]  ;;  %v10751_v59 = vld [vmem:[#allocation70_spill] sm:$0xff] }
 0x8c2   :  { %v3525_v22 = vsel %vm10748_vm7, %v3521_v13, %v8521_v40  ;;  %v3780_v36 = vmul.f32 %v4673_v7, %v3771_v21  ;;  %v3252_v46 = vadd.f32 %v3248_v31, %v3228_v62  ;;  %v3554_v11 = vmul.f32 %v4647_v27, %v3548_v14  ;;  %v4674_v40 = vld [vmem:[%s10188_s6 + $0x370] sm:$0xff]  ;;  %v3770_v31 = vpop.permute.xlu0 %3769  ;;  %v10752_v35 = vld [vmem:[#allocation66_spill] sm:$0xff] }
 0x8c3   :  { %v3532_v20 = vmul.f32 %v4645_v55, %v3525_v22  ;;  %v3253_v1 = vadd.f32 %v3249_v10, %v3229_v23  ;;  %v3555_v32 = vmul.f32 %v4648_v53, %v3546_v58  ;;  %v8796_v62 = vadd.f32 %v3533_v26, %v8583_v15  ;;  %v4630_v55 = vld [vmem:[%s10188_s6 + $0x228] sm:$0xff]  ;;  %v4629_v26 = vld [vmem:[%s10188_s6 + $0x220] sm:$0xff] }
 0x8c4   :  { %vm10753_vm2 = vcmp.lt.s32.totalorder %v5995_v3, 77  ;;  %v3774_v15 = vsel %vm1747_vm1, %v3770_v31, %v8564_v50  ;;  %v3793_v0 = vmul.f32 %v4678_v48, %v8665_v4  ;;  %v3794_v10 = vmul.f32 %v4679_v42, %v8660_v25  ;;  %v8820_v13 = vpop.permute.xlu1 %3825  ;;  %v4680_v58 = vld [vmem:[%s10188_s6 + $0x3a0] sm:$0xff]  ;;  %v4681_v42 = vld [vmem:[%s10188_s6 + $0x3a8] sm:$0xff] }
 0x8c5   :  { %v8793_v29 = vadd.f32 %v3532_v20, %v8581_v5  ;;  %10750 = vst [vmem:[#allocation60_spill] sm:$0xff] %v8796_v62  ;;  %v3288_v7 = vsel %vm10753_vm2, %v10752_v35, %v10751_v59  ;;  %vm10754_vm8 = vmmov %vm10753_vm2  ;;  %v3772_v5 = vsel %vm1747_vm1, %v8564_v50, %v3770_v31  ;;  %v3781_v27 = vmul.f32 %v4674_v40, %v3774_v15  ;;  %v10756_v6 = vld [vmem:[#allocation62_spill] sm:$0xff]  ;;  %v10757_v50 = vld [vmem:[#allocation69_spill] sm:$0xff] }
 0x8c6   :  { %v3290_v21 = vsel %vm10754_vm8, %v10751_v59, %v10752_v35  ;;  %v3782_v14 = vmul.f32 %v4675_v12, %v3772_v5  ;;  %10755 = vst [vmem:[#allocation75_spill] sm:$0xff] %v8820_v13  ;;  %v3535_v23 = vadd.f32 %v3531_v39, %v3511_v2  ;;  %v3558_v53 = vadd.f32 %v3554_v11, %v3534_v33  ;;  %v10758_v20 = vld [vmem:[#allocation82_spill] sm:$0xff]  ;;  %v8841_v48 = vpop.permute.xlu0 %3238 }
 0x8c7   :  { %10749 = vst [vmem:[#allocation67_spill] sm:$0xff] %v8793_v29  ;;  %v3809_v22 = vsel %vm1786_vm4, %v10757_v50, %v10756_v6  ;;  %v2969_v31 = vadd.f32 %v10758_v20, %v2957_v57  ;;  %v3807_v11 = vsel %vm1786_vm4, %v10756_v6, %v10757_v50  ;;  %v3297_v2 = vmul.f32 %v4630_v55, %v3290_v21  ;;  %v4585_v50 = vld [vmem:[%s10188_s6 + $0xc0] sm:$0xff]  ;;  %v10772_v20 = vld [vmem:[#allocation39_spill] sm:$0xff] }
 0x8c8   :  { %v8837_v39 = vadd.f32 %v3793_v0, %v3781_v27  ;;  %v8839_v33 = vadd.f32 %v3794_v10, %v3782_v14  ;;  %10761 = vst [vmem:[#allocation47_spill] sm:$0xff] %v8841_v48  ;;  %v3795_v40 = vadd.f32 %v8724_v60, %v3779_v16  ;;  %v3796_v12 = vadd.f32 %v3792_v24, %v3780_v36  ;;  %v8848_v55 = vpop.permute.xlu1 %2999  ;;  %v4581_v0 = vld [vmem:[%s10188_s6 + $0xa0] sm:$0xff]  ;;  %v4582_v16 = vld [vmem:[%s10188_s6 + $0xa8] sm:$0xff]  ;;  %v10762_v60 = vld [vmem:[#allocation68_spill] sm:$0xff] }
 0x8c9   :  { %v2970_v57 = vadd.f32 %v8318_v37, %v8721_v19  ;;  %v3296_v59 = vmul.f32 %v4629_v26, %v3288_v7  ;;  %v3559_v35 = vadd.f32 %v3555_v32, %v3535_v23  ;;  %v3815_v5 = vmul.f32 %v4680_v58, %v3809_v22  ;;  %v10763_v37 = vld [vmem:[#allocation61_spill] sm:$0xff]  ;;  %v4684_v24 = vld [vmem:[%s10188_s6 + $0x3c0] sm:$0xff]  ;;  %v4656_v26 = vld [vmem:[%s10188_s6 + $0x2e8] sm:$0xff] }
 0x8ca   :  { %10759 = vst [vmem:[#allocation53_spill] sm:$0xff] %v8837_v39  ;;  %10760 = vst [vmem:[#allocation45_spill] sm:$0xff] %v8839_v33  ;;  %v3276_v15 = vadd.f32 %v8692_v28, %v3252_v46  ;;  %v3277_v6 = vadd.f32 %v8694_v9, %v3253_v1  ;;  %v3816_v21 = vmul.f32 %v4681_v42, %v3807_v11  ;;  %vm10764_vm1 = vcmp.lt.s32.totalorder %v5995_v3, 127  ;;  %v10766_v36 = vld [vmem:[#allocation33_spill] sm:$0xff]  ;;  %v10767_v46 = vld [vmem:[#allocation35_spill] sm:$0xff]  ;;  %v8886_v23 = vpop.permute.xlu0 %3544 }
 0x8cb   :  { %v2981_v19 = vsel %vm10764_vm1, %v10763_v37, %v10762_v60  ;;  %vm10765_vm10 = vmmov %vm10764_vm1  ;;  %v3570_v9 = vadd.f32 %v8321_v38, %v3558_v53  ;;  %v3833_v1 = vsel %vm1812_vm15, %v10767_v46, %v10766_v36  ;;  %v4655_v7 = vld [vmem:[%s10188_s6 + $0x2e0] sm:$0xff]  ;;  %v10768_v10 = vld [vmem:[#allocation43_spill] sm:$0xff]  ;;  %vm10770_vm5 = vcmp.lt.s32.totalorder %v5995_v3, 123 }
 0x8cc   :  { %v2983_v28 = vsel %vm10765_vm10, %v10762_v60, %v10763_v37  ;;  %v3301_v32 = vadd.f32 %v3297_v2, %v3277_v6  ;;  %v10769_v38 = vld [vmem:[#allocation41_spill] sm:$0xff]  ;;  %vm10771_vm9 = vmmov %vm10770_vm5  ;;  %v4685_v53 = vld [vmem:[%s10188_s6 + $0x3c8] sm:$0xff]  ;;  %v3831_v58 = vsel %vm1812_vm15, %v10766_v36, %v10767_v46  ;;  %v3300_v6 = vadd.f32 %v3296_v59, %v3276_v15  ;;  %v8923_v15 = vpop.permute.xlu1 %3282 }
 0x8cd   :  { %v3582_v27 = vsel %vm10770_vm5, %v10769_v38, %v10768_v10  ;;  %v3584_v14 = vsel %vm10771_vm9, %v10768_v10, %v10769_v38  ;;  %v4586_v22 = vld [vmem:[%s10188_s6 + $0xc8] sm:$0xff]  ;;  %v10773_v42 = vld [vmem:[#allocation37_spill] sm:$0xff]  ;;  %v2989_v60 = vmul.f32 %v4581_v0, %v2981_v19  ;;  %v2990_v37 = vmul.f32 %v4582_v16, %v2983_v28  ;;  %v4659_v36 = vld [vmem:[%s10188_s6 + $0x300] sm:$0xff] }
 0x8ce   :  { %v3005_v11 = vsel %vm914_vm6, %v10773_v42, %v10772_v20  ;;  %v3007_v2 = vsel %vm914_vm6, %v10772_v20, %v10773_v42  ;;  %v4660_v46 = vld [vmem:[%s10188_s6 + $0x308] sm:$0xff]  ;;  %v10774_v10 = vld [vmem:[#allocation24_spill] sm:$0xff]  ;;  %v10775_v38 = vld [vmem:[#allocation34_spill] sm:$0xff]  ;;  %vm10776_vm11 = vcmp.lt.s32.totalorder %v5995_v3, 53  ;;  %v3839_v0 = vmul.f32 %v4684_v24, %v3833_v1  ;;  %v8926_v13 = vpop.permute.xlu0 %3805 }
 0x8cf   :  { %v3606_v33 = vsel %vm10776_vm11, %v10775_v38, %v10774_v10  ;;  %vm10777_vm12 = vmmov %vm10776_vm11  ;;  %v3571_v16 = vadd.f32 %v8381_v41, %v3559_v35  ;;  %v3590_v19 = vmul.f32 %v4655_v7, %v3582_v27  ;;  %v3591_v28 = vmul.f32 %v4656_v26, %v3584_v14  ;;  %v10778_v48 = vld [vmem:[#allocation15_spill] sm:$0xff]  ;;  %v4700_v24 = vld [vmem:[%s10188_s6 + $0x440] sm:$0xff] }
 0x8d0   :  { %v3608_v59 = vsel %vm10777_vm12, %v10774_v10, %v10775_v38  ;;  %v3840_v20 = vmul.f32 %v4685_v53, %v3831_v58  ;;  %v3013_v42 = vmul.f32 %v4585_v50, %v3005_v11  ;;  %v3014_v39 = vmul.f32 %v4586_v22, %v3007_v2  ;;  %v4692_v7 = vld [vmem:[%s10188_s6 + $0x400] sm:$0xff]  ;;  %v10779_v26 = vld [vmem:[#allocation27_spill] sm:$0xff]  ;;  %vm10781_vm13 = vmmov %vm10764_vm1 }
 0x8d1   :  { %v3305_v62 = vadd.f32 %v3301_v32, %v10778_v48  ;;  %v3819_v29 = vadd.f32 %v3815_v5, %v3795_v40  ;;  %v3614_v30 = vmul.f32 %v4659_v36, %v3606_v33  ;;  %v3615_v4 = vmul.f32 %v4660_v46, %v3608_v59  ;;  %v10780_v27 = vld [vmem:[#allocation22_spill] sm:$0xff]  ;;  %v8940_v33 = vpop.permute.xlu1 %3576  ;;  %v4701_v14 = vld [vmem:[%s10188_s6 + $0x448] sm:$0xff]  ;;  %vm10782_vm7 = vmmov %vm10764_vm1 }
 0x8d2   :  { %v3304_v25 = vadd.f32 %v3300_v6, %v10778_v48  ;;  %v3820_v1 = vadd.f32 %v3816_v21, %v3796_v12  ;;  %v2993_v41 = vadd.f32 %v2989_v60, %v2969_v31  ;;  %v2994_v35 = vadd.f32 %v2990_v37, %v2970_v57  ;;  %v4589_v48 = vld [vmem:[%s10188_s6 + $0xe0] sm:$0xff]  ;;  %v4590_v31 = vld [vmem:[%s10188_s6 + $0xe8] sm:$0xff]  ;;  %v2980_v22 = vpop.permute.xlu0 %2979  ;;  %vm10808_vm9 = vmmov %vm10770_vm5 }
 0x8d3   :  { %v3867_v40 = vsel %vm1851_vm14, %v10780_v27, %v10779_v26  ;;  %v3843_v12 = vadd.f32 %v3839_v0, %v3819_v29  ;;  %v3594_v57 = vadd.f32 %v3590_v19, %v3570_v9  ;;  %v3595_v5 = vadd.f32 %v3591_v28, %v3571_v16  ;;  %v4693_v21 = vld [vmem:[%s10188_s6 + $0x408] sm:$0xff]  ;;  %v4607_v19 = vld [vmem:[%s10188_s6 + $0x170] sm:$0xff] }
 0x8d4   :  { %v3869_v32 = vsel %vm1851_vm14, %v10779_v26, %v10780_v27  ;;  %v3844_v53 = vadd.f32 %v3840_v20, %v3820_v1  ;;  %v3017_v58 = vadd.f32 %v3013_v42, %v2993_v41  ;;  %v3018_v50 = vadd.f32 %v3014_v39, %v2994_v35  ;;  %v4608_v1 = vld [vmem:[%s10188_s6 + $0x178] sm:$0xff]  ;;  %v4649_v41 = vld [vmem:[%s10188_s6 + $0x2b0] sm:$0xff]  ;;  %v10784_v26 = vld [vmem:[#allocation79_spill] sm:$0xff] }
 0x8d5   :  { %v3309_v29 = vmax.f32 %v3305_v62, 0.0  ;;  %v3618_v9 = vadd.f32 %v3614_v30, %v3594_v57  ;;  %v3619_v11 = vadd.f32 %v3615_v4, %v3595_v5  ;;  %v3875_v2 = vmul.f32 %v4692_v7, %v3867_v40  ;;  %v8963_v10 = vpop.permute.xlu1 %3600  ;;  %v4603_v4 = vld [vmem:[%s10188_s6 + $0x150] sm:$0xff]  ;;  %v4666_v62 = vld [vmem:[%s10188_s6 + $0x338] sm:$0xff]  ;;  %v10785_v40 = vld [vmem:[#allocation78_spill] sm:$0xff] }
 0x8d6   :  { %v3308_v6 = vmax.f32 %v3304_v25, 0.0  ;;  %v8959_v60 = vmul.f32 %v4700_v24, %v8497_v52  ;;  %v3037_v37 = vmul.f32 %v4589_v48, %v8703_v34  ;;  %v3038_v36 = vmul.f32 %v4590_v31, %v8683_v18  ;;  %v4583_v52 = vld [vmem:[%s10188_s6 + $0xb0] sm:$0xff]  ;;  %v4584_v25 = vld [vmem:[%s10188_s6 + $0xb8] sm:$0xff]  ;;  %v8994_v59 = vpop.permute.xlu0 %3829 }
 0x8d7   :  { %v3876_v46 = vmul.f32 %v4693_v21, %v3869_v32  ;;  %v8966_v38 = vmul.f32 %v4701_v14, %v8476_v8  ;;  %v3855_v39 = vadd.f32 %v8327_v49, %v3843_v12  ;;  %v2982_v18 = vsel %vm10781_vm13, %v8781_v56, %v2980_v22  ;;  %v4604_v34 = vld [vmem:[%s10188_s6 + $0x158] sm:$0xff]  ;;  %v4665_v30 = vld [vmem:[%s10188_s6 + $0x330] sm:$0xff]  ;;  %vm10815_vm13 = vmmov %vm10777_vm12 }
 0x8d8   :  { %v2984_v49 = vsel %vm10782_vm7, %v2980_v22, %v8781_v56  ;;  %v3856_v8 = vadd.f32 %v8384_v44, %v3844_v53  ;;  %v8996_v0 = vadd.f32 %v3038_v36, %v3018_v50  ;;  %v8998_v16 = vadd.f32 %v3037_v37, %v3017_v58  ;;  %v4702_v57 = vld [vmem:[%s10188_s6 + $0x450] sm:$0xff]  ;;  %v4588_v21 = vld [vmem:[%s10188_s6 + $0xd8] sm:$0xff] }
 0x8d9   :  { %v9000_v56 = vmin.f32 %v3309_v29, 6.0  ;;  %v9002_v44 = vadd.f32 %v3875_v2, %v3855_v39  ;;  %v9008_v28 = vadd.f32 %v8570_v51, %v3619_v11  ;;  %v9011_v20 = vadd.f32 %v8567_v17, %v3618_v9  ;;  %v9027_v7 = vpop.permute.xlu1 %3861  ;;  %v4587_v5 = vld [vmem:[%s10188_s6 + $0xd0] sm:$0xff]  ;;  %v10786_v32 = vld [vmem:[#allocation81_spill] sm:$0xff] }
 0x8da   :  { %v9013_v42 = vmin.f32 %v3308_v6, 6.0  ;;  %v9015_v24 = vadd.f32 %v3876_v46, %v3856_v8  ;;  %vm10783_vm2 = vcmp.lt.s32.totalorder %v5995_v3, 5  ;;  %v2991_v35 = vmul.f32 %v4583_v52, %v2982_v18  ;;  %v4703_v53 = vld [vmem:[%s10188_s6 + $0x458] sm:$0xff]  ;;  %v4591_v58 = vld [vmem:[%s10188_s6 + $0xf0] sm:$0xff]  ;;  %v3004_v11 = vpop.permute.xlu0 %3003 }
 0x8db   :  { %v3549_v51 = vsel %vm10783_vm2, %v8886_v23, %v8674_v63  ;;  %v2992_v17 = vmul.f32 %v4584_v25, %v2984_v49  ;;  %v9030_v27 = vmul.f32 %v4603_v4, %v10784_v26  ;;  %v9033_v48 = vmul.f32 %v4604_v34, %v10785_v40  ;;  %v4650_v50 = vld [vmem:[%s10188_s6 + $0x2b8] sm:$0xff]  ;;  %vm10787_vm8 = vmmov %vm10783_vm2  ;;  %v10788_v2 = vld [vmem:[#allocation80_spill] sm:$0xff] }
 0x8dc   :  { %v9036_v31 = vmul.f32 %v4665_v30, %v10785_v40  ;;  %v9039_v12 = vmul.f32 %v4666_v62, %v10784_v26  ;;  %v9051_v14 = vmul.f32 %v4607_v19, %v10786_v32  ;;  %v3547_v22 = vsel %vm10787_vm8, %v8674_v63, %v8886_v23  ;;  %v4592_v37 = vld [vmem:[%s10188_s6 + $0xf8] sm:$0xff]  ;;  %v10789_v25 = vld [vmem:[#allocation83_spill] sm:$0xff]  ;;  %v10790_v49 = vld [vmem:[#allocation96_spill] sm:$0xff] }
 0x8dd   :  { %v2971_v29 = vadd.f32 %v8391_v47, %v8646_v61  ;;  %v2972_v9 = vadd.f32 %v8423_v54, %v8649_v43  ;;  %v9071_v6 = vmul.f32 %v4608_v1, %v10788_v2  ;;  %v3556_v36 = vmul.f32 %v4649_v41, %v3549_v51  ;;  %v4611_v54 = vld [vmem:[%s10188_s6 + $0x190] sm:$0xff]  ;;  %v4612_v61 = vld [vmem:[%s10188_s6 + $0x198] sm:$0xff]  ;;  %v9088_v4 = vpop.permute.xlu1 %3047  ;;  %v10792_v1 = vld [vmem:[#allocation46_spill] sm:$0xff] }
 0x8de   :  { %v3006_v46 = vsel %vm914_vm6, %v8848_v55, %v3004_v11  ;;  %v3008_v47 = vsel %vm914_vm6, %v3004_v11, %v8848_v55  ;;  %v9091_v52 = vmul.f32 %v4702_v57, %v8296_v45  ;;  %v9094_v18 = vmul.f32 %v4703_v53, %v10789_v25  ;;  %v4627_v55 = vld [vmem:[%s10188_s6 + $0x210] sm:$0xff]  ;;  %v4628_v30 = vld [vmem:[%s10188_s6 + $0x218] sm:$0xff]  ;;  %v9111_v26 = vpop.permute.xlu0 %3286  ;;  %v10800_v11 = vld [vmem:[#allocation67_spill] sm:$0xff] }
 0x8df   :  { %v2995_v43 = vadd.f32 %v2991_v35, %v2971_v29  ;;  %v2996_v63 = vadd.f32 %v2992_v17, %v2972_v9  ;;  %v3015_v23 = vmul.f32 %v4587_v5, %v3006_v46  ;;  %v3016_v39 = vmul.f32 %v4588_v21, %v3008_v47  ;;  %v10791_v62 = vld [vmem:[#allocation97_spill] sm:$0xff]  ;;  %v4619_v45 = vld [vmem:[%s10188_s6 + $0x1d0] sm:$0xff]  ;;  %v10799_v29 = vld [vmem:[#allocation90_spill] sm:$0xff] }
 0x8e0   :  { %v3039_v8 = vmul.f32 %v4591_v58, %v10790_v49  ;;  %v3557_v34 = vmul.f32 %v4650_v50, %v3547_v22  ;;  %v3040_v19 = vmul.f32 %v4592_v37, %v10791_v62  ;;  %v10793_v41 = vld [vmem:[#allocation89_spill] sm:$0xff]  ;;  %vm10794_vm6 = vcmp.lt.s32.totalorder %v5995_v3, 125  ;;  %v10796_v5 = vld [vmem:[#allocation84_spill] sm:$0xff]  ;;  %v10798_v50 = vld [vmem:[#allocation54_spill] sm:$0xff] }
 0x8e1   :  { %v3217_v51 = vsel %vm10794_vm6, %v10793_v41, %v10792_v1  ;;  %v3019_v35 = vadd.f32 %v3015_v23, %v2995_v43  ;;  %v3020_v17 = vadd.f32 %v3016_v39, %v2996_v63  ;;  %v10795_v40 = vld [vmem:[#allocation85_spill] sm:$0xff]  ;;  %v9117_v21 = vmul.f32 %v4612_v61, %v10796_v5  ;;  %vm10797_vm1 = vmmov %vm10794_vm6  ;;  %v4682_v58 = vld [vmem:[%s10188_s6 + $0x3b0] sm:$0xff]  ;;  %v9137_v37 = vpop.permute.xlu1 %3885 }
 0x8e2   :  { %v9114_v57 = vmul.f32 %v4611_v54, %v10795_v40  ;;  %v4620_v32 = vld [vmem:[%s10188_s6 + $0x1d8] sm:$0xff]  ;;  %v3219_v53 = vsel %vm10797_vm1, %v10792_v1, %v10793_v41  ;;  %v3810_v22 = vsel %vm1786_vm4, %v8926_v13, %v10798_v50  ;;  %v9134_v9 = vmul.f32 %v4627_v55, %v10799_v29  ;;  %v10801_v54 = vld [vmem:[#allocation91_spill] sm:$0xff]  ;;  %v10802_v63 = vld [vmem:[#allocation60_spill] sm:$0xff]  ;;  %v3581_v1 = vpop.permute.xlu0 %3580 }
 0x8e3   :  { %v3560_v2 = vadd.f32 %v3556_v36, %v10800_v11  ;;  %v9139_v46 = vadd.f32 %v3039_v8, %v3019_v35  ;;  %v9141_v47 = vadd.f32 %v3040_v19, %v3020_v17  ;;  %v9144_v61 = vmul.f32 %v4628_v30, %v10801_v54  ;;  %v4683_v39 = vld [vmem:[%s10188_s6 + $0x3b8] sm:$0xff]  ;;  %v4657_v25 = vld [vmem:[%s10188_s6 + $0x2f0] sm:$0xff]  ;;  %v10803_v8 = vld [vmem:[#allocation47_spill] sm:$0xff] }
 0x8e4   :  { %v9146_v43 = vmul.f32 %v4619_v45, %v3217_v51  ;;  %v3561_v23 = vadd.f32 %v3557_v34, %v10802_v63  ;;  %v3808_v36 = vsel %vm1786_vm4, %v10798_v50, %v8926_v13  ;;  %v4658_v55 = vld [vmem:[%s10188_s6 + $0x2f8] sm:$0xff]  ;;  %v9162_v49 = vmul.f32 %v4620_v32, %v3219_v53  ;;  %v10804_v34 = vld [vmem:[#allocation95_spill] sm:$0xff]  ;;  %v4686_v13 = vld [vmem:[%s10188_s6 + $0x3d0] sm:$0xff] }
 0x8e5   :  { %vm10805_vm10 = vcmp.lt.s32.totalorder %v5995_v3, 83  ;;  %v3817_v62 = vmul.f32 %v4682_v58, %v3810_v22  ;;  %v10806_v19 = vld [vmem:[#allocation75_spill] sm:$0xff]  ;;  %v4687_v51 = vld [vmem:[%s10188_s6 + $0x3d8] sm:$0xff]  ;;  %v3583_v17 = vsel %vm10770_vm5, %v8940_v33, %v3581_v1  ;;  %v3585_v40 = vsel %vm10808_vm9, %v3581_v1, %v8940_v33  ;;  %v4599_v5 = vld [vmem:[%s10188_s6 + $0x130] sm:$0xff]  ;;  %v3107_v29 = vpop.permute.xlu1 %3106 }
 0x8e6   :  { %v9168_v30 = vsel %vm10805_vm10, %v10804_v34, %v10803_v8  ;;  %v3834_v45 = vsel %vm1812_vm15, %v8994_v59, %v10806_v19  ;;  %vm10807_vm4 = vmmov %vm10805_vm10  ;;  %v3832_v35 = vsel %vm1812_vm15, %v10806_v19, %v8994_v59  ;;  %v4600_v32 = vld [vmem:[%s10188_s6 + $0x138] sm:$0xff]  ;;  %v3818_v53 = vmul.f32 %v4683_v39, %v3808_v36  ;;  %v10809_v58 = vld [vmem:[#allocation86_spill] sm:$0xff]  ;;  %v3605_v19 = vpop.permute.xlu0 %3604 }
 0x8e7   :  { %v9181_v41 = vsel %vm10807_vm4, %v10803_v8, %v10804_v34  ;;  %v3572_v50 = vadd.f32 %v10809_v58, %v3560_v2  ;;  %v3592_v59 = vmul.f32 %v4657_v25, %v3583_v17  ;;  %v3593_v22 = vmul.f32 %v4658_v55, %v3585_v40  ;;  %v10810_v54 = vld [vmem:[#allocation92_spill] sm:$0xff]  ;;  %v10811_v8 = vld [vmem:[#allocation14_spill] sm:$0xff]  ;;  %v4662_v2 = vld [vmem:[%s10188_s6 + $0x318] sm:$0xff] }
 0x8e8   :  { %v3841_v11 = vmul.f32 %v4686_v13, %v3834_v45  ;;  %v3573_v63 = vadd.f32 %v10810_v54, %v3561_v23  ;;  %vm10812_vm15 = vcmp.lt.s32.totalorder %v5995_v3, 51  ;;  %v4661_v39 = vld [vmem:[%s10188_s6 + $0x310] sm:$0xff]  ;;  %v10814_v36 = vld [vmem:[#allocation53_spill] sm:$0xff]  ;;  %v3842_v55 = vmul.f32 %v4687_v51, %v3832_v35  ;;  %v4593_v51 = vld [vmem:[%s10188_s6 + $0x100] sm:$0xff] }
 0x8e9   :  { %v3109_v33 = vsel %vm10812_vm15, %v10811_v8, %v3107_v29  ;;  %vm10813_vm11 = vmmov %vm10812_vm15  ;;  %v3821_v25 = vadd.f32 %v3817_v62, %v10814_v36  ;;  %v3596_v45 = vadd.f32 %v3592_v59, %v3572_v50  ;;  %v3607_v17 = vsel %vm10777_vm12, %v8963_v10, %v3605_v19  ;;  %v3046_v35 = vpop.permute.xlu1 %3045  ;;  %v4594_v59 = vld [vmem:[%s10188_s6 + $0x108] sm:$0xff] }
 0x8ea   :  { %v3111_v34 = vsel %vm10813_vm11, %v3107_v29, %v10811_v8  ;;  %v3119_v13 = vmul.f32 %v4600_v32, %v3109_v33  ;;  %v3597_v1 = vadd.f32 %v3593_v22, %v3573_v63  ;;  %v3609_v40 = vsel %vm10815_vm13, %v3605_v19, %v8963_v10  ;;  %v10817_v22 = vld [vmem:[#allocation16_spill] sm:$0xff] }
 0x8eb   :  { %v3118_v23 = vmul.f32 %v4599_v5, %v3111_v34  ;;  %v3616_v54 = vmul.f32 %v4661_v39, %v3607_v17  ;;  %v3617_v62 = vmul.f32 %v4662_v2, %v3609_v40  ;;  %v10816_v5 = vld [vmem:[#allocation45_spill] sm:$0xff]  ;;  %v3845_v50 = vadd.f32 %v3841_v11, %v3821_v25  ;;  %v4694_v39 = vld [vmem:[%s10188_s6 + $0x410] sm:$0xff] }
 0x8ec   :  { %v3147_v29 = vadd.f32 %v9033_v48, %v3119_v13  ;;  %v3822_v32 = vadd.f32 %v3818_v53, %v10816_v5  ;;  %v3053_v10 = vsel %vm966_vm3, %v3046_v35, %v10817_v22  ;;  %v3866_v53 = vpop.permute.xlu0 %3865  ;;  %v4695_v2 = vld [vmem:[%s10188_s6 + $0x418] sm:$0xff]  ;;  %vm10818_vm7 = vcmp.lt.s32.totalorder %v5995_v3, 77  ;;  %v4623_v19 = vld [vmem:[%s10188_s6 + $0x1f0] sm:$0xff] }
 0x8ed   :  { %v3146_v58 = vadd.f32 %v9030_v27, %v3118_v23  ;;  %v3055_v27 = vsel %vm966_vm3, %v10817_v22, %v3046_v35  ;;  %v3620_v8 = vadd.f32 %v3616_v54, %v3596_v45  ;;  %v3621_v33 = vadd.f32 %v3617_v62, %v3597_v1  ;;  %v9258_v13 = vpop.permute.xlu1 %3636  ;;  %v4631_v17 = vld [vmem:[%s10188_s6 + $0x230] sm:$0xff]  ;;  %v10821_v40 = vld [vmem:[#allocation93_spill] sm:$0xff] }
 0x8ee   :  { %v3171_v63 = vadd.f32 %v9071_v6, %v3147_v29  ;;  %v3846_v11 = vadd.f32 %v3842_v55, %v3822_v32  ;;  %v3061_v34 = vmul.f32 %v4593_v51, %v3053_v10  ;;  %v3868_v36 = vsel %vm1851_vm14, %v9027_v7, %v3866_v53  ;;  %v10822_v54 = vld [vmem:[#allocation88_spill] sm:$0xff]  ;;  %v10823_v51 = vld [vmem:[#allocation94_spill] sm:$0xff]  ;;  %v4596_v32 = vld [vmem:[%s10188_s6 + $0x118] sm:$0xff] }
 0x8ef   :  { %v3170_v48 = vadd.f32 %v9051_v14, %v3146_v58  ;;  %v3870_v14 = vsel %vm1851_vm14, %v3866_v53, %v9027_v7  ;;  %v3289_v6 = vsel %vm10818_vm7, %v8923_v15, %v9111_v26  ;;  %v3062_v23 = vmul.f32 %v4594_v59, %v3055_v27  ;;  %vm10819_vm14 = vmmov %vm10818_vm7  ;;  %v4595_v5 = vld [vmem:[%s10188_s6 + $0x110] sm:$0xff] }
 0x8f0   :  { %v3195_v55 = vadd.f32 %v9117_v21, %v3171_v63  ;;  %v3291_v7 = vsel %vm10819_vm14, %v9111_v26, %v8923_v15  ;;  %v3065_v45 = vadd.f32 %v3061_v34, %v8998_v16  ;;  %v9269_v1 = vadd.f32 %v9036_v31, %v3620_v8  ;;  %v4624_v21 = vld [vmem:[%s10188_s6 + $0x1f8] sm:$0xff]  ;;  %v10820_v26 = vld [vmem:[#allocation87_spill] sm:$0xff] }
 0x8f1   :  { %v3194_v25 = vadd.f32 %v9114_v57, %v3170_v48  ;;  %v9272_v57 = vadd.f32 %v9039_v12, %v3621_v33  ;;  %v4632_v15 = vld [vmem:[%s10188_s6 + $0x238] sm:$0xff]  ;;  %v3877_v58 = vmul.f32 %v4694_v39, %v3868_v36  ;;  %v3878_v29 = vmul.f32 %v4695_v2, %v3870_v14  ;;  %v3052_v12 = vpop.permute.xlu0 %3051  ;;  %v10824_v48 = vld [vmem:[#allocation19_spill] sm:$0xff]  ;;  %v3884_v8 = vpop.permute.xlu1 %3883  ;;  %v4667_v14 = vld [vmem:[%s10188_s6 + $0x340] sm:$0xff] }
 0x8f2   :  { %v3207_v31 = vadd.f32 %v10821_v40, %v3195_v55  ;;  %v3857_v62 = vadd.f32 %v10822_v54, %v3845_v50  ;;  %v3858_v35 = vadd.f32 %v10823_v51, %v3846_v11  ;;  %v3054_v59 = vsel %vm966_vm3, %v9088_v4, %v3052_v12 }
 0x8f3   :  { %v3206_v16 = vadd.f32 %v10820_v26, %v3194_v25  ;;  %v3056_v22 = vsel %vm966_vm3, %v3052_v12, %v9088_v4  ;;  %v3066_v27 = vadd.f32 %v3062_v23, %v8996_v0  ;;  %v9303_v63 = vadd.f32 %v3065_v45, %v10824_v48  ;;  %v4698_v4 = vld [vmem:[%s10188_s6 + $0x430] sm:$0xff]  ;;  %v4699_v0 = vld [vmem:[%s10188_s6 + $0x438] sm:$0xff]  ;;  %v4696_v23 = vld [vmem:[%s10188_s6 + $0x420] sm:$0xff] }
 0x8f4   :  { %v3231_v10 = vadd.f32 %v9162_v49, %v3207_v31  ;;  %v3250_v33 = vmul.f32 %v4623_v19, %v9168_v30  ;;  %v3251_v53 = vmul.f32 %v4624_v21, %v9181_v41  ;;  %v9307_v11 = vmul.f32 %v4631_v17, %v3289_v6  ;;  %v10825_v19 = vld [vmem:[#allocation76_spill] sm:$0xff]  ;;  %v4697_v17 = vld [vmem:[%s10188_s6 + $0x428] sm:$0xff] }
 0x8f5   :  { %v3230_v50 = vadd.f32 %v9146_v43, %v3206_v16  ;;  %v3299_v34 = vmul.f32 %v4632_v15, %v3291_v7  ;;  %v3881_v43 = vadd.f32 %v3877_v58, %v3857_v62  ;;  %v3882_v39 = vadd.f32 %v3878_v29, %v3858_v35  ;;  %v3890_v36 = vpop.permute.xlu0 %3889  ;;  %v3635_v21 = vpop.permute.xlu1 %3634  ;;  %v10826_v16 = vld [vmem:[#allocation77_spill] sm:$0xff]  ;;  %v4669_v31 = vld [vmem:[%s10188_s6 + $0x350] sm:$0xff] }
 0x8f6   :  { %v3063_v49 = vmul.f32 %v4595_v5, %v3054_v59  ;;  %v3064_v2 = vmul.f32 %v4596_v32, %v3056_v22  ;;  %v3892_v30 = vsel %vm1877_vm0, %v9137_v37, %v3890_v36  ;;  %v3894_v41 = vsel %vm1877_vm0, %v3890_v36, %v9137_v37  ;;  %v4670_v58 = vld [vmem:[%s10188_s6 + $0x358] sm:$0xff] }
 0x8f7   :  { %v3255_v6 = vadd.f32 %v3251_v53, %v3231_v10  ;;  %v3254_v25 = vadd.f32 %v3250_v33, %v3230_v50  ;;  %v3073_v55 = vmax.f32 %v9303_v63, 0.0  ;;  %v3891_v7 = vsel %vm1877_vm0, %v3884_v8, %v10825_v19  ;;  %v10831_v53 = vld [vmem:[#allocation17_spill] sm:$0xff] }
 0x8f8   :  { %v3901_v45 = vmul.f32 %v4698_v4, %v3892_v30  ;;  %v9332_v37 = vadd.f32 %v3066_v27, %v10824_v48  ;;  %v3893_v15 = vsel %vm1877_vm0, %v10825_v19, %v3884_v8  ;;  %v3902_v26 = vmul.f32 %v4699_v0, %v3894_v41 }
 0x8f9   :  { %vm10827_vm3 = vcmp.lt.s32.totalorder %v5995_v3, 43  ;;  %v3279_v29 = vadd.f32 %v9144_v61, %v3255_v6  ;;  %v3067_v12 = vadd.f32 %v3063_v49, %v9139_v46  ;;  %v3068_v54 = vadd.f32 %v3064_v2, %v9141_v47  ;;  %v3641_v35 = vpop.permute.xlu0 %3640  ;;  %v3922_v27 = vpop.permute.xlu1 %3921  ;;  %v4668_v47 = vld [vmem:[%s10188_s6 + $0x348] sm:$0xff] }
 0x8fa   :  { %v3642_v40 = vsel %vm10827_vm3, %v3635_v21, %v10826_v16  ;;  %v3905_v62 = vadd.f32 %v3901_v45, %v3881_v43  ;;  %v3899_v5 = vmul.f32 %v4696_v23, %v3891_v7  ;;  %v3906_v32 = vadd.f32 %v3902_v26, %v3882_v39  ;;  %vm10828_vm0 = vmmov %vm10827_vm3  ;;  %v4706_v39 = vld [vmem:[%s10188_s6 + $0x470] sm:$0xff] }
 0x8fb   :  { %v3650_v51 = vmul.f32 %v4667_v14, %v3642_v40  ;;  %v3643_v59 = vsel %vm10828_vm0, %v9258_v13, %v3641_v35  ;;  %vm10829_vm2 = vmmov %vm10828_vm0  ;;  %v3900_v50 = vmul.f32 %v4697_v17, %v3893_v15  ;;  %v9370_v4 = vadd.f32 %v3067_v12, %v10831_v53  ;;  %v10835_v14 = vld [vmem:[#allocation21_spill] sm:$0xff] }
 0x8fc   :  { %v3645_v22 = vsel %vm10829_vm2, %v3641_v35, %v9258_v13  ;;  %v3652_v10 = vmul.f32 %v4669_v31, %v3643_v59  ;;  %vm10830_vm8 = vmmov %vm10828_vm0  ;;  %v3917_v8 = vadd.f32 %v9091_v52, %v3905_v62  ;;  %v9367_v33 = vadd.f32 %v9094_v18, %v3906_v32  ;;  %v10833_v18 = vld [vmem:[#allocation18_spill] sm:$0xff]  ;;  %v10838_v35 = vld [vmem:[#allocation7_spill] sm:$0xff] }
 0x8fd   :  { %v3654_v61 = vadd.f32 %v3650_v51, %v9011_v20  ;;  %v3653_v46 = vmul.f32 %v4670_v58, %v3645_v22  ;;  %v3644_v48 = vsel %vm10830_vm8, %v10826_v16, %v3635_v21  ;;  %v3303_v13 = vadd.f32 %v3299_v34, %v3279_v29  ;;  %v3926_v49 = vpop.permute.xlu0 %3925  ;;  %v3920_v23 = vpop.permute.xlu1 %3919  ;;  %v4707_v16 = vld [vmem:[%s10188_s6 + $0x478] sm:$0xff]  ;;  %v4705_v22 = vld [vmem:[%s10188_s6 + $0x468] sm:$0xff] }
 0x8fe   :  { %v3656_v20 = vadd.f32 %v3652_v10, %v9269_v1  ;;  %v3278_v2 = vadd.f32 %v9134_v9, %v3254_v25  ;;  %vm10832_vm6 = vcmp.lt.s32.totalorder %v5995_v3, 9  ;;  %v3072_v34 = vadd.f32 %v3068_v54, %v10831_v53  ;;  %v4704_v9 = vld [vmem:[%s10188_s6 + $0x460] sm:$0xff] }
 0x8ff   :  { %v3657_v43 = vadd.f32 %v3653_v46, %v9272_v57  ;;  %v3928_v52 = vsel %vm10832_vm6, %v3922_v27, %v3926_v49  ;;  %v3307_v0 = vadd.f32 %v3303_v13, %v10833_v18  ;;  %v3074_v36 = vmax.f32 %v9332_v37, 0.0  ;;  %v10834_v57 = vld [vmem:[#allocation20_spill] sm:$0xff]  ;;  %vm10836_vm1 = vmmov %vm10832_vm6 }
 0x900   :  { %v3903_v1 = vadd.f32 %v3899_v5, %v9002_v44  ;;  %v3651_v30 = vmul.f32 %v4668_v47, %v3644_v48  ;;  %v9385_v41 = vadd.f32 %v3654_v61, %v10834_v57  ;;  %v3660_v6 = vadd.f32 %v3656_v20, %v10835_v14  ;;  %vm10837_vm10 = vmmov %vm10836_vm1  ;;  %v10841_v20 = vld [vmem:[#allocation23_spill] sm:$0xff] }
 0x901   :  { %v3937_v19 = vmul.f32 %v4706_v39, %v3928_v52  ;;  %v3311_v25 = vmax.f32 %v3307_v0, 0.0  ;;  %v3302_v7 = vadd.f32 %v9307_v11, %v3278_v2  ;;  %v3661_v45 = vadd.f32 %v3657_v43, %v10835_v14  ;;  %v3924_v17 = vpop.permute.xlu0 %3923  ;;  %v582_v54 = vpop.permute.xlu1 %581  ;;  %vm10839_vm4 = vmmov %vm10836_vm1 }
 0x902   :  { %v3075_v21 = vmax.f32 %v9370_v4, 0.0  ;;  %v3904_v44 = vadd.f32 %v3900_v50, %v9015_v24  ;;  %v3930_v37 = vsel %vm10836_vm1, %v3926_v49, %v3922_v27  ;;  %v3076_v15 = vmax.f32 %v3072_v34, 0.0  ;;  %v10840_v27 = vld [vmem:[#allocation6_spill] sm:$0xff] }
 0x903   :  { %v3664_v26 = vmax.f32 %v3660_v6, 0.0  ;;  %v3927_v40 = vsel %vm10837_vm10, %v3920_v23, %v3924_v17  ;;  %v9402_v11 = vmin.f32 %v3311_v25, 6.0  ;;  %v3306_v31 = vadd.f32 %v3302_v7, %v10833_v18  ;;  %v10842_v18 = vld [vmem:[#allocation9_spill] sm:$0xff] }
 0x904   :  { %v3655_v58 = vadd.f32 %v3651_v30, %v9008_v28  ;;  %v3662_v24 = vmax.f32 %v9385_v41, 0.0  ;;  %v3915_v29 = vadd.f32 %v8959_v60, %v3903_v1  ;;  %v3935_v12 = vmul.f32 %v4704_v9, %v3927_v40  ;;  %v10843_v41 = vld [vmem:[#allocation73_spill] sm:$0xff] }
 0x905   :  { %v3941_v62 = vadd.f32 %v3937_v19, %v3917_v8  ;;  %3348 = vmatprep.subr.mxu0 %v9402_v11  ;;  %v3310_v51 = vmax.f32 %v3306_v31, 0.0  ;;  %v605_v5 = vadd.f32 %v582_v54, %v10838_v35  ;;  %v3665_v32 = vmax.f32 %v3661_v45, 0.0  ;;  %v584_v50 = vpop.permute.xlu0 %583  ;;  %v586_v3 = vpop.permute.xlu1 %585  ;;  %v10846_v45 = vld [vmem:[#allocation8_spill] sm:$0xff]  ;;  %v10849_v31 = vld [vmem:[#allocation11_spill] sm:$0xff]  ;;  %v10851_v54 = vld [vmem:[#allocation10_spill] sm:$0xff] }
 0x906   :  { %v3938_v59 = vmul.f32 %v4707_v16, %v3930_v37  ;;  %v3929_v28 = vsel %vm10839_vm4, %v3924_v17, %v3920_v23  ;;  %v3469_v60 = vmax.f32 %v9000_v56, %v9402_v11  ;;  %v9417_v61 = vmin.f32 %v3076_v15, 6.0 }
 0x907   :  { %v9419_v10 = vmin.f32 %v3310_v51, 6.0  ;;  %v4357_v46 = vmul.f32 -1.442695, %v605_v5  ;;  %v606_v47 = vadd.f32 %v10840_v27, %v584_v50  ;;  %v9422_v48 = vmin.f32 %v3664_v26, 6.0  ;;  %v5078_v51 = vld [vmem:[%s10190_s8 + $0xf8] sm:$0xff]  ;;  %v5080_v27 = vld [vmem:[%s10190_s8 + $0xe8] sm:$0xff] }
 0x908   :  { %v3939_v8 = vadd.f32 %v3935_v12, %v3915_v29  ;;  %v9424_v13 = vmin.f32 %v3665_v32, 6.0  ;;  %v3659_v53 = vadd.f32 %v3655_v58, %v10834_v57  ;;  %v9427_v4 = vmin.f32 %v3074_v36, 6.0 }
 0x909   :  { %v3945_v43 = vadd.f32 %v3941_v62, %v10841_v20  ;;  %v3936_v39 = vmul.f32 %v4705_v22, %v3929_v28  ;;  %3349 = vmatpush1.msra.mxu0 %v9419_v10  ;;  %4987 = vpow2.f32 %v4357_v46  ;;  %v4358_v49 = vmul.f32 -1.442695, %v606_v47  ;;  %v588_v36 = vpop.permute.xlu0 %587  ;;  %v590_v9 = vpop.permute.xlu1 %589  ;;  %v5079_v28 = vld [vmem:[%s10190_s8 + $0xf0] sm:$0xff] }
 0x90a   :  { %3350 = vmatprep.subr.mxu0 %v9000_v56  ;;  %v3470_v2 = vrot.slane %v3469_v60, 4  ;;  %3702 = vmatprep.subr.mxu1 %v9424_v13  ;;  %v3663_v52 = vmax.f32 %v3659_v53, 0.0  ;;  %v607_v0 = vadd.f32 %v586_v3, %v10842_v18  ;;  %v3093_v34 = vmax.f32 %v9427_v4, %v9417_v61  ;;  %v10853_v3 = vld [vmem:[#allocation12_spill] sm:$0xff] }
 0x90b   :  { %v3942_v1 = vadd.f32 %v3938_v59, %v9367_v33  ;;  %v3916_v30 = vadd.f32 %v8966_v38, %v3904_v44  ;;  %3351 = vmatpush1.msra.mxu0 %v9013_v42  ;;  %4989 = vpow2.f32 %v4358_v49  ;;  %v9439_v57 = vmin.f32 %v3075_v21, 6.0  ;;  %3703 = vmatpush1.msra.mxu1 %v9422_v48 }
 0x90c   :  { %v3943_v14 = vadd.f32 %v3939_v8, %v10843_v41  ;;  %3419 = vmatprep.subr.mxu0 %v9417_v61  ;;  %v10844_v6 = vmov 0.015625   ;;  %vm10845_vm5 = vcmask 130048   ;;  %v9446_v23 = vmin.f32 %v3663_v52, 6.0  ;;  %v10852_v8 = vld [vmem:[#allocation13_spill] sm:$0xff] }
 0x90d   :  { %4633 = vmatmul.mubr.msk.f32.vlgmr.msra.gmra.mxu0 %vm10845_vm5, %v10844_v6  ;;  %v4359_v19 = vmul.f32 -1.442695, %v607_v0  ;;  %v3094_v33 = vrot.slane %v3093_v34, 4  ;;  %v3949_v38 = vmax.f32 %v3945_v43, 0.0  ;;  %v9451_v25 = vmin.f32 %v3073_v55, 6.0  ;;  %v592_v26 = vpop.permute.xlu0 %591  ;;  %vm10848_vm9 = vmmov %vm10845_vm5  ;;  %v5082_v0 = vld [vmem:[%s10190_s8 + $0xd8] sm:$0xff] }
 0x90e   :  { %3420 = vmatpush1.msra.mxu0 %v9439_v57  ;;  %v9453_v7 = vmin.f32 %v3662_v24, 6.0  ;;  %v608_v21 = vadd.f32 %v10846_v45, %v588_v36  ;;  %v10847_v44 = vmov 0.0   ;;  %v3940_v37 = vadd.f32 %v3936_v39, %v3916_v30  ;;  %3704 = vmatprep.subr.mxu1 %v9446_v23  ;;  %vm10850_vm15 = vmmov %vm10845_vm5  ;;  %v594_v24 = vpop.permute.xlu1 %593  ;;  %v5081_v39 = vld [vmem:[%s10190_s8 + $0xe0] sm:$0xff] }
 0x90f   :  { %3455 = vmatprep.mubr.f32.mxu0 %v10847_v44  ;;  %v3471_v17 = vmax.f32 %v3469_v60, %v3470_v2  ;;  %4991 = vpow2.f32 %v4359_v19  ;;  %v3095_v15 = vmax.f32 %v3093_v34, %v3094_v33  ;;  %3421 = vmatprep.subr.mxu0 %v9427_v4  ;;  %v3754_v63 = vmax.f32 %v9446_v23, %v9424_v13  ;;  %v10854_v2 = vld [vmem:[#allocation59_spill] sm:$0xff]  ;;  %v5083_v19 = vld [vmem:[%s10190_s8 + $0xd0] sm:$0xff]  ;;  %vm10857_vm11 = vmmov %vm10845_vm5 }
 0x910   :  { %3422 = vmatpush1.msra.mxu0 %v9451_v25  ;;  %3705 = vmatpush1.msra.mxu1 %v9453_v7  ;;  %v4360_v55 = vmul.f32 -1.442695, %v608_v21  ;;  %v3946_v16 = vadd.f32 %v3942_v1, %v10841_v20  ;;  %v3947_v40 = vmax.f32 %v3943_v14, 0.0  ;;  %v609_v58 = vadd.f32 %v590_v9, %v10849_v31  ;;  %v5084_v21 = vld [vmem:[%s10190_s8 + $0xc8] sm:$0xff] }
 0x911   :  { %4634 = vmatmul.mubr.msk.f32.vlgmr.msra.gmra.mxu0 %vm10848_vm9, %v10844_v6  ;;  %4671 = vmatmul.mubr.msk.f32.vlgmr.msra.gmra.mxu1 %vm10850_vm15, %v10844_v6  ;;  %v3096_v29 = vrot.slane %v3095_v15, 2  ;;  %v610_v62 = vadd.f32 %v10851_v54, %v592_v26  ;;  %v3472_v35 = vrot.slane %v3471_v17, 2  ;;  %v9474_v5 = vmin.f32 %v3949_v38, 6.0  ;;  %v596_v22 = vpop.permute.xlu0 %595  ;;  %v10855_v38 = vld [vmem:[#allocation65_spill] sm:$0xff] }
 0x912   :  { %4993 = vpow2.f32 %v4360_v55  ;;  %v3950_v12 = vmax.f32 %v3946_v16, 0.0  ;;  %4023 = vmatprep.mubr.f32.mxu0 %v10847_v44  ;;  %4048 = vmatprep.subr.mxu1 %v5078_v51  ;;  %v4361_v32 = vmul.f32 -1.442695, %v609_v58  ;;  %v3944_v59 = vadd.f32 %v3940_v37, %v10843_v41  ;;  %v2701_v43 = vpop.permute.xlu1 %2700  ;;  %v5086_v58 = vld [vmem:[%s10190_s8 + $0xb8] sm:$0xff]  ;;  %v5088_v51 = vld [vmem:[%s10190_s8 + $0x2f0] sm:$0xff] }
 0x913   :  { %4049 = vmatpush1.msra.mxu1 %v5079_v28  ;;  %v3755_v60 = vrot.slane %v3754_v63, 4  ;;  %v4362_v46 = vmul.f32 -1.442695, %v610_v62  ;;  %v611_v53 = vadd.f32 %v594_v24, %v10852_v8  ;;  %v612_v20 = vadd.f32 %v10853_v3, %v596_v22  ;;  %v5089_v22 = vld [vmem:[%s10190_s8 + $0xb0] sm:$0xff]  ;;  %v5091_v8 = vld [vmem:[%s10190_s8 + $0xa8] sm:$0xff] }
 0x914   :  { %v9480_v50 = vmin.f32 %v3950_v12, 6.0  ;;  %4050 = vmatprep.subr.mxu1 %v5080_v27  ;;  %4995 = vpow2.f32 %v4361_v32  ;;  %v3948_v47 = vmax.f32 %v3944_v59, 0.0  ;;  %v9491_v49 = vmin.f32 %v3947_v40, 6.0  ;;  %v10856_v40 = vld [vmem:[#allocation30_spill] sm:$0xff]  ;;  %v10858_v32 = vld [vmem:[#allocation44_spill] sm:$0xff] }
 0x915   :  { %4051 = vmatpush1.msra.mxu1 %v5081_v39  ;;  %4997 = vpow2.f32 %v4362_v46  ;;  %v2724_v52 = vadd.f32 %v2701_v43, %v10854_v2  ;;  %v9494_v18 = vmax.f32 %v3095_v15, %v3096_v29  ;;  %v4363_v1 = vmul.f32 -1.442695, %v611_v53  ;;  %v2703_v41 = vpop.permute.xlu0 %2702  ;;  %v5087_v29 = vld [vmem:[%s10190_s8 + $0x2f8] sm:$0xff]  ;;  %v5092_v53 = vld [vmem:[%s10190_s8 + $0x2e0] sm:$0xff] }
 0x916   :  { %3987 = vmatprep.subr.mxu0 %v9480_v50  ;;  %4052 = vmatprep.subr.mxu1 %v5082_v0  ;;  %v4988_v34 = vpop.eup %4987  ;;  %v9500_v36 = vmin.f32 %v3948_v47, 6.0  ;;  %v4364_v30 = vmul.f32 -1.442695, %v612_v20  ;;  %v3473_v14 = vmax.f32 %v3471_v17, %v3472_v35  ;;  %v3756_v9 = vmax.f32 %v3754_v63, %v3755_v60  ;;  %v2705_v15 = vpop.permute.xlu1 %2704  ;;  %v5085_v63 = vld [vmem:[%s10190_s8 + $0xc0] sm:$0xff]  ;;  %v5090_v60 = vld [vmem:[%s10190_s8 + $0x2e8] sm:$0xff]  ;;  %v5094_v0 = vld [vmem:[%s10190_s8 + $0x2d8] sm:$0xff] }
 0x917   :  { %3988 = vmatpush1.msra.mxu0 %v9474_v5  ;;  %4053 = vmatpush1.msra.mxu1 %v5083_v19  ;;  %v637_v33 = vadd.f32 1.0, %v4988_v34  ;;  %v2725_v45 = vadd.f32 %v10855_v38, %v2703_v41  ;;  %4999 = vpow2.f32 %v4363_v1  ;;  %v4555_v17 = vmul.f32 -1.442695, %v2724_v52  ;;  %v10859_v20 = vld [vmem:[#allocation71_spill] sm:$0xff]  ;;  %v5093_v2 = vld [vmem:[%s10190_s8 + $0xa0] sm:$0xff]  ;;  %v5095_v41 = vld [vmem:[%s10190_s8 + $0x98] sm:$0xff] }
 0x918   :  { %4054 = vmatprep.subr.mxu1 %v5084_v21  ;;  %v4990_v44 = vpop.eup %4989  ;;  %3989 = vmatprep.subr.mxu0 %v9500_v36  ;;  %v4039_v37 = vmax.f32 %v9500_v36, %v9480_v50  ;;  %v3474_v26 = vrot.slane %v3473_v14, 1  ;;  %v2726_v31 = vadd.f32 %v2705_v15, %v10856_v40  ;;  %v3098_v54 = vrot.slane %v9494_v18, 1  ;;  %v5096_v19 = vld [vmem:[%s10190_s8 + $0x2d0] sm:$0xff] }
 0x919   :  { %4055 = vmatpush1.msra.mxu1 %v5085_v63  ;;  %5001 = vrcp.f32 %v637_v33  ;;  %v638_v55 = vadd.f32 1.0, %v4990_v44  ;;  %3990 = vmatpush1.msra.mxu0 %v9491_v49  ;;  %v4556_v16 = vmul.f32 -1.442695, %v2725_v45  ;;  %v2707_v12 = vpop.permute.xlu0 %2706  ;;  %v5098_v45 = vld [vmem:[%s10190_s8 + $0x2c8] sm:$0xff] }
 0x91a   :  { %4056 = vmatprep.subr.mxu1 %v5086_v58  ;;  %v4040_v24 = vrot.slane %v4039_v37, 4  ;;  %4708 = vmatmul.mubr.msk.f32.vlgmr.msra.gmra.mxu0 %vm10857_vm11, %v10844_v6  ;;  %5003 = vpow2.f32 %v4364_v30  ;;  %v4557_v35 = vmul.f32 -1.442695, %v2726_v31  ;;  %v2727_v59 = vadd.f32 %v10858_v32, %v2707_v12  ;;  %v2709_v46 = vpop.permute.xlu1 %2708  ;;  %v5101_v31 = vld [vmem:[%s10190_s8 + $0x80] sm:$0xff]  ;;  %v5104_v32 = vld [vmem:[%s10190_s8 + $0x2b0] sm:$0xff] }
 0x91b   :  { %4119 = vmatprep.subr.mxu0 %v5087_v29  ;;  %5005 = vrcp.f32 %v638_v55  ;;  %v3757_v6 = vrot.slane %v3756_v9, 2  ;;  %4057 = vmatpush1.msra.mxu1 %v5089_v22  ;;  %v9536_v27 = vmax.f32 %v3473_v14, %v3474_v26  ;;  %v2728_v43 = vadd.f32 %v2709_v46, %v10859_v20  ;;  %v5100_v26 = vld [vmem:[%s10190_s8 + $0x2c0] sm:$0xff]  ;;  %v5102_v29 = vld [vmem:[%s10190_s8 + $0x2b8] sm:$0xff] }
 0x91c   :  { %v4992_v62 = vpop.eup %4991  ;;  %4120 = vmatpush1.msra.mxu0 %v5088_v51  ;;  %5007 = vpow2.f32 %v4555_v17  ;;  %v4041_v47 = vmax.f32 %v4039_v37, %v4040_v24  ;;  %4058 = vmatprep.subr.mxu1 %v5091_v8  ;;  %v4558_v3 = vmul.f32 -1.442695, %v2727_v59  ;;  %v3099_v1 = vmax.f32 %v9494_v18, %v3098_v54  ;;  %v5097_v18 = vld [vmem:[%s10190_s8 + $0x90] sm:$0xff]  ;;  %v5099_v17 = vld [vmem:[%s10190_s8 + $0x88] sm:$0xff]  ;;  %v5103_v51 = vld [vmem:[%s10190_s8 + $0x78] sm:$0xff] }
 0x91d   :  { %v639_v28 = vadd.f32 1.0, %v4992_v62  ;;  %4121 = vmatprep.subr.mxu0 %v5090_v60  ;;  %5009 = vpow2.f32 %v4556_v16  ;;  %v3758_v39 = vmax.f32 %v3756_v9, %v3757_v6  ;;  %4059 = vmatpush1.msra.mxu1 %v5093_v2  ;;  %v2711_v34 = vpop.permute.xlu0 %2710  ;;  %v4559_v33 = vmul.f32 -1.442695, %v2728_v43  ;;  %v10860_v9 = vld [vmem:[#allocation74_spill] sm:$0xff]  ;;  %v10861_v16 = vld [vmem:[#allocation49_spill] sm:$0xff]  ;;  %v10862_v6 = vld [vmem:[#allocation56_spill] sm:$0xff] }
 0x91e   :  { %4122 = vmatpush1.msra.mxu0 %v5092_v53  ;;  %v4042_v30 = vrot.slane %v4041_v47, 2  ;;  %4060 = vmatprep.subr.mxu1 %v5095_v41  ;;  %v2729_v38 = vadd.f32 %v10860_v9, %v2711_v34  ;;  %v2713_v37 = vpop.permute.xlu1 %2712  ;;  %v3477_v55 = vmax.f32 %v3099_v1, %v9536_v27  ;;  %v5106_v60 = vld [vmem:[%s10190_s8 + $0x2a8] sm:$0xff]  ;;  %v5109_v43 = vld [vmem:[%s10190_s8 + $0x60] sm:$0xff]  ;;  %v5111_v34 = vld [vmem:[%s10190_s8 + $0x58] sm:$0xff] }
 0x91f   :  { %v4994_v52 = vpop.eup %4993  ;;  %5011 = vrcp.f32 %v639_v28  ;;  %4123 = vmatprep.subr.mxu0 %v5094_v0  ;;  %4061 = vmatpush1.msra.mxu1 %v5097_v18  ;;  %v3759_v21 = vrot.slane %v3758_v39, 1  ;;  %v2730_v40 = vadd.f32 %v2713_v37, %v10861_v16  ;;  %v5105_v28 = vld [vmem:[%s10190_s8 + $0x70] sm:$0xff]  ;;  %v5107_v8 = vld [vmem:[%s10190_s8 + $0x68] sm:$0xff]  ;;  %v5115_v18 = vld [vmem:[%s10190_s8 + $0x280] sm:$0xff] }
 0x920   :  { %v640_v14 = vadd.f32 1.0, %v4994_v52  ;;  %4124 = vmatpush1.msra.mxu0 %v5096_v19  ;;  %5013 = vpow2.f32 %v4557_v35  ;;  %v4043_v44 = vmax.f32 %v4041_v47, %v4042_v30  ;;  %4062 = vmatprep.subr.mxu1 %v5099_v17  ;;  %v4560_v63 = vmul.f32 -1.442695, %v2729_v38  ;;  %v5110_v52 = vld [vmem:[%s10190_s8 + $0x298] sm:$0xff]  ;;  %v5112_v30 = vld [vmem:[%s10190_s8 + $0x290] sm:$0xff]  ;;  %v5114_v9 = vld [vmem:[%s10190_s8 + $0x288] sm:$0xff] }
 0x921   :  { %4125 = vmatprep.subr.mxu0 %v5098_v45  ;;  %5015 = vpow2.f32 %v4558_v3  ;;  %v4996_v15 = vpop.eup %4995  ;;  %4063 = vmatpush1.msra.mxu1 %v5101_v31  ;;  %v3760_v12 = vmax.f32 %v3758_v39, %v3759_v21  ;;  %v2715_v62 = vpop.permute.xlu0 %2714  ;;  %v4561_v59 = vmul.f32 -1.442695, %v2730_v40  ;;  %v9595_v47 = vstv %s9538_s9  ;;  %v5108_v3 = vld [vmem:[%s10190_s8 + $0x2a0] sm:$0xff]  ;;  %v5116_v37 = vld [vmem:[%s10190_s8 + $0x278] sm:$0xff]  ;;  %v5117_v17 = vld [vmem:[%s10190_s8 + $0x48] sm:$0xff] }
 0x922   :  { %5017 = vrcp.f32 %v640_v14  ;;  %4126 = vmatpush1.msra.mxu0 %v5100_v26  ;;  %v4998_v58 = vpop.eup %4997  ;;  %v641_v24 = vadd.f32 1.0, %v4996_v15  ;;  %v4044_v54 = vrot.slane %v4043_v44, 1  ;;  %4064 = vmatprep.subr.mxu1 %v5103_v51  ;;  %v2731_v22 = vadd.f32 %v10862_v6, %v2715_v62  ;;  %v5113_v14 = vld [vmem:[%s10190_s8 + $0x50] sm:$0xff]  ;;  %v5119_v16 = vld [vmem:[%s10190_s8 + $0x268] sm:$0xff]  ;;  %v5120_v31 = vld [vmem:[%s10190_s8 + $0x40] sm:$0xff] }
 0x923   :  { %4127 = vmatprep.subr.mxu0 %v5102_v29  ;;  %5019 = vpow2.f32 %v4559_v33  ;;  %v642_v35 = vadd.f32 1.0, %v4998_v58  ;;  %4065 = vmatpush1.msra.mxu1 %v5105_v28  ;;  %v3762_v46 = vmax.f32 %v3477_v55, %v3760_v12  ;;  %v5121_v29 = vld [vmem:[%s10190_s8 + $0x260] sm:$0xff]  ;;  %v5122_v12 = vld [vmem:[%s10190_s8 + $0x38] sm:$0xff]  ;;  %v5126_v28 = vld [vmem:[%s10190_s8 + $0x248] sm:$0xff] }
 0x924   :  { %4128 = vmatpush1.msra.mxu0 %v5104_v32  ;;  %5021 = vpow2.f32 %v4560_v63  ;;  %v4045_v27 = vmax.f32 %v4043_v44, %v4044_v54  ;;  %4066 = vmatprep.subr.mxu1 %v5107_v8  ;;  %v5000_v53 = vpop.eup %4999  ;;  %v4562_v20 = vmul.f32 -1.442695, %v2731_v22  ;;  %v5118_v63 = vld [vmem:[%s10190_s8 + $0x270] sm:$0xff]  ;;  %v5123_v51 = vld [vmem:[%s10190_s8 + $0x258] sm:$0xff] }
 0x925   :  { %5023 = vrcp.f32 %v641_v24  ;;  %4129 = vmatprep.subr.mxu0 %v5106_v60  ;;  %4067 = vmatpush1.msra.mxu1 %v5109_v43  ;;  %v643_v2 = vadd.f32 1.0, %v5000_v53  ;;  %v5124_v32 = vld [vmem:[%s10190_s8 + $0x250] sm:$0xff]  ;;  %v5128_v53 = vld [vmem:[%s10190_s8 + $0x240] sm:$0xff]  ;;  %v5130_v43 = vld [vmem:[%s10190_s8 + $0x238] sm:$0xff] }
 0x926   :  { %5025 = vrcp.f32 %v642_v35  ;;  %4130 = vmatpush1.msra.mxu0 %v5108_v3  ;;  %v5002_v39 = vpop.eup %5001  ;;  %v4047_v0 = vmax.f32 %v3762_v46, %v4045_v27  ;;  %4068 = vmatprep.subr.mxu1 %v5111_v34  ;;  %v5127_v46 = vld [vmem:[%s10190_s8 + $0x28] sm:$0xff]  ;;  %v5129_v3 = vld [vmem:[%s10190_s8 + $0x20] sm:$0xff] }
 0x927   :  { %4131 = vmatprep.subr.mxu0 %v5110_v52  ;;  %5027 = vpow2.f32 %v4561_v59  ;;  %v5004_v1 = vpop.eup %5003  ;;  %v2245_v41 = vmul.f32 %v5002_v39, %v9595_v47  ;;  %4069 = vmatpush1.msra.mxu1 %v5113_v14  ;;  %v5125_v59 = vld [vmem:[%s10190_s8 + $0x30] sm:$0xff] }
 0x928   :  { %4132 = vmatpush1.msra.mxu0 %v5112_v30  ;;  %5029 = vpow2.f32 %v4562_v20  ;;  %v5006_v19 = vpop.eup %5005  ;;  %v644_v33 = vadd.f32 1.0, %v5004_v1  ;;  %4183 = vmatprep.mubr.f32.mxu0 %v4047_v0  ;;  %v5131_v52 = vld [vmem:[%s10190_s8 + $0x230] sm:$0xff]  ;;  %v5132_v0 = vld [vmem:[%s10190_s8 + $0x18] sm:$0xff]  ;;  %v5133_v30 = vld [vmem:[%s10190_s8 + $0x228] sm:$0xff] }
 0x929   :  { %5031 = vrcp.f32 %v643_v2  ;;  %4133 = vmatprep.subr.mxu0 %v5114_v9  ;;  %v5008_v38 = vpop.eup %5007  ;;  %2255 = vperm.xlu1 %4985, %v2245_v41   ;;  %v2246_v45 = vmul.f32 %v5006_v19, %v9595_v47  ;;  %v5135_v9 = vld [vmem:[%s10190_s8 + $0x10] sm:$0xff] }
 0x92a   :  { %4134 = vmatpush1.msra.mxu0 %v5115_v18  ;;  %v5010_v21 = vpop.eup %5009  ;;  %5033 = vrcp.f32 %v644_v33  ;;  %v2756_v44 = vadd.f32 1.0, %v5008_v38  ;;  %4070 = vmatprep.subr.mxu1 %v5117_v17  ;;  %v5134_v33 = vld [vmem:[%s10190_s8 + $0x220] sm:$0xff]  ;;  %v5136_v38 = vld [vmem:[%s10190_s8 + $0x218] sm:$0xff]  ;;  %v5139_v17 = vld [vmem:[%s10190_s8 + $0x208] sm:$0xff] }
 0x92b   :  { %4135 = vmatprep.subr.mxu0 %v5116_v37  ;;  %v2757_v26 = vadd.f32 1.0, %v5010_v21  ;;  %2260 = vperm.xlu0 %4986, %v2246_v45   ;;  %v5137_v21 = vld [vmem:[%s10190_s8 + $0x210] sm:$0xff]  ;;  %v3462_v37 = vmax.f32 %v9013_v42, %v9419_v10 }
 0x92c   :  { %v5012_v15 = vpop.eup %5011  ;;  %4136 = vmatpush1.msra.mxu0 %v5118_v63  ;;  %5035 = vrcp.f32 %v2756_v44  ;;  %4071 = vmatpush1.msra.mxu1 %v5120_v31  ;;  %v5138_v44 = vld [vmem:[%s10190_s8 + $0x8] sm:$0xff]  ;;  %v5140_v63 = vld [vmem:[%s10190_s8 + $0x200] sm:$0xff]  ;;  %v3747_v31 = vmax.f32 %v9453_v7, %v9422_v48 }
 0x92d   :  { %v5014_v55 = vpop.eup %5013  ;;  %4137 = vmatprep.subr.mxu0 %v5119_v16  ;;  %v2247_v40 = vmul.f32 %v5012_v15, %v9595_v47  ;;  %5037 = vrcp.f32 %v2757_v26  ;;  %4072 = vmatprep.subr.mxu1 %v5122_v12  ;;  %v5144_v12 = vld [vmem:[%s10190_s8 + $0x1f8] sm:$0xff] }
 0x92e   :  { %v5016_v58 = vpop.eup %5015  ;;  %v2758_v24 = vadd.f32 1.0, %v5014_v55  ;;  %4138 = vmatpush1.msra.mxu0 %v5121_v29  ;;  %4073 = vmatpush1.msra.mxu1 %v5125_v59  ;;  %v5141_v55 = vld [vmem:[%s10190_s8] sm:$0xff]  ;;  %v5143_v29 = vld [vmem:[%s10190_s8 + $0x3f0] sm:$0xff] }
 0x92f   :  { %v5018_v54 = vpop.eup %5017  ;;  %v2759_v62 = vadd.f32 1.0, %v5016_v58  ;;  %4139 = vmatprep.subr.mxu0 %v5123_v51  ;;  %2265 = vperm.xlu1 %4985, %v2247_v40   ;;  %v3086_v40 = vmax.f32 %v9451_v25, %v9439_v57  ;;  %v5142_v58 = vld [vmem:[%s10190_s8 + $0x3f8] sm:$0xff]  ;;  %v4032_v51 = vmax.f32 %v9491_v49, %v9474_v5 }
 0x930   :  { %v5020_v35 = vpop.eup %5019  ;;  %5039 = vrcp.f32 %v2758_v24  ;;  %4140 = vmatpush1.msra.mxu0 %v5124_v32  ;;  %v2248_v60 = vmul.f32 %v5018_v54, %v9595_v47  ;;  %4074 = vmatprep.subr.mxu1 %v5127_v46  ;;  %v3748_v46 = vrot.slane %v3747_v31, 4 }
 0x931   :  { %v5022_v6 = vpop.eup %5021  ;;  %5041 = vrcp.f32 %v2759_v62  ;;  %v2760_v22 = vadd.f32 1.0, %v5020_v35  ;;  %4141 = vmatprep.subr.mxu0 %v5126_v28  ;;  %4075 = vmatpush1.msra.mxu1 %v5129_v3  ;;  %v3463_v62 = vrot.slane %v3462_v37, 4  ;;  %v5145_v35 = vld [vmem:[%s10190_s8 + $0x3e8] sm:$0xff]  ;;  %v5147_v28 = vld [vmem:[%s10190_s8 + $0x1f0] sm:$0xff] }
 0x932   :  { %v5024_v27 = vpop.eup %5023  ;;  %v2761_v8 = vadd.f32 1.0, %v5022_v6  ;;  %4142 = vmatpush1.msra.mxu0 %v5128_v53  ;;  %4076 = vmatprep.subr.mxu1 %v5132_v0  ;;  %v5146_v6 = vld [vmem:[%s10190_s8 + $0x3e0] sm:$0xff]  ;;  %v5149_v53 = vld [vmem:[%s10190_s8 + $0x3d0] sm:$0xff]  ;;  %v5150_v3 = vld [vmem:[%s10190_s8 + $0x1e8] sm:$0xff] }
 0x933   :  { %v5026_v20 = vpop.eup %5025  ;;  %5043 = vrcp.f32 %v2760_v22  ;;  %4143 = vmatprep.subr.mxu0 %v5130_v43  ;;  %2270 = vperm.xlu1 %4985, %v2248_v60   ;;  %v2249_v39 = vmul.f32 %v5024_v27, %v9595_v47  ;;  %v3087_v60 = vrot.slane %v3086_v40, 4  ;;  %v5148_v27 = vld [vmem:[%s10190_s8 + $0x3d8] sm:$0xff]  ;;  %v4033_v43 = vrot.slane %v4032_v51, 4 }
 0x934   :  { %v5028_v2 = vpop.eup %5027  ;;  %4144 = vmatpush1.msra.mxu0 %v5131_v52  ;;  %5045 = vrcp.f32 %v2761_v8  ;;  %v2250_v41 = vmul.f32 %v5026_v20, %v9595_v47  ;;  %4077 = vmatpush1.msra.mxu1 %v5135_v9  ;;  %v3464_v20 = vmax.f32 %v3462_v37, %v3463_v62  ;;  %v5156_v9 = vld [vmem:[%s10190_s8 + $0x1d8] sm:$0xff] }
 0x935   :  { %v5030_v34 = vpop.eup %5029  ;;  %v2762_v1 = vadd.f32 1.0, %v5028_v2  ;;  %4145 = vmatprep.subr.mxu0 %v5133_v30  ;;  %2275 = vperm.xlu0 %4986, %v2249_v39   ;;  %v5151_v39 = vld [vmem:[%s10190_s8 + $0x3c8] sm:$0xff]  ;;  %v3088_v30 = vmax.f32 %v3086_v40, %v3087_v60  ;;  %v5166_v62 = vld [vmem:[%s10190_s8 + $0x378] sm:$0xff]  ;;  %v5171_v60 = vld [vmem:[%s10190_s8 + $0x360] sm:$0xff] }
 0x936   :  { %v5032_v14 = vpop.eup %5031  ;;  %v2763_v19 = vadd.f32 1.0, %v5030_v34  ;;  %4146 = vmatpush1.msra.mxu0 %v5134_v33  ;;  %4078 = vmatprep.subr.mxu1 %v5138_v44  ;;  %v5152_v34 = vld [vmem:[%s10190_s8 + $0x3c0] sm:$0xff]  ;;  %v5155_v33 = vld [vmem:[%s10190_s8 + $0x3b0] sm:$0xff]  ;;  %v4034_v44 = vmax.f32 %v4032_v51, %v4033_v43  ;;  %v5162_v40 = vld [vmem:[%s10190_s8 + $0x1c8] sm:$0xff] }
 0x937   :  { %5047 = vrcp.f32 %v2762_v1  ;;  %4147 = vmatprep.subr.mxu0 %v5136_v38  ;;  %2280 = vperm.xlu1 %4985, %v2250_v41   ;;  %v2251_v18 = vmul.f32 %v5032_v14, %v9595_v47  ;;  %v5034_v45 = vpop.eup %5033  ;;  %v5153_v1 = vld [vmem:[%s10190_s8 + $0x1e0] sm:$0xff]  ;;  %v3749_v41 = vmax.f32 %v3747_v31, %v3748_v46  ;;  %v5154_v14 = vld [vmem:[%s10190_s8 + $0x3b8] sm:$0xff]  ;;  %v3465_v38 = vrot.slane %v3464_v20, 2  ;;  %v5163_v31 = vld [vmem:[%s10190_s8 + $0x388] sm:$0xff] }
 0x938   :  { %4148 = vmatpush1.msra.mxu0 %v5137_v21  ;;  %5049 = vrcp.f32 %v2763_v19  ;;  %v2252_v15 = vmul.f32 %v5034_v45, %v9595_v47  ;;  %4079 = vmatpush1.msra.mxu1 %v5141_v55  ;;  %v5172_v46 = vld [vmem:[%s10190_s8 + $0x1a8] sm:$0xff]  ;;  %v5176_v43 = vld [vmem:[%s10190_s8 + $0x198] sm:$0xff] }
 0x939   :  { %4149 = vmatprep.subr.mxu0 %v5139_v17  ;;  %2285 = vperm.xlu0 %4986, %v2251_v18   ;;  %v5036_v26 = vpop.eup %5035  ;;  %v5157_v18 = vld [vmem:[%s10190_s8 + $0x3a8] sm:$0xff]  ;;  %v5158_v17 = vld [vmem:[%s10190_s8 + $0x3a0] sm:$0xff]  ;;  %v3750_v55 = vrot.slane %v3749_v41, 2 }
 0x93a   :  { %4150 = vmatpush1.msra.mxu0 %v5140_v63  ;;  %v5038_v16 = vpop.eup %5037  ;;  %v4244_v24 = vmul.f32 %v5036_v26, %v9595_v47  ;;  %4080 = vmatprep.subr.mxu1 %v5144_v12  ;;  %v3089_v26 = vrot.slane %v3088_v30, 2  ;;  %v5160_v63 = vld [vmem:[%s10190_s8 + $0x398] sm:$0xff]  ;;  %v5164_v12 = vld [vmem:[%s10190_s8 + $0x380] sm:$0xff] }
 0x93b   :  { %4151 = vmatprep.subr.mxu0 %v5142_v58  ;;  %2290 = vperm.xlu1 %4985, %v2252_v15   ;;  %v4245_v32 = vmul.f32 %v5038_v16, %v9595_v47  ;;  %v5159_v15 = vld [vmem:[%s10190_s8 + $0x1d0] sm:$0xff] }
 0x93c   :  { %4152 = vmatpush2.msra.mxu0 %v5143_v29  ;;  %4081 = vmatpush2.msra.mxu1 %v5147_v28  ;;  %v5161_v16 = vld [vmem:[%s10190_s8 + $0x390] sm:$0xff]  ;;  %v4035_v29 = vrot.slane %v4034_v44, 2  ;;  %v3090_v51 = vmax.f32 %v3088_v30, %v3089_v26  ;;  %v5181_v30 = vld [vmem:[%s10190_s8 + $0x338] sm:$0xff]  ;;  %v5190_v26 = vld [vmem:[%s10190_s8 + $0x160] sm:$0xff] }
 0x93d   :  { %v5040_v54 = vpop.eup %5039  ;;  %4153 = vmatprep.subr.mxu0 %v5145_v35  ;;  %4254 = vperm.xlu0 %4986, %v4244_v24   ;;  %v3466_v24 = vmax.f32 %v3464_v20, %v3465_v38  ;;  %v5167_v35 = vld [vmem:[%s10190_s8 + $0x370] sm:$0xff]  ;;  %v5185_v38 = vld [vmem:[%s10190_s8 + $0x328] sm:$0xff] }
 0x93e   :  { %v5042_v59 = vpop.eup %5041  ;;  %4154 = vmatpush2.msra.mxu0 %v5146_v6  ;;  %v4246_v22 = vmul.f32 %v5040_v54, %v9595_v47  ;;  %4082 = vmatprep.subr.mxu1 %v5150_v3  ;;  %v5165_v54 = vld [vmem:[%s10190_s8 + $0x1c0] sm:$0xff]  ;;  %v5170_v28 = vld [vmem:[%s10190_s8 + $0x1b0] sm:$0xff] }
 0x93f   :  { %4155 = vmatprep.subr.mxu0 %v5148_v27  ;;  %4259 = vperm.xlu1 %4985, %v4245_v32   ;;  %v4247_v2 = vmul.f32 %v5042_v59, %v9595_v47  ;;  %v5168_v32 = vld [vmem:[%s10190_s8 + $0x1b8] sm:$0xff]  ;;  %v5169_v59 = vld [vmem:[%s10190_s8 + $0x368] sm:$0xff]  ;;  %v3467_v6 = vrot.slane %v3466_v24, 1  ;;  %v5174_v3 = vld [vmem:[%s10190_s8 + $0x1a0] sm:$0xff] }
 0x940   :  { %v5044_v8 = vpop.eup %5043  ;;  %4156 = vmatpush2.msra.mxu0 %v5149_v53  ;;  %4083 = vmatpush2.msra.mxu1 %v5153_v1  ;;  %v5173_v27 = vld [vmem:[%s10190_s8 + $0x358] sm:$0xff]  ;;  %v5175_v20 = vld [vmem:[%s10190_s8 + $0x350] sm:$0xff]  ;;  %v5180_v1 = vld [vmem:[%s10190_s8 + $0x188] sm:$0xff] }
 0x941   :  { %4157 = vmatprep.subr.mxu0 %v5151_v39  ;;  %4264 = vperm.xlu0 %4986, %v4246_v22   ;;  %v4248_v52 = vmul.f32 %v5044_v8, %v9595_v47  ;;  %v5046_v0 = vpop.eup %5045  ;;  %v4036_v22 = vmax.f32 %v4034_v44, %v4035_v29  ;;  %v3091_v8 = vrot.slane %v3090_v51, 1  ;;  %v5177_v39 = vld [vmem:[%s10190_s8 + $0x348] sm:$0xff]  ;;  %v5187_v44 = vld [vmem:[%s10190_s8 + $0x320] sm:$0xff] }
 0x942   :  { %4158 = vmatpush2.msra.mxu0 %v5152_v34  ;;  %4084 = vmatprep.subr.mxu1 %v5156_v9  ;;  %v4249_v45 = vmul.f32 %v5046_v0, %v9595_v47  ;;  %v5178_v0 = vld [vmem:[%s10190_s8 + $0x190] sm:$0xff]  ;;  %v5179_v34 = vld [vmem:[%s10190_s8 + $0x340] sm:$0xff]  ;;  %v5184_v9 = vld [vmem:[%s10190_s8 + $0x178] sm:$0xff] }
 0x943   :  { %4159 = vmatprep.subr.mxu0 %v5154_v14  ;;  %4269 = vperm.xlu1 %4985, %v4247_v2   ;;  %v3468_v2 = vmax.f32 %v3466_v24, %v3467_v6  ;;  %v5196_v24 = vld [vmem:[%s10190_s8 + $0x148] sm:$0xff]  ;;  %v5197_v29 = vld [vmem:[%s10190_s8 + $0x140] sm:$0xff] }
 0x944   :  { %v5048_v19 = vpop.eup %5047  ;;  %4160 = vmatpush2.msra.mxu0 %v5155_v33  ;;  %4085 = vmatpush2.msra.mxu1 %v5159_v15  ;;  %v5183_v33 = vld [vmem:[%s10190_s8 + $0x330] sm:$0xff]  ;;  %v10863_v6 = vld [vmem:[#allocation51_spill] sm:$0xff] }
 0x945   :  { %4161 = vmatprep.subr.mxu0 %v5157_v18  ;;  %4274 = vperm.xlu0 %4986, %v4248_v52   ;;  %v4250_v21 = vmul.f32 %v5048_v19, %v9595_v47  ;;  %v5050_v37 = vpop.eup %5049  ;;  %v4037_v52 = vrot.slane %v4036_v22, 1  ;;  %v5182_v19 = vld [vmem:[%s10190_s8 + $0x180] sm:$0xff] }
 0x946   :  { %4162 = vmatpush2.msra.mxu0 %v5158_v17  ;;  %4086 = vmatprep.subr.mxu1 %v5162_v40  ;;  %v4251_v58 = vmul.f32 %v5050_v37, %v9595_v47  ;;  %v3751_v47 = vmax.f32 %v3749_v41, %v3750_v55  ;;  %v3092_v41 = vmax.f32 %v3090_v51, %v3091_v8  ;;  %v5188_v37 = vld [vmem:[%s10190_s8 + $0x168] sm:$0xff]  ;;  %v5189_v17 = vld [vmem:[%s10190_s8 + $0x318] sm:$0xff]  ;;  %v5201_v51 = vld [vmem:[%s10190_s8 + $0x120] sm:$0xff] }
 0x947   :  { %4163 = vmatprep.subr.mxu0 %v5160_v63  ;;  %4279 = vperm.xlu1 %4985, %v4249_v45   ;;  %v4038_v45 = vmax.f32 %v4036_v22, %v4037_v52  ;;  %v5191_v63 = vld [vmem:[%s10190_s8 + $0x310] sm:$0xff]  ;;  %v5192_v55 = vld [vmem:[%s10190_s8 + $0x158] sm:$0xff]  ;;  %v10867_v52 = vlaneseq }
 0x948   :  { %4164 = vmatpush2.msra.mxu0 %v5161_v16  ;;  %4087 = vmatpush2.msra.mxu1 %v5165_v54  ;;  %v3752_v53 = vrot.slane %v3751_v47, 1  ;;  %v3476_v18 = vmax.f32 %v3092_v41, %v3468_v2  ;;  %v5193_v16 = vld [vmem:[%s10190_s8 + $0x308] sm:$0xff]  ;;  %v5199_v54 = vld [vmem:[%s10190_s8 + $0x130] sm:$0xff] }
 0x949   :  { %4165 = vmatprep.subr.mxu0 %v5163_v31  ;;  %4284 = vperm.xlu0 %4986, %v4250_v21   ;;  %v5186_v21 = vld [vmem:[%s10190_s8 + $0x170] sm:$0xff] }
 0x94a   :  { %4166 = vmatpush2.msra.mxu0 %v5164_v12  ;;  %4088 = vmatprep.subr.mxu1 %v5168_v32  ;;  %v3753_v14 = vmax.f32 %v3751_v47, %v3752_v53  ;;  %v5194_v31 = vld [vmem:[%s10190_s8 + $0x150] sm:$0xff]  ;;  %v5198_v12 = vld [vmem:[%s10190_s8 + $0x138] sm:$0xff]  ;;  %v5204_v32 = vld [vmem:[%s10190_s8 + $0x108] sm:$0xff] }
 0x94b   :  { %4167 = vmatprep.subr.mxu0 %v5166_v62  ;;  %4289 = vperm.xlu1 %4985, %v4251_v58   ;;  %v5195_v58 = vld [vmem:[%s10190_s8 + $0x300] sm:$0xff]  ;;  %v5200_v62 = vld [vmem:[%s10190_s8 + $0x128] sm:$0xff]  ;;  %v5202_v47 = vld [vmem:[%s10190_s8 + $0x118] sm:$0xff] }
 0x94c   :  { %4168 = vmatpush2.msra.mxu0 %v5167_v35  ;;  %4089 = vmatpush2.msra.mxu1 %v5170_v28  ;;  %v3761_v15 = vmax.f32 %v3476_v18, %v3753_v14  ;;  %v5203_v35 = vld [vmem:[%s10190_s8 + $0x110] sm:$0xff] }
 0x94d   :  { %4169 = vmatprep.subr.mxu0 %v5169_v59  ;;  %4090 = vmatprep.subr.mxu1 %v5172_v46  ;;  %v5205_v59 = vld [vmem:[%s10190_s8 + $0x100] sm:$0xff]  ;;  %v10864_v22 = vld [vmem:[#allocation48_spill] sm:$0xff] }
 0x94e   :  { %4170 = vmatpush2.msra.mxu0 %v5171_v60  ;;  %4091 = vmatpush2.msra.mxu1 %v5174_v3  ;;  %v4046_v40 = vmax.f32 %v3761_v15, %v4038_v45  ;;  %v2185_v28 = vadd.f32 %v10864_v22, %v10863_v6  ;;  %v10865_v60 = vld [vmem:[#allocation52_spill] sm:$0xff]  ;;  %v10866_v46 = vld [vmem:[#allocation50_spill] sm:$0xff]  ;;  %v5207_v45 = vld [vmem:[%s10182_s0 + $0x8] sm:$0xff] }
 0x94f   :  { %4171 = vmatprep.subr.mxu0 %v5173_v27  ;;  %4092 = vmatprep.subr.mxu1 %v5176_v43  ;;  %v2187_v27 = vadd.f32 %v10866_v46, %v10865_v60  ;;  %v10872_v22 = vld [vmem:[#allocation57_spill] sm:$0xff]  ;;  %v10873_v60 = vld [vmem:[#allocation28_spill] sm:$0xff] }
 0x950   :  { %4172 = vmatpush2.msra.mxu0 %v5175_v20  ;;  %4093 = vmatpush2.msra.mxu1 %v5178_v0  ;;  %v4511_v8 = vmul.f32 -1.442695, %v2185_v28  ;;  %v2205_v0 = vshrl.u32 %v10867_v52, 7 }
 0x951   :  { %4173 = vmatprep.subr.mxu0 %v5177_v39  ;;  %4094 = vmatprep.subr.mxu1 %v5180_v1  ;;  %v4512_v53 = vmul.f32 -1.442695, %v2187_v27  ;;  %v9923_v1 = vstv %s191_s5 }
 0x952   :  { %4174 = vmatpush2.msra.mxu0 %v5179_v34  ;;  %4095 = vmatpush2.msra.mxu1 %v5182_v19  ;;  %5051 = vpow2.f32 %v4511_v8  ;;  %v9926_v41 = vsub.s32 0, %v2205_v0  ;;  %v10875_v0 = vld [vmem:[#allocation38_spill] sm:$0xff] }
 0x953   :  { %4175 = vmatprep.subr.mxu0 %v5181_v30  ;;  %4096 = vmatprep.subr.mxu1 %v5184_v9  ;;  %5053 = vpow2.f32 %v4512_v53 }
 0x954   :  { %4176 = vmatpush2.msra.mxu0 %v5183_v33  ;;  %4097 = vmatpush2.msra.mxu1 %v5186_v21 }
 0x955   :  { %4177 = vmatprep.subr.mxu0 %v5185_v38  ;;  %4098 = vmatprep.subr.mxu1 %v5188_v37  ;;  %v5206_v38 = vld [vmem:[%s10182_s0] sm:$0xff] }
 0x956   :  { %4178 = vmatpush2.msra.mxu0 %v5187_v44  ;;  %4099 = vmatpush2.msra.mxu1 %v5190_v26  ;;  %v10868_v44 = vld [vmem:[#allocation32_spill] sm:$0xff] }
 0x957   :  { %4179 = vmatprep.subr.mxu0 %v5189_v17  ;;  %4100 = vmatprep.subr.mxu1 %v5192_v55  ;;  %v10869_v17 = vld [vmem:[#allocation55_spill] sm:$0xff] }
 0x958   :  { %4180 = vmatpush2.msra.mxu0 %v5191_v63  ;;  %4101 = vmatpush2.msra.mxu1 %v5194_v31  ;;  %v5208_v63 = vld [vmem:[%s10182_s0 + $0x10] sm:$0xff] }
 0x959   :  { %4181 = vmatprep.subr.mxu0 %v5193_v16  ;;  %4102 = vmatprep.subr.mxu1 %v5196_v24  ;;  %v5209_v16 = vld [vmem:[%s10182_s0 + $0x18] sm:$0xff]  ;;  %v10870_v24 = vld [vmem:[#allocation36_spill] sm:$0xff] }
 0x95a   :  { %4182 = vmatpush2.msra.mxu0 %v5195_v58  ;;  %4103 = vmatpush2.msra.mxu1 %v5197_v29 }
 0x95b   :  { %4184 = vmatmul.mubr.f32.vlgmr.msra.gmra.mxu0 %v4046_v40  ;;  %4104 = vmatprep.subr.mxu1 %v5198_v12  ;;  %v10871_v12 = vld [vmem:[#allocation29_spill] sm:$0xff] }
 0x95c   :  { %4105 = vmatpush2.msra.mxu1 %v5199_v54 }
 0x95d   :  { %4106 = vmatprep.subr.mxu1 %v5200_v62 }
 0x95e   :  { %4107 = vmatpush2.msra.mxu1 %v5201_v51 }
 0x95f   :  { %4108 = vmatprep.subr.mxu1 %v5202_v47  ;;  %v5052_v3 = vpop.eup %5051 }
 0x960   :  { %4109 = vmatpush2.msra.mxu1 %v5203_v35  ;;  %v5054_v20 = vpop.eup %5053  ;;  %v2195_v43 = vadd.f32 1.0, %v5052_v3  ;;  %v5210_v35 = vld [vmem:[%s10182_s0 + $0x20] sm:$0xff]  ;;  %v5212_v3 = vld [vmem:[%s10182_s0 + $0x30] sm:$0xff] }
 0x961   :  { %4110 = vmatprep.subr.mxu1 %v5204_v32  ;;  %v2196_v39 = vadd.f32 1.0, %v5054_v20 }
 0x962   :  { %4111 = vmatpush2.msra.mxu1 %v5205_v59  ;;  %5055 = vrcp.f32 %v2195_v43  ;;  %v5211_v59 = vld [vmem:[%s10182_s0 + $0x28] sm:$0xff]  ;;  %v5213_v43 = vld [vmem:[%s10182_s0 + $0x38] sm:$0xff] }
 0x963   :  { %5057 = vrcp.f32 %v2196_v39 }
 0x96f   :  { %v5056_v2 = vpop.eup %5055 }
 0x970   :  { %v5058_v34 = vpop.eup %5057  ;;  %v2202_v30 = vmul.f32 %v5056_v2, %v9923_v1  ;;  %v10874_v2 = vld [vmem:[#allocation31_spill] sm:$0xff] }
 0x971   :  { %v2203_v14 = vmul.f32 %v5058_v34, %v9923_v1 }
 0x972   :  { %v9930_v19 = vrot.slane %v2202_v30, %v9926_v41 }
 0x973   :  { %v9933_v33 = vrot.slane %v2203_v14, %v9926_v41  ;;  %v5214_v14 = vld [vmem:[%s10182_s0 + $0x40] sm:$0xff] }
 0x974   :  { %v2212_v18 = vmul.f32 %v5206_v38, %v9930_v19  ;;  %v2214_v55 = vmul.f32 %v5208_v63, %v9930_v19  ;;  %v2216_v32 = vmul.f32 %v5210_v35, %v9930_v19  ;;  %v2218_v20 = vmul.f32 %v5212_v3, %v9930_v19  ;;  %v5215_v38 = vld [vmem:[%s10182_s0 + $0x48] sm:$0xff]  ;;  %v5216_v63 = vld [vmem:[%s10182_s0 + $0x50] sm:$0xff]  ;;  %v5221_v3 = vld [vmem:[%s10182_s0 + $0x78] sm:$0xff] }
 0x975   :  { %v2213_v21 = vmul.f32 %v5207_v45, %v9933_v33  ;;  %v2215_v40 = vmul.f32 %v5209_v16, %v9933_v33  ;;  %v2217_v6 = vmul.f32 %v5211_v59, %v9933_v33  ;;  %v2219_v39 = vmul.f32 %v5213_v43, %v9933_v33  ;;  %v10876_v45 = vld [vmem:[#allocation40_spill] sm:$0xff]  ;;  %v5217_v16 = vld [vmem:[%s10182_s0 + $0x58] sm:$0xff]  ;;  %v5219_v35 = vld [vmem:[%s10182_s0 + $0x68] sm:$0xff] }
 0x976   :  { %v10880_v59 = vld [vmem:[#allocation58_spill] sm:$0xff] }
 0x9a4   :  { %v2256_v9 = vpop.permute.xlu1 %2255 }
 0x9a5   :  { %v2293_v37 = vmul.f32 %v2256_v9, %v10868_v44  ;;  %v2294_v15 = vmul.f32 %v2256_v9, %v10869_v17  ;;  %v2220_v9 = vmul.f32 %v5214_v14, %v9930_v19  ;;  %v10877_v44 = vld [vmem:[#allocation63_spill] sm:$0xff] }
 0x9a6   :  { %v2261_v26 = vpop.permute.xlu0 %2260 }
 0x9a7   :  { %v2309_v31 = vadd.f32 %v2293_v37, %v2212_v18  ;;  %v2310_v58 = vadd.f32 %v2294_v15, %v2213_v21  ;;  %v2295_v29 = vmul.f32 %v2261_v26, %v10870_v24  ;;  %v2296_v54 = vmul.f32 %v2261_v26, %v10871_v12  ;;  %v10878_v24 = vld [vmem:[#allocation72_spill] sm:$0xff] }
 0x9a8   :  { %v2221_v18 = vmul.f32 %v5215_v38, %v9933_v33  ;;  %v10879_v12 = vld [vmem:[#allocation64_spill] sm:$0xff] }
 0x9a9   :  { %2325 = vst [vmem:[%s10192_s10] sm:$0xff] %v2309_v31  ;;  %2326 = vst [vmem:[%s10192_s10 + $0x8] sm:$0xff] %v2310_v58  ;;  %v2311_v62 = vadd.f32 %v2295_v29, %v2214_v55  ;;  %v2312_v51 = vadd.f32 %v2296_v54, %v2215_v40  ;;  %v2222_v55 = vmul.f32 %v5216_v63, %v9930_v19 }
 0x9aa   :  { %v2266_v47 = vpop.permute.xlu1 %2265  ;;  %v2223_v40 = vmul.f32 %v5217_v16, %v9933_v33 }
 0x9ab   :  { %v2297_v28 = vmul.f32 %v2266_v47, %v10872_v22  ;;  %v2298_v46 = vmul.f32 %v2266_v47, %v10873_v60  ;;  %2327 = vst [vmem:[%s10192_s10 + $0x10] sm:$0xff] %v2311_v62  ;;  %2328 = vst [vmem:[%s10192_s10 + $0x18] sm:$0xff] %v2312_v51  ;;  %v5218_v51 = vld [vmem:[%s10182_s0 + $0x60] sm:$0xff] }
 0x9ac   :  { %v2224_v47 = vmul.f32 %v5218_v51, %v9930_v19  ;;  %v10881_v22 = vld [vmem:[#allocation42_spill] sm:$0xff] }
 0x9ad   :  { %v2313_v27 = vadd.f32 %v2297_v28, %v2216_v32  ;;  %v2314_v8 = vadd.f32 %v2298_v46, %v2217_v6  ;;  %v2225_v32 = vmul.f32 %v5219_v35, %v9933_v33 }
 0x9ae   :  { %v2271_v53 = vpop.permute.xlu1 %2270 }
 0x9af   :  { %2329 = vst [vmem:[%s10192_s10 + $0x20] sm:$0xff] %v2313_v27  ;;  %2330 = vst [vmem:[%s10192_s10 + $0x28] sm:$0xff] %v2314_v8  ;;  %v2299_v52 = vmul.f32 %v2271_v53, %v10874_v2  ;;  %v2300_v34 = vmul.f32 %v2271_v53, %v10875_v0  ;;  %v5220_v8 = vld [vmem:[%s10182_s0 + $0x70] sm:$0xff]  ;;  %v10882_v2 = vld [vmem:[#allocation26_spill] sm:$0xff] }
 0x9b0   :  { %v2276_v30 = vpop.permute.xlu0 %2275  ;;  %v2226_v53 = vmul.f32 %v5220_v8, %v9930_v19  ;;  %v10883_v0 = vld [vmem:[#allocation25_spill] sm:$0xff] }
 0x9b1   :  { %v2301_v21 = vmul.f32 %v2276_v30, %v10876_v45  ;;  %v2302_v37 = vmul.f32 %v2276_v30, %v10877_v44  ;;  %v2315_v17 = vadd.f32 %v2299_v52, %v2218_v20  ;;  %v2316_v15 = vadd.f32 %v2300_v34, %v2219_v39 }
 0x9b2   :  { %v2281_v26 = vpop.permute.xlu1 %2280  ;;  %v2227_v20 = vmul.f32 %v5221_v3, %v9933_v33 }
 0x9b3   :  { %v2317_v31 = vadd.f32 %v2301_v21, %v2220_v9  ;;  %v2318_v58 = vadd.f32 %v2302_v37, %v2221_v18  ;;  %2331 = vst [vmem:[%s10192_s10 + $0x30] sm:$0xff] %v2315_v17  ;;  %2332 = vst [vmem:[%s10192_s10 + $0x38] sm:$0xff] %v2316_v15  ;;  %v2303_v29 = vmul.f32 %v2281_v26, %v10878_v24 }
 0x9b4   :  { %v2304_v54 = vmul.f32 %v2281_v26, %v10879_v12  ;;  %v2286_v62 = vpop.permute.xlu0 %2285 }
 0x9b5   :  { %2333 = vst [vmem:[%s10192_s10 + $0x40] sm:$0xff] %v2317_v31  ;;  %2334 = vst [vmem:[%s10192_s10 + $0x48] sm:$0xff] %v2318_v58  ;;  %v2305_v6 = vmul.f32 %v2286_v62, %v10880_v59  ;;  %v2306_v28 = vmul.f32 %v2286_v62, %v10881_v22  ;;  %v2319_v60 = vadd.f32 %v2303_v29, %v2222_v55 }
 0x9b6   :  { %v2320_v46 = vadd.f32 %v2304_v54, %v2223_v40  ;;  %v2291_v27 = vpop.permute.xlu1 %2290 }
 0x9b7   :  { %v2321_v43 = vadd.f32 %v2305_v6, %v2224_v47  ;;  %v2322_v39 = vadd.f32 %v2306_v28, %v2225_v32  ;;  %2335 = vst [vmem:[%s10192_s10 + $0x50] sm:$0xff] %v2319_v60  ;;  %v2307_v52 = vmul.f32 %v2291_v27, %v10882_v2  ;;  %v2308_v19 = vmul.f32 %v2291_v27, %v10883_v0 }
 0x9b8   :  { %2336 = vst [vmem:[%s10192_s10 + $0x58] sm:$0xff] %v2320_v46  ;;  %v4255_v62 = vpop.permute.xlu0 %4254 }
 0x9b9   :  { %2337 = vst [vmem:[%s10192_s10 + $0x60] sm:$0xff] %v2321_v43  ;;  %2338 = vst [vmem:[%s10192_s10 + $0x68] sm:$0xff] %v2322_v39  ;;  %v2323_v33 = vadd.f32 %v2307_v52, %v2226_v53  ;;  %v2324_v34 = vadd.f32 %v2308_v19, %v2227_v20  ;;  %v4292_v20 = vmul.f32 %v4255_v62, %v9451_v25 }
 0x9ba   :  { %v4260_v51 = vpop.permute.xlu1 %4259  ;;  %v10066_v43 = vmul.f32 %v4255_v62, %v9427_v4  ;;  %v5222_v4 = vld [vmem:[%s10182_s0 + $0x80] sm:$0xff]  ;;  %v5233_v62 = vld [vmem:[%s10182_s0 + $0xb8] sm:$0xff] }
 0x9bb   :  { %2339 = vst [vmem:[%s10192_s10 + $0x70] sm:$0xff] %v2323_v33  ;;  %2340 = vst [vmem:[%s10192_s10 + $0x78] sm:$0xff] %v2324_v34  ;;  %v4294_v39 = vmul.f32 %v4260_v51, %v9439_v57 }
 0x9bc   :  { %v4265_v6 = vpop.permute.xlu0 %4264 }
 0x9bd   :  { %v4296_v2 = vmul.f32 %v4265_v6, %v9013_v42  ;;  %v5223_v42 = vld [vmem:[%s10182_s0 + $0x90] sm:$0xff] }
 0x9be   :  { %v4270_v22 = vpop.permute.xlu1 %4269 }
 0x9bf   :  { %v4298_v0 = vmul.f32 %v4270_v22, %v9419_v10 }
 0x9c0   :  { %v4275_v28 = vpop.permute.xlu0 %4274 }
 0x9c1   :  { %v4300_v52 = vmul.f32 %v4275_v28, %v9453_v7  ;;  %v5224_v7 = vld [vmem:[%s10182_s0 + $0xa0] sm:$0xff] }
 0x9c2   :  { %v4280_v60 = vpop.permute.xlu1 %4279 }
 0x9c3   :  { %v4302_v34 = vmul.f32 %v4280_v60, %v9422_v48  ;;  %v5225_v48 = vld [vmem:[%s10182_s0 + $0xb0] sm:$0xff] }
 0x9c4   :  { %v4285_v27 = vpop.permute.xlu0 %4284 }
 0x9c5   :  { %v4304_v33 = vmul.f32 %v4285_v27, %v9491_v49 }
 0x9c6   :  { %v4290_v8 = vpop.permute.xlu1 %4289 }
 0x9cd   :  { %v3386_v30 = vpop.f32.mrf.mxu0 }
 0x9cf   :  { %v3388_v14 = vpop.f32.mrf.mxu0 }
 0x9d1   :  { %v3457_v9 = vpop.f32.mrf.mxu0  ;;  %v3740_v18 = vpop.f32.mrf.mxu1 }
 0x9d2   :  { %v3458_v21 = vadd.f32 %v3457_v9, %v3386_v30  ;;  %v4306_v30 = vmul.f32 %v4290_v8, %v9474_v5  ;;  %v5227_v9 = vld [vmem:[%s10182_s0 + $0xd0] sm:$0xff] }
 0x9d3   :  { %v3459_v38 = vpop.f32.mrf.mxu0  ;;  %v3742_v44 = vpop.f32.mrf.mxu1 }
 0x9d4   :  { %v3460_v45 = vadd.f32 %v3459_v38, %v3388_v14  ;;  %v3745_v15 = vadd.f32 %v3740_v18, %v3458_v21  ;;  %v5228_v18 = vld [vmem:[%s10182_s0 + $0xe0] sm:$0xff]  ;;  %v5229_v21 = vld [vmem:[%s10182_s0 + $0xf0] sm:$0xff] }
 0x9d6   :  { %v3746_v17 = vadd.f32 %v3742_v44, %v3460_v45 }
 0x9da   :  { %v4025_v37 = vpop.f32.mrf.mxu0 }
 0x9db   :  { %v4030_v55 = vadd.f32 %v4025_v37, %v3745_v15 }
 0x9dc   :  { %v4027_v26 = vpop.f32.mrf.mxu0 }
 0x9dd   :  { %v4031_v63 = vadd.f32 %v4027_v26, %v3746_v17 }
 0x9df   :  { %4112 = vmatprep.mubr.f32.mxu1 %v4031_v63 }
 0x9e0   :  { %4113 = vmatmul.mubr.f32.vlgmr.msra.gmra.mxu1 %v4030_v55 }
 0xa1b   :  { %v4185_v16 = vpop.f32.mrf.mxu0 }
 0xa1d   :  { %v4187_v58 = vpop.f32.mrf.mxu0 }
 0xaa0   :  { %v4114_v40 = vpop.f32.mrf.mxu1 }
 0xaa1   :  { %v4186_v31 = vadd.f32 %v4185_v16, %v4114_v40 }
 0xaa2   :  { %v4116_v24 = vpop.f32.mrf.mxu1 }
 0xaa3   :  { %v4709_v29 = vmul.f32 -1.442695, %v4186_v31  ;;  %v4188_v12 = vadd.f32 %v4187_v58, %v4116_v24  ;;  %v4297_v31 = vmul.f32 %v4265_v6, %v9000_v56  ;;  %v4295_v58 = vmul.f32 %v4260_v51, %v9417_v61  ;;  %v5236_v6 = vld [vmem:[%s10182_s0 + $0xe8] sm:$0xff] }
 0xaa4   :  { %v4299_v24 = vmul.f32 %v4270_v22, %v9402_v11  ;;  %v4301_v11 = vmul.f32 %v4275_v28, %v9446_v23  ;;  %v4305_v61 = vmul.f32 %v4285_v27, %v9500_v36  ;;  %v5237_v28 = vld [vmem:[%s10182_s0 + $0xf8] sm:$0xff] }
 0xaa5   :  { %5059 = vpow2.f32 %v4709_v29  ;;  %v4710_v54 = vmul.f32 -1.442695, %v4188_v12  ;;  %v4303_v29 = vmul.f32 %v4280_v60, %v9424_v13  ;;  %v4307_v12 = vmul.f32 %v4290_v8, %v9480_v50  ;;  %v5230_v13 = vld [vmem:[%s10182_s0 + $0x88] sm:$0xff]  ;;  %v5231_v50 = vld [vmem:[%s10182_s0 + $0x98] sm:$0xff] }
 0xaa7   :  { %5061 = vpow2.f32 %v4710_v54 }
 0xab2   :  { %v5060_v47 = vpop.eup %5059 }
 0xab3   :  { %v4196_v35 = vadd.f32 1.0, %v5060_v47  ;;  %v5234_v47 = vld [vmem:[%s10182_s0 + $0xc8] sm:$0xff] }
 0xab4   :  { %v5062_v32 = vpop.eup %5061 }
 0xab5   :  { %5063 = vrcp.f32 %v4196_v35  ;;  %v4197_v59 = vadd.f32 1.0, %v5062_v32  ;;  %v5235_v32 = vld [vmem:[%s10182_s0 + $0xd8] sm:$0xff] }
 0xab7   :  { %5065 = vrcp.f32 %v4197_v59 }
 0xac2   :  { %v5064_v46 = vpop.eup %5063 }
 0xac3   :  { %v4202_v53 = vmul.f32 %v5064_v46, %v9923_v1 }
 0xac4   :  { %v5066_v3 = vpop.eup %5065 }
 0xac5   :  { %v4207_v19 = vrot.slane %v4202_v53, %v9926_v41  ;;  %v4203_v25 = vmul.f32 %v5066_v3, %v9923_v1  ;;  %v5226_v1 = vld [vmem:[%s10182_s0 + $0xc0] sm:$0xff] }
 0xac7   :  { %v4212_v57 = vmul.f32 %v5222_v4, %v4207_v19  ;;  %v4214_v10 = vmul.f32 %v5223_v42, %v4207_v19  ;;  %v4216_v49 = vmul.f32 %v5224_v7, %v4207_v19  ;;  %v4218_v5 = vmul.f32 %v5225_v48, %v4207_v19 }
 0xac8   :  { %v4220_v14 = vmul.f32 %v5226_v1, %v4207_v19  ;;  %v4222_v38 = vmul.f32 %v5227_v9, %v4207_v19  ;;  %v4224_v45 = vmul.f32 %v5228_v18, %v4207_v19  ;;  %v4226_v44 = vmul.f32 %v5229_v21, %v4207_v19 }
 0xac9   :  { %v4308_v37 = vadd.f32 %v4292_v20, %v4212_v57  ;;  %v4310_v17 = vadd.f32 %v4294_v39, %v4214_v10  ;;  %v4312_v15 = vadd.f32 %v4296_v2, %v4216_v49  ;;  %v4314_v26 = vadd.f32 %v4298_v0, %v4218_v5 }
 0xaca   :  { %v4316_v63 = vadd.f32 %v4300_v52, %v4220_v14  ;;  %v4318_v55 = vadd.f32 %v4302_v34, %v4222_v38  ;;  %v4320_v16 = vadd.f32 %v4304_v33, %v4224_v45  ;;  %v4322_v40 = vadd.f32 %v4306_v30, %v4226_v44 }
 0xacb   :  { %4711 = vst [vmem:[%s10192_s10 + $0x80] sm:$0xff] %v4308_v37  ;;  %4713 = vst [vmem:[%s10192_s10 + $0x90] sm:$0xff] %v4310_v17  ;;  %v4211_v56 = vrot.slane %v4203_v25, %v9926_v41  ;;  %v5232_v41 = vld [vmem:[%s10182_s0 + $0xa8] sm:$0xff] }
 0xacc   :  { %4715 = vst [vmem:[%s10192_s10 + $0xa0] sm:$0xff] %v4312_v15  ;;  %4717 = vst [vmem:[%s10192_s10 + $0xb0] sm:$0xff] %v4314_v26 }
 0xacd   :  { %4719 = vst [vmem:[%s10192_s10 + $0xc0] sm:$0xff] %v4316_v63  ;;  %4721 = vst [vmem:[%s10192_s10 + $0xd0] sm:$0xff] %v4318_v55  ;;  %v4213_v23 = vmul.f32 %v5230_v13, %v4211_v56  ;;  %v4215_v36 = vmul.f32 %v5231_v50, %v4211_v56  ;;  %v4217_v54 = vmul.f32 %v5232_v41, %v4211_v56 }
 0xace   :  { %4723 = vst [vmem:[%s10192_s10 + $0xe0] sm:$0xff] %v4320_v16  ;;  %4725 = vst [vmem:[%s10192_s10 + $0xf0] sm:$0xff] %v4322_v40  ;;  %v4219_v51 = vmul.f32 %v5233_v62, %v4211_v56  ;;  %v4221_v35 = vmul.f32 %v5234_v47, %v4211_v56  ;;  %v4223_v59 = vmul.f32 %v5235_v32, %v4211_v56 }
 0xacf   :  { %v4225_v22 = vmul.f32 %v5236_v6, %v4211_v56  ;;  %v4227_v60 = vmul.f32 %v5237_v28, %v4211_v56  ;;  %v4309_v46 = vadd.f32 %v10066_v43, %v4213_v23  ;;  %v4311_v27 = vadd.f32 %v4295_v58, %v4215_v36 }
 0xad0   :  { %v4313_v8 = vadd.f32 %v4297_v31, %v4217_v54  ;;  %v4315_v53 = vadd.f32 %v4299_v24, %v4219_v51  ;;  %v4317_v3 = vadd.f32 %v4301_v11, %v4221_v35  ;;  %v4319_v20 = vadd.f32 %v4303_v29, %v4223_v59 }
 0xad1   :  { %v4321_v39 = vadd.f32 %v4305_v61, %v4225_v22  ;;  %v4323_v2 = vadd.f32 %v4307_v12, %v4227_v60  ;;  %4712 = vst [vmem:[%s10192_s10 + $0x88] sm:$0xff] %v4309_v46  ;;  %4714 = vst [vmem:[%s10192_s10 + $0x98] sm:$0xff] %v4311_v27 }
 0xad2   :  { %4716 = vst [vmem:[%s10192_s10 + $0xa8] sm:$0xff] %v4313_v8  ;;  %4718 = vst [vmem:[%s10192_s10 + $0xb8] sm:$0xff] %v4315_v53 }
 0xad3   :  { %4720 = vst [vmem:[%s10192_s10 + $0xc8] sm:$0xff] %v4317_v3  ;;  %4722 = vst [vmem:[%s10192_s10 + $0xd8] sm:$0xff] %v4319_v20 }
 0xad4   :  { %4724 = vst [vmem:[%s10192_s10 + $0xe8] sm:$0xff] %v4321_v39  ;;  %4726 = vst [vmem:[%s10192_s10 + $0xf8] sm:$0xff] %v4323_v2 }
 0xad5   :  { %4345 = vsyncpa [#allocation4], 1 }

</bundles_post_ra>
